<compile_context>
chip_gen: v5e
topology: v5e:2x2
jax: 0.10.0
libtpu: 0.0.40
codegen_flags: <defaults>
</compile_context>

<pallas_src>
import functools

import numpy as np
import jax
import jax.numpy as jnp
from jax import lax
from jax.experimental import pallas as pl
from jax.experimental.pallas import tpu as pltpu


# ---------------------------------------------------------------------------
# The single fused Pallas kernel
# ---------------------------------------------------------------------------

def _bigtail4_kernel(
    prgb_ref, wrgb_ref, brgb_ref,          # first-stage im2col slab + weights
    s8_ref, s4_ref, s2_ref,                # dilated-conv shift matrices
    p84_ref, p42_ref,                      # 2x2 maxpool corner-select matrices
    w0_ref, b0_ref, w1_ref, b1_ref, w2_ref, b2_ref,
    w3_ref, b3_ref, w4_ref, b4_ref,
    wo_ref, bo_ref,                        # 1x1 output head
    o_ref):
    """Entire BigTail4 forward, straight-line, all activations in VMEM."""
    f32, bf16 = jnp.float32, jnp.bfloat16

    def relu(v):
        return jnp.maximum(v, 0.0)

    def corner_max(v):
        # rows are corner-major: [4*Mp, C] -> max over the 4 corner blocks.
        mp = v.shape[0] // 4
        return jnp.maximum(jnp.maximum(v[0 * mp:1 * mp], v[1 * mp:2 * mp]),
                           jnp.maximum(v[2 * mp:3 * mp], v[3 * mp:4 * mp]))

    def dconv(x_f32, s_ref, w_ref, b_ref):
        # Dilated 3x3 conv: for each tap t, (S_t @ x) routes the shifted /
        # zero-padded input rows (exact 0/1 selection), then accumulate
        # against that tap's [Cin, Cout] weight slice.  f32 accumulation.
        xb = x_f32.astype(bf16)
        acc = None
        for t in range(9):
            tap = jnp.dot(s_ref[t], xb,
                          preferred_element_type=f32).astype(bf16)
            contrib = jnp.dot(tap, w_ref[t], preferred_element_type=f32)
            acc = contrib if acc is None else acc + contrib
        return relu(acc + b_ref[...])

    def pool2x2(x_f32, p_ref):
        xb = x_f32.astype(bf16)
        c = [jnp.dot(p_ref[i], xb, preferred_element_type=f32)
             for i in range(4)]
        return jnp.maximum(jnp.maximum(c[0], c[1]), jnp.maximum(c[2], c[3]))

    # --- fused red|green|blue conv + bias + ReLU + 2x2 maxpool -------------
    y = jnp.dot(prgb_ref[...], wrgb_ref[...], preferred_element_type=f32)
    h = corner_max(relu(y + brgb_ref[...]))          # [N*8*8, 40]

    # --- dilated tail, all in VMEM -----------------------------------------
    h = dconv(h, s8_ref, w0_ref, b0_ref)             # [N*8*8, 60]
    h = dconv(h, s8_ref, w1_ref, b1_ref)             # [N*8*8, 60]
    h = dconv(h, s8_ref, w2_ref, b2_ref)             # [N*8*8, 60]
    h = pool2x2(h, p84_ref)                          # [N*4*4, 60]
    h = dconv(h, s4_ref, w3_ref, b3_ref)             # [N*4*4, 30]
    h = pool2x2(h, p42_ref)                          # [N*2*2, 30]
    h = dconv(h, s2_ref, w4_ref, b4_ref)             # [N*2*2, 10]

    # --- 1x1 output head (no ReLU), f32 ------------------------------------
    o_ref[...] = (jnp.dot(h, wo_ref[...], preferred_element_type=f32)
                  + bo_ref[...])


# ---------------------------------------------------------------------------
# Host-side constant builders (shift / pooling selection matrices)
# ---------------------------------------------------------------------------

@functools.lru_cache(maxsize=None)
def _shift_mats(n, h, w, dilation):
    """[9, n*h*w, n*h*w] 0/1 matrices; S_t @ x = tap t of a dilated 3x3 conv."""
    m = n * h * w
    mats = np.zeros((9, m, m), np.float32)
    t = 0
    for kh in range(3):
        for kw in range(3):
            dy = dilation * (kh - 1)
            dx = dilation * (kw - 1)
            for b in range(n):
                for y in range(h):
                    yy = y + dy
                    if not 0 <= yy < h:
                        continue
                    for x in range(w):
                        xx = x + dx
                        if not 0 <= xx < w:
                            continue
                        mats[t, b * h * w + y * w + x,
                             b * h * w + yy * w + xx] = 1.0
            t += 1
    return mats


@functools.lru_cache(maxsize=None)
def _pool_mats(n, h, w):
    """[4, n*(h//2)*(w//2), n*h*w] 0/1 corner-selection matrices for 2x2 pool."""
    hh, wh = h // 2, w // 2
    mp, m = n * hh * wh, n * h * w
    mats = np.zeros((4, mp, m), np.float32)
    c = 0
    for dy in (0, 1):
        for dx in (0, 1):
            for b in range(n):
                for yy in range(hh):
                    for xx in range(wh):
                        mats[c, b * hh * wh + yy * wh + xx,
                             b * h * w + (2 * yy + dy) * w + (2 * xx + dx)] = 1.0
            c += 1
    return mats


# ---------------------------------------------------------------------------
# JAX glue: im2col / layout plumbing for the first (9x9) fused conv
# ---------------------------------------------------------------------------

def _im2col(x, kh, kw, dilation, padding):
    """x: [N,H,W,Cin] -> patches [N,Ho,Wo,KH*KW*Cin] (feature order ih,iw,cin)."""
    n, h, w, cin = x.shape
    ho = h + 2 * padding - dilation * (kh - 1)
    wo = w + 2 * padding - dilation * (kw - 1)
    xp = jnp.pad(x, ((0, 0), (padding, padding), (padding, padding), (0, 0)))
    taps = [xp[:, ih * dilation:ih * dilation + ho,
               iw * dilation:iw * dilation + wo, :]
            for ih in range(kh) for iw in range(kw)]
    return jnp.concatenate(taps, axis=-1), ho, wo


def _corner_major(p, n, ho, wo):
    """[N,Ho,Wo,F] -> [4*N*(Ho//2)*(Wo//2), F], rows grouped by 2x2 pool corner."""
    hh, wh = ho // 2, wo // 2
    groups = [p[:, dy::2, dx::2, :].reshape(n * hh * wh, p.shape[-1])
              for dy in (0, 1) for dx in (0, 1)]
    return jnp.concatenate(groups, axis=0)


def _embed_center(w, k_target):
    """Zero-embed a KxK conv kernel into the center of a k_target x k_target."""
    kh = w.shape[0]
    off = (k_target - kh) // 2
    return jnp.pad(w, ((off, off), (off, off), (0, 0), (0, 0)))


# ---------------------------------------------------------------------------
# Parameters (deterministic synthetic init, BigTail4 shapes)
# ---------------------------------------------------------------------------

_CONV_SHAPES = {
    "red":    (9, 9, 3, 10),
    "green":  (7, 7, 3, 14),
    "blue":   (5, 5, 3, 16),
    "c0":     (3, 3, 40, 60),
    "c1":     (3, 3, 60, 60),
    "c2":     (3, 3, 60, 60),
    "c3":     (3, 3, 60, 30),
    "c4":     (3, 3, 30, 10),
    "output": (1, 1, 10, 1),
}


def init_params(key):
    params = {}
    keys = jax.random.split(key, 2 * len(_CONV_SHAPES))
    ki = iter(range(len(keys)))
    for name, shp in _CONV_SHAPES.items():
        fan_in = shp[0] * shp[1] * shp[2]
        params[name + "_w"] = (jax.random.normal(keys[next(ki)], shp,
                                                 jnp.float32)
                               * (1.0 / jnp.sqrt(fan_in)))
        params[name + "_b"] = 0.05 * jax.random.normal(
            keys[next(ki)], (shp[3],), jnp.float32)
    return params


# ---------------------------------------------------------------------------
# Forward pass (single Pallas call)
# ---------------------------------------------------------------------------

def forward(params, x_nchw):
    x = jnp.transpose(x_nchw, (0, 2, 3, 1)).astype(jnp.float32)  # NHWC
    n = x.shape[0]

    # Fused red|green|blue conv weights: embed 7x7 / 5x5 into a 9x9 envelope,
    # concat along Cout (maxpool(relu(.)) acts per channel, so fusing the
    # branch convs + channel concat is exact).
    w_rgb = jnp.concatenate([
        params["red_w"],
        _embed_center(params["green_w"], 9),
        _embed_center(params["blue_w"], 9)], axis=-1)              # [9,9,3,40]
    b_rgb = jnp.concatenate([params["red_b"], params["green_b"],
                             params["blue_b"]])
    c_rgb = w_rgb.shape[-1]
    wrgb = w_rgb.reshape(9 * 9 * 3, c_rgb).astype(jnp.bfloat16)
    brgb = b_rgb.reshape(1, c_rgb).astype(jnp.float32)

    patches, ho, wo = _im2col(x, 9, 9, 1, 4)
    prgb = _corner_major(patches, n, ho, wo).astype(jnp.bfloat16)  # [4*Mp, 243]

    h1, w1 = ho // 2, wo // 2        # 8x8 after first pool
    h2, w2 = h1 // 2, w1 // 2        # 4x4
    h3, w3 = h2 // 2, w2 // 2        # 2x2

    s8 = jnp.asarray(_shift_mats(n, h1, w1, 2), jnp.bfloat16)
    s4 = jnp.asarray(_shift_mats(n, h2, w2, 2), jnp.bfloat16)
    s2 = jnp.asarray(_shift_mats(n, h3, w3, 2), jnp.bfloat16)
    p84 = jnp.asarray(_pool_mats(n, h1, w1), jnp.bfloat16)
    p42 = jnp.asarray(_pool_mats(n, h2, w2), jnp.bfloat16)

    def w3d(name):
        wv = params[name + "_w"]
        kh, kw, cin, cout = wv.shape
        return wv.reshape(kh * kw, cin, cout).astype(jnp.bfloat16)

    def b2d(name):
        return params[name + "_b"].reshape(1, -1).astype(jnp.float32)

    wo_ = params["output_w"].reshape(10, 1).astype(jnp.float32)
    bo_ = params["output_b"].reshape(1, 1).astype(jnp.float32)

    m_out = n * h3 * w3
    out = pl.pallas_call(
        _bigtail4_kernel,
        out_shape=jax.ShapeDtypeStruct((m_out, 1), jnp.float32),
        compiler_params=pltpu.CompilerParams(
            vmem_limit_bytes=32 * 1024 * 1024),
    )(prgb, wrgb, brgb, s8, s4, s2, p84, p42,
      w3d("c0"), b2d("c0"), w3d("c1"), b2d("c1"), w3d("c2"), b2d("c2"),
      w3d("c3"), b2d("c3"), w3d("c4"), b2d("c4"), wo_, bo_)

    out = out.reshape(n, h3, w3, 1)
    return jnp.transpose(out, (0, 3, 1, 2))                        # NCHW


# ---------------------------------------------------------------------------
# Pure-JAX reference (BigTail4 semantics, f32 throughout)
# ---------------------------------------------------------------------------

def _ref_conv(x, w, b, dilation, padding, relu):
    y = lax.conv_general_dilated(
        x, w, window_strides=(1, 1),
        padding=[(padding, padding), (padding, padding)],
        rhs_dilation=(dilation, dilation),
        dimension_numbers=("NHWC", "HWIO", "NHWC"))
    y = y + b
    if relu:
        y = jnp.maximum(y, 0.0)
    return y


def _ref_pool(x):
    return lax.reduce_window(x, -jnp.inf, lax.max,
                             (1, 2, 2, 1), (1, 2, 2, 1), "VALID")


def forward_ref(params, x_nchw):
    x = jnp.transpose(x_nchw, (0, 2, 3, 1)).astype(jnp.float32)
    xr = _ref_pool(_ref_conv(x, params["red_w"], params["red_b"], 1, 4, True))
    xg = _ref_pool(_ref_conv(x, params["green_w"], params["green_b"], 1, 3,
                             True))
    xb = _ref_pool(_ref_conv(x, params["blue_w"], params["blue_b"], 1, 2,
                             True))
    h = jnp.concatenate([xr, xg, xb], axis=-1)
    h = _ref_conv(h, params["c0_w"], params["c0_b"], 2, 2, True)
    h = _ref_conv(h, params["c1_w"], params["c1_b"], 2, 2, True)
    h = _ref_conv(h, params["c2_w"], params["c2_b"], 2, 2, True)
    h = _ref_pool(h)
    h = _ref_conv(h, params["c3_w"], params["c3_b"], 2, 2, True)
    h = _ref_pool(h)
    h = _ref_conv(h, params["c4_w"], params["c4_b"], 2, 2, True)
    h = _ref_conv(h, params["output_w"], params["output_b"], 1, 0, False)
    return jnp.transpose(h, (0, 3, 1, 2))


# ---------------------------------------------------------------------------

if __name__ == "__main__":
    key = jax.random.PRNGKey(0)
    pkey, xkey = jax.random.split(key)
    params = init_params(pkey)
    x = jax.random.normal(xkey, (2, 3, 16, 16), jnp.float32)  # NCHW like PyTorch

    out = jax.block_until_ready(jax.jit(forward)(params, x))
    assert out.shape == (2, 1, 2, 2), out.shape

    ref = jax.block_until_ready(jax.jit(forward_ref)(params, x))
    max_err = float(jnp.max(jnp.abs(out - ref)))
    # bf16 matmul operands (f32 accumulation) vs f32 reference -> loose tol.
    assert jnp.allclose(out, ref, atol=5e-2, rtol=5e-2), max_err

    print("KERNEL_OK")
</pallas_src>

<mosaic_0001>
module attributes {stable_mosaic.version = 11 : i64} {
  func.func @_bigtail4_kernel(%arg0: memref<512x243xbf16, #tpu.memory_space<vmem>>, %arg1: memref<243x40xbf16, #tpu.memory_space<vmem>>, %arg2: memref<1x40xf32, #tpu.memory_space<vmem>>, %arg3: memref<9x128x128xbf16, #tpu.memory_space<vmem>>, %arg4: memref<9x32x32xbf16, #tpu.memory_space<vmem>>, %arg5: memref<9x8x8xbf16, #tpu.memory_space<vmem>>, %arg6: memref<4x32x128xbf16, #tpu.memory_space<vmem>>, %arg7: memref<4x8x32xbf16, #tpu.memory_space<vmem>>, %arg8: memref<9x40x60xbf16, #tpu.memory_space<vmem>>, %arg9: memref<1x60xf32, #tpu.memory_space<vmem>>, %arg10: memref<9x60x60xbf16, #tpu.memory_space<vmem>>, %arg11: memref<1x60xf32, #tpu.memory_space<vmem>>, %arg12: memref<9x60x60xbf16, #tpu.memory_space<vmem>>, %arg13: memref<1x60xf32, #tpu.memory_space<vmem>>, %arg14: memref<9x60x30xbf16, #tpu.memory_space<vmem>>, %arg15: memref<1x30xf32, #tpu.memory_space<vmem>>, %arg16: memref<9x30x10xbf16, #tpu.memory_space<vmem>>, %arg17: memref<1x10xf32, #tpu.memory_space<vmem>>, %arg18: memref<10x1xf32, #tpu.memory_space<vmem>>, %arg19: memref<1x1xf32, #tpu.memory_space<vmem>>, %arg20: memref<8x1xf32, #tpu.memory_space<vmem>>) attributes {dimension_semantics = [], scalar_prefetch = 0 : i64, scratch_operands = 0 : i64, tpu.core_type = #tpu.core_type<tc>} {
    %c0 = arith.constant 0 : index
    %c0_0 = arith.constant 0 : index
    %0 = vector.load %arg0[%c0, %c0_0] : memref<512x243xbf16, #tpu.memory_space<vmem>>, vector<512x243xbf16>
    %c0_1 = arith.constant 0 : index
    %c0_2 = arith.constant 0 : index
    %1 = vector.load %arg1[%c0_1, %c0_2] : memref<243x40xbf16, #tpu.memory_space<vmem>>, vector<243x40xbf16>
    %cst = arith.constant dense<0.000000e+00> : vector<512x40xf32>
    %2 = tpu.matmul %0, %1, %cst {dimension_numbers = #tpu.dot_dimension_numbers<[1], [0], [0], [1], [0, 0, 1, 1], [], []>} : vector<512x243xbf16>, vector<243x40xbf16>, vector<512x40xf32> -> vector<512x40xf32>
    %c0_3 = arith.constant 0 : index
    %c0_4 = arith.constant 0 : index
    %3 = vector.load %arg2[%c0_3, %c0_4] : memref<1x40xf32, #tpu.memory_space<vmem>>, vector<1x40xf32>
    %4 = vector.broadcast %3 : vector<1x40xf32> to vector<512x40xf32>
    %5 = arith.addf %2, %4 : vector<512x40xf32>
    %cst_5 = arith.constant 0.000000e+00 : f32
    %6 = vector.broadcast %cst_5 : f32 to vector<512x40xf32>
    %7 = arith.maximumf %5, %6 : vector<512x40xf32>
    %8 = vector.extract_strided_slice %7 {offsets = [0, 0], sizes = [128, 40], strides = [1, 1]} : vector<512x40xf32> to vector<128x40xf32>
    %9 = vector.extract_strided_slice %7 {offsets = [128, 0], sizes = [128, 40], strides = [1, 1]} : vector<512x40xf32> to vector<128x40xf32>
    %10 = arith.maximumf %8, %9 : vector<128x40xf32>
    %11 = vector.extract_strided_slice %7 {offsets = [256, 0], sizes = [128, 40], strides = [1, 1]} : vector<512x40xf32> to vector<128x40xf32>
    %12 = vector.extract_strided_slice %7 {offsets = [384, 0], sizes = [128, 40], strides = [1, 1]} : vector<512x40xf32> to vector<128x40xf32>
    %13 = arith.maximumf %11, %12 : vector<128x40xf32>
    %14 = arith.maximumf %10, %13 : vector<128x40xf32>
    %15 = arith.truncf %14 : vector<128x40xf32> to vector<128x40xbf16>
    %c0_6 = arith.constant 0 : index
    %c0_7 = arith.constant 0 : index
    %c0_8 = arith.constant 0 : index
    %16 = vector.load %arg3[%c0_6, %c0_7, %c0_8] : memref<9x128x128xbf16, #tpu.memory_space<vmem>>, vector<1x128x128xbf16>
    %17 = vector.shape_cast %16 : vector<1x128x128xbf16> to vector<128x128xbf16>
    %cst_9 = arith.constant dense<0.000000e+00> : vector<128x40xf32>
    %18 = tpu.matmul %17, %15, %cst_9 {dimension_numbers = #tpu.dot_dimension_numbers<[1], [0], [0], [1], [0, 0, 1, 1], [], []>} : vector<128x128xbf16>, vector<128x40xbf16>, vector<128x40xf32> -> vector<128x40xf32>
    %19 = arith.truncf %18 : vector<128x40xf32> to vector<128x40xbf16>
    %c0_10 = arith.constant 0 : index
    %c0_11 = arith.constant 0 : index
    %c0_12 = arith.constant 0 : index
    %20 = vector.load %arg8[%c0_10, %c0_11, %c0_12] : memref<9x40x60xbf16, #tpu.memory_space<vmem>>, vector<1x40x60xbf16>
    %21 = vector.shape_cast %20 : vector<1x40x60xbf16> to vector<40x60xbf16>
    %cst_13 = arith.constant dense<0.000000e+00> : vector<128x60xf32>
    %22 = tpu.matmul %19, %21, %cst_13 {dimension_numbers = #tpu.dot_dimension_numbers<[1], [0], [0], [1], [0, 0, 1, 1], [], []>} : vector<128x40xbf16>, vector<40x60xbf16>, vector<128x60xf32> -> vector<128x60xf32>
    %c1 = arith.constant 1 : index
    %c0_14 = arith.constant 0 : index
    %c0_15 = arith.constant 0 : index
    %23 = vector.load %arg3[%c1, %c0_14, %c0_15] : memref<9x128x128xbf16, #tpu.memory_space<vmem>>, vector<1x128x128xbf16>
    %24 = vector.shape_cast %23 : vector<1x128x128xbf16> to vector<128x128xbf16>
    %cst_16 = arith.constant dense<0.000000e+00> : vector<128x40xf32>
    %25 = tpu.matmul %24, %15, %cst_16 {dimension_numbers = #tpu.dot_dimension_numbers<[1], [0], [0], [1], [0, 0, 1, 1], [], []>} : vector<128x128xbf16>, vector<128x40xbf16>, vector<128x40xf32> -> vector<128x40xf32>
    %26 = arith.truncf %25 : vector<128x40xf32> to vector<128x40xbf16>
    %c1_17 = arith.constant 1 : index
    %c0_18 = arith.constant 0 : index
    %c0_19 = arith.constant 0 : index
    %27 = vector.load %arg8[%c1_17, %c0_18, %c0_19] : memref<9x40x60xbf16, #tpu.memory_space<vmem>>, vector<1x40x60xbf16>
    %28 = vector.shape_cast %27 : vector<1x40x60xbf16> to vector<40x60xbf16>
    %cst_20 = arith.constant dense<0.000000e+00> : vector<128x60xf32>
    %29 = tpu.matmul %26, %28, %cst_20 {dimension_numbers = #tpu.dot_dimension_numbers<[1], [0], [0], [1], [0, 0, 1, 1], [], []>} : vector<128x40xbf16>, vector<40x60xbf16>, vector<128x60xf32> -> vector<128x60xf32>
    %30 = arith.addf %22, %29 : vector<128x60xf32>
    %c2 = arith.constant 2 : index
    %c0_21 = arith.constant 0 : index
    %c0_22 = arith.constant 0 : index
    %31 = vector.load %arg3[%c2, %c0_21, %c0_22] : memref<9x128x128xbf16, #tpu.memory_space<vmem>>, vector<1x128x128xbf16>
    %32 = vector.shape_cast %31 : vector<1x128x128xbf16> to vector<128x128xbf16>
    %cst_23 = arith.constant dense<0.000000e+00> : vector<128x40xf32>
    %33 = tpu.matmul %32, %15, %cst_23 {dimension_numbers = #tpu.dot_dimension_numbers<[1], [0], [0], [1], [0, 0, 1, 1], [], []>} : vector<128x128xbf16>, vector<128x40xbf16>, vector<128x40xf32> -> vector<128x40xf32>
    %34 = arith.truncf %33 : vector<128x40xf32> to vector<128x40xbf16>
    %c2_24 = arith.constant 2 : index
    %c0_25 = arith.constant 0 : index
    %c0_26 = arith.constant 0 : index
    %35 = vector.load %arg8[%c2_24, %c0_25, %c0_26] : memref<9x40x60xbf16, #tpu.memory_space<vmem>>, vector<1x40x60xbf16>
    %36 = vector.shape_cast %35 : vector<1x40x60xbf16> to vector<40x60xbf16>
    %cst_27 = arith.constant dense<0.000000e+00> : vector<128x60xf32>
    %37 = tpu.matmul %34, %36, %cst_27 {dimension_numbers = #tpu.dot_dimension_numbers<[1], [0], [0], [1], [0, 0, 1, 1], [], []>} : vector<128x40xbf16>, vector<40x60xbf16>, vector<128x60xf32> -> vector<128x60xf32>
    %38 = arith.addf %30, %37 : vector<128x60xf32>
    %c3 = arith.constant 3 : index
    %c0_28 = arith.constant 0 : index
    %c0_29 = arith.constant 0 : index
    %39 = vector.load %arg3[%c3, %c0_28, %c0_29] : memref<9x128x128xbf16, #tpu.memory_space<vmem>>, vector<1x128x128xbf16>
    %40 = vector.shape_cast %39 : vector<1x128x128xbf16> to vector<128x128xbf16>
    %cst_30 = arith.constant dense<0.000000e+00> : vector<128x40xf32>
    %41 = tpu.matmul %40, %15, %cst_30 {dimension_numbers = #tpu.dot_dimension_numbers<[1], [0], [0], [1], [0, 0, 1, 1], [], []>} : vector<128x128xbf16>, vector<128x40xbf16>, vector<128x40xf32> -> vector<128x40xf32>
    %42 = arith.truncf %41 : vector<128x40xf32> to vector<128x40xbf16>
    %c3_31 = arith.constant 3 : index
    %c0_32 = arith.constant 0 : index
    %c0_33 = arith.constant 0 : index
    %43 = vector.load %arg8[%c3_31, %c0_32, %c0_33] : memref<9x40x60xbf16, #tpu.memory_space<vmem>>, vector<1x40x60xbf16>
    %44 = vector.shape_cast %43 : vector<1x40x60xbf16> to vector<40x60xbf16>
    %cst_34 = arith.constant dense<0.000000e+00> : vector<128x60xf32>
    %45 = tpu.matmul %42, %44, %cst_34 {dimension_numbers = #tpu.dot_dimension_numbers<[1], [0], [0], [1], [0, 0, 1, 1], [], []>} : vector<128x40xbf16>, vector<40x60xbf16>, vector<128x60xf32> -> vector<128x60xf32>
    %46 = arith.addf %38, %45 : vector<128x60xf32>
    %c4 = arith.constant 4 : index
    %c0_35 = arith.constant 0 : index
    %c0_36 = arith.constant 0 : index
    %47 = vector.load %arg3[%c4, %c0_35, %c0_36] : memref<9x128x128xbf16, #tpu.memory_space<vmem>>, vector<1x128x128xbf16>
    %48 = vector.shape_cast %47 : vector<1x128x128xbf16> to vector<128x128xbf16>
    %cst_37 = arith.constant dense<0.000000e+00> : vector<128x40xf32>
    %49 = tpu.matmul %48, %15, %cst_37 {dimension_numbers = #tpu.dot_dimension_numbers<[1], [0], [0], [1], [0, 0, 1, 1], [], []>} : vector<128x128xbf16>, vector<128x40xbf16>, vector<128x40xf32> -> vector<128x40xf32>
    %50 = arith.truncf %49 : vector<128x40xf32> to vector<128x40xbf16>
    %c4_38 = arith.constant 4 : index
    %c0_39 = arith.constant 0 : index
    %c0_40 = arith.constant 0 : index
    %51 = vector.load %arg8[%c4_38, %c0_39, %c0_40] : memref<9x40x60xbf16, #tpu.memory_space<vmem>>, vector<1x40x60xbf16>
    %52 = vector.shape_cast %51 : vector<1x40x60xbf16> to vector<40x60xbf16>
    %cst_41 = arith.constant dense<0.000000e+00> : vector<128x60xf32>
    %53 = tpu.matmul %50, %52, %cst_41 {dimension_numbers = #tpu.dot_dimension_numbers<[1], [0], [0], [1], [0, 0, 1, 1], [], []>} : vector<128x40xbf16>, vector<40x60xbf16>, vector<128x60xf32> -> vector<128x60xf32>
    %54 = arith.addf %46, %53 : vector<128x60xf32>
    %c5 = arith.constant 5 : index
    %c0_42 = arith.constant 0 : index
    %c0_43 = arith.constant 0 : index
    %55 = vector.load %arg3[%c5, %c0_42, %c0_43] : memref<9x128x128xbf16, #tpu.memory_space<vmem>>, vector<1x128x128xbf16>
    %56 = vector.shape_cast %55 : vector<1x128x128xbf16> to vector<128x128xbf16>
    %cst_44 = arith.constant dense<0.000000e+00> : vector<128x40xf32>
    %57 = tpu.matmul %56, %15, %cst_44 {dimension_numbers = #tpu.dot_dimension_numbers<[1], [0], [0], [1], [0, 0, 1, 1], [], []>} : vector<128x128xbf16>, vector<128x40xbf16>, vector<128x40xf32> -> vector<128x40xf32>
    %58 = arith.truncf %57 : vector<128x40xf32> to vector<128x40xbf16>
    %c5_45 = arith.constant 5 : index
    %c0_46 = arith.constant 0 : index
    %c0_47 = arith.constant 0 : index
    %59 = vector.load %arg8[%c5_45, %c0_46, %c0_47] : memref<9x40x60xbf16, #tpu.memory_space<vmem>>, vector<1x40x60xbf16>
    %60 = vector.shape_cast %59 : vector<1x40x60xbf16> to vector<40x60xbf16>
    %cst_48 = arith.constant dense<0.000000e+00> : vector<128x60xf32>
    %61 = tpu.matmul %58, %60, %cst_48 {dimension_numbers = #tpu.dot_dimension_numbers<[1], [0], [0], [1], [0, 0, 1, 1], [], []>} : vector<128x40xbf16>, vector<40x60xbf16>, vector<128x60xf32> -> vector<128x60xf32>
    %62 = arith.addf %54, %61 : vector<128x60xf32>
    %c6 = arith.constant 6 : index
    %c0_49 = arith.constant 0 : index
    %c0_50 = arith.constant 0 : index
    %63 = vector.load %arg3[%c6, %c0_49, %c0_50] : memref<9x128x128xbf16, #tpu.memory_space<vmem>>, vector<1x128x128xbf16>
    %64 = vector.shape_cast %63 : vector<1x128x128xbf16> to vector<128x128xbf16>
    %cst_51 = arith.constant dense<0.000000e+00> : vector<128x40xf32>
    %65 = tpu.matmul %64, %15, %cst_51 {dimension_numbers = #tpu.dot_dimension_numbers<[1], [0], [0], [1], [0, 0, 1, 1], [], []>} : vector<128x128xbf16>, vector<128x40xbf16>, vector<128x40xf32> -> vector<128x40xf32>
    %66 = arith.truncf %65 : vector<128x40xf32> to vector<128x40xbf16>
    %c6_52 = arith.constant 6 : index
    %c0_53 = arith.constant 0 : index
    %c0_54 = arith.constant 0 : index
    %67 = vector.load %arg8[%c6_52, %c0_53, %c0_54] : memref<9x40x60xbf16, #tpu.memory_space<vmem>>, vector<1x40x60xbf16>
    %68 = vector.shape_cast %67 : vector<1x40x60xbf16> to vector<40x60xbf16>
    %cst_55 = arith.constant dense<0.000000e+00> : vector<128x60xf32>
    %69 = tpu.matmul %66, %68, %cst_55 {dimension_numbers = #tpu.dot_dimension_numbers<[1], [0], [0], [1], [0, 0, 1, 1], [], []>} : vector<128x40xbf16>, vector<40x60xbf16>, vector<128x60xf32> -> vector<128x60xf32>
    %70 = arith.addf %62, %69 : vector<128x60xf32>
    %c7 = arith.constant 7 : index
    %c0_56 = arith.constant 0 : index
    %c0_57 = arith.constant 0 : index
    %71 = vector.load %arg3[%c7, %c0_56, %c0_57] : memref<9x128x128xbf16, #tpu.memory_space<vmem>>, vector<1x128x128xbf16>
    %72 = vector.shape_cast %71 : vector<1x128x128xbf16> to vector<128x128xbf16>
    %cst_58 = arith.constant dense<0.000000e+00> : vector<128x40xf32>
    %73 = tpu.matmul %72, %15, %cst_58 {dimension_numbers = #tpu.dot_dimension_numbers<[1], [0], [0], [1], [0, 0, 1, 1], [], []>} : vector<128x128xbf16>, vector<128x40xbf16>, vector<128x40xf32> -> vector<128x40xf32>
    %74 = arith.truncf %73 : vector<128x40xf32> to vector<128x40xbf16>
    %c7_59 = arith.constant 7 : index
    %c0_60 = arith.constant 0 : index
    %c0_61 = arith.constant 0 : index
    %75 = vector.load %arg8[%c7_59, %c0_60, %c0_61] : memref<9x40x60xbf16, #tpu.memory_space<vmem>>, vector<1x40x60xbf16>
    %76 = vector.shape_cast %75 : vector<1x40x60xbf16> to vector<40x60xbf16>
    %cst_62 = arith.constant dense<0.000000e+00> : vector<128x60xf32>
    %77 = tpu.matmul %74, %76, %cst_62 {dimension_numbers = #tpu.dot_dimension_numbers<[1], [0], [0], [1], [0, 0, 1, 1], [], []>} : vector<128x40xbf16>, vector<40x60xbf16>, vector<128x60xf32> -> vector<128x60xf32>
    %78 = arith.addf %70, %77 : vector<128x60xf32>
    %c8 = arith.constant 8 : index
    %c0_63 = arith.constant 0 : index
    %c0_64 = arith.constant 0 : index
    %79 = vector.load %arg3[%c8, %c0_63, %c0_64] : memref<9x128x128xbf16, #tpu.memory_space<vmem>>, vector<1x128x128xbf16>
    %80 = vector.shape_cast %79 : vector<1x128x128xbf16> to vector<128x128xbf16>
    %cst_65 = arith.constant dense<0.000000e+00> : vector<128x40xf32>
    %81 = tpu.matmul %80, %15, %cst_65 {dimension_numbers = #tpu.dot_dimension_numbers<[1], [0], [0], [1], [0, 0, 1, 1], [], []>} : vector<128x128xbf16>, vector<128x40xbf16>, vector<128x40xf32> -> vector<128x40xf32>
    %82 = arith.truncf %81 : vector<128x40xf32> to vector<128x40xbf16>
    %c8_66 = arith.constant 8 : index
    %c0_67 = arith.constant 0 : index
    %c0_68 = arith.constant 0 : index
    %83 = vector.load %arg8[%c8_66, %c0_67, %c0_68] : memref<9x40x60xbf16, #tpu.memory_space<vmem>>, vector<1x40x60xbf16>
    %84 = vector.shape_cast %83 : vector<1x40x60xbf16> to vector<40x60xbf16>
    %cst_69 = arith.constant dense<0.000000e+00> : vector<128x60xf32>
    %85 = tpu.matmul %82, %84, %cst_69 {dimension_numbers = #tpu.dot_dimension_numbers<[1], [0], [0], [1], [0, 0, 1, 1], [], []>} : vector<128x40xbf16>, vector<40x60xbf16>, vector<128x60xf32> -> vector<128x60xf32>
    %86 = arith.addf %78, %85 : vector<128x60xf32>
    %c0_70 = arith.constant 0 : index
    %c0_71 = arith.constant 0 : index
    %87 = vector.load %arg9[%c0_70, %c0_71] : memref<1x60xf32, #tpu.memory_space<vmem>>, vector<1x60xf32>
    %88 = vector.broadcast %87 : vector<1x60xf32> to vector<128x60xf32>
    %89 = arith.addf %86, %88 : vector<128x60xf32>
    %cst_72 = arith.constant 0.000000e+00 : f32
    %90 = vector.broadcast %cst_72 : f32 to vector<128x60xf32>
    %91 = arith.maximumf %89, %90 : vector<128x60xf32>
    %92 = arith.truncf %91 : vector<128x60xf32> to vector<128x60xbf16>
    %c0_73 = arith.constant 0 : index
    %c0_74 = arith.constant 0 : index
    %c0_75 = arith.constant 0 : index
    %93 = vector.load %arg3[%c0_73, %c0_74, %c0_75] : memref<9x128x128xbf16, #tpu.memory_space<vmem>>, vector<1x128x128xbf16>
    %94 = vector.shape_cast %93 : vector<1x128x128xbf16> to vector<128x128xbf16>
    %cst_76 = arith.constant dense<0.000000e+00> : vector<128x60xf32>
    %95 = tpu.matmul %94, %92, %cst_76 {dimension_numbers = #tpu.dot_dimension_numbers<[1], [0], [0], [1], [0, 0, 1, 1], [], []>} : vector<128x128xbf16>, vector<128x60xbf16>, vector<128x60xf32> -> vector<128x60xf32>
    %96 = arith.truncf %95 : vector<128x60xf32> to vector<128x60xbf16>
    %c0_77 = arith.constant 0 : index
    %c0_78 = arith.constant 0 : index
    %c0_79 = arith.constant 0 : index
    %97 = vector.load %arg10[%c0_77, %c0_78, %c0_79] : memref<9x60x60xbf16, #tpu.memory_space<vmem>>, vector<1x60x60xbf16>
    %98 = vector.shape_cast %97 : vector<1x60x60xbf16> to vector<60x60xbf16>
    %cst_80 = arith.constant dense<0.000000e+00> : vector<128x60xf32>
    %99 = tpu.matmul %96, %98, %cst_80 {dimension_numbers = #tpu.dot_dimension_numbers<[1], [0], [0], [1], [0, 0, 1, 1], [], []>} : vector<128x60xbf16>, vector<60x60xbf16>, vector<128x60xf32> -> vector<128x60xf32>
    %c1_81 = arith.constant 1 : index
    %c0_82 = arith.constant 0 : index
    %c0_83 = arith.constant 0 : index
    %100 = vector.load %arg3[%c1_81, %c0_82, %c0_83] : memref<9x128x128xbf16, #tpu.memory_space<vmem>>, vector<1x128x128xbf16>
    %101 = vector.shape_cast %100 : vector<1x128x128xbf16> to vector<128x128xbf16>
    %cst_84 = arith.constant dense<0.000000e+00> : vector<128x60xf32>
    %102 = tpu.matmul %101, %92, %cst_84 {dimension_numbers = #tpu.dot_dimension_numbers<[1], [0], [0], [1], [0, 0, 1, 1], [], []>} : vector<128x128xbf16>, vector<128x60xbf16>, vector<128x60xf32> -> vector<128x60xf32>
    %103 = arith.truncf %102 : vector<128x60xf32> to vector<128x60xbf16>
    %c1_85 = arith.constant 1 : index
    %c0_86 = arith.constant 0 : index
    %c0_87 = arith.constant 0 : index
    %104 = vector.load %arg10[%c1_85, %c0_86, %c0_87] : memref<9x60x60xbf16, #tpu.memory_space<vmem>>, vector<1x60x60xbf16>
    %105 = vector.shape_cast %104 : vector<1x60x60xbf16> to vector<60x60xbf16>
    %cst_88 = arith.constant dense<0.000000e+00> : vector<128x60xf32>
    %106 = tpu.matmul %103, %105, %cst_88 {dimension_numbers = #tpu.dot_dimension_numbers<[1], [0], [0], [1], [0, 0, 1, 1], [], []>} : vector<128x60xbf16>, vector<60x60xbf16>, vector<128x60xf32> -> vector<128x60xf32>
    %107 = arith.addf %99, %106 : vector<128x60xf32>
    %c2_89 = arith.constant 2 : index
    %c0_90 = arith.constant 0 : index
    %c0_91 = arith.constant 0 : index
    %108 = vector.load %arg3[%c2_89, %c0_90, %c0_91] : memref<9x128x128xbf16, #tpu.memory_space<vmem>>, vector<1x128x128xbf16>
    %109 = vector.shape_cast %108 : vector<1x128x128xbf16> to vector<128x128xbf16>
    %cst_92 = arith.constant dense<0.000000e+00> : vector<128x60xf32>
    %110 = tpu.matmul %109, %92, %cst_92 {dimension_numbers = #tpu.dot_dimension_numbers<[1], [0], [0], [1], [0, 0, 1, 1], [], []>} : vector<128x128xbf16>, vector<128x60xbf16>, vector<128x60xf32> -> vector<128x60xf32>
    %111 = arith.truncf %110 : vector<128x60xf32> to vector<128x60xbf16>
    %c2_93 = arith.constant 2 : index
    %c0_94 = arith.constant 0 : index
    %c0_95 = arith.constant 0 : index
    %112 = vector.load %arg10[%c2_93, %c0_94, %c0_95] : memref<9x60x60xbf16, #tpu.memory_space<vmem>>, vector<1x60x60xbf16>
    %113 = vector.shape_cast %112 : vector<1x60x60xbf16> to vector<60x60xbf16>
    %cst_96 = arith.constant dense<0.000000e+00> : vector<128x60xf32>
    %114 = tpu.matmul %111, %113, %cst_96 {dimension_numbers = #tpu.dot_dimension_numbers<[1], [0], [0], [1], [0, 0, 1, 1], [], []>} : vector<128x60xbf16>, vector<60x60xbf16>, vector<128x60xf32> -> vector<128x60xf32>
    %115 = arith.addf %107, %114 : vector<128x60xf32>
    %c3_97 = arith.constant 3 : index
    %c0_98 = arith.constant 0 : index
    %c0_99 = arith.constant 0 : index
    %116 = vector.load %arg3[%c3_97, %c0_98, %c0_99] : memref<9x128x128xbf16, #tpu.memory_space<vmem>>, vector<1x128x128xbf16>
    %117 = vector.shape_cast %116 : vector<1x128x128xbf16> to vector<128x128xbf16>
    %cst_100 = arith.constant dense<0.000000e+00> : vector<128x60xf32>
    %118 = tpu.matmul %117, %92, %cst_100 {dimension_numbers = #tpu.dot_dimension_numbers<[1], [0], [0], [1], [0, 0, 1, 1], [], []>} : vector<128x128xbf16>, vector<128x60xbf16>, vector<128x60xf32> -> vector<128x60xf32>
    %119 = arith.truncf %118 : vector<128x60xf32> to vector<128x60xbf16>
    %c3_101 = arith.constant 3 : index
    %c0_102 = arith.constant 0 : index
    %c0_103 = arith.constant 0 : index
    %120 = vector.load %arg10[%c3_101, %c0_102, %c0_103] : memref<9x60x60xbf16, #tpu.memory_space<vmem>>, vector<1x60x60xbf16>
    %121 = vector.shape_cast %120 : vector<1x60x60xbf16> to vector<60x60xbf16>
    %cst_104 = arith.constant dense<0.000000e+00> : vector<128x60xf32>
    %122 = tpu.matmul %119, %121, %cst_104 {dimension_numbers = #tpu.dot_dimension_numbers<[1], [0], [0], [1], [0, 0, 1, 1], [], []>} : vector<128x60xbf16>, vector<60x60xbf16>, vector<128x60xf32> -> vector<128x60xf32>
    %123 = arith.addf %115, %122 : vector<128x60xf32>
    %c4_105 = arith.constant 4 : index
    %c0_106 = arith.constant 0 : index
    %c0_107 = arith.constant 0 : index
    %124 = vector.load %arg3[%c4_105, %c0_106, %c0_107] : memref<9x128x128xbf16, #tpu.memory_space<vmem>>, vector<1x128x128xbf16>
    %125 = vector.shape_cast %124 : vector<1x128x128xbf16> to vector<128x128xbf16>
    %cst_108 = arith.constant dense<0.000000e+00> : vector<128x60xf32>
    %126 = tpu.matmul %125, %92, %cst_108 {dimension_numbers = #tpu.dot_dimension_numbers<[1], [0], [0], [1], [0, 0, 1, 1], [], []>} : vector<128x128xbf16>, vector<128x60xbf16>, vector<128x60xf32> -> vector<128x60xf32>
    %127 = arith.truncf %126 : vector<128x60xf32> to vector<128x60xbf16>
    %c4_109 = arith.constant 4 : index
    %c0_110 = arith.constant 0 : index
    %c0_111 = arith.constant 0 : index
    %128 = vector.load %arg10[%c4_109, %c0_110, %c0_111] : memref<9x60x60xbf16, #tpu.memory_space<vmem>>, vector<1x60x60xbf16>
    %129 = vector.shape_cast %128 : vector<1x60x60xbf16> to vector<60x60xbf16>
    %cst_112 = arith.constant dense<0.000000e+00> : vector<128x60xf32>
    %130 = tpu.matmul %127, %129, %cst_112 {dimension_numbers = #tpu.dot_dimension_numbers<[1], [0], [0], [1], [0, 0, 1, 1], [], []>} : vector<128x60xbf16>, vector<60x60xbf16>, vector<128x60xf32> -> vector<128x60xf32>
    %131 = arith.addf %123, %130 : vector<128x60xf32>
    %c5_113 = arith.constant 5 : index
    %c0_114 = arith.constant 0 : index
    %c0_115 = arith.constant 0 : index
    %132 = vector.load %arg3[%c5_113, %c0_114, %c0_115] : memref<9x128x128xbf16, #tpu.memory_space<vmem>>, vector<1x128x128xbf16>
    %133 = vector.shape_cast %132 : vector<1x128x128xbf16> to vector<128x128xbf16>
    %cst_116 = arith.constant dense<0.000000e+00> : vector<128x60xf32>
    %134 = tpu.matmul %133, %92, %cst_116 {dimension_numbers = #tpu.dot_dimension_numbers<[1], [0], [0], [1], [0, 0, 1, 1], [], []>} : vector<128x128xbf16>, vector<128x60xbf16>, vector<128x60xf32> -> vector<128x60xf32>
    %135 = arith.truncf %134 : vector<128x60xf32> to vector<128x60xbf16>
    %c5_117 = arith.constant 5 : index
    %c0_118 = arith.constant 0 : index
    %c0_119 = arith.constant 0 : index
    %136 = vector.load %arg10[%c5_117, %c0_118, %c0_119] : memref<9x60x60xbf16, #tpu.memory_space<vmem>>, vector<1x60x60xbf16>
    %137 = vector.shape_cast %136 : vector<1x60x60xbf16> to vector<60x60xbf16>
    %cst_120 = arith.constant dense<0.000000e+00> : vector<128x60xf32>
    %138 = tpu.matmul %135, %137, %cst_120 {dimension_numbers = #tpu.dot_dimension_numbers<[1], [0], [0], [1], [0, 0, 1, 1], [], []>} : vector<128x60xbf16>, vector<60x60xbf16>, vector<128x60xf32> -> vector<128x60xf32>
    %139 = arith.addf %131, %138 : vector<128x60xf32>
    %c6_121 = arith.constant 6 : index
    %c0_122 = arith.constant 0 : index
    %c0_123 = arith.constant 0 : index
    %140 = vector.load %arg3[%c6_121, %c0_122, %c0_123] : memref<9x128x128xbf16, #tpu.memory_space<vmem>>, vector<1x128x128xbf16>
    %141 = vector.shape_cast %140 : vector<1x128x128xbf16> to vector<128x128xbf16>
    %cst_124 = arith.constant dense<0.000000e+00> : vector<128x60xf32>
    %142 = tpu.matmul %141, %92, %cst_124 {dimension_numbers = #tpu.dot_dimension_numbers<[1], [0], [0], [1], [0, 0, 1, 1], [], []>} : vector<128x128xbf16>, vector<128x60xbf16>, vector<128x60xf32> -> vector<128x60xf32>
    %143 = arith.truncf %142 : vector<128x60xf32> to vector<128x60xbf16>
    %c6_125 = arith.constant 6 : index
    %c0_126 = arith.constant 0 : index
    %c0_127 = arith.constant 0 : index
    %144 = vector.load %arg10[%c6_125, %c0_126, %c0_127] : memref<9x60x60xbf16, #tpu.memory_space<vmem>>, vector<1x60x60xbf16>
    %145 = vector.shape_cast %144 : vector<1x60x60xbf16> to vector<60x60xbf16>
    %cst_128 = arith.constant dense<0.000000e+00> : vector<128x60xf32>
    %146 = tpu.matmul %143, %145, %cst_128 {dimension_numbers = #tpu.dot_dimension_numbers<[1], [0], [0], [1], [0, 0, 1, 1], [], []>} : vector<128x60xbf16>, vector<60x60xbf16>, vector<128x60xf32> -> vector<128x60xf32>
    %147 = arith.addf %139, %146 : vector<128x60xf32>
    %c7_129 = arith.constant 7 : index
    %c0_130 = arith.constant 0 : index
    %c0_131 = arith.constant 0 : index
    %148 = vector.load %arg3[%c7_129, %c0_130, %c0_131] : memref<9x128x128xbf16, #tpu.memory_space<vmem>>, vector<1x128x128xbf16>
    %149 = vector.shape_cast %148 : vector<1x128x128xbf16> to vector<128x128xbf16>
    %cst_132 = arith.constant dense<0.000000e+00> : vector<128x60xf32>
    %150 = tpu.matmul %149, %92, %cst_132 {dimension_numbers = #tpu.dot_dimension_numbers<[1], [0], [0], [1], [0, 0, 1, 1], [], []>} : vector<128x128xbf16>, vector<128x60xbf16>, vector<128x60xf32> -> vector<128x60xf32>
    %151 = arith.truncf %150 : vector<128x60xf32> to vector<128x60xbf16>
    %c7_133 = arith.constant 7 : index
    %c0_134 = arith.constant 0 : index
    %c0_135 = arith.constant 0 : index
    %152 = vector.load %arg10[%c7_133, %c0_134, %c0_135] : memref<9x60x60xbf16, #tpu.memory_space<vmem>>, vector<1x60x60xbf16>
    %153 = vector.shape_cast %152 : vector<1x60x60xbf16> to vector<60x60xbf16>
    %cst_136 = arith.constant dense<0.000000e+00> : vector<128x60xf32>
    %154 = tpu.matmul %151, %153, %cst_136 {dimension_numbers = #tpu.dot_dimension_numbers<[1], [0], [0], [1], [0, 0, 1, 1], [], []>} : vector<128x60xbf16>, vector<60x60xbf16>, vector<128x60xf32> -> vector<128x60xf32>
    %155 = arith.addf %147, %154 : vector<128x60xf32>
    %c8_137 = arith.constant 8 : index
    %c0_138 = arith.constant 0 : index
    %c0_139 = arith.constant 0 : index
    %156 = vector.load %arg3[%c8_137, %c0_138, %c0_139] : memref<9x128x128xbf16, #tpu.memory_space<vmem>>, vector<1x128x128xbf16>
    %157 = vector.shape_cast %156 : vector<1x128x128xbf16> to vector<128x128xbf16>
    %cst_140 = arith.constant dense<0.000000e+00> : vector<128x60xf32>
    %158 = tpu.matmul %157, %92, %cst_140 {dimension_numbers = #tpu.dot_dimension_numbers<[1], [0], [0], [1], [0, 0, 1, 1], [], []>} : vector<128x128xbf16>, vector<128x60xbf16>, vector<128x60xf32> -> vector<128x60xf32>
    %159 = arith.truncf %158 : vector<128x60xf32> to vector<128x60xbf16>
    %c8_141 = arith.constant 8 : index
    %c0_142 = arith.constant 0 : index
    %c0_143 = arith.constant 0 : index
    %160 = vector.load %arg10[%c8_141, %c0_142, %c0_143] : memref<9x60x60xbf16, #tpu.memory_space<vmem>>, vector<1x60x60xbf16>
    %161 = vector.shape_cast %160 : vector<1x60x60xbf16> to vector<60x60xbf16>
    %cst_144 = arith.constant dense<0.000000e+00> : vector<128x60xf32>
    %162 = tpu.matmul %159, %161, %cst_144 {dimension_numbers = #tpu.dot_dimension_numbers<[1], [0], [0], [1], [0, 0, 1, 1], [], []>} : vector<128x60xbf16>, vector<60x60xbf16>, vector<128x60xf32> -> vector<128x60xf32>
    %163 = arith.addf %155, %162 : vector<128x60xf32>
    %c0_145 = arith.constant 0 : index
    %c0_146 = arith.constant 0 : index
    %164 = vector.load %arg11[%c0_145, %c0_146] : memref<1x60xf32, #tpu.memory_space<vmem>>, vector<1x60xf32>
    %165 = vector.broadcast %164 : vector<1x60xf32> to vector<128x60xf32>
    %166 = arith.addf %163, %165 : vector<128x60xf32>
    %cst_147 = arith.constant 0.000000e+00 : f32
    %167 = vector.broadcast %cst_147 : f32 to vector<128x60xf32>
    %168 = arith.maximumf %166, %167 : vector<128x60xf32>
    %169 = arith.truncf %168 : vector<128x60xf32> to vector<128x60xbf16>
    %c0_148 = arith.constant 0 : index
    %c0_149 = arith.constant 0 : index
    %c0_150 = arith.constant 0 : index
    %170 = vector.load %arg3[%c0_148, %c0_149, %c0_150] : memref<9x128x128xbf16, #tpu.memory_space<vmem>>, vector<1x128x128xbf16>
    %171 = vector.shape_cast %170 : vector<1x128x128xbf16> to vector<128x128xbf16>
    %cst_151 = arith.constant dense<0.000000e+00> : vector<128x60xf32>
    %172 = tpu.matmul %171, %169, %cst_151 {dimension_numbers = #tpu.dot_dimension_numbers<[1], [0], [0], [1], [0, 0, 1, 1], [], []>} : vector<128x128xbf16>, vector<128x60xbf16>, vector<128x60xf32> -> vector<128x60xf32>
    %173 = arith.truncf %172 : vector<128x60xf32> to vector<128x60xbf16>
    %c0_152 = arith.constant 0 : index
    %c0_153 = arith.constant 0 : index
    %c0_154 = arith.constant 0 : index
    %174 = vector.load %arg12[%c0_152, %c0_153, %c0_154] : memref<9x60x60xbf16, #tpu.memory_space<vmem>>, vector<1x60x60xbf16>
    %175 = vector.shape_cast %174 : vector<1x60x60xbf16> to vector<60x60xbf16>
    %cst_155 = arith.constant dense<0.000000e+00> : vector<128x60xf32>
    %176 = tpu.matmul %173, %175, %cst_155 {dimension_numbers = #tpu.dot_dimension_numbers<[1], [0], [0], [1], [0, 0, 1, 1], [], []>} : vector<128x60xbf16>, vector<60x60xbf16>, vector<128x60xf32> -> vector<128x60xf32>
    %c1_156 = arith.constant 1 : index
    %c0_157 = arith.constant 0 : index
    %c0_158 = arith.constant 0 : index
    %177 = vector.load %arg3[%c1_156, %c0_157, %c0_158] : memref<9x128x128xbf16, #tpu.memory_space<vmem>>, vector<1x128x128xbf16>
    %178 = vector.shape_cast %177 : vector<1x128x128xbf16> to vector<128x128xbf16>
    %cst_159 = arith.constant dense<0.000000e+00> : vector<128x60xf32>
    %179 = tpu.matmul %178, %169, %cst_159 {dimension_numbers = #tpu.dot_dimension_numbers<[1], [0], [0], [1], [0, 0, 1, 1], [], []>} : vector<128x128xbf16>, vector<128x60xbf16>, vector<128x60xf32> -> vector<128x60xf32>
    %180 = arith.truncf %179 : vector<128x60xf32> to vector<128x60xbf16>
    %c1_160 = arith.constant 1 : index
    %c0_161 = arith.constant 0 : index
    %c0_162 = arith.constant 0 : index
    %181 = vector.load %arg12[%c1_160, %c0_161, %c0_162] : memref<9x60x60xbf16, #tpu.memory_space<vmem>>, vector<1x60x60xbf16>
    %182 = vector.shape_cast %181 : vector<1x60x60xbf16> to vector<60x60xbf16>
    %cst_163 = arith.constant dense<0.000000e+00> : vector<128x60xf32>
    %183 = tpu.matmul %180, %182, %cst_163 {dimension_numbers = #tpu.dot_dimension_numbers<[1], [0], [0], [1], [0, 0, 1, 1], [], []>} : vector<128x60xbf16>, vector<60x60xbf16>, vector<128x60xf32> -> vector<128x60xf32>
    %184 = arith.addf %176, %183 : vector<128x60xf32>
    %c2_164 = arith.constant 2 : index
    %c0_165 = arith.constant 0 : index
    %c0_166 = arith.constant 0 : index
    %185 = vector.load %arg3[%c2_164, %c0_165, %c0_166] : memref<9x128x128xbf16, #tpu.memory_space<vmem>>, vector<1x128x128xbf16>
    %186 = vector.shape_cast %185 : vector<1x128x128xbf16> to vector<128x128xbf16>
    %cst_167 = arith.constant dense<0.000000e+00> : vector<128x60xf32>
    %187 = tpu.matmul %186, %169, %cst_167 {dimension_numbers = #tpu.dot_dimension_numbers<[1], [0], [0], [1], [0, 0, 1, 1], [], []>} : vector<128x128xbf16>, vector<128x60xbf16>, vector<128x60xf32> -> vector<128x60xf32>
    %188 = arith.truncf %187 : vector<128x60xf32> to vector<128x60xbf16>
    %c2_168 = arith.constant 2 : index
    %c0_169 = arith.constant 0 : index
    %c0_170 = arith.constant 0 : index
    %189 = vector.load %arg12[%c2_168, %c0_169, %c0_170] : memref<9x60x60xbf16, #tpu.memory_space<vmem>>, vector<1x60x60xbf16>
    %190 = vector.shape_cast %189 : vector<1x60x60xbf16> to vector<60x60xbf16>
    %cst_171 = arith.constant dense<0.000000e+00> : vector<128x60xf32>
    %191 = tpu.matmul %188, %190, %cst_171 {dimension_numbers = #tpu.dot_dimension_numbers<[1], [0], [0], [1], [0, 0, 1, 1], [], []>} : vector<128x60xbf16>, vector<60x60xbf16>, vector<128x60xf32> -> vector<128x60xf32>
    %192 = arith.addf %184, %191 : vector<128x60xf32>
    %c3_172 = arith.constant 3 : index
    %c0_173 = arith.constant 0 : index
    %c0_174 = arith.constant 0 : index
    %193 = vector.load %arg3[%c3_172, %c0_173, %c0_174] : memref<9x128x128xbf16, #tpu.memory_space<vmem>>, vector<1x128x128xbf16>
    %194 = vector.shape_cast %193 : vector<1x128x128xbf16> to vector<128x128xbf16>
    %cst_175 = arith.constant dense<0.000000e+00> : vector<128x60xf32>
    %195 = tpu.matmul %194, %169, %cst_175 {dimension_numbers = #tpu.dot_dimension_numbers<[1], [0], [0], [1], [0, 0, 1, 1], [], []>} : vector<128x128xbf16>, vector<128x60xbf16>, vector<128x60xf32> -> vector<128x60xf32>
    %196 = arith.truncf %195 : vector<128x60xf32> to vector<128x60xbf16>
    %c3_176 = arith.constant 3 : index
    %c0_177 = arith.constant 0 : index
    %c0_178 = arith.constant 0 : index
    %197 = vector.load %arg12[%c3_176, %c0_177, %c0_178] : memref<9x60x60xbf16, #tpu.memory_space<vmem>>, vector<1x60x60xbf16>
    %198 = vector.shape_cast %197 : vector<1x60x60xbf16> to vector<60x60xbf16>
    %cst_179 = arith.constant dense<0.000000e+00> : vector<128x60xf32>
    %199 = tpu.matmul %196, %198, %cst_179 {dimension_numbers = #tpu.dot_dimension_numbers<[1], [0], [0], [1], [0, 0, 1, 1], [], []>} : vector<128x60xbf16>, vector<60x60xbf16>, vector<128x60xf32> -> vector<128x60xf32>
    %200 = arith.addf %192, %199 : vector<128x60xf32>
    %c4_180 = arith.constant 4 : index
    %c0_181 = arith.constant 0 : index
    %c0_182 = arith.constant 0 : index
    %201 = vector.load %arg3[%c4_180, %c0_181, %c0_182] : memref<9x128x128xbf16, #tpu.memory_space<vmem>>, vector<1x128x128xbf16>
    %202 = vector.shape_cast %201 : vector<1x128x128xbf16> to vector<128x128xbf16>
    %cst_183 = arith.constant dense<0.000000e+00> : vector<128x60xf32>
    %203 = tpu.matmul %202, %169, %cst_183 {dimension_numbers = #tpu.dot_dimension_numbers<[1], [0], [0], [1], [0, 0, 1, 1], [], []>} : vector<128x128xbf16>, vector<128x60xbf16>, vector<128x60xf32> -> vector<128x60xf32>
    %204 = arith.truncf %203 : vector<128x60xf32> to vector<128x60xbf16>
    %c4_184 = arith.constant 4 : index
    %c0_185 = arith.constant 0 : index
    %c0_186 = arith.constant 0 : index
    %205 = vector.load %arg12[%c4_184, %c0_185, %c0_186] : memref<9x60x60xbf16, #tpu.memory_space<vmem>>, vector<1x60x60xbf16>
    %206 = vector.shape_cast %205 : vector<1x60x60xbf16> to vector<60x60xbf16>
    %cst_187 = arith.constant dense<0.000000e+00> : vector<128x60xf32>
    %207 = tpu.matmul %204, %206, %cst_187 {dimension_numbers = #tpu.dot_dimension_numbers<[1], [0], [0], [1], [0, 0, 1, 1], [], []>} : vector<128x60xbf16>, vector<60x60xbf16>, vector<128x60xf32> -> vector<128x60xf32>
    %208 = arith.addf %200, %207 : vector<128x60xf32>
    %c5_188 = arith.constant 5 : index
    %c0_189 = arith.constant 0 : index
    %c0_190 = arith.constant 0 : index
    %209 = vector.load %arg3[%c5_188, %c0_189, %c0_190] : memref<9x128x128xbf16, #tpu.memory_space<vmem>>, vector<1x128x128xbf16>
    %210 = vector.shape_cast %209 : vector<1x128x128xbf16> to vector<128x128xbf16>
    %cst_191 = arith.constant dense<0.000000e+00> : vector<128x60xf32>
    %211 = tpu.matmul %210, %169, %cst_191 {dimension_numbers = #tpu.dot_dimension_numbers<[1], [0], [0], [1], [0, 0, 1, 1], [], []>} : vector<128x128xbf16>, vector<128x60xbf16>, vector<128x60xf32> -> vector<128x60xf32>
    %212 = arith.truncf %211 : vector<128x60xf32> to vector<128x60xbf16>
    %c5_192 = arith.constant 5 : index
    %c0_193 = arith.constant 0 : index
    %c0_194 = arith.constant 0 : index
    %213 = vector.load %arg12[%c5_192, %c0_193, %c0_194] : memref<9x60x60xbf16, #tpu.memory_space<vmem>>, vector<1x60x60xbf16>
    %214 = vector.shape_cast %213 : vector<1x60x60xbf16> to vector<60x60xbf16>
    %cst_195 = arith.constant dense<0.000000e+00> : vector<128x60xf32>
    %215 = tpu.matmul %212, %214, %cst_195 {dimension_numbers = #tpu.dot_dimension_numbers<[1], [0], [0], [1], [0, 0, 1, 1], [], []>} : vector<128x60xbf16>, vector<60x60xbf16>, vector<128x60xf32> -> vector<128x60xf32>
    %216 = arith.addf %208, %215 : vector<128x60xf32>
    %c6_196 = arith.constant 6 : index
    %c0_197 = arith.constant 0 : index
    %c0_198 = arith.constant 0 : index
    %217 = vector.load %arg3[%c6_196, %c0_197, %c0_198] : memref<9x128x128xbf16, #tpu.memory_space<vmem>>, vector<1x128x128xbf16>
    %218 = vector.shape_cast %217 : vector<1x128x128xbf16> to vector<128x128xbf16>
    %cst_199 = arith.constant dense<0.000000e+00> : vector<128x60xf32>
    %219 = tpu.matmul %218, %169, %cst_199 {dimension_numbers = #tpu.dot_dimension_numbers<[1], [0], [0], [1], [0, 0, 1, 1], [], []>} : vector<128x128xbf16>, vector<128x60xbf16>, vector<128x60xf32> -> vector<128x60xf32>
    %220 = arith.truncf %219 : vector<128x60xf32> to vector<128x60xbf16>
    %c6_200 = arith.constant 6 : index
    %c0_201 = arith.constant 0 : index
    %c0_202 = arith.constant 0 : index
    %221 = vector.load %arg12[%c6_200, %c0_201, %c0_202] : memref<9x60x60xbf16, #tpu.memory_space<vmem>>, vector<1x60x60xbf16>
    %222 = vector.shape_cast %221 : vector<1x60x60xbf16> to vector<60x60xbf16>
    %cst_203 = arith.constant dense<0.000000e+00> : vector<128x60xf32>
    %223 = tpu.matmul %220, %222, %cst_203 {dimension_numbers = #tpu.dot_dimension_numbers<[1], [0], [0], [1], [0, 0, 1, 1], [], []>} : vector<128x60xbf16>, vector<60x60xbf16>, vector<128x60xf32> -> vector<128x60xf32>
    %224 = arith.addf %216, %223 : vector<128x60xf32>
    %c7_204 = arith.constant 7 : index
    %c0_205 = arith.constant 0 : index
    %c0_206 = arith.constant 0 : index
    %225 = vector.load %arg3[%c7_204, %c0_205, %c0_206] : memref<9x128x128xbf16, #tpu.memory_space<vmem>>, vector<1x128x128xbf16>
    %226 = vector.shape_cast %225 : vector<1x128x128xbf16> to vector<128x128xbf16>
    %cst_207 = arith.constant dense<0.000000e+00> : vector<128x60xf32>
    %227 = tpu.matmul %226, %169, %cst_207 {dimension_numbers = #tpu.dot_dimension_numbers<[1], [0], [0], [1], [0, 0, 1, 1], [], []>} : vector<128x128xbf16>, vector<128x60xbf16>, vector<128x60xf32> -> vector<128x60xf32>
    %228 = arith.truncf %227 : vector<128x60xf32> to vector<128x60xbf16>
    %c7_208 = arith.constant 7 : index
    %c0_209 = arith.constant 0 : index
    %c0_210 = arith.constant 0 : index
    %229 = vector.load %arg12[%c7_208, %c0_209, %c0_210] : memref<9x60x60xbf16, #tpu.memory_space<vmem>>, vector<1x60x60xbf16>
    %230 = vector.shape_cast %229 : vector<1x60x60xbf16> to vector<60x60xbf16>
    %cst_211 = arith.constant dense<0.000000e+00> : vector<128x60xf32>
    %231 = tpu.matmul %228, %230, %cst_211 {dimension_numbers = #tpu.dot_dimension_numbers<[1], [0], [0], [1], [0, 0, 1, 1], [], []>} : vector<128x60xbf16>, vector<60x60xbf16>, vector<128x60xf32> -> vector<128x60xf32>
    %232 = arith.addf %224, %231 : vector<128x60xf32>
    %c8_212 = arith.constant 8 : index
    %c0_213 = arith.constant 0 : index
    %c0_214 = arith.constant 0 : index
    %233 = vector.load %arg3[%c8_212, %c0_213, %c0_214] : memref<9x128x128xbf16, #tpu.memory_space<vmem>>, vector<1x128x128xbf16>
    %234 = vector.shape_cast %233 : vector<1x128x128xbf16> to vector<128x128xbf16>
    %cst_215 = arith.constant dense<0.000000e+00> : vector<128x60xf32>
    %235 = tpu.matmul %234, %169, %cst_215 {dimension_numbers = #tpu.dot_dimension_numbers<[1], [0], [0], [1], [0, 0, 1, 1], [], []>} : vector<128x128xbf16>, vector<128x60xbf16>, vector<128x60xf32> -> vector<128x60xf32>
    %236 = arith.truncf %235 : vector<128x60xf32> to vector<128x60xbf16>
    %c8_216 = arith.constant 8 : index
    %c0_217 = arith.constant 0 : index
    %c0_218 = arith.constant 0 : index
    %237 = vector.load %arg12[%c8_216, %c0_217, %c0_218] : memref<9x60x60xbf16, #tpu.memory_space<vmem>>, vector<1x60x60xbf16>
    %238 = vector.shape_cast %237 : vector<1x60x60xbf16> to vector<60x60xbf16>
    %cst_219 = arith.constant dense<0.000000e+00> : vector<128x60xf32>
    %239 = tpu.matmul %236, %238, %cst_219 {dimension_numbers = #tpu.dot_dimension_numbers<[1], [0], [0], [1], [0, 0, 1, 1], [], []>} : vector<128x60xbf16>, vector<60x60xbf16>, vector<128x60xf32> -> vector<128x60xf32>
    %240 = arith.addf %232, %239 : vector<128x60xf32>
    %c0_220 = arith.constant 0 : index
    %c0_221 = arith.constant 0 : index
    %241 = vector.load %arg13[%c0_220, %c0_221] : memref<1x60xf32, #tpu.memory_space<vmem>>, vector<1x60xf32>
    %242 = vector.broadcast %241 : vector<1x60xf32> to vector<128x60xf32>
    %243 = arith.addf %240, %242 : vector<128x60xf32>
    %cst_222 = arith.constant 0.000000e+00 : f32
    %244 = vector.broadcast %cst_222 : f32 to vector<128x60xf32>
    %245 = arith.maximumf %243, %244 : vector<128x60xf32>
    %246 = arith.truncf %245 : vector<128x60xf32> to vector<128x60xbf16>
    %c0_223 = arith.constant 0 : index
    %c0_224 = arith.constant 0 : index
    %c0_225 = arith.constant 0 : index
    %247 = vector.load %arg6[%c0_223, %c0_224, %c0_225] : memref<4x32x128xbf16, #tpu.memory_space<vmem>>, vector<1x32x128xbf16>
    %248 = vector.shape_cast %247 : vector<1x32x128xbf16> to vector<32x128xbf16>
    %cst_226 = arith.constant dense<0.000000e+00> : vector<32x60xf32>
    %249 = tpu.matmul %248, %246, %cst_226 {dimension_numbers = #tpu.dot_dimension_numbers<[1], [0], [0], [1], [0, 0, 1, 1], [], []>} : vector<32x128xbf16>, vector<128x60xbf16>, vector<32x60xf32> -> vector<32x60xf32>
    %c1_227 = arith.constant 1 : index
    %c0_228 = arith.constant 0 : index
    %c0_229 = arith.constant 0 : index
    %250 = vector.load %arg6[%c1_227, %c0_228, %c0_229] : memref<4x32x128xbf16, #tpu.memory_space<vmem>>, vector<1x32x128xbf16>
    %251 = vector.shape_cast %250 : vector<1x32x128xbf16> to vector<32x128xbf16>
    %cst_230 = arith.constant dense<0.000000e+00> : vector<32x60xf32>
    %252 = tpu.matmul %251, %246, %cst_230 {dimension_numbers = #tpu.dot_dimension_numbers<[1], [0], [0], [1], [0, 0, 1, 1], [], []>} : vector<32x128xbf16>, vector<128x60xbf16>, vector<32x60xf32> -> vector<32x60xf32>
    %c2_231 = arith.constant 2 : index
    %c0_232 = arith.constant 0 : index
    %c0_233 = arith.constant 0 : index
    %253 = vector.load %arg6[%c2_231, %c0_232, %c0_233] : memref<4x32x128xbf16, #tpu.memory_space<vmem>>, vector<1x32x128xbf16>
    %254 = vector.shape_cast %253 : vector<1x32x128xbf16> to vector<32x128xbf16>
    %cst_234 = arith.constant dense<0.000000e+00> : vector<32x60xf32>
    %255 = tpu.matmul %254, %246, %cst_234 {dimension_numbers = #tpu.dot_dimension_numbers<[1], [0], [0], [1], [0, 0, 1, 1], [], []>} : vector<32x128xbf16>, vector<128x60xbf16>, vector<32x60xf32> -> vector<32x60xf32>
    %c3_235 = arith.constant 3 : index
    %c0_236 = arith.constant 0 : index
    %c0_237 = arith.constant 0 : index
    %256 = vector.load %arg6[%c3_235, %c0_236, %c0_237] : memref<4x32x128xbf16, #tpu.memory_space<vmem>>, vector<1x32x128xbf16>
    %257 = vector.shape_cast %256 : vector<1x32x128xbf16> to vector<32x128xbf16>
    %cst_238 = arith.constant dense<0.000000e+00> : vector<32x60xf32>
    %258 = tpu.matmul %257, %246, %cst_238 {dimension_numbers = #tpu.dot_dimension_numbers<[1], [0], [0], [1], [0, 0, 1, 1], [], []>} : vector<32x128xbf16>, vector<128x60xbf16>, vector<32x60xf32> -> vector<32x60xf32>
    %259 = arith.maximumf %249, %252 : vector<32x60xf32>
    %260 = arith.maximumf %255, %258 : vector<32x60xf32>
    %261 = arith.maximumf %259, %260 : vector<32x60xf32>
    %262 = arith.truncf %261 : vector<32x60xf32> to vector<32x60xbf16>
    %c0_239 = arith.constant 0 : index
    %c0_240 = arith.constant 0 : index
    %c0_241 = arith.constant 0 : index
    %263 = vector.load %arg4[%c0_239, %c0_240, %c0_241] : memref<9x32x32xbf16, #tpu.memory_space<vmem>>, vector<1x32x32xbf16>
    %264 = vector.shape_cast %263 : vector<1x32x32xbf16> to vector<32x32xbf16>
    %cst_242 = arith.constant dense<0.000000e+00> : vector<32x60xf32>
    %265 = tpu.matmul %264, %262, %cst_242 {dimension_numbers = #tpu.dot_dimension_numbers<[1], [0], [0], [1], [0, 0, 1, 1], [], []>} : vector<32x32xbf16>, vector<32x60xbf16>, vector<32x60xf32> -> vector<32x60xf32>
    %266 = arith.truncf %265 : vector<32x60xf32> to vector<32x60xbf16>
    %c0_243 = arith.constant 0 : index
    %c0_244 = arith.constant 0 : index
    %c0_245 = arith.constant 0 : index
    %267 = vector.load %arg14[%c0_243, %c0_244, %c0_245] : memref<9x60x30xbf16, #tpu.memory_space<vmem>>, vector<1x60x30xbf16>
    %268 = vector.shape_cast %267 : vector<1x60x30xbf16> to vector<60x30xbf16>
    %cst_246 = arith.constant dense<0.000000e+00> : vector<32x30xf32>
    %269 = tpu.matmul %266, %268, %cst_246 {dimension_numbers = #tpu.dot_dimension_numbers<[1], [0], [0], [1], [0, 0, 1, 1], [], []>} : vector<32x60xbf16>, vector<60x30xbf16>, vector<32x30xf32> -> vector<32x30xf32>
    %c1_247 = arith.constant 1 : index
    %c0_248 = arith.constant 0 : index
    %c0_249 = arith.constant 0 : index
    %270 = vector.load %arg4[%c1_247, %c0_248, %c0_249] : memref<9x32x32xbf16, #tpu.memory_space<vmem>>, vector<1x32x32xbf16>
    %271 = vector.shape_cast %270 : vector<1x32x32xbf16> to vector<32x32xbf16>
    %cst_250 = arith.constant dense<0.000000e+00> : vector<32x60xf32>
    %272 = tpu.matmul %271, %262, %cst_250 {dimension_numbers = #tpu.dot_dimension_numbers<[1], [0], [0], [1], [0, 0, 1, 1], [], []>} : vector<32x32xbf16>, vector<32x60xbf16>, vector<32x60xf32> -> vector<32x60xf32>
    %273 = arith.truncf %272 : vector<32x60xf32> to vector<32x60xbf16>
    %c1_251 = arith.constant 1 : index
    %c0_252 = arith.constant 0 : index
    %c0_253 = arith.constant 0 : index
    %274 = vector.load %arg14[%c1_251, %c0_252, %c0_253] : memref<9x60x30xbf16, #tpu.memory_space<vmem>>, vector<1x60x30xbf16>
    %275 = vector.shape_cast %274 : vector<1x60x30xbf16> to vector<60x30xbf16>
    %cst_254 = arith.constant dense<0.000000e+00> : vector<32x30xf32>
    %276 = tpu.matmul %273, %275, %cst_254 {dimension_numbers = #tpu.dot_dimension_numbers<[1], [0], [0], [1], [0, 0, 1, 1], [], []>} : vector<32x60xbf16>, vector<60x30xbf16>, vector<32x30xf32> -> vector<32x30xf32>
    %277 = arith.addf %269, %276 : vector<32x30xf32>
    %c2_255 = arith.constant 2 : index
    %c0_256 = arith.constant 0 : index
    %c0_257 = arith.constant 0 : index
    %278 = vector.load %arg4[%c2_255, %c0_256, %c0_257] : memref<9x32x32xbf16, #tpu.memory_space<vmem>>, vector<1x32x32xbf16>
    %279 = vector.shape_cast %278 : vector<1x32x32xbf16> to vector<32x32xbf16>
    %cst_258 = arith.constant dense<0.000000e+00> : vector<32x60xf32>
    %280 = tpu.matmul %279, %262, %cst_258 {dimension_numbers = #tpu.dot_dimension_numbers<[1], [0], [0], [1], [0, 0, 1, 1], [], []>} : vector<32x32xbf16>, vector<32x60xbf16>, vector<32x60xf32> -> vector<32x60xf32>
    %281 = arith.truncf %280 : vector<32x60xf32> to vector<32x60xbf16>
    %c2_259 = arith.constant 2 : index
    %c0_260 = arith.constant 0 : index
    %c0_261 = arith.constant 0 : index
    %282 = vector.load %arg14[%c2_259, %c0_260, %c0_261] : memref<9x60x30xbf16, #tpu.memory_space<vmem>>, vector<1x60x30xbf16>
    %283 = vector.shape_cast %282 : vector<1x60x30xbf16> to vector<60x30xbf16>
    %cst_262 = arith.constant dense<0.000000e+00> : vector<32x30xf32>
    %284 = tpu.matmul %281, %283, %cst_262 {dimension_numbers = #tpu.dot_dimension_numbers<[1], [0], [0], [1], [0, 0, 1, 1], [], []>} : vector<32x60xbf16>, vector<60x30xbf16>, vector<32x30xf32> -> vector<32x30xf32>
    %285 = arith.addf %277, %284 : vector<32x30xf32>
    %c3_263 = arith.constant 3 : index
    %c0_264 = arith.constant 0 : index
    %c0_265 = arith.constant 0 : index
    %286 = vector.load %arg4[%c3_263, %c0_264, %c0_265] : memref<9x32x32xbf16, #tpu.memory_space<vmem>>, vector<1x32x32xbf16>
    %287 = vector.shape_cast %286 : vector<1x32x32xbf16> to vector<32x32xbf16>
    %cst_266 = arith.constant dense<0.000000e+00> : vector<32x60xf32>
    %288 = tpu.matmul %287, %262, %cst_266 {dimension_numbers = #tpu.dot_dimension_numbers<[1], [0], [0], [1], [0, 0, 1, 1], [], []>} : vector<32x32xbf16>, vector<32x60xbf16>, vector<32x60xf32> -> vector<32x60xf32>
    %289 = arith.truncf %288 : vector<32x60xf32> to vector<32x60xbf16>
    %c3_267 = arith.constant 3 : index
    %c0_268 = arith.constant 0 : index
    %c0_269 = arith.constant 0 : index
    %290 = vector.load %arg14[%c3_267, %c0_268, %c0_269] : memref<9x60x30xbf16, #tpu.memory_space<vmem>>, vector<1x60x30xbf16>
    %291 = vector.shape_cast %290 : vector<1x60x30xbf16> to vector<60x30xbf16>
    %cst_270 = arith.constant dense<0.000000e+00> : vector<32x30xf32>
    %292 = tpu.matmul %289, %291, %cst_270 {dimension_numbers = #tpu.dot_dimension_numbers<[1], [0], [0], [1], [0, 0, 1, 1], [], []>} : vector<32x60xbf16>, vector<60x30xbf16>, vector<32x30xf32> -> vector<32x30xf32>
    %293 = arith.addf %285, %292 : vector<32x30xf32>
    %c4_271 = arith.constant 4 : index
    %c0_272 = arith.constant 0 : index
    %c0_273 = arith.constant 0 : index
    %294 = vector.load %arg4[%c4_271, %c0_272, %c0_273] : memref<9x32x32xbf16, #tpu.memory_space<vmem>>, vector<1x32x32xbf16>
    %295 = vector.shape_cast %294 : vector<1x32x32xbf16> to vector<32x32xbf16>
    %cst_274 = arith.constant dense<0.000000e+00> : vector<32x60xf32>
    %296 = tpu.matmul %295, %262, %cst_274 {dimension_numbers = #tpu.dot_dimension_numbers<[1], [0], [0], [1], [0, 0, 1, 1], [], []>} : vector<32x32xbf16>, vector<32x60xbf16>, vector<32x60xf32> -> vector<32x60xf32>
    %297 = arith.truncf %296 : vector<32x60xf32> to vector<32x60xbf16>
    %c4_275 = arith.constant 4 : index
    %c0_276 = arith.constant 0 : index
    %c0_277 = arith.constant 0 : index
    %298 = vector.load %arg14[%c4_275, %c0_276, %c0_277] : memref<9x60x30xbf16, #tpu.memory_space<vmem>>, vector<1x60x30xbf16>
    %299 = vector.shape_cast %298 : vector<1x60x30xbf16> to vector<60x30xbf16>
    %cst_278 = arith.constant dense<0.000000e+00> : vector<32x30xf32>
    %300 = tpu.matmul %297, %299, %cst_278 {dimension_numbers = #tpu.dot_dimension_numbers<[1], [0], [0], [1], [0, 0, 1, 1], [], []>} : vector<32x60xbf16>, vector<60x30xbf16>, vector<32x30xf32> -> vector<32x30xf32>
    %301 = arith.addf %293, %300 : vector<32x30xf32>
    %c5_279 = arith.constant 5 : index
    %c0_280 = arith.constant 0 : index
    %c0_281 = arith.constant 0 : index
    %302 = vector.load %arg4[%c5_279, %c0_280, %c0_281] : memref<9x32x32xbf16, #tpu.memory_space<vmem>>, vector<1x32x32xbf16>
    %303 = vector.shape_cast %302 : vector<1x32x32xbf16> to vector<32x32xbf16>
    %cst_282 = arith.constant dense<0.000000e+00> : vector<32x60xf32>
    %304 = tpu.matmul %303, %262, %cst_282 {dimension_numbers = #tpu.dot_dimension_numbers<[1], [0], [0], [1], [0, 0, 1, 1], [], []>} : vector<32x32xbf16>, vector<32x60xbf16>, vector<32x60xf32> -> vector<32x60xf32>
    %305 = arith.truncf %304 : vector<32x60xf32> to vector<32x60xbf16>
    %c5_283 = arith.constant 5 : index
    %c0_284 = arith.constant 0 : index
    %c0_285 = arith.constant 0 : index
    %306 = vector.load %arg14[%c5_283, %c0_284, %c0_285] : memref<9x60x30xbf16, #tpu.memory_space<vmem>>, vector<1x60x30xbf16>
    %307 = vector.shape_cast %306 : vector<1x60x30xbf16> to vector<60x30xbf16>
    %cst_286 = arith.constant dense<0.000000e+00> : vector<32x30xf32>
    %308 = tpu.matmul %305, %307, %cst_286 {dimension_numbers = #tpu.dot_dimension_numbers<[1], [0], [0], [1], [0, 0, 1, 1], [], []>} : vector<32x60xbf16>, vector<60x30xbf16>, vector<32x30xf32> -> vector<32x30xf32>
    %309 = arith.addf %301, %308 : vector<32x30xf32>
    %c6_287 = arith.constant 6 : index
    %c0_288 = arith.constant 0 : index
    %c0_289 = arith.constant 0 : index
    %310 = vector.load %arg4[%c6_287, %c0_288, %c0_289] : memref<9x32x32xbf16, #tpu.memory_space<vmem>>, vector<1x32x32xbf16>
    %311 = vector.shape_cast %310 : vector<1x32x32xbf16> to vector<32x32xbf16>
    %cst_290 = arith.constant dense<0.000000e+00> : vector<32x60xf32>
    %312 = tpu.matmul %311, %262, %cst_290 {dimension_numbers = #tpu.dot_dimension_numbers<[1], [0], [0], [1], [0, 0, 1, 1], [], []>} : vector<32x32xbf16>, vector<32x60xbf16>, vector<32x60xf32> -> vector<32x60xf32>
    %313 = arith.truncf %312 : vector<32x60xf32> to vector<32x60xbf16>
    %c6_291 = arith.constant 6 : index
    %c0_292 = arith.constant 0 : index
    %c0_293 = arith.constant 0 : index
    %314 = vector.load %arg14[%c6_291, %c0_292, %c0_293] : memref<9x60x30xbf16, #tpu.memory_space<vmem>>, vector<1x60x30xbf16>
    %315 = vector.shape_cast %314 : vector<1x60x30xbf16> to vector<60x30xbf16>
    %cst_294 = arith.constant dense<0.000000e+00> : vector<32x30xf32>
    %316 = tpu.matmul %313, %315, %cst_294 {dimension_numbers = #tpu.dot_dimension_numbers<[1], [0], [0], [1], [0, 0, 1, 1], [], []>} : vector<32x60xbf16>, vector<60x30xbf16>, vector<32x30xf32> -> vector<32x30xf32>
    %317 = arith.addf %309, %316 : vector<32x30xf32>
    %c7_295 = arith.constant 7 : index
    %c0_296 = arith.constant 0 : index
    %c0_297 = arith.constant 0 : index
    %318 = vector.load %arg4[%c7_295, %c0_296, %c0_297] : memref<9x32x32xbf16, #tpu.memory_space<vmem>>, vector<1x32x32xbf16>
    %319 = vector.shape_cast %318 : vector<1x32x32xbf16> to vector<32x32xbf16>
    %cst_298 = arith.constant dense<0.000000e+00> : vector<32x60xf32>
    %320 = tpu.matmul %319, %262, %cst_298 {dimension_numbers = #tpu.dot_dimension_numbers<[1], [0], [0], [1], [0, 0, 1, 1], [], []>} : vector<32x32xbf16>, vector<32x60xbf16>, vector<32x60xf32> -> vector<32x60xf32>
    %321 = arith.truncf %320 : vector<32x60xf32> to vector<32x60xbf16>
    %c7_299 = arith.constant 7 : index
    %c0_300 = arith.constant 0 : index
    %c0_301 = arith.constant 0 : index
    %322 = vector.load %arg14[%c7_299, %c0_300, %c0_301] : memref<9x60x30xbf16, #tpu.memory_space<vmem>>, vector<1x60x30xbf16>
    %323 = vector.shape_cast %322 : vector<1x60x30xbf16> to vector<60x30xbf16>
    %cst_302 = arith.constant dense<0.000000e+00> : vector<32x30xf32>
    %324 = tpu.matmul %321, %323, %cst_302 {dimension_numbers = #tpu.dot_dimension_numbers<[1], [0], [0], [1], [0, 0, 1, 1], [], []>} : vector<32x60xbf16>, vector<60x30xbf16>, vector<32x30xf32> -> vector<32x30xf32>
    %325 = arith.addf %317, %324 : vector<32x30xf32>
    %c8_303 = arith.constant 8 : index
    %c0_304 = arith.constant 0 : index
    %c0_305 = arith.constant 0 : index
    %326 = vector.load %arg4[%c8_303, %c0_304, %c0_305] : memref<9x32x32xbf16, #tpu.memory_space<vmem>>, vector<1x32x32xbf16>
    %327 = vector.shape_cast %326 : vector<1x32x32xbf16> to vector<32x32xbf16>
    %cst_306 = arith.constant dense<0.000000e+00> : vector<32x60xf32>
    %328 = tpu.matmul %327, %262, %cst_306 {dimension_numbers = #tpu.dot_dimension_numbers<[1], [0], [0], [1], [0, 0, 1, 1], [], []>} : vector<32x32xbf16>, vector<32x60xbf16>, vector<32x60xf32> -> vector<32x60xf32>
    %329 = arith.truncf %328 : vector<32x60xf32> to vector<32x60xbf16>
    %c8_307 = arith.constant 8 : index
    %c0_308 = arith.constant 0 : index
    %c0_309 = arith.constant 0 : index
    %330 = vector.load %arg14[%c8_307, %c0_308, %c0_309] : memref<9x60x30xbf16, #tpu.memory_space<vmem>>, vector<1x60x30xbf16>
    %331 = vector.shape_cast %330 : vector<1x60x30xbf16> to vector<60x30xbf16>
    %cst_310 = arith.constant dense<0.000000e+00> : vector<32x30xf32>
    %332 = tpu.matmul %329, %331, %cst_310 {dimension_numbers = #tpu.dot_dimension_numbers<[1], [0], [0], [1], [0, 0, 1, 1], [], []>} : vector<32x60xbf16>, vector<60x30xbf16>, vector<32x30xf32> -> vector<32x30xf32>
    %333 = arith.addf %325, %332 : vector<32x30xf32>
    %c0_311 = arith.constant 0 : index
    %c0_312 = arith.constant 0 : index
    %334 = vector.load %arg15[%c0_311, %c0_312] : memref<1x30xf32, #tpu.memory_space<vmem>>, vector<1x30xf32>
    %335 = vector.broadcast %334 : vector<1x30xf32> to vector<32x30xf32>
    %336 = arith.addf %333, %335 : vector<32x30xf32>
    %cst_313 = arith.constant 0.000000e+00 : f32
    %337 = vector.broadcast %cst_313 : f32 to vector<32x30xf32>
    %338 = arith.maximumf %336, %337 : vector<32x30xf32>
    %339 = arith.truncf %338 : vector<32x30xf32> to vector<32x30xbf16>
    %c0_314 = arith.constant 0 : index
    %c0_315 = arith.constant 0 : index
    %c0_316 = arith.constant 0 : index
    %340 = vector.load %arg7[%c0_314, %c0_315, %c0_316] : memref<4x8x32xbf16, #tpu.memory_space<vmem>>, vector<1x8x32xbf16>
    %341 = vector.shape_cast %340 : vector<1x8x32xbf16> to vector<8x32xbf16>
    %cst_317 = arith.constant dense<0.000000e+00> : vector<8x30xf32>
    %342 = tpu.matmul %341, %339, %cst_317 {dimension_numbers = #tpu.dot_dimension_numbers<[1], [0], [0], [1], [0, 0, 1, 1], [], []>} : vector<8x32xbf16>, vector<32x30xbf16>, vector<8x30xf32> -> vector<8x30xf32>
    %c1_318 = arith.constant 1 : index
    %c0_319 = arith.constant 0 : index
    %c0_320 = arith.constant 0 : index
    %343 = vector.load %arg7[%c1_318, %c0_319, %c0_320] : memref<4x8x32xbf16, #tpu.memory_space<vmem>>, vector<1x8x32xbf16>
    %344 = vector.shape_cast %343 : vector<1x8x32xbf16> to vector<8x32xbf16>
    %cst_321 = arith.constant dense<0.000000e+00> : vector<8x30xf32>
    %345 = tpu.matmul %344, %339, %cst_321 {dimension_numbers = #tpu.dot_dimension_numbers<[1], [0], [0], [1], [0, 0, 1, 1], [], []>} : vector<8x32xbf16>, vector<32x30xbf16>, vector<8x30xf32> -> vector<8x30xf32>
    %c2_322 = arith.constant 2 : index
    %c0_323 = arith.constant 0 : index
    %c0_324 = arith.constant 0 : index
    %346 = vector.load %arg7[%c2_322, %c0_323, %c0_324] : memref<4x8x32xbf16, #tpu.memory_space<vmem>>, vector<1x8x32xbf16>
    %347 = vector.shape_cast %346 : vector<1x8x32xbf16> to vector<8x32xbf16>
    %cst_325 = arith.constant dense<0.000000e+00> : vector<8x30xf32>
    %348 = tpu.matmul %347, %339, %cst_325 {dimension_numbers = #tpu.dot_dimension_numbers<[1], [0], [0], [1], [0, 0, 1, 1], [], []>} : vector<8x32xbf16>, vector<32x30xbf16>, vector<8x30xf32> -> vector<8x30xf32>
    %c3_326 = arith.constant 3 : index
    %c0_327 = arith.constant 0 : index
    %c0_328 = arith.constant 0 : index
    %349 = vector.load %arg7[%c3_326, %c0_327, %c0_328] : memref<4x8x32xbf16, #tpu.memory_space<vmem>>, vector<1x8x32xbf16>
    %350 = vector.shape_cast %349 : vector<1x8x32xbf16> to vector<8x32xbf16>
    %cst_329 = arith.constant dense<0.000000e+00> : vector<8x30xf32>
    %351 = tpu.matmul %350, %339, %cst_329 {dimension_numbers = #tpu.dot_dimension_numbers<[1], [0], [0], [1], [0, 0, 1, 1], [], []>} : vector<8x32xbf16>, vector<32x30xbf16>, vector<8x30xf32> -> vector<8x30xf32>
    %352 = arith.maximumf %342, %345 : vector<8x30xf32>
    %353 = arith.maximumf %348, %351 : vector<8x30xf32>
    %354 = arith.maximumf %352, %353 : vector<8x30xf32>
    %355 = arith.truncf %354 : vector<8x30xf32> to vector<8x30xbf16>
    %c0_330 = arith.constant 0 : index
    %c0_331 = arith.constant 0 : index
    %c0_332 = arith.constant 0 : index
    %356 = vector.load %arg5[%c0_330, %c0_331, %c0_332] : memref<9x8x8xbf16, #tpu.memory_space<vmem>>, vector<1x8x8xbf16>
    %357 = vector.shape_cast %356 : vector<1x8x8xbf16> to vector<8x8xbf16>
    %cst_333 = arith.constant dense<0.000000e+00> : vector<8x30xf32>
    %358 = tpu.matmul %357, %355, %cst_333 {dimension_numbers = #tpu.dot_dimension_numbers<[1], [0], [0], [1], [0, 0, 1, 1], [], []>} : vector<8x8xbf16>, vector<8x30xbf16>, vector<8x30xf32> -> vector<8x30xf32>
    %359 = arith.truncf %358 : vector<8x30xf32> to vector<8x30xbf16>
    %c0_334 = arith.constant 0 : index
    %c0_335 = arith.constant 0 : index
    %c0_336 = arith.constant 0 : index
    %360 = vector.load %arg16[%c0_334, %c0_335, %c0_336] : memref<9x30x10xbf16, #tpu.memory_space<vmem>>, vector<1x30x10xbf16>
    %361 = vector.shape_cast %360 : vector<1x30x10xbf16> to vector<30x10xbf16>
    %cst_337 = arith.constant dense<0.000000e+00> : vector<8x10xf32>
    %362 = tpu.matmul %359, %361, %cst_337 {dimension_numbers = #tpu.dot_dimension_numbers<[1], [0], [0], [1], [0, 0, 1, 1], [], []>} : vector<8x30xbf16>, vector<30x10xbf16>, vector<8x10xf32> -> vector<8x10xf32>
    %c1_338 = arith.constant 1 : index
    %c0_339 = arith.constant 0 : index
    %c0_340 = arith.constant 0 : index
    %363 = vector.load %arg5[%c1_338, %c0_339, %c0_340] : memref<9x8x8xbf16, #tpu.memory_space<vmem>>, vector<1x8x8xbf16>
    %364 = vector.shape_cast %363 : vector<1x8x8xbf16> to vector<8x8xbf16>
    %cst_341 = arith.constant dense<0.000000e+00> : vector<8x30xf32>
    %365 = tpu.matmul %364, %355, %cst_341 {dimension_numbers = #tpu.dot_dimension_numbers<[1], [0], [0], [1], [0, 0, 1, 1], [], []>} : vector<8x8xbf16>, vector<8x30xbf16>, vector<8x30xf32> -> vector<8x30xf32>
    %366 = arith.truncf %365 : vector<8x30xf32> to vector<8x30xbf16>
    %c1_342 = arith.constant 1 : index
    %c0_343 = arith.constant 0 : index
    %c0_344 = arith.constant 0 : index
    %367 = vector.load %arg16[%c1_342, %c0_343, %c0_344] : memref<9x30x10xbf16, #tpu.memory_space<vmem>>, vector<1x30x10xbf16>
    %368 = vector.shape_cast %367 : vector<1x30x10xbf16> to vector<30x10xbf16>
    %cst_345 = arith.constant dense<0.000000e+00> : vector<8x10xf32>
    %369 = tpu.matmul %366, %368, %cst_345 {dimension_numbers = #tpu.dot_dimension_numbers<[1], [0], [0], [1], [0, 0, 1, 1], [], []>} : vector<8x30xbf16>, vector<30x10xbf16>, vector<8x10xf32> -> vector<8x10xf32>
    %370 = arith.addf %362, %369 : vector<8x10xf32>
    %c2_346 = arith.constant 2 : index
    %c0_347 = arith.constant 0 : index
    %c0_348 = arith.constant 0 : index
    %371 = vector.load %arg5[%c2_346, %c0_347, %c0_348] : memref<9x8x8xbf16, #tpu.memory_space<vmem>>, vector<1x8x8xbf16>
    %372 = vector.shape_cast %371 : vector<1x8x8xbf16> to vector<8x8xbf16>
    %cst_349 = arith.constant dense<0.000000e+00> : vector<8x30xf32>
    %373 = tpu.matmul %372, %355, %cst_349 {dimension_numbers = #tpu.dot_dimension_numbers<[1], [0], [0], [1], [0, 0, 1, 1], [], []>} : vector<8x8xbf16>, vector<8x30xbf16>, vector<8x30xf32> -> vector<8x30xf32>
    %374 = arith.truncf %373 : vector<8x30xf32> to vector<8x30xbf16>
    %c2_350 = arith.constant 2 : index
    %c0_351 = arith.constant 0 : index
    %c0_352 = arith.constant 0 : index
    %375 = vector.load %arg16[%c2_350, %c0_351, %c0_352] : memref<9x30x10xbf16, #tpu.memory_space<vmem>>, vector<1x30x10xbf16>
    %376 = vector.shape_cast %375 : vector<1x30x10xbf16> to vector<30x10xbf16>
    %cst_353 = arith.constant dense<0.000000e+00> : vector<8x10xf32>
    %377 = tpu.matmul %374, %376, %cst_353 {dimension_numbers = #tpu.dot_dimension_numbers<[1], [0], [0], [1], [0, 0, 1, 1], [], []>} : vector<8x30xbf16>, vector<30x10xbf16>, vector<8x10xf32> -> vector<8x10xf32>
    %378 = arith.addf %370, %377 : vector<8x10xf32>
    %c3_354 = arith.constant 3 : index
    %c0_355 = arith.constant 0 : index
    %c0_356 = arith.constant 0 : index
    %379 = vector.load %arg5[%c3_354, %c0_355, %c0_356] : memref<9x8x8xbf16, #tpu.memory_space<vmem>>, vector<1x8x8xbf16>
    %380 = vector.shape_cast %379 : vector<1x8x8xbf16> to vector<8x8xbf16>
    %cst_357 = arith.constant dense<0.000000e+00> : vector<8x30xf32>
    %381 = tpu.matmul %380, %355, %cst_357 {dimension_numbers = #tpu.dot_dimension_numbers<[1], [0], [0], [1], [0, 0, 1, 1], [], []>} : vector<8x8xbf16>, vector<8x30xbf16>, vector<8x30xf32> -> vector<8x30xf32>
    %382 = arith.truncf %381 : vector<8x30xf32> to vector<8x30xbf16>
    %c3_358 = arith.constant 3 : index
    %c0_359 = arith.constant 0 : index
    %c0_360 = arith.constant 0 : index
    %383 = vector.load %arg16[%c3_358, %c0_359, %c0_360] : memref<9x30x10xbf16, #tpu.memory_space<vmem>>, vector<1x30x10xbf16>
    %384 = vector.shape_cast %383 : vector<1x30x10xbf16> to vector<30x10xbf16>
    %cst_361 = arith.constant dense<0.000000e+00> : vector<8x10xf32>
    %385 = tpu.matmul %382, %384, %cst_361 {dimension_numbers = #tpu.dot_dimension_numbers<[1], [0], [0], [1], [0, 0, 1, 1], [], []>} : vector<8x30xbf16>, vector<30x10xbf16>, vector<8x10xf32> -> vector<8x10xf32>
    %386 = arith.addf %378, %385 : vector<8x10xf32>
    %c4_362 = arith.constant 4 : index
    %c0_363 = arith.constant 0 : index
    %c0_364 = arith.constant 0 : index
    %387 = vector.load %arg5[%c4_362, %c0_363, %c0_364] : memref<9x8x8xbf16, #tpu.memory_space<vmem>>, vector<1x8x8xbf16>
    %388 = vector.shape_cast %387 : vector<1x8x8xbf16> to vector<8x8xbf16>
    %cst_365 = arith.constant dense<0.000000e+00> : vector<8x30xf32>
    %389 = tpu.matmul %388, %355, %cst_365 {dimension_numbers = #tpu.dot_dimension_numbers<[1], [0], [0], [1], [0, 0, 1, 1], [], []>} : vector<8x8xbf16>, vector<8x30xbf16>, vector<8x30xf32> -> vector<8x30xf32>
    %390 = arith.truncf %389 : vector<8x30xf32> to vector<8x30xbf16>
    %c4_366 = arith.constant 4 : index
    %c0_367 = arith.constant 0 : index
    %c0_368 = arith.constant 0 : index
    %391 = vector.load %arg16[%c4_366, %c0_367, %c0_368] : memref<9x30x10xbf16, #tpu.memory_space<vmem>>, vector<1x30x10xbf16>
    %392 = vector.shape_cast %391 : vector<1x30x10xbf16> to vector<30x10xbf16>
    %cst_369 = arith.constant dense<0.000000e+00> : vector<8x10xf32>
    %393 = tpu.matmul %390, %392, %cst_369 {dimension_numbers = #tpu.dot_dimension_numbers<[1], [0], [0], [1], [0, 0, 1, 1], [], []>} : vector<8x30xbf16>, vector<30x10xbf16>, vector<8x10xf32> -> vector<8x10xf32>
    %394 = arith.addf %386, %393 : vector<8x10xf32>
    %c5_370 = arith.constant 5 : index
    %c0_371 = arith.constant 0 : index
    %c0_372 = arith.constant 0 : index
    %395 = vector.load %arg5[%c5_370, %c0_371, %c0_372] : memref<9x8x8xbf16, #tpu.memory_space<vmem>>, vector<1x8x8xbf16>
    %396 = vector.shape_cast %395 : vector<1x8x8xbf16> to vector<8x8xbf16>
    %cst_373 = arith.constant dense<0.000000e+00> : vector<8x30xf32>
    %397 = tpu.matmul %396, %355, %cst_373 {dimension_numbers = #tpu.dot_dimension_numbers<[1], [0], [0], [1], [0, 0, 1, 1], [], []>} : vector<8x8xbf16>, vector<8x30xbf16>, vector<8x30xf32> -> vector<8x30xf32>
    %398 = arith.truncf %397 : vector<8x30xf32> to vector<8x30xbf16>
    %c5_374 = arith.constant 5 : index
    %c0_375 = arith.constant 0 : index
    %c0_376 = arith.constant 0 : index
    %399 = vector.load %arg16[%c5_374, %c0_375, %c0_376] : memref<9x30x10xbf16, #tpu.memory_space<vmem>>, vector<1x30x10xbf16>
    %400 = vector.shape_cast %399 : vector<1x30x10xbf16> to vector<30x10xbf16>
    %cst_377 = arith.constant dense<0.000000e+00> : vector<8x10xf32>
    %401 = tpu.matmul %398, %400, %cst_377 {dimension_numbers = #tpu.dot_dimension_numbers<[1], [0], [0], [1], [0, 0, 1, 1], [], []>} : vector<8x30xbf16>, vector<30x10xbf16>, vector<8x10xf32> -> vector<8x10xf32>
    %402 = arith.addf %394, %401 : vector<8x10xf32>
    %c6_378 = arith.constant 6 : index
    %c0_379 = arith.constant 0 : index
    %c0_380 = arith.constant 0 : index
    %403 = vector.load %arg5[%c6_378, %c0_379, %c0_380] : memref<9x8x8xbf16, #tpu.memory_space<vmem>>, vector<1x8x8xbf16>
    %404 = vector.shape_cast %403 : vector<1x8x8xbf16> to vector<8x8xbf16>
    %cst_381 = arith.constant dense<0.000000e+00> : vector<8x30xf32>
    %405 = tpu.matmul %404, %355, %cst_381 {dimension_numbers = #tpu.dot_dimension_numbers<[1], [0], [0], [1], [0, 0, 1, 1], [], []>} : vector<8x8xbf16>, vector<8x30xbf16>, vector<8x30xf32> -> vector<8x30xf32>
    %406 = arith.truncf %405 : vector<8x30xf32> to vector<8x30xbf16>
    %c6_382 = arith.constant 6 : index
    %c0_383 = arith.constant 0 : index
    %c0_384 = arith.constant 0 : index
    %407 = vector.load %arg16[%c6_382, %c0_383, %c0_384] : memref<9x30x10xbf16, #tpu.memory_space<vmem>>, vector<1x30x10xbf16>
    %408 = vector.shape_cast %407 : vector<1x30x10xbf16> to vector<30x10xbf16>
    %cst_385 = arith.constant dense<0.000000e+00> : vector<8x10xf32>
    %409 = tpu.matmul %406, %408, %cst_385 {dimension_numbers = #tpu.dot_dimension_numbers<[1], [0], [0], [1], [0, 0, 1, 1], [], []>} : vector<8x30xbf16>, vector<30x10xbf16>, vector<8x10xf32> -> vector<8x10xf32>
    %410 = arith.addf %402, %409 : vector<8x10xf32>
    %c7_386 = arith.constant 7 : index
    %c0_387 = arith.constant 0 : index
    %c0_388 = arith.constant 0 : index
    %411 = vector.load %arg5[%c7_386, %c0_387, %c0_388] : memref<9x8x8xbf16, #tpu.memory_space<vmem>>, vector<1x8x8xbf16>
    %412 = vector.shape_cast %411 : vector<1x8x8xbf16> to vector<8x8xbf16>
    %cst_389 = arith.constant dense<0.000000e+00> : vector<8x30xf32>
    %413 = tpu.matmul %412, %355, %cst_389 {dimension_numbers = #tpu.dot_dimension_numbers<[1], [0], [0], [1], [0, 0, 1, 1], [], []>} : vector<8x8xbf16>, vector<8x30xbf16>, vector<8x30xf32> -> vector<8x30xf32>
    %414 = arith.truncf %413 : vector<8x30xf32> to vector<8x30xbf16>
    %c7_390 = arith.constant 7 : index
    %c0_391 = arith.constant 0 : index
    %c0_392 = arith.constant 0 : index
    %415 = vector.load %arg16[%c7_390, %c0_391, %c0_392] : memref<9x30x10xbf16, #tpu.memory_space<vmem>>, vector<1x30x10xbf16>
    %416 = vector.shape_cast %415 : vector<1x30x10xbf16> to vector<30x10xbf16>
    %cst_393 = arith.constant dense<0.000000e+00> : vector<8x10xf32>
    %417 = tpu.matmul %414, %416, %cst_393 {dimension_numbers = #tpu.dot_dimension_numbers<[1], [0], [0], [1], [0, 0, 1, 1], [], []>} : vector<8x30xbf16>, vector<30x10xbf16>, vector<8x10xf32> -> vector<8x10xf32>
    %418 = arith.addf %410, %417 : vector<8x10xf32>
    %c8_394 = arith.constant 8 : index
    %c0_395 = arith.constant 0 : index
    %c0_396 = arith.constant 0 : index
    %419 = vector.load %arg5[%c8_394, %c0_395, %c0_396] : memref<9x8x8xbf16, #tpu.memory_space<vmem>>, vector<1x8x8xbf16>
    %420 = vector.shape_cast %419 : vector<1x8x8xbf16> to vector<8x8xbf16>
    %cst_397 = arith.constant dense<0.000000e+00> : vector<8x30xf32>
    %421 = tpu.matmul %420, %355, %cst_397 {dimension_numbers = #tpu.dot_dimension_numbers<[1], [0], [0], [1], [0, 0, 1, 1], [], []>} : vector<8x8xbf16>, vector<8x30xbf16>, vector<8x30xf32> -> vector<8x30xf32>
    %422 = arith.truncf %421 : vector<8x30xf32> to vector<8x30xbf16>
    %c8_398 = arith.constant 8 : index
    %c0_399 = arith.constant 0 : index
    %c0_400 = arith.constant 0 : index
    %423 = vector.load %arg16[%c8_398, %c0_399, %c0_400] : memref<9x30x10xbf16, #tpu.memory_space<vmem>>, vector<1x30x10xbf16>
    %424 = vector.shape_cast %423 : vector<1x30x10xbf16> to vector<30x10xbf16>
    %cst_401 = arith.constant dense<0.000000e+00> : vector<8x10xf32>
    %425 = tpu.matmul %422, %424, %cst_401 {dimension_numbers = #tpu.dot_dimension_numbers<[1], [0], [0], [1], [0, 0, 1, 1], [], []>} : vector<8x30xbf16>, vector<30x10xbf16>, vector<8x10xf32> -> vector<8x10xf32>
    %426 = arith.addf %418, %425 : vector<8x10xf32>
    %c0_402 = arith.constant 0 : index
    %c0_403 = arith.constant 0 : index
    %427 = vector.load %arg17[%c0_402, %c0_403] : memref<1x10xf32, #tpu.memory_space<vmem>>, vector<1x10xf32>
    %428 = vector.broadcast %427 : vector<1x10xf32> to vector<8x10xf32>
    %429 = arith.addf %426, %428 : vector<8x10xf32>
    %cst_404 = arith.constant 0.000000e+00 : f32
    %430 = vector.broadcast %cst_404 : f32 to vector<8x10xf32>
    %431 = arith.maximumf %429, %430 : vector<8x10xf32>
    %c0_405 = arith.constant 0 : index
    %c0_406 = arith.constant 0 : index
    %432 = vector.load %arg18[%c0_405, %c0_406] : memref<10x1xf32, #tpu.memory_space<vmem>>, vector<10x1xf32>
    %cst_407 = arith.constant dense<0.000000e+00> : vector<8x1xf32>
    %433 = tpu.matmul %431, %432, %cst_407 {dimension_numbers = #tpu.dot_dimension_numbers<[1], [0], [0], [1], [0, 0, 1, 1], [], []>} : vector<8x10xf32>, vector<10x1xf32>, vector<8x1xf32> -> vector<8x1xf32>
    %c0_408 = arith.constant 0 : index
    %c0_409 = arith.constant 0 : index
    %434 = vector.load %arg19[%c0_408, %c0_409] : memref<1x1xf32, #tpu.memory_space<vmem>>, vector<1x1xf32>
    %435 = vector.broadcast %434 : vector<1x1xf32> to vector<8x1xf32>
    %436 = arith.addf %433, %435 : vector<8x1xf32>
    %c0_410 = arith.constant 0 : index
    %c0_411 = arith.constant 0 : index
    %437 = vector.load %arg20[%c0_410, %c0_411] : memref<8x1xf32, #tpu.memory_space<vmem>>, vector<8x1xf32>
    tpu.vector_store %arg20[%c0_410, %c0_411], %436 {strides = array<i32>} : memref<8x1xf32, #tpu.memory_space<vmem>>, vector<8x1xf32>,
    return
  }
}

</mosaic_0001>

<bundles_post_ra>
// kernel: forward.1
= control target key start
LH: loop header
LB: loop body
LE: loop exit
PB: predicated region body
PF: predicated region fallthrough
CT: control target
= control target key end

     0   :  { %vm645_vm0 = vcmask 1040384   ;;  %vm646_vm1 = vcmask 1041408   ;;  %v10765_v2 = vmov 65535   ;;  %vm548_vm2 = vcmask 941056   ;;  %s14326_s1 = inlined_call_operand.vmem [shape: bf16[243,40], index: 1, kind: input, shape index: {}]   ;;  %s14327_s2 = inlined_call_operand.vmem [shape: f32[1,40], index: 2, kind: input, shape index: {}]   ;;  %s14328_s0 = inlined_call_operand.vmem [shape: bf16[512,243], index: 0, kind: input, shape index: {}]   ;;  %s14329_s8 = inlined_call_operand.vmem [shape: bf16[9,40,60], index: 8, kind: input, shape index: {}]   ;;  %s14330_s3 = inlined_call_operand.vmem [shape: bf16[9,128,128], index: 3, kind: input, shape index: {}]   ;;  %s14331_s9 = inlined_call_operand.vmem [shape: f32[1,60], index: 9, kind: input, shape index: {}]   ;;  %s14332_s10 = inlined_call_operand.vmem [shape: bf16[9,60,60], index: 10, kind: input, shape index: {}]   ;;  %s14333_s11 = inlined_call_operand.vmem [shape: f32[1,60], index: 11, kind: input, shape index: {}]   ;;  %s14334_s12 = inlined_call_operand.vmem [shape: bf16[9,60,60], index: 12, kind: input, shape index: {}]   ;;  %s14335_s13 = inlined_call_operand.vmem [shape: f32[1,60], index: 13, kind: input, shape index: {}]   ;;  %s14336_s6 = inlined_call_operand.vmem [shape: bf16[4,32,128], index: 6, kind: input, shape index: {}]   ;;  %s14337_s14 = inlined_call_operand.vmem [shape: bf16[9,60,30], index: 14, kind: input, shape index: {}]   ;;  %s14338_s4 = inlined_call_operand.vmem [shape: bf16[9,32,32], index: 4, kind: input, shape index: {}]   ;;  %s14339_s15 = inlined_call_operand.vmem [shape: f32[1,30], index: 15, kind: input, shape index: {}]   ;;  %s14340_s7 = inlined_call_operand.vmem [shape: bf16[4,8,32], index: 7, kind: input, shape index: {}]   ;;  %s14341_s16 = inlined_call_operand.vmem [shape: bf16[9,30,10], index: 16, kind: input, shape index: {}]   ;;  %s14342_s5 = inlined_call_operand.vmem [shape: bf16[9,8,8], index: 5, kind: input, shape index: {}]   ;;  %s14343_s17 = inlined_call_operand.vmem [shape: f32[1,10], index: 17, kind: input, shape index: {}]   ;;  %s14344_s18 = inlined_call_operand.vmem [shape: f32[10,1], index: 18, kind: input, shape index: {}]   ;;  %s14345_s19 = inlined_call_operand.<no memory space> [shape: f32[1,1], index: 19, kind: input, shape index: {}]   ;;  %s14346_s20 = inlined_call_operand.vmem [shape: f32[8,1], index: 20, kind: output, shape index: {}]  }
   0x1   :  { %14352 = sst [smem:[#allocation3_spill]] %s14326_s1  ;;  %v647_v3 = vsel %vm645_vm0, 4294967295, %v10765_v2  ;;  %vm1404_vm3 = vcmask 1043456   ;;  %vm1379_vm4 = vcmask 326656   ;;  %vm3416_vm5 = vcmask 1045504  }
   0x2   :  { %14353 = sst [smem:[#allocation4_spill]] %s14327_s2  ;;  %v648_v6 = vsel %vm646_vm1, %v647_v3, 0  ;;  %vm3391_vm6 = vcmask 490496   ;;  %vm6690_vm7 = vcmask 261120   ;;  %vm7775_vm8 = vcmask 1046528  }
   0x3   :  { %14354 = sst [smem:[#allocation5_spill]] %s14328_s0  ;;  %vm7711_vm9 = vcmask 64512   ;;  %vm7771_vm10 = vcmask 244736   ;;  %vm8219_vm11 = vcmask 80896   ;;  %vm8246_vm12 = vcmask 7168  }
   0x4   :  { %14355 = sst [smem:[#allocation6_spill]] %s14329_s8 }
   0x5   :  { %14356 = sst [smem:[#allocation7_spill]] %s14330_s3 }
   0x6   :  { %s14357_s23 = sld [smem:[#allocation3_spill]] }
   0x7   :  { %s14358_s24 = sld [smem:[#allocation5_spill]] }
   0x8   :  { %s14359_s8 = sld [smem:[#allocation4_spill]] }
   0x9   :  { %s14360_s2 = sld [smem:[#allocation6_spill]] }
   0xa   :  { %s14361_s0 = sld [smem:[#allocation7_spill]] }
   0xc   :  { %v10362_v0 = vld [vmem:[%s14357_s23 + $0x38] sm:$0xff]  ;;  %v10361_v5 = vld [vmem:[%s14357_s23 + $0x30] sm:$0xff]  ;;  %v10360_v9 = vld [vmem:[%s14357_s23 + $0x28] sm:$0xff] }
   0xd   :  { %v162_v1 = vld [vmem:[%s14357_s23 + $0x78] sm:$0x3]  ;;  %652 = vmatpush.bf16.msra.mxu0 %v10362_v0  ;;  %v10369_v10 = vld [vmem:[%s14357_s23 + $0x70] sm:$0xff]  ;;  %v10359_v11 = vld [vmem:[%s14357_s23 + $0x20] sm:$0xff] }
   0xe   :  { %v516_v4 = vunpack.c.l.b16 %v162_v1  ;;  %v10368_v12 = vld [vmem:[%s14357_s23 + $0x68] sm:$0xff]  ;;  %v10358_v13 = vld [vmem:[%s14357_s23 + $0x18] sm:$0xff]  ;;  %v10367_v14 = vld [vmem:[%s14357_s23 + $0x60] sm:$0xff] }
   0xf   :  { %v10357_v15 = vld [vmem:[%s14357_s23 + $0x10] sm:$0xff]  ;;  %v10366_v16 = vld [vmem:[%s14357_s23 + $0x58] sm:$0xff]  ;;  %v10356_v17 = vld [vmem:[%s14357_s23 + $0x8] sm:$0xff] }
  0x10   :  { %v532_v7 = vpack.c.b16 %v516_v4, %v516_v4  ;;  %v10365_v18 = vld [vmem:[%s14357_s23 + $0x50] sm:$0xff]  ;;  %v10355_v19 = vld [vmem:[%s14357_s23] sm:$0xff]  ;;  %v10292_v21 = vld [vmem:[%s14358_s24 + $0x4] sm:$0xf0] }
  0x11   :  { %653 = vmatpush.bf16.msra.mxu0 %v10361_v5  ;;  %v8254_v20 = vld [vmem:[%s14358_s24] sm:$0xf]  ;;  %v10364_v22 = vld [vmem:[%s14357_s23 + $0x48] sm:$0xff]  ;;  %v10291_v25 = vld [vmem:[%s14358_s24 + $0x4] sm:$0xf] }
  0x12   :  { %v650_v8 = vand.u32 %v648_v6, %v532_v7  ;;  %v8255_v23 = vor.u32 %v10292_v21, %v8254_v20  ;;  %v10363_v24 = vld [vmem:[%s14357_s23 + $0x40] sm:$0xff]  ;;  %v8256_v26 = vld [vmem:[%s14358_s24 + $0x8] sm:$0xf0]  ;;  %v8262_v28 = vld [vmem:[%s14358_s24 + $0x10] sm:$0xf] }
  0x13   :  { %v8259_v27 = vor.u32 %v10291_v25, %v8256_v26  ;;  %v10294_v29 = vld [vmem:[%s14358_s24 + $0x14] sm:$0xf0]  ;;  %v10293_v31 = vld [vmem:[%s14358_s24 + $0x14] sm:$0xf]  ;;  %v8264_v32 = vld [vmem:[%s14358_s24 + $0x18] sm:$0xf0] }
  0x14   :  { %821 = vmatpush.bf16.msra.mxu1 %v650_v8  ;;  %v8263_v30 = vor.u32 %v10294_v29, %v8262_v28  ;;  %v8267_v33 = vor.u32 %v10293_v31, %v8264_v32  ;;  %v8270_v34 = vld [vmem:[%s14358_s24 + $0x20] sm:$0xf]  ;;  %v10296_v35 = vld [vmem:[%s14358_s24 + $0x24] sm:$0xf0]  ;;  %v10295_v37 = vld [vmem:[%s14358_s24 + $0x24] sm:$0xf] }
  0x15   :  { %654 = vmatpush.bf16.msra.mxu0 %v10360_v9  ;;  %v8271_v36 = vor.u32 %v10296_v35, %v8270_v34  ;;  %v8272_v38 = vld [vmem:[%s14358_s24 + $0x28] sm:$0xf0]  ;;  %v8278_v40 = vld [vmem:[%s14358_s24 + $0x30] sm:$0xf]  ;;  %v10298_v41 = vld [vmem:[%s14358_s24 + $0x34] sm:$0xf0] }
  0x16   :  { %v8275_v39 = vor.u32 %v10295_v37, %v8272_v38  ;;  %v8279_v42 = vor.u32 %v10298_v41, %v8278_v40  ;;  %v10297_v43 = vld [vmem:[%s14358_s24 + $0x34] sm:$0xf]  ;;  %v8280_v44 = vld [vmem:[%s14358_s24 + $0x38] sm:$0xf0]  ;;  %v8286_v46 = vld [vmem:[%s14358_s24 + $0x40] sm:$0xf] }
  0x17   :  { %v8283_v45 = vor.u32 %v10297_v43, %v8280_v44  ;;  %v10300_v47 = vld [vmem:[%s14358_s24 + $0x44] sm:$0xf0]  ;;  %v10299_v49 = vld [vmem:[%s14358_s24 + $0x44] sm:$0xf]  ;;  %v8288_v50 = vld [vmem:[%s14358_s24 + $0x48] sm:$0xf0] }
  0x18   :  { %822 = vmatpush.bf16.msra.mxu1 %v10369_v10  ;;  %v8287_v48 = vor.u32 %v10300_v47, %v8286_v46  ;;  %v8291_v51 = vor.u32 %v10299_v49, %v8288_v50  ;;  %v8294_v52 = vld [vmem:[%s14358_s24 + $0x50] sm:$0xf]  ;;  %v10302_v53 = vld [vmem:[%s14358_s24 + $0x54] sm:$0xf0]  ;;  %v10301_v55 = vld [vmem:[%s14358_s24 + $0x54] sm:$0xf] }
  0x19   :  { %655 = vmatpush.bf16.msra.mxu0 %v10359_v11  ;;  %v8295_v54 = vor.u32 %v10302_v53, %v8294_v52  ;;  %v8296_v56 = vld [vmem:[%s14358_s24 + $0x58] sm:$0xf0]  ;;  %v8302_v58 = vld [vmem:[%s14358_s24 + $0x60] sm:$0xf]  ;;  %v10304_v59 = vld [vmem:[%s14358_s24 + $0x64] sm:$0xf0] }
  0x1a   :  { %v8299_v57 = vor.u32 %v10301_v55, %v8296_v56  ;;  %v8303_v60 = vor.u32 %v10304_v59, %v8302_v58  ;;  %v10303_v61 = vld [vmem:[%s14358_s24 + $0x64] sm:$0xf]  ;;  %v8304_v62 = vld [vmem:[%s14358_s24 + $0x68] sm:$0xf0]  ;;  %v8310_v0 = vld [vmem:[%s14358_s24 + $0x70] sm:$0xf] }
  0x1b   :  { %v8307_v63 = vor.u32 %v10303_v61, %v8304_v62  ;;  %v10306_v1 = vld [vmem:[%s14358_s24 + $0x74] sm:$0xf0]  ;;  %v10305_v3 = vld [vmem:[%s14358_s24 + $0x74] sm:$0xf]  ;;  %v8312_v4 = vld [vmem:[%s14358_s24 + $0x78] sm:$0xf0] }
  0x1c   :  { %823 = vmatpush.bf16.msra.mxu1 %v10368_v12  ;;  %v8311_v2 = vor.u32 %v10306_v1, %v8310_v0  ;;  %v8315_v5 = vor.u32 %v10305_v3, %v8312_v4  ;;  %v8318_v6 = vld [vmem:[%s14358_s24 + $0x80] sm:$0xf]  ;;  %v10308_v7 = vld [vmem:[%s14358_s24 + $0x84] sm:$0xf0]  ;;  %v10307_v11 = vld [vmem:[%s14358_s24 + $0x84] sm:$0xf] }
  0x1d   :  { %656 = vmatpush.bf16.msra.mxu0 %v10358_v13  ;;  %v11033_v8 = vld [vmem:[%s14359_s8] ss:$0 sm:$0xff]  ;;  %v8319_v9 = vor.u32 %v10308_v7, %v8318_v6  ;;  %v8320_v12 = vld [vmem:[%s14358_s24 + $0x88] sm:$0xf0]  ;;  %v10310_v20 = vld [vmem:[%s14358_s24 + $0x94] sm:$0xf0] }
  0x1e   :  { %v10309_v25 = vld [vmem:[%s14358_s24 + $0x94] sm:$0xf]  ;;  %v8328_v26 = vld [vmem:[%s14358_s24 + $0x98] sm:$0xf0]  ;;  %v10312_v34 = vld [vmem:[%s14358_s24 + $0xa4] sm:$0xf0] }
  0x1f   :  { %v8331_v28 = vor.u32 %v10309_v25, %v8328_v26  ;;  %v8336_v40 = vld [vmem:[%s14358_s24 + $0xa8] sm:$0xf0]  ;;  %v8342_v47 = vld [vmem:[%s14358_s24 + $0xb0] sm:$0xf]  ;;  %v10313_v53 = vld [vmem:[%s14358_s24 + $0xb4] sm:$0xf] }
  0x20   :  { %824 = vmatpush.bf16.msra.mxu1 %v10367_v14  ;;  %v8323_v14 = vor.u32 %v10307_v11, %v8320_v12  ;;  %v8350_v61 = vld [vmem:[%s14358_s24 + $0xc0] sm:$0xf]  ;;  %v10316_v62 = vld [vmem:[%s14358_s24 + $0xc4] sm:$0xf0]  ;;  %v10315_v3 = vld [vmem:[%s14358_s24 + $0xc4] sm:$0xf] }
  0x21   :  { %657 = vmatpush.bf16.msra.mxu0 %v10357_v15  ;;  %v8351_v1 = vor.u32 %v10316_v62, %v8350_v61  ;;  %v8352_v4 = vld [vmem:[%s14358_s24 + $0xc8] sm:$0xf0]  ;;  %v8358_v12 = vld [vmem:[%s14358_s24 + $0xd0] sm:$0xf]  ;;  %v8382_v61 = vld [vmem:[%s14358_s24 + $0x100] sm:$0xf] }
  0x22   :  { %v8355_v6 = vor.u32 %v10315_v3, %v8352_v4  ;;  %v10324_v62 = vld [vmem:[%s14358_s24 + $0x104] sm:$0xf0]  ;;  %v10323_v4 = vld [vmem:[%s14358_s24 + $0x104] sm:$0xf] }
  0x24   :  { %825 = vmatpush.bf16.msra.mxu1 %v10366_v16 }
  0x25   :  { %658 = vmatpush.bf16.msra.mxu0 %v10356_v17 }
  0x28   :  { %826 = vmatpush.bf16.msra.mxu1 %v10365_v18 }
  0x29   :  { %659 = vmatpush.bf16.msra.mxu0 %v10355_v19  ;;  %v8326_v19 = vld [vmem:[%s14358_s24 + $0x90] sm:$0xf] }
  0x2c   :  { %827 = vmatpush.bf16.msra.mxu1 %v10364_v22  ;;  %660 = vmatmul.bf16.vlgmr.msra.gmra.mxu0 %v8255_v23  ;;  %v8327_v23 = vor.u32 %v10310_v20, %v8326_v19  ;;  %v10317_v19 = vld [vmem:[%s14358_s24 + $0xd4] sm:$0xf]  ;;  %v8360_v20 = vld [vmem:[%s14358_s24 + $0xd8] sm:$0xf0] }
  0x30   :  { %828 = vmatpush.bf16.msra.mxu1 %v10363_v24 }
  0x33   :  { %8568 = vmatmul.msk.bf16.vlgmr.msra.gmra.mxu1 %vm548_vm2, %v8259_v27 }
  0x3c   :  { %665 = vmatmul.bf16.gmra.mxu0 %v8263_v30 }
  0x43   :  { %8569 = vmatmul.msk.bf16.gmra.mxu1 %vm548_vm2, %v8267_v33  ;;  %v8334_v33 = vld [vmem:[%s14358_s24 + $0xa0] sm:$0xf] }
  0x44   :  { %v8335_v37 = vor.u32 %v10312_v34, %v8334_v33 }
  0x4c   :  { %670 = vmatmul.bf16.gmra.mxu0 %v8271_v36 }
  0x53   :  { %8570 = vmatmul.msk.bf16.gmra.mxu1 %vm548_vm2, %v8275_v39  ;;  %v10311_v39 = vld [vmem:[%s14358_s24 + $0xa4] sm:$0xf] }
  0x5c   :  { %675 = vmatmul.bf16.gmra.mxu0 %v8279_v42  ;;  %v8339_v42 = vor.u32 %v10311_v39, %v8336_v40 }
  0x63   :  { %8571 = vmatmul.msk.bf16.gmra.mxu1 %vm548_vm2, %v8283_v45 }
  0x6c   :  { %680 = vmatmul.bf16.gmra.mxu0 %v8287_v48  ;;  %v10314_v48 = vld [vmem:[%s14358_s24 + $0xb4] sm:$0xf0] }
  0x73   :  { %8572 = vmatmul.msk.bf16.gmra.mxu1 %vm548_vm2, %v8291_v51  ;;  %v8343_v51 = vor.u32 %v10314_v48, %v8342_v47 }
  0x7c   :  { %685 = vmatmul.bf16.gmra.mxu0 %v8295_v54  ;;  %v8344_v54 = vld [vmem:[%s14358_s24 + $0xb8] sm:$0xf0] }
  0x7d   :  { %v8347_v56 = vor.u32 %v10313_v53, %v8344_v54  ;;  %v8376_v53 = vld [vmem:[%s14358_s24 + $0xf8] sm:$0xf0] }
  0x83   :  { %8573 = vmatmul.msk.bf16.gmra.mxu1 %vm548_vm2, %v8299_v57 }
  0x8c   :  { %690 = vmatmul.bf16.gmra.mxu0 %v8303_v60 }
  0x93   :  { %8574 = vmatmul.msk.bf16.gmra.mxu1 %vm548_vm2, %v8307_v63 }
  0x9c   :  { %695 = vmatmul.bf16.gmra.mxu0 %v8311_v2 }
  0xa3   :  { %8575 = vmatmul.msk.bf16.gmra.mxu1 %vm548_vm2, %v8315_v5 }
  0xa9   :  { %v661_v10 = vpop.f32.mrf.mxu0 }
  0xaa   :  { %v662_v13 = vadd.f32 %v11033_v8, %v661_v10 }
  0xac   :  { %700 = vmatmul.bf16.gmra.mxu0 %v8319_v9 }
  0xb0   :  { %v830_v15 = vpop.f32.mrf.mxu1 }
  0xb1   :  { %v11042_v16 = vadd.f32 %v830_v15, %v662_v13  ;;  %v663_v17 = vpop.f32.mrf.mxu0  ;;  %v10318_v13 = vld [vmem:[%s14358_s24 + $0xd4] sm:$0xf0] }
  0xb2   :  { %v664_v18 = vadd.f32 %v11033_v8, %v663_v17  ;;  %v8359_v17 = vor.u32 %v10318_v13, %v8358_v12 }
  0xb3   :  { %8576 = vmatmul.msk.bf16.gmra.mxu1 %vm548_vm2, %v8323_v14  ;;  %v990_v12 = vmax.f32 %v11042_v16, 0.0 }
  0xb8   :  { %v832_v21 = vpop.f32.mrf.mxu1 }
  0xb9   :  { %v11052_v22 = vadd.f32 %v832_v21, %v664_v18  ;;  %v666_v24 = vpop.f32.mrf.mxu0 }
  0xba   :  { %v667_v27 = vadd.f32 %v11033_v8, %v666_v24 }
  0xbb   :  { %v991_v16 = vmax.f32 %v11052_v22, 0.0 }
  0xbc   :  { %705 = vmatmul.bf16.gmra.mxu0 %v8327_v23  ;;  %v8363_v23 = vor.u32 %v10317_v19, %v8360_v20  ;;  %v8390_v19 = vld [vmem:[%s14358_s24 + $0x110] sm:$0xf]  ;;  %v10326_v20 = vld [vmem:[%s14358_s24 + $0x114] sm:$0xf0] }
  0xc0   :  { %v835_v29 = vpop.f32.mrf.mxu1 }
  0xc1   :  { %v11061_v30 = vadd.f32 %v835_v29, %v667_v27  ;;  %v668_v31 = vpop.f32.mrf.mxu0  ;;  %v10320_v29 = vld [vmem:[%s14358_s24 + $0xe4] sm:$0xf0] }
  0xc2   :  { %v669_v32 = vadd.f32 %v11033_v8, %v668_v31 }
  0xc3   :  { %8577 = vmatmul.msk.bf16.gmra.mxu1 %vm548_vm2, %v8331_v28  ;;  %v8366_v28 = vld [vmem:[%s14358_s24 + $0xe0] sm:$0xf]  ;;  %v992_v22 = vmax.f32 %v11061_v30, 0.0 }
  0xc4   :  { %v8367_v33 = vor.u32 %v10320_v29, %v8366_v28  ;;  %v10325_v28 = vld [vmem:[%s14358_s24 + $0x114] sm:$0xf]  ;;  %v8392_v29 = vld [vmem:[%s14358_s24 + $0x118] sm:$0xf0] }
  0xc8   :  { %v837_v35 = vpop.f32.mrf.mxu1 }
  0xc9   :  { %v11071_v36 = vadd.f32 %v837_v35, %v669_v32  ;;  %v671_v38 = vpop.f32.mrf.mxu0  ;;  %v10319_v35 = vld [vmem:[%s14358_s24 + $0xe4] sm:$0xf] }
  0xca   :  { %v672_v41 = vadd.f32 %v11033_v8, %v671_v38 }
  0xcb   :  { %v993_v30 = vmax.f32 %v11071_v36, 0.0 }
  0xcc   :  { %710 = vmatmul.bf16.gmra.mxu0 %v8335_v37  ;;  %v8368_v37 = vld [vmem:[%s14358_s24 + $0xe8] sm:$0xf0] }
  0xcd   :  { %v8371_v39 = vor.u32 %v10319_v35, %v8368_v37 }
  0xd0   :  { %v840_v43 = vpop.f32.mrf.mxu1 }
  0xd1   :  { %v11080_v44 = vadd.f32 %v840_v43, %v672_v41  ;;  %v673_v45 = vpop.f32.mrf.mxu0 }
  0xd2   :  { %v674_v46 = vadd.f32 %v11033_v8, %v673_v45  ;;  %v8374_v45 = vld [vmem:[%s14358_s24 + $0xf0] sm:$0xf] }
  0xd3   :  { %8578 = vmatmul.msk.bf16.gmra.mxu1 %vm548_vm2, %v8339_v42  ;;  %v994_v36 = vmax.f32 %v11080_v44, 0.0 }
  0xd8   :  { %v842_v49 = vpop.f32.mrf.mxu1 }
  0xd9   :  { %v11090_v50 = vadd.f32 %v842_v49, %v674_v46  ;;  %v676_v52 = vpop.f32.mrf.mxu0  ;;  %v10322_v46 = vld [vmem:[%s14358_s24 + $0xf4] sm:$0xf0] }
  0xda   :  { %v677_v55 = vadd.f32 %v11033_v8, %v676_v52  ;;  %v8375_v49 = vor.u32 %v10322_v46, %v8374_v45  ;;  %v10321_v52 = vld [vmem:[%s14358_s24 + $0xf4] sm:$0xf]  ;;  %v10328_v45 = vld [vmem:[%s14358_s24 + $0x124] sm:$0xf0] }
  0xdb   :  { %v995_v44 = vmax.f32 %v11090_v50, 0.0 }
  0xdc   :  { %715 = vmatmul.bf16.gmra.mxu0 %v8343_v51 }
  0xe0   :  { %v845_v57 = vpop.f32.mrf.mxu1 }
  0xe1   :  { %v11099_v58 = vadd.f32 %v845_v57, %v677_v55  ;;  %v678_v59 = vpop.f32.mrf.mxu0  ;;  %v8379_v55 = vor.u32 %v10321_v52, %v8376_v53  ;;  %v10327_v53 = vld [vmem:[%s14358_s24 + $0x124] sm:$0xf] }
  0xe2   :  { %v679_v60 = vadd.f32 %v11033_v8, %v678_v59 }
  0xe3   :  { %8579 = vmatmul.msk.bf16.gmra.mxu1 %vm548_vm2, %v8347_v56  ;;  %v996_v50 = vmax.f32 %v11099_v58, 0.0 }
  0xe8   :  { %v847_v63 = vpop.f32.mrf.mxu1 }
  0xe9   :  { %v11109_v0 = vadd.f32 %v847_v63, %v679_v60  ;;  %v681_v2 = vpop.f32.mrf.mxu0 }
  0xea   :  { %v682_v5 = vadd.f32 %v11033_v8, %v681_v2  ;;  %v8383_v2 = vor.u32 %v10324_v62, %v8382_v61 }
  0xeb   :  { %v997_v58 = vmax.f32 %v11109_v0, 0.0 }
  0xec   :  { %720 = vmatmul.bf16.gmra.mxu0 %v8351_v1 }
  0xf0   :  { %v850_v7 = vpop.f32.mrf.mxu1 }
  0xf1   :  { %v11118_v9 = vadd.f32 %v850_v7, %v682_v5  ;;  %v683_v10 = vpop.f32.mrf.mxu0  ;;  %v8384_v5 = vld [vmem:[%s14358_s24 + $0x108] sm:$0xf0] }
  0xf2   :  { %v684_v11 = vadd.f32 %v11033_v8, %v683_v10  ;;  %v8387_v7 = vor.u32 %v10323_v4, %v8384_v5  ;;  %v8406_v4 = vld [vmem:[%s14358_s24 + $0x130] sm:$0xf]  ;;  %v10330_v5 = vld [vmem:[%s14358_s24 + $0x134] sm:$0xf0] }
  0xf3   :  { %8580 = vmatmul.msk.bf16.gmra.mxu1 %vm548_vm2, %v8355_v6  ;;  %v998_v0 = vmax.f32 %v11118_v9, 0.0 }
  0xf8   :  { %v852_v14 = vpop.f32.mrf.mxu1 }
  0xf9   :  { %v11128_v15 = vadd.f32 %v852_v14, %v684_v11  ;;  %v686_v18 = vpop.f32.mrf.mxu0 }
  0xfa   :  { %v687_v21 = vadd.f32 %v11033_v8, %v686_v18 }
  0xfb   :  { %v999_v9 = vmax.f32 %v11128_v15, 0.0 }
  0xfc   :  { %725 = vmatmul.bf16.gmra.mxu0 %v8359_v17 }
 0x100   :  { %v855_v24 = vpop.f32.mrf.mxu1 }
 0x101   :  { %v11137_v25 = vadd.f32 %v855_v24, %v687_v21  ;;  %v688_v26 = vpop.f32.mrf.mxu0  ;;  %v8391_v24 = vor.u32 %v10326_v20, %v8390_v19 }
 0x102   :  { %v689_v27 = vadd.f32 %v11033_v8, %v688_v26 }
 0x103   :  { %8581 = vmatmul.msk.bf16.gmra.mxu1 %vm548_vm2, %v8363_v23  ;;  %v1000_v15 = vmax.f32 %v11137_v25, 0.0 }
 0x108   :  { %v857_v31 = vpop.f32.mrf.mxu1 }
 0x109   :  { %v11147_v32 = vadd.f32 %v857_v31, %v689_v27  ;;  %v691_v34 = vpop.f32.mrf.mxu0 }
 0x10a   :  { %v692_v38 = vadd.f32 %v11033_v8, %v691_v34  ;;  %v8395_v34 = vor.u32 %v10325_v28, %v8392_v29  ;;  %v8414_v28 = vld [vmem:[%s14358_s24 + $0x140] sm:$0xf]  ;;  %v10332_v29 = vld [vmem:[%s14358_s24 + $0x144] sm:$0xf0] }
 0x10b   :  { %v1001_v25 = vmax.f32 %v11147_v32, 0.0 }
 0x10c   :  { %730 = vmatmul.bf16.gmra.mxu0 %v8367_v33 }
 0x110   :  { %v860_v40 = vpop.f32.mrf.mxu1 }
 0x111   :  { %v11156_v41 = vadd.f32 %v860_v40, %v692_v38  ;;  %v693_v42 = vpop.f32.mrf.mxu0 }
 0x112   :  { %v694_v43 = vadd.f32 %v11033_v8, %v693_v42 }
 0x113   :  { %8582 = vmatmul.msk.bf16.gmra.mxu1 %vm548_vm2, %v8371_v39  ;;  %v1002_v32 = vmax.f32 %v11156_v41, 0.0 }
 0x118   :  { %v862_v47 = vpop.f32.mrf.mxu1 }
 0x119   :  { %v11166_v48 = vadd.f32 %v862_v47, %v694_v43  ;;  %v696_v51 = vpop.f32.mrf.mxu0  ;;  %v8398_v43 = vld [vmem:[%s14358_s24 + $0x120] sm:$0xf] }
 0x11a   :  { %v697_v54 = vadd.f32 %v11033_v8, %v696_v51 }
 0x11b   :  { %v1003_v41 = vmax.f32 %v11166_v48, 0.0 }
 0x11c   :  { %735 = vmatmul.bf16.gmra.mxu0 %v8375_v49  ;;  %v8399_v49 = vor.u32 %v10328_v45, %v8398_v43 }
 0x120   :  { %v865_v56 = vpop.f32.mrf.mxu1 }
 0x121   :  { %v11175_v57 = vadd.f32 %v865_v56, %v697_v54  ;;  %v698_v59 = vpop.f32.mrf.mxu0  ;;  %v8400_v54 = vld [vmem:[%s14358_s24 + $0x128] sm:$0xf0] }
 0x122   :  { %v699_v60 = vadd.f32 %v11033_v8, %v698_v59  ;;  %v8403_v59 = vor.u32 %v10327_v53, %v8400_v54  ;;  %v8422_v53 = vld [vmem:[%s14358_s24 + $0x150] sm:$0xf]  ;;  %v10334_v54 = vld [vmem:[%s14358_s24 + $0x154] sm:$0xf0] }
 0x123   :  { %8583 = vmatmul.msk.bf16.gmra.mxu1 %vm548_vm2, %v8379_v55  ;;  %v1004_v48 = vmax.f32 %v11175_v57, 0.0 }
 0x128   :  { %v867_v63 = vpop.f32.mrf.mxu1 }
 0x129   :  { %v11185_v1 = vadd.f32 %v867_v63, %v699_v60  ;;  %v701_v3 = vpop.f32.mrf.mxu0 }
 0x12a   :  { %v702_v6 = vadd.f32 %v11033_v8, %v701_v3 }
 0x12b   :  { %v1005_v57 = vmax.f32 %v11185_v1, 0.0 }
 0x12c   :  { %740 = vmatmul.bf16.gmra.mxu0 %v8383_v2 }
 0x130   :  { %v870_v10 = vpop.f32.mrf.mxu1 }
 0x131   :  { %v871_v11 = vadd.f32 %v870_v10, %v702_v6  ;;  %v703_v14 = vpop.f32.mrf.mxu0  ;;  %v8407_v10 = vor.u32 %v10330_v5, %v8406_v4 }
 0x132   :  { %v704_v18 = vadd.f32 %v11033_v8, %v703_v14  ;;  %v8408_v14 = vld [vmem:[%s14358_s24 + $0x138] sm:$0xf0] }
 0x133   :  { %v1006_v13 = vmax.f32 %v871_v11, 0.0  ;;  %8584 = vmatmul.msk.bf16.gmra.mxu1 %vm548_vm2, %v8387_v7 }
 0x135   :  { %v11196_v17 = vmax.f32 %v990_v12, %v1006_v13  ;;  %v10329_v13 = vld [vmem:[%s14358_s24 + $0x134] sm:$0xf] }
 0x136   :  { %v8411_v20 = vor.u32 %v10329_v13, %v8408_v14  ;;  %v8430_v13 = vld [vmem:[%s14358_s24 + $0x160] sm:$0xf]  ;;  %v10336_v14 = vld [vmem:[%s14358_s24 + $0x164] sm:$0xf0] }
 0x138   :  { %v872_v21 = vpop.f32.mrf.mxu1 }
 0x139   :  { %v873_v23 = vadd.f32 %v872_v21, %v704_v18  ;;  %v706_v27 = vpop.f32.mrf.mxu0 }
 0x13a   :  { %v707_v33 = vadd.f32 %v11033_v8, %v706_v27 }
 0x13b   :  { %v1007_v26 = vmax.f32 %v873_v23, 0.0 }
 0x13c   :  { %745 = vmatmul.bf16.gmra.mxu0 %v8391_v24 }
 0x13d   :  { %v11212_v31 = vmax.f32 %v991_v16, %v1007_v26 }
 0x140   :  { %v875_v35 = vpop.f32.mrf.mxu1 }
 0x141   :  { %v876_v37 = vadd.f32 %v875_v35, %v707_v33  ;;  %v708_v39 = vpop.f32.mrf.mxu0  ;;  %v8415_v35 = vor.u32 %v10332_v29, %v8414_v28 }
 0x142   :  { %v709_v42 = vadd.f32 %v11033_v8, %v708_v39  ;;  %v8416_v39 = vld [vmem:[%s14358_s24 + $0x148] sm:$0xf0] }
 0x143   :  { %v1008_v38 = vmax.f32 %v876_v37, 0.0  ;;  %8585 = vmatmul.msk.bf16.gmra.mxu1 %vm548_vm2, %v8395_v34 }
 0x145   :  { %v11217_v40 = vmax.f32 %v992_v22, %v1008_v38  ;;  %v10331_v38 = vld [vmem:[%s14358_s24 + $0x144] sm:$0xf] }
 0x146   :  { %v8419_v45 = vor.u32 %v10331_v38, %v8416_v39  ;;  %v8438_v38 = vld [vmem:[%s14358_s24 + $0x170] sm:$0xf]  ;;  %v10338_v39 = vld [vmem:[%s14358_s24 + $0x174] sm:$0xf0] }
 0x148   :  { %v877_v46 = vpop.f32.mrf.mxu1 }
 0x149   :  { %v878_v47 = vadd.f32 %v877_v46, %v709_v42  ;;  %v711_v52 = vpop.f32.mrf.mxu0 }
 0x14a   :  { %v712_v56 = vadd.f32 %v11033_v8, %v711_v52 }
 0x14b   :  { %v1009_v51 = vmax.f32 %v878_v47, 0.0 }
 0x14c   :  { %750 = vmatmul.bf16.gmra.mxu0 %v8399_v49 }
 0x14d   :  { %v11233_v55 = vmax.f32 %v993_v30, %v1009_v51 }
 0x150   :  { %v880_v60 = vpop.f32.mrf.mxu1 }
 0x151   :  { %v881_v61 = vadd.f32 %v880_v60, %v712_v56  ;;  %v713_v63 = vpop.f32.mrf.mxu0  ;;  %v8423_v60 = vor.u32 %v10334_v54, %v8422_v53 }
 0x152   :  { %v714_v3 = vadd.f32 %v11033_v8, %v713_v63  ;;  %v8424_v63 = vld [vmem:[%s14358_s24 + $0x158] sm:$0xf0] }
 0x153   :  { %v1010_v62 = vmax.f32 %v881_v61, 0.0  ;;  %8586 = vmatmul.msk.bf16.gmra.mxu1 %vm548_vm2, %v8403_v59 }
 0x155   :  { %v11238_v2 = vmax.f32 %v994_v36, %v1010_v62  ;;  %v10333_v62 = vld [vmem:[%s14358_s24 + $0x154] sm:$0xf] }
 0x156   :  { %v8427_v5 = vor.u32 %v10333_v62, %v8424_v63  ;;  %v8446_v62 = vld [vmem:[%s14358_s24 + $0x180] sm:$0xf]  ;;  %v10340_v63 = vld [vmem:[%s14358_s24 + $0x184] sm:$0xf0] }
 0x158   :  { %v882_v6 = vpop.f32.mrf.mxu1 }
 0x159   :  { %v883_v7 = vadd.f32 %v882_v6, %v714_v3  ;;  %v716_v12 = vpop.f32.mrf.mxu0 }
 0x15a   :  { %v717_v19 = vadd.f32 %v11033_v8, %v716_v12 }
 0x15b   :  { %v1011_v11 = vmax.f32 %v883_v7, 0.0 }
 0x15c   :  { %755 = vmatmul.bf16.gmra.mxu0 %v8407_v10 }
 0x15d   :  { %v11254_v18 = vmax.f32 %v995_v44, %v1011_v11 }
 0x160   :  { %v885_v21 = vpop.f32.mrf.mxu1 }
 0x161   :  { %v886_v23 = vadd.f32 %v885_v21, %v717_v19  ;;  %v718_v16 = vpop.f32.mrf.mxu0  ;;  %v8431_v21 = vor.u32 %v10336_v14, %v8430_v13 }
 0x162   :  { %v719_v27 = vadd.f32 %v11033_v8, %v718_v16  ;;  %v8432_v16 = vld [vmem:[%s14358_s24 + $0x168] sm:$0xf0] }
 0x163   :  { %v1012_v24 = vmax.f32 %v886_v23, 0.0  ;;  %8587 = vmatmul.msk.bf16.gmra.mxu1 %vm548_vm2, %v8411_v20 }
 0x165   :  { %v11259_v26 = vmax.f32 %v996_v50, %v1012_v24  ;;  %v10335_v24 = vld [vmem:[%s14358_s24 + $0x164] sm:$0xf] }
 0x166   :  { %v8435_v29 = vor.u32 %v10335_v24, %v8432_v16 }
 0x168   :  { %v887_v33 = vpop.f32.mrf.mxu1 }
 0x169   :  { %v888_v34 = vadd.f32 %v887_v33, %v719_v27  ;;  %v721_v22 = vpop.f32.mrf.mxu0 }
 0x16a   :  { %v722_v43 = vadd.f32 %v11033_v8, %v721_v22 }
 0x16b   :  { %v1013_v37 = vmax.f32 %v888_v34, 0.0 }
 0x16c   :  { %760 = vmatmul.bf16.gmra.mxu0 %v8415_v35 }
 0x16d   :  { %v11275_v42 = vmax.f32 %v997_v58, %v1013_v37 }
 0x170   :  { %v890_v46 = vpop.f32.mrf.mxu1 }
 0x171   :  { %v891_v47 = vadd.f32 %v890_v46, %v722_v43  ;;  %v723_v30 = vpop.f32.mrf.mxu0  ;;  %v8439_v46 = vor.u32 %v10338_v39, %v8438_v38  ;;  %v8462_v39 = vld [vmem:[%s14358_s24 + $0x1a0] sm:$0xf] }
 0x172   :  { %v724_v52 = vadd.f32 %v11033_v8, %v723_v30  ;;  %v8440_v30 = vld [vmem:[%s14358_s24 + $0x178] sm:$0xf0] }
 0x173   :  { %v1014_v49 = vmax.f32 %v891_v47, 0.0  ;;  %8588 = vmatmul.msk.bf16.gmra.mxu1 %vm548_vm2, %v8419_v45 }
 0x175   :  { %v11280_v51 = vmax.f32 %v998_v0, %v1014_v49  ;;  %v10337_v49 = vld [vmem:[%s14358_s24 + $0x174] sm:$0xf] }
 0x176   :  { %v8443_v54 = vor.u32 %v10337_v49, %v8440_v30  ;;  %v8464_v49 = vld [vmem:[%s14358_s24 + $0x1a8] sm:$0xf0] }
 0x178   :  { %v892_v56 = vpop.f32.mrf.mxu1 }
 0x179   :  { %v893_v59 = vadd.f32 %v892_v56, %v724_v52  ;;  %v726_v36 = vpop.f32.mrf.mxu0 }
 0x17a   :  { %v727_v4 = vadd.f32 %v11033_v8, %v726_v36 }
 0x17b   :  { %v1015_v61 = vmax.f32 %v893_v59, 0.0 }
 0x17c   :  { %765 = vmatmul.bf16.gmra.mxu0 %v8423_v60 }
 0x17d   :  { %v11296_v3 = vmax.f32 %v999_v9, %v1015_v61 }
 0x180   :  { %v895_v6 = vpop.f32.mrf.mxu1 }
 0x181   :  { %v896_v7 = vadd.f32 %v895_v6, %v727_v4  ;;  %v728_v44 = vpop.f32.mrf.mxu0  ;;  %v8447_v6 = vor.u32 %v10340_v63, %v8446_v62 }
 0x182   :  { %v729_v12 = vadd.f32 %v11033_v8, %v728_v44  ;;  %v8448_v44 = vld [vmem:[%s14358_s24 + $0x188] sm:$0xf0] }
 0x183   :  { %v1016_v10 = vmax.f32 %v896_v7, 0.0  ;;  %8589 = vmatmul.msk.bf16.gmra.mxu1 %vm548_vm2, %v8427_v5 }
 0x185   :  { %v11301_v11 = vmax.f32 %v1000_v15, %v1016_v10  ;;  %v10339_v10 = vld [vmem:[%s14358_s24 + $0x184] sm:$0xf] }
 0x186   :  { %v8451_v14 = vor.u32 %v10339_v10, %v8448_v44 }
 0x188   :  { %v897_v19 = vpop.f32.mrf.mxu1 }
 0x189   :  { %v898_v20 = vadd.f32 %v897_v19, %v729_v12  ;;  %v731_v50 = vpop.f32.mrf.mxu0 }
 0x18a   :  { %v732_v28 = vadd.f32 %v11033_v8, %v731_v50 }
 0x18b   :  { %v1017_v23 = vmax.f32 %v898_v20, 0.0 }
 0x18c   :  { %770 = vmatmul.bf16.gmra.mxu0 %v8431_v21 }
 0x18d   :  { %v11317_v27 = vmax.f32 %v1001_v25, %v1017_v23  ;;  %v8454_v25 = vld [vmem:[%s14358_s24 + $0x190] sm:$0xf]  ;;  %v10342_v23 = vld [vmem:[%s14358_s24 + $0x194] sm:$0xf0] }
 0x18e   :  { %v8455_v16 = vor.u32 %v10342_v23, %v8454_v25 }
 0x190   :  { %v900_v33 = vpop.f32.mrf.mxu1 }
 0x191   :  { %v901_v34 = vadd.f32 %v900_v33, %v732_v28  ;;  %v733_v58 = vpop.f32.mrf.mxu0  ;;  %v8456_v33 = vld [vmem:[%s14358_s24 + $0x198] sm:$0xf0] }
 0x192   :  { %v734_v22 = vadd.f32 %v11033_v8, %v733_v58 }
 0x193   :  { %v1018_v35 = vmax.f32 %v901_v34, 0.0  ;;  %8590 = vmatmul.msk.bf16.gmra.mxu1 %vm548_vm2, %v8435_v29  ;;  %v10341_v29 = vld [vmem:[%s14358_s24 + $0x194] sm:$0xf] }
 0x195   :  { %v11322_v37 = vmax.f32 %v1002_v32, %v1018_v35  ;;  %v8459_v32 = vor.u32 %v10341_v29, %v8456_v33 }
 0x198   :  { %v902_v43 = vpop.f32.mrf.mxu1 }
 0x199   :  { %v903_v45 = vadd.f32 %v902_v43, %v734_v22  ;;  %v736_v0 = vpop.f32.mrf.mxu0  ;;  %v10344_v43 = vld [vmem:[%s14358_s24 + $0x1a4] sm:$0xf0] }
 0x19a   :  { %v737_v53 = vadd.f32 %v11033_v8, %v736_v0  ;;  %v10343_v0 = vld [vmem:[%s14358_s24 + $0x1a4] sm:$0xf] }
 0x19b   :  { %v1019_v47 = vmax.f32 %v903_v45, 0.0 }
 0x19c   :  { %775 = vmatmul.bf16.gmra.mxu0 %v8439_v46 }
 0x19d   :  { %v11338_v52 = vmax.f32 %v1003_v41, %v1019_v47  ;;  %v8463_v41 = vor.u32 %v10344_v43, %v8462_v39 }
 0x1a0   :  { %v905_v56 = vpop.f32.mrf.mxu1 }
 0x1a1   :  { %v906_v59 = vadd.f32 %v905_v56, %v737_v53  ;;  %v738_v9 = vpop.f32.mrf.mxu0  ;;  %v8467_v53 = vor.u32 %v10343_v0, %v8464_v49 }
 0x1a2   :  { %v739_v36 = vadd.f32 %v11033_v8, %v738_v9  ;;  %v10346_v9 = vld [vmem:[%s14358_s24 + $0x1b4] sm:$0xf0] }
 0x1a3   :  { %v1020_v60 = vmax.f32 %v906_v59, 0.0  ;;  %8591 = vmatmul.msk.bf16.gmra.mxu1 %vm548_vm2, %v8443_v54 }
 0x1a5   :  { %v11343_v61 = vmax.f32 %v1004_v48, %v1020_v60  ;;  %v8470_v60 = vld [vmem:[%s14358_s24 + $0x1b0] sm:$0xf] }
 0x1a6   :  { %v8471_v63 = vor.u32 %v10346_v9, %v8470_v60 }
 0x1a8   :  { %v907_v4 = vpop.f32.mrf.mxu1 }
 0x1a9   :  { %v908_v5 = vadd.f32 %v907_v4, %v739_v36  ;;  %v741_v15 = vpop.f32.mrf.mxu0 }
 0x1aa   :  { %v742_v13 = vadd.f32 %v11033_v8, %v741_v15 }
 0x1ab   :  { %v1021_v7 = vmax.f32 %v908_v5, 0.0  ;;  %v10345_v5 = vld [vmem:[%s14358_s24 + $0x1b4] sm:$0xf] }
 0x1ac   :  { %780 = vmatmul.bf16.gmra.mxu0 %v8447_v6  ;;  %v8472_v6 = vld [vmem:[%s14358_s24 + $0x1b8] sm:$0xf0] }
 0x1ad   :  { %v11359_v12 = vmax.f32 %v1005_v57, %v1021_v7  ;;  %v8475_v7 = vor.u32 %v10345_v5, %v8472_v6 }
 0x1b0   :  { %v910_v19 = vpop.f32.mrf.mxu1 }
 0x1b1   :  { %v11362_v20 = vadd.f32 %v910_v19, %v742_v13  ;;  %v743_v1 = vpop.f32.mrf.mxu0  ;;  %v10348_v19 = vld [vmem:[%s14358_s24 + $0x1c4] sm:$0xf0] }
 0x1b2   :  { %v744_v21 = vadd.f32 %v11033_v8, %v743_v1 }
 0x1b3   :  { %8592 = vmatmul.msk.bf16.gmra.mxu1 %vm548_vm2, %v8451_v14  ;;  %v8478_v14 = vld [vmem:[%s14358_s24 + $0x1c0] sm:$0xf] }
 0x1b4   :  { %v8479_v25 = vor.u32 %v10348_v19, %v8478_v14 }
 0x1b8   :  { %v912_v50 = vpop.f32.mrf.mxu1 }
 0x1b9   :  { %v11372_v24 = vadd.f32 %v912_v50, %v744_v21  ;;  %v746_v28 = vpop.f32.mrf.mxu0  ;;  %v10347_v50 = vld [vmem:[%s14358_s24 + $0x1c4] sm:$0xf] }
 0x1ba   :  { %v747_v34 = vadd.f32 %v11033_v8, %v746_v28 }
 0x1bc   :  { %785 = vmatmul.bf16.gmra.mxu0 %v8455_v16  ;;  %v8480_v16 = vld [vmem:[%s14358_s24 + $0x1c8] sm:$0xf0] }
 0x1bd   :  { %v8483_v29 = vor.u32 %v10347_v50, %v8480_v16 }
 0x1c0   :  { %v915_v35 = vpop.f32.mrf.mxu1 }
 0x1c1   :  { %v11381_v58 = vadd.f32 %v915_v35, %v747_v34  ;;  %v748_v22 = vpop.f32.mrf.mxu0  ;;  %v8486_v35 = vld [vmem:[%s14358_s24 + $0x1d0] sm:$0xf] }
 0x1c2   :  { %v749_v38 = vadd.f32 %v11033_v8, %v748_v22  ;;  %v10350_v22 = vld [vmem:[%s14358_s24 + $0x1d4] sm:$0xf0] }
 0x1c3   :  { %8593 = vmatmul.msk.bf16.gmra.mxu1 %vm548_vm2, %v8459_v32  ;;  %v8487_v39 = vor.u32 %v10350_v22, %v8486_v35 }
 0x1c8   :  { %v917_v45 = vpop.f32.mrf.mxu1 }
 0x1c9   :  { %v11391_v46 = vadd.f32 %v917_v45, %v749_v38  ;;  %v751_v47 = vpop.f32.mrf.mxu0  ;;  %v10349_v45 = vld [vmem:[%s14358_s24 + $0x1d4] sm:$0xf] }
 0x1ca   :  { %v752_v30 = vadd.f32 %v11033_v8, %v751_v47 }
 0x1cc   :  { %790 = vmatmul.bf16.gmra.mxu0 %v8463_v41  ;;  %v8488_v41 = vld [vmem:[%s14358_s24 + $0x1d8] sm:$0xf0] }
 0x1cd   :  { %v8491_v0 = vor.u32 %v10349_v45, %v8488_v41  ;;  %v1022_v45 = vmax.f32 %v11362_v20, 0.0 }
 0x1d0   :  { %v920_v54 = vpop.f32.mrf.mxu1 }
 0x1d1   :  { %v11400_v56 = vadd.f32 %v920_v54, %v752_v30  ;;  %v753_v59 = vpop.f32.mrf.mxu0  ;;  %v8494_v54 = vld [vmem:[%s14358_s24 + $0x1e0] sm:$0xf] }
 0x1d2   :  { %v754_v48 = vadd.f32 %v11033_v8, %v753_v59  ;;  %v10352_v59 = vld [vmem:[%s14358_s24 + $0x1e4] sm:$0xf0] }
 0x1d3   :  { %8594 = vmatmul.msk.bf16.gmra.mxu1 %vm548_vm2, %v8467_v53  ;;  %v8495_v60 = vor.u32 %v10352_v59, %v8494_v54 }
 0x1d8   :  { %v922_v36 = vpop.f32.mrf.mxu1 }
 0x1d9   :  { %v11410_v62 = vadd.f32 %v922_v36, %v754_v48  ;;  %v756_v4 = vpop.f32.mrf.mxu0  ;;  %v10351_v36 = vld [vmem:[%s14358_s24 + $0x1e4] sm:$0xf] }
 0x1da   :  { %v757_v57 = vadd.f32 %v11033_v8, %v756_v4 }
 0x1dc   :  { %795 = vmatmul.bf16.gmra.mxu0 %v8471_v63  ;;  %v8496_v63 = vld [vmem:[%s14358_s24 + $0x1e8] sm:$0xf0] }
 0x1dd   :  { %v8499_v5 = vor.u32 %v10351_v36, %v8496_v63 }
 0x1e0   :  { %v925_v15 = vpop.f32.mrf.mxu1 }
 0x1e1   :  { %v11419_v10 = vadd.f32 %v925_v15, %v757_v57  ;;  %v758_v44 = vpop.f32.mrf.mxu0  ;;  %v8502_v15 = vld [vmem:[%s14358_s24 + $0x1f0] sm:$0xf] }
 0x1e2   :  { %v759_v13 = vadd.f32 %v11033_v8, %v758_v44  ;;  %v10354_v44 = vld [vmem:[%s14358_s24 + $0x1f4] sm:$0xf0] }
 0x1e3   :  { %8595 = vmatmul.msk.bf16.gmra.mxu1 %vm548_vm2, %v8475_v7  ;;  %v8503_v14 = vor.u32 %v10354_v44, %v8502_v15 }
 0x1e8   :  { %v927_v1 = vpop.f32.mrf.mxu1 }
 0x1e9   :  { %v11429_v21 = vadd.f32 %v927_v1, %v759_v13  ;;  %v761_v23 = vpop.f32.mrf.mxu0  ;;  %v10353_v1 = vld [vmem:[%s14358_s24 + $0x1f4] sm:$0xf] }
 0x1ea   :  { %v762_v28 = vadd.f32 %v11033_v8, %v761_v23 }
 0x1ec   :  { %800 = vmatmul.bf16.gmra.mxu0 %v8479_v25  ;;  %v8504_v25 = vld [vmem:[%s14358_s24 + $0x1f8] sm:$0xf0] }
 0x1ed   :  { %v8507_v50 = vor.u32 %v10353_v1, %v8504_v25 }
 0x1f0   :  { %v930_v33 = vpop.f32.mrf.mxu1 }
 0x1f1   :  { %v11438_v34 = vadd.f32 %v930_v33, %v762_v28  ;;  %v11441_v32 = vpop.f32.mrf.mxu0 }
 0x1f3   :  { %8596 = vmatmul.msk.bf16.gmra.mxu1 %vm548_vm2, %v8483_v29 }
 0x1f8   :  { %v11449_v38 = vpop.f32.mrf.mxu1 }
 0x1f9   :  { %v766_v43 = vpop.f32.mrf.mxu0 }
 0x1fa   :  { %v767_v47 = vadd.f32 %v11033_v8, %v766_v43 }
 0x1fc   :  { %805 = vmatmul.bf16.gmra.mxu0 %v8487_v39 }
 0x200   :  { %v935_v49 = vpop.f32.mrf.mxu1 }
 0x201   :  { %v11458_v30 = vadd.f32 %v935_v49, %v767_v47  ;;  %v11461_v53 = vpop.f32.mrf.mxu0 }
 0x203   :  { %8597 = vmatmul.msk.bf16.gmra.mxu1 %vm548_vm2, %v8491_v0 }
 0x208   :  { %v11469_v48 = vpop.f32.mrf.mxu1 }
 0x209   :  { %v771_v9 = vpop.f32.mrf.mxu0 }
 0x20a   :  { %v772_v4 = vadd.f32 %v11033_v8, %v771_v9  ;;  %v1023_v9 = vmax.f32 %v11372_v24, 0.0 }
 0x20c   :  { %810 = vmatmul.bf16.gmra.mxu0 %v8495_v60 }
 0x210   :  { %v940_v6 = vpop.f32.mrf.mxu1 }
 0x211   :  { %v11478_v57 = vadd.f32 %v940_v6, %v772_v4  ;;  %v11481_v7 = vpop.f32.mrf.mxu0 }
 0x213   :  { %8598 = vmatmul.msk.bf16.gmra.mxu1 %vm548_vm2, %v8499_v5 }
 0x218   :  { %v11489_v13 = vpop.f32.mrf.mxu1 }
 0x219   :  { %v776_v19 = vpop.f32.mrf.mxu0 }
 0x21a   :  { %v777_v23 = vadd.f32 %v11033_v8, %v776_v19 }
 0x21c   :  { %815 = vmatmul.bf16.gmra.mxu0 %v8503_v14  ;;  %v1024_v14 = vmax.f32 %v11381_v58, 0.0 }
 0x220   :  { %v945_v16 = vpop.f32.mrf.mxu1 }
 0x221   :  { %v11498_v28 = vadd.f32 %v945_v16, %v777_v23  ;;  %v11501_v29 = vpop.f32.mrf.mxu0  ;;  %v1025_v16 = vmax.f32 %v11391_v46, 0.0 }
 0x223   :  { %8599 = vmatmul.msk.bf16.gmra.mxu1 %vm548_vm2, %v8507_v50 }
 0x228   :  { %v11503_v33 = vpop.f32.mrf.mxu1 }
 0x229   :  { %v781_v35 = vpop.f32.mrf.mxu0 }
 0x22a   :  { %v782_v22 = vadd.f32 %v11033_v8, %v781_v35 }
 0x230   :  { %v950_v39 = vpop.f32.mrf.mxu1 }
 0x231   :  { %v951_v43 = vadd.f32 %v950_v39, %v782_v22  ;;  %v783_v47 = vpop.f32.mrf.mxu0 }
 0x232   :  { %v784_v54 = vadd.f32 %v11033_v8, %v783_v47  ;;  %v1026_v47 = vmax.f32 %v11400_v56, 0.0 }
 0x233   :  { %v1038_v41 = vmax.f32 %v951_v43, 0.0 }
 0x235   :  { %v1070_v0 = vmax.f32 %v1022_v45, %v1038_v41 }
 0x237   :  { %v1086_v49 = vmax.f32 %v11196_v17, %v1070_v0 }
 0x238   :  { %v952_v59 = vpop.f32.mrf.mxu1 }
 0x239   :  { %v953_v60 = vadd.f32 %v952_v59, %v784_v54  ;;  %v786_v63 = vpop.f32.mrf.mxu0 }
 0x23a   :  { %v787_v5 = vadd.f32 %v11033_v8, %v786_v63 }
 0x23b   :  { %v1039_v36 = vmax.f32 %v953_v60, 0.0 }
 0x23d   :  { %v1071_v4 = vmax.f32 %v1023_v9, %v1039_v36  ;;  %v1027_v9 = vmax.f32 %v11410_v62, 0.0 }
 0x23f   :  { %v1087_v6 = vmax.f32 %v11212_v31, %v1071_v4 }
 0x240   :  { %v955_v15 = vpop.f32.mrf.mxu1 }
 0x241   :  { %v11512_v20 = vpack.c.bf16 %v1087_v6, %v1086_v49  ;;  %v956_v44 = vadd.f32 %v955_v15, %v787_v5  ;;  %v788_v19 = vpop.f32.mrf.mxu0 }
 0x242   :  { %v789_v24 = vadd.f32 %v11033_v8, %v788_v19 }
 0x243   :  { %v1040_v17 = vmax.f32 %v956_v44, 0.0  ;;  %v1028_v44 = vmax.f32 %v11419_v10, 0.0 }
 0x245   :  { %v1072_v1 = vmax.f32 %v1024_v14, %v1040_v17 }
 0x247   :  { %v1088_v25 = vmax.f32 %v11217_v40, %v1072_v1 }
 0x248   :  { %v957_v23 = vpop.f32.mrf.mxu1 }
 0x249   :  { %v958_v50 = vadd.f32 %v957_v23, %v789_v24  ;;  %v791_v22 = vpop.f32.mrf.mxu0  ;;  %v1029_v24 = vmax.f32 %v11429_v21, 0.0 }
 0x24a   :  { %v792_v39 = vadd.f32 %v11033_v8, %v791_v22 }
 0x24b   :  { %v1041_v35 = vmax.f32 %v958_v50, 0.0 }
 0x24d   :  { %v1073_v31 = vmax.f32 %v1025_v16, %v1041_v35 }
 0x24f   :  { %v1089_v43 = vmax.f32 %v11233_v55, %v1073_v31 }
 0x250   :  { %v960_v45 = vpop.f32.mrf.mxu1 }
 0x251   :  { %v11520_v58 = vpack.c.bf16 %v1089_v43, %v1088_v25  ;;  %v961_v41 = vadd.f32 %v960_v45, %v792_v39  ;;  %v793_v0 = vpop.f32.mrf.mxu0  ;;  %v1030_v39 = vmax.f32 %v11438_v34, 0.0  ;;  %v764_v45 = vadd.f32 %v11033_v8, %v11441_v32 }
 0x252   :  { %v794_v46 = vadd.f32 %v11033_v8, %v793_v0 }
 0x253   :  { %v1042_v40 = vmax.f32 %v961_v41, 0.0  ;;  %v933_v21 = vadd.f32 %v11449_v38, %v764_v45  ;;  %v1032_v38 = vmax.f32 %v11458_v30, 0.0 }
 0x255   :  { %v1074_v49 = vmax.f32 %v1026_v47, %v1042_v40 }
 0x257   :  { %v1090_v54 = vmax.f32 %v11238_v2, %v1074_v49  ;;  %v1031_v49 = vmax.f32 %v933_v21, 0.0 }
 0x258   :  { %v962_v59 = vpop.f32.mrf.mxu1 }
 0x259   :  { %v963_v60 = vadd.f32 %v962_v59, %v794_v46  ;;  %v796_v63 = vpop.f32.mrf.mxu0 }
 0x25a   :  { %v797_v4 = vadd.f32 %v11033_v8, %v796_v63 }
 0x25b   :  { %v1043_v36 = vmax.f32 %v963_v60, 0.0 }
 0x25d   :  { %v1075_v55 = vmax.f32 %v1027_v9, %v1043_v36 }
 0x25f   :  { %v1091_v5 = vmax.f32 %v11254_v18, %v1075_v55  ;;  %v10620_v55 = vld [vmem:[%s14359_s8] ss:$0 sm:$0xff] }
 0x260   :  { %v965_v6 = vpop.f32.mrf.mxu1 }
 0x261   :  { %v11528_v56 = vpack.c.bf16 %v1091_v5, %v1090_v54  ;;  %v966_v15 = vadd.f32 %v965_v6, %v797_v4  ;;  %v798_v14 = vpop.f32.mrf.mxu0  ;;  %v769_v4 = vadd.f32 %v10620_v55, %v11461_v53  ;;  %v1034_v53 = vmax.f32 %v11478_v57, 0.0 }
 0x262   :  { %v799_v62 = vadd.f32 %v11033_v8, %v798_v14 }
 0x263   :  { %v1044_v2 = vmax.f32 %v966_v15, 0.0  ;;  %v938_v6 = vadd.f32 %v11469_v48, %v769_v4  ;;  %v10371_v4 = vld [vmem:[%s14361_s0 + $0x8] sm:$0xff] }
 0x265   :  { %v1076_v17 = vmax.f32 %v1028_v44, %v1044_v2  ;;  %v1033_v2 = vmax.f32 %v938_v6, 0.0  ;;  %v10372_v6 = vld [vmem:[%s14361_s0 + $0x10] sm:$0xff] }
 0x267   :  { %v1092_v19 = vmax.f32 %v11259_v26, %v1076_v17 }
 0x268   :  { %v967_v1 = vpop.f32.mrf.mxu1 }
 0x269   :  { %v968_v25 = vadd.f32 %v967_v1, %v799_v62  ;;  %v801_v50 = vpop.f32.mrf.mxu0 }
 0x26a   :  { %v802_v16 = vadd.f32 %v11033_v8, %v801_v50 }
 0x26b   :  { %v1045_v23 = vmax.f32 %v968_v25, 0.0 }
 0x26d   :  { %v1077_v18 = vmax.f32 %v1029_v24, %v1045_v23 }
 0x26f   :  { %v1093_v35 = vmax.f32 %v11275_v42, %v1077_v18 }
 0x270   :  { %v970_v22 = vpop.f32.mrf.mxu1 }
 0x271   :  { %v11536_v10 = vpack.c.bf16 %v1093_v35, %v1092_v19  ;;  %v971_v31 = vadd.f32 %v970_v22, %v802_v16  ;;  %v803_v43 = vpop.f32.mrf.mxu0 }
 0x272   :  { %v804_v40 = vadd.f32 %v11033_v8, %v803_v43 }
 0x273   :  { %v1046_v26 = vmax.f32 %v971_v31, 0.0 }
 0x275   :  { %v1078_v41 = vmax.f32 %v1030_v39, %v1046_v26 }
 0x277   :  { %v1094_v47 = vmax.f32 %v11280_v51, %v1078_v41 }
 0x278   :  { %v972_v0 = vpop.f32.mrf.mxu1 }
 0x279   :  { %v973_v42 = vadd.f32 %v972_v0, %v804_v40  ;;  %v806_v46 = vpop.f32.mrf.mxu0 }
 0x27a   :  { %v807_v34 = vadd.f32 %v11033_v8, %v806_v46 }
 0x27b   :  { %v1047_v54 = vmax.f32 %v973_v42, 0.0 }
 0x27d   :  { %v1079_v59 = vmax.f32 %v1031_v49, %v1047_v54 }
 0x27f   :  { %v1095_v60 = vmax.f32 %v11296_v3, %v1079_v59 }
 0x280   :  { %v975_v9 = vpop.f32.mrf.mxu1 }
 0x281   :  { %v11546_v36 = vpack.c.bf16 %v1095_v60, %v1094_v47  ;;  %v976_v32 = vadd.f32 %v975_v9, %v807_v34  ;;  %v808_v51 = vpop.f32.mrf.mxu0 }
 0x282   :  { %v809_v3 = vadd.f32 %v10620_v55, %v808_v51  ;;  %v10389_v51 = vld [vmem:[%s14360_s2 + $0x1c] sm:$0xff] }
 0x283   :  { %v1048_v63 = vmax.f32 %v976_v32, 0.0 }
 0x285   :  { %v1080_v5 = vmax.f32 %v1032_v38, %v1048_v63  ;;  %v10380_v38 = vld [vmem:[%s14361_s0 + $0x40] sm:$0xff] }
 0x286   :  { %v10410_v63 = vld [vmem:[%s14361_s0 + $0x100] sm:$0xff] }
 0x287   :  { %v1096_v8 = vmax.f32 %v11301_v11, %v1080_v5  ;;  %v774_v11 = vadd.f32 %v10620_v55, %v11481_v7  ;;  %v1036_v7 = vmax.f32 %v11498_v28, 0.0  ;;  %v10381_v5 = vld [vmem:[%s14361_s0 + $0x48] sm:$0xff] }
 0x288   :  { %v977_v15 = vpop.f32.mrf.mxu1 }
 0x289   :  { %v978_v44 = vadd.f32 %v977_v15, %v809_v3  ;;  %v811_v17 = vpop.f32.mrf.mxu0  ;;  %v943_v18 = vadd.f32 %v11489_v13, %v774_v11  ;;  %v10373_v3 = vld [vmem:[%s14361_s0 + $0x18] sm:$0xff]  ;;  %v10379_v11 = vld [vmem:[%s14360_s2 + $0x8] sm:$0xff] }
 0x28a   :  { %v812_v19 = vadd.f32 %v10620_v55, %v811_v17  ;;  %v10383_v15 = vld [vmem:[%s14361_s0 + $0x58] sm:$0xff]  ;;  %v10385_v17 = vld [vmem:[%s14361_s0 + $0x68] sm:$0xff] }
 0x28b   :  { %v1049_v14 = vmax.f32 %v978_v44, 0.0  ;;  %v1035_v39 = vmax.f32 %v943_v18, 0.0  ;;  %v10374_v44 = vld [vmem:[%s14361_s0 + $0x20] sm:$0xff] }
 0x28d   :  { %v1081_v30 = vmax.f32 %v1033_v2, %v1049_v14  ;;  %v10384_v2 = vld [vmem:[%s14361_s0 + $0x60] sm:$0xff]  ;;  %v10375_v14 = vld [vmem:[%s14361_s0 + $0x28] sm:$0xff] }
 0x28f   :  { %v1097_v62 = vmax.f32 %v11317_v27, %v1081_v30  ;;  %v10376_v30 = vld [vmem:[%s14361_s0 + $0x30] sm:$0xff] }
 0x290   :  { %v980_v1 = vpop.f32.mrf.mxu1 }
 0x291   :  { %v11556_v25 = vpack.c.bf16 %v1097_v62, %v1096_v8  ;;  %v981_v24 = vadd.f32 %v980_v1, %v812_v19  ;;  %v813_v48 = vpop.f32.mrf.mxu0  ;;  %v10382_v8 = vld [vmem:[%s14361_s0 + $0x50] sm:$0xff] }
 0x292   :  { %v814_v35 = vadd.f32 %v10620_v55, %v813_v48  ;;  %v10386_v19 = vld [vmem:[%s14361_s0 + $0x70] sm:$0xff] }
 0x293   :  { %v1050_v23 = vmax.f32 %v981_v24, 0.0  ;;  %v1235_v62 = vld [vmem:[%s14360_s2 + $0x10] sm:$0xf] }
 0x294   :  { %v1466_v1 = vunpack.c.l.b16 %v1235_v62 }
 0x295   :  { %v1082_v50 = vmax.f32 %v1034_v53, %v1050_v23  ;;  %v8907_v23 = vld [vmem:[%s14360_s2 + $0x60] sm:$0xf] }
 0x296   :  { %v1469_v24 = vpack.c.b16 %v1466_v1, %v1466_v1  ;;  %v2155_v48 = vunpack.c.l.b16 %v8907_v23  ;;  %v10390_v23 = vld [vmem:[%s14361_s0 + $0x80] sm:$0xff] }
 0x297   :  { %v1098_v16 = vmax.f32 %v11322_v37, %v1082_v50  ;;  %v779_v37 = vadd.f32 %v10620_v55, %v11501_v29 }
 0x298   :  { %v982_v22 = vpop.f32.mrf.mxu1  ;;  %v1497_v53 = vsel %vm1404_vm3, %v1469_v24, 0  ;;  %v2158_v50 = vpack.c.b16 %v2155_v48, %v2155_v48  ;;  %v10419_v48 = vld [vmem:[%s14360_s2 + $0x58] sm:$0xff] }
 0x299   :  { %v983_v31 = vadd.f32 %v982_v22, %v814_v35  ;;  %v816_v26 = vpop.f32.mrf.mxu0  ;;  %v948_v42 = vadd.f32 %v11503_v33, %v779_v37  ;;  %v10370_v33 = vld [vmem:[%s14361_s0] sm:$0xff]  ;;  %v10377_v35 = vld [vmem:[%s14361_s0 + $0x38] sm:$0xff] }
 0x29a   :  { %v817_v45 = vadd.f32 %v10620_v55, %v816_v26  ;;  %v2186_v18 = vsel %vm1404_vm3, %v2158_v50, 0  ;;  %v10387_v22 = vld [vmem:[%s14361_s0 + $0x78] sm:$0xff] }
 0x29b   :  { %v1051_v27 = vmax.f32 %v983_v31, 0.0  ;;  %v1037_v34 = vmax.f32 %v948_v42, 0.0  ;;  %2193 = vmatpush.bf16.msrb.mxu1 %v2186_v18 }
 0x29d   :  { %v1083_v43 = vmax.f32 %v1035_v39, %v1051_v27 }
 0x29f   :  { %v1099_v41 = vmax.f32 %v11338_v52, %v1083_v43  ;;  %2194 = vmatpush.bf16.msrb.mxu1 %v10419_v48 }
 0x2a0   :  { %v985_v57 = vpop.f32.mrf.mxu1 }
 0x2a1   :  { %v11563_v21 = vpack.c.bf16 %v1099_v41, %v1098_v16  ;;  %v986_v47 = vadd.f32 %v985_v57, %v817_v45  ;;  %v818_v13 = vpop.f32.mrf.mxu0  ;;  %v10378_v16 = vld [vmem:[%s14360_s2] sm:$0xff] }
 0x2a2   :  { %v819_v54 = vadd.f32 %v10620_v55, %v818_v13  ;;  %v10388_v55 = vld [vmem:[%s14360_s2 + $0x14] sm:$0xff] }
 0x2a3   :  { %v1052_v40 = vmax.f32 %v986_v47, 0.0 }
 0x2a5   :  { %v1084_v0 = vmax.f32 %v1036_v7, %v1052_v40 }
 0x2a7   :  { %v1100_v49 = vmax.f32 %v11343_v61, %v1084_v0  ;;  %v8684_v61 = vld [vmem:[%s14360_s2 + $0x24] sm:$0xf] }
 0x2a8   :  { %v987_v46 = vpop.f32.mrf.mxu1 }
 0x2a9   :  { %v988_v59 = vadd.f32 %v987_v46, %v819_v54 }
 0x2ab   :  { %v1053_v52 = vmax.f32 %v988_v59, 0.0 }
 0x2ad   :  { %v1085_v60 = vmax.f32 %v1037_v34, %v1053_v52 }
 0x2af   :  { %v1101_v9 = vmax.f32 %v11359_v12, %v1085_v60  ;;  %v1373_v12 = vunpack.c.l.b16 %v8684_v61 }
 0x2b1   :  { %v11570_v32 = vpack.c.bf16 %v1101_v9, %v1100_v49  ;;  %v1376_v28 = vpack.c.b16 %v1373_v12, %v1373_v12 }
 0x2b3   :  { %1174 = vmatpush.bf16.msra.mxu2 %v11570_v32  ;;  %1301 = vmatpush.bf16.msra.mxu3 %v11570_v32  ;;  %v1406_v29 = vsel %vm1404_vm3, %v1376_v28, 0 }
 0x2b4   :  { %2083 = vmatpush.bf16.msrb.mxu0 %v11570_v32 }
 0x2b7   :  { %1175 = vmatpush.bf16.msra.mxu2 %v11563_v21  ;;  %1302 = vmatpush.bf16.msra.mxu3 %v11563_v21 }
 0x2b8   :  { %2084 = vmatpush.bf16.msrb.mxu0 %v11563_v21 }
 0x2bb   :  { %1176 = vmatpush.bf16.msra.mxu2 %v11556_v25  ;;  %1303 = vmatpush.bf16.msra.mxu3 %v11556_v25 }
 0x2bc   :  { %2085 = vmatpush.bf16.msrb.mxu0 %v11556_v25 }
 0x2bf   :  { %1177 = vmatpush.bf16.msra.mxu2 %v11546_v36  ;;  %1304 = vmatpush.bf16.msra.mxu3 %v11546_v36 }
 0x2c0   :  { %2086 = vmatpush.bf16.msrb.mxu0 %v11546_v36 }
 0x2c3   :  { %1178 = vmatpush.bf16.msra.mxu2 %v11536_v10  ;;  %1305 = vmatpush.bf16.msra.mxu3 %v11536_v10 }
 0x2c4   :  { %2087 = vmatpush.bf16.msrb.mxu0 %v11536_v10 }
 0x2c7   :  { %1179 = vmatpush.bf16.msra.mxu2 %v11528_v56  ;;  %1306 = vmatpush.bf16.msra.mxu3 %v11528_v56 }
 0x2c8   :  { %2088 = vmatpush.bf16.msrb.mxu0 %v11528_v56 }
 0x2cb   :  { %1180 = vmatpush.bf16.msra.mxu2 %v11520_v58  ;;  %1307 = vmatpush.bf16.msra.mxu3 %v11520_v58 }
 0x2cc   :  { %2089 = vmatpush.bf16.msrb.mxu0 %v11520_v58 }
 0x2cf   :  { %1181 = vmatpush.bf16.msra.mxu2 %v11512_v20  ;;  %1308 = vmatpush.bf16.msra.mxu3 %v11512_v20 }
 0x2d0   :  { %2090 = vmatpush.bf16.msrb.mxu0 %v11512_v20 }
 0x2d2   :  { %1182 = vmatmul.bf16.vlgmr.msra.gmra.mxu2 %v10370_v33  ;;  %1309 = vmatmul.bf16.vlgmr.msra.gmra.mxu3 %v10380_v38 }
 0x2d3   :  { %1413 = vmatpush.bf16.msrb.mxu2 %v1406_v29  ;;  %2091 = vmatmul.bf16.vlgmr.msrb.gmra.mxu0 %v10410_v63 }
 0x2d4   :  { %2553 = vmatpush.bf16.msra.mxu0 %v11570_v32  ;;  %1504 = vmatpush.bf16.msrb.mxu3 %v1497_v53 }
 0x2d7   :  { %1414 = vmatpush.bf16.msrb.mxu2 %v10389_v51 }
 0x2d8   :  { %2554 = vmatpush.bf16.msra.mxu0 %v11563_v21  ;;  %1505 = vmatpush.bf16.msrb.mxu3 %v10379_v11 }
 0x2db   :  { %1415 = vmatpush.bf16.msrb.mxu2 %v10388_v55 }
 0x2dc   :  { %2555 = vmatpush.bf16.msra.mxu0 %v11556_v25  ;;  %1506 = vmatpush.bf16.msrb.mxu3 %v10378_v16 }
 0x2df   :  { %1613 = vmatpush.bf16.msra.mxu2 %v11570_v32 }
 0x2e0   :  { %2556 = vmatpush.bf16.msra.mxu0 %v11546_v36 }
 0x2e2   :  { %1187 = vmatmul.bf16.gmra.mxu2 %v10371_v4  ;;  %1314 = vmatmul.bf16.gmra.mxu3 %v10381_v5 }
 0x2e3   :  { %1614 = vmatpush.bf16.msra.mxu2 %v11563_v21 }
 0x2e4   :  { %2557 = vmatpush.bf16.msra.mxu0 %v11536_v10 }
 0x2e7   :  { %1615 = vmatpush.bf16.msra.mxu2 %v11556_v25 }
 0x2e8   :  { %2558 = vmatpush.bf16.msra.mxu0 %v11528_v56 }
 0x2eb   :  { %1616 = vmatpush.bf16.msra.mxu2 %v11546_v36 }
 0x2ec   :  { %2559 = vmatpush.bf16.msra.mxu0 %v11520_v58 }
 0x2ef   :  { %1617 = vmatpush.bf16.msra.mxu2 %v11536_v10 }
 0x2f0   :  { %2560 = vmatpush.bf16.msra.mxu0 %v11512_v20 }
 0x2f2   :  { %1192 = vmatmul.bf16.gmra.mxu2 %v10372_v6  ;;  %1319 = vmatmul.bf16.gmra.mxu3 %v10382_v8 }
 0x2f3   :  { %1618 = vmatpush.bf16.msra.mxu2 %v11528_v56 }
 0x2f4   :  { %3023 = vmatpush.bf16.msrb.mxu0 %v11570_v32 }
 0x2f7   :  { %1619 = vmatpush.bf16.msra.mxu2 %v11520_v58 }
 0x2f8   :  { %3024 = vmatpush.bf16.msrb.mxu0 %v11563_v21 }
 0x2fb   :  { %1620 = vmatpush.bf16.msra.mxu2 %v11512_v20 }
 0x2fc   :  { %3025 = vmatpush.bf16.msrb.mxu0 %v11556_v25 }
 0x300   :  { %3026 = vmatpush.bf16.msrb.mxu0 %v11546_v36 }
 0x302   :  { %1197 = vmatmul.bf16.gmra.mxu2 %v10373_v3  ;;  %1324 = vmatmul.bf16.gmra.mxu3 %v10383_v15 }
 0x304   :  { %3027 = vmatpush.bf16.msrb.mxu0 %v11536_v10 }
 0x308   :  { %3028 = vmatpush.bf16.msrb.mxu0 %v11528_v56 }
 0x30c   :  { %3029 = vmatpush.bf16.msrb.mxu0 %v11520_v58 }
 0x310   :  { %3030 = vmatpush.bf16.msrb.mxu0 %v11512_v20 }
 0x312   :  { %1202 = vmatmul.bf16.gmra.mxu2 %v10374_v44  ;;  %1329 = vmatmul.bf16.gmra.mxu3 %v10384_v2 }
 0x322   :  { %1207 = vmatmul.bf16.gmra.mxu2 %v10375_v14  ;;  %1334 = vmatmul.bf16.gmra.mxu3 %v10385_v17 }
 0x332   :  { %1212 = vmatmul.bf16.gmra.mxu2 %v10376_v30  ;;  %1339 = vmatmul.bf16.gmra.mxu3 %v10386_v19 }
 0x342   :  { %1217 = vmatmul.bf16.gmra.mxu2 %v10377_v35  ;;  %1344 = vmatmul.bf16.gmra.mxu3 %v10387_v22  ;;  %v10391_v22 = vld [vmem:[%s14361_s0 + $0x88] sm:$0xff] }
 0x355   :  { %v1183_v31 = vpop.f32.mrf.mxu2  ;;  %v1310_v39 = vpop.f32.mrf.mxu3 }
 0x35d   :  { %v1185_v27 = vpop.f32.mrf.mxu2  ;;  %v1312_v26 = vpop.f32.mrf.mxu3 }
 0x35e   :  { %v1223_v43 = vpack.c.bf16 %v1185_v27, %v1183_v31  ;;  %v1350_v45 = vpack.c.bf16 %v1312_v26, %v1310_v39 }
 0x360   :  { %8693 = vmatmul.msk.bf16.vlgmr.msrb.gmra.mxu2 %vm1379_vm4, %v1350_v45  ;;  %8709 = vmatmul.msk.bf16.vlgmr.msrb.gmra.mxu3 %vm1379_vm4, %v1223_v43  ;;  %v10392_v45 = vld [vmem:[%s14361_s0 + $0x90] sm:$0xff] }
 0x361   :  { %1848 = vmatpush.bf16.msrb.mxu2 %v11570_v32 }
 0x365   :  { %1849 = vmatpush.bf16.msrb.mxu2 %v11563_v21  ;;  %v1188_v41 = vpop.f32.mrf.mxu2  ;;  %v1315_v57 = vpop.f32.mrf.mxu3 }
 0x369   :  { %1850 = vmatpush.bf16.msrb.mxu2 %v11556_v25 }
 0x36d   :  { %1851 = vmatpush.bf16.msrb.mxu2 %v11546_v36  ;;  %v1190_v47 = vpop.f32.mrf.mxu2  ;;  %v1317_v7 = vpop.f32.mrf.mxu3 }
 0x36e   :  { %v1224_v40 = vpack.c.bf16 %v1190_v47, %v1188_v41  ;;  %v1351_v13 = vpack.c.bf16 %v1317_v7, %v1315_v57 }
 0x370   :  { %8694 = vmatmul.msk.bf16.gmra.mxu2 %vm1379_vm4, %v1351_v13  ;;  %8710 = vmatmul.msk.bf16.gmra.mxu3 %vm1379_vm4, %v1224_v40  ;;  %v10393_v13 = vld [vmem:[%s14361_s0 + $0x98] sm:$0xff] }
 0x371   :  { %1852 = vmatpush.bf16.msrb.mxu2 %v11536_v10 }
 0x375   :  { %1853 = vmatpush.bf16.msrb.mxu2 %v11528_v56  ;;  %v1193_v37 = vpop.f32.mrf.mxu2  ;;  %v1320_v0 = vpop.f32.mrf.mxu3 }
 0x379   :  { %1854 = vmatpush.bf16.msrb.mxu2 %v11520_v58 }
 0x37d   :  { %1855 = vmatpush.bf16.msrb.mxu2 %v11512_v20  ;;  %v1195_v42 = vpop.f32.mrf.mxu2  ;;  %v1322_v54 = vpop.f32.mrf.mxu3 }
 0x37e   :  { %v1225_v49 = vpack.c.bf16 %v1195_v42, %v1193_v37  ;;  %v1352_v46 = vpack.c.bf16 %v1322_v54, %v1320_v0 }
 0x380   :  { %8711 = vmatmul.msk.bf16.gmra.mxu3 %vm1379_vm4, %v1225_v49  ;;  %8695 = vmatmul.msk.bf16.gmra.mxu2 %vm1379_vm4, %v1352_v46  ;;  %v10394_v46 = vld [vmem:[%s14361_s0 + $0xa0] sm:$0xff] }
 0x385   :  { %v1198_v59 = vpop.f32.mrf.mxu2  ;;  %v1325_v34 = vpop.f32.mrf.mxu3 }
 0x38d   :  { %v1200_v52 = vpop.f32.mrf.mxu2  ;;  %v1327_v9 = vpop.f32.mrf.mxu3 }
 0x38e   :  { %v1226_v60 = vpack.c.bf16 %v1200_v52, %v1198_v59  ;;  %v1353_v61 = vpack.c.bf16 %v1327_v9, %v1325_v34 }
 0x390   :  { %8712 = vmatmul.msk.bf16.gmra.mxu3 %vm1379_vm4, %v1226_v60  ;;  %8696 = vmatmul.msk.bf16.gmra.mxu2 %vm1379_vm4, %v1353_v61  ;;  %v10395_v61 = vld [vmem:[%s14361_s0 + $0xa8] sm:$0xff] }
 0x395   :  { %v1203_v12 = vpop.f32.mrf.mxu2  ;;  %v1330_v28 = vpop.f32.mrf.mxu3 }
 0x39d   :  { %v1205_v29 = vpop.f32.mrf.mxu2  ;;  %v1332_v38 = vpop.f32.mrf.mxu3 }
 0x39e   :  { %v1227_v33 = vpack.c.bf16 %v1205_v29, %v1203_v12  ;;  %v1354_v63 = vpack.c.bf16 %v1332_v38, %v1330_v28  ;;  %v8769_v12 = vld [vmem:[%s14360_s2 + $0x38] sm:$0xf] }
 0x39f   :  { %v1685_v28 = vunpack.c.l.b16 %v8769_v12  ;;  %v10405_v12 = vld [vmem:[%s14361_s0 + $0xe8] sm:$0xff] }
 0x3a0   :  { %8713 = vmatmul.msk.bf16.gmra.mxu3 %vm1379_vm4, %v1227_v33  ;;  %8697 = vmatmul.msk.bf16.gmra.mxu2 %vm1379_vm4, %v1354_v63 }
 0x3a1   :  { %v1688_v29 = vpack.c.b16 %v1685_v28, %v1685_v28  ;;  %v10417_v28 = vld [vmem:[%s14361_s0 + $0x138] sm:$0xff] }
 0x3a3   :  { %v1716_v33 = vsel %vm1404_vm3, %v1688_v29, 0  ;;  %v8838_v29 = vld [vmem:[%s14360_s2 + $0x4c] sm:$0xf] }
 0x3a4   :  { %1723 = vmatpush.bf16.msra.mxu3 %v1716_v33  ;;  %v1920_v33 = vunpack.c.l.b16 %v8838_v29 }
 0x3a5   :  { %v1208_v51 = vpop.f32.mrf.mxu2  ;;  %v1335_v55 = vpop.f32.mrf.mxu3 }
 0x3ad   :  { %v1210_v4 = vpop.f32.mrf.mxu2  ;;  %v1337_v6 = vpop.f32.mrf.mxu3 }
 0x3ae   :  { %v1228_v5 = vpack.c.bf16 %v1210_v4, %v1208_v51  ;;  %v1355_v8 = vpack.c.bf16 %v1337_v6, %v1335_v55 }
 0x3b0   :  { %8714 = vmatmul.msk.bf16.gmra.mxu3 %vm1379_vm4, %v1228_v5  ;;  %8698 = vmatmul.msk.bf16.gmra.mxu2 %vm1379_vm4, %v1355_v8  ;;  %v10396_v5 = vld [vmem:[%s14361_s0 + $0xb0] sm:$0xff] }
 0x3b5   :  { %v1213_v3 = vpop.f32.mrf.mxu2  ;;  %v1340_v15 = vpop.f32.mrf.mxu3 }
 0x3bd   :  { %v1215_v44 = vpop.f32.mrf.mxu2  ;;  %v1342_v14 = vpop.f32.mrf.mxu3 }
 0x3be   :  { %v1229_v2 = vpack.c.bf16 %v1215_v44, %v1213_v3  ;;  %v1356_v17 = vpack.c.bf16 %v1342_v14, %v1340_v15  ;;  %v10399_v15 = vld [vmem:[%s14360_s2 + $0x30] sm:$0xff] }
 0x3bf   :  { %1724 = vmatpush.bf16.msra.mxu3 %v10399_v15  ;;  %v10406_v15 = vld [vmem:[%s14361_s0 + $0xf0] sm:$0xff] }
 0x3c0   :  { %8715 = vmatmul.msk.bf16.gmra.mxu3 %vm1379_vm4, %v1229_v2  ;;  %8699 = vmatmul.msk.bf16.gmra.mxu2 %vm1379_vm4, %v1356_v17  ;;  %v10398_v2 = vld [vmem:[%s14360_s2 + $0x28] sm:$0xff]  ;;  %v10397_v17 = vld [vmem:[%s14361_s0 + $0xb8] sm:$0xff] }
 0x3c3   :  { %1725 = vmatpush.bf16.msra.mxu3 %v10398_v2  ;;  %v2092_v2 = vpop.f32.mrf.mxu0 }
 0x3c5   :  { %v1218_v30 = vpop.f32.mrf.mxu2  ;;  %v1345_v19 = vpop.f32.mrf.mxu3 }
 0x3cd   :  { %v1220_v62 = vpop.f32.mrf.mxu2  ;;  %v1347_v24 = vpop.f32.mrf.mxu3 }
 0x3ce   :  { %v1230_v1 = vpack.c.bf16 %v1220_v62, %v1218_v30  ;;  %v1357_v53 = vpack.c.bf16 %v1347_v24, %v1345_v19  ;;  %v10411_v30 = vld [vmem:[%s14361_s0 + $0x108] sm:$0xff] }
 0x3cf   :  { %2096 = vmatmul.bf16.gmra.mxu0 %v10411_v30 }
 0x3d0   :  { %8716 = vmatmul.msk.bf16.gmra.mxu3 %vm1379_vm4, %v1230_v1  ;;  %8700 = vmatmul.msk.bf16.gmra.mxu2 %vm1379_vm4, %v1357_v53  ;;  %v10400_v53 = vld [vmem:[%s14361_s0 + $0xc0] sm:$0xff] }
 0x3e0   :  { %1621 = vmatmul.bf16.vlgmr.msra.gmra.mxu2 %v10390_v23  ;;  %v10412_v23 = vld [vmem:[%s14361_s0 + $0x110] sm:$0xff] }
 0x3e1   :  { %2318 = vmatpush.bf16.msra.mxu2 %v11570_v32  ;;  %2101 = vmatmul.bf16.gmra.mxu0 %v10412_v23  ;;  %v10408_v23 = vld [vmem:[%s14360_s2 + $0x3c] sm:$0xff] }
 0x3e3   :  { %v1417_v11 = vpop.f32.mrf.mxu2  ;;  %v1508_v50 = vpop.f32.mrf.mxu3 }
 0x3e4   :  { %v11726_v18 = vadd.f32 %v1508_v50, %v1417_v11 }
 0x3e5   :  { %2319 = vmatpush.bf16.msra.mxu2 %v11563_v21 }
 0x3e9   :  { %2320 = vmatpush.bf16.msra.mxu2 %v11556_v25 }
 0x3eb   :  { %v11730_v16 = vpop.f32.mrf.mxu2  ;;  %v11732_v35 = vpop.f32.mrf.mxu3 }
 0x3ed   :  { %2321 = vmatpush.bf16.msra.mxu2 %v11546_v36 }
 0x3f0   :  { %1626 = vmatmul.bf16.gmra.mxu2 %v10391_v22  ;;  %v10401_v22 = vld [vmem:[%s14361_s0 + $0xc8] sm:$0xff] }
 0x3f1   :  { %2322 = vmatpush.bf16.msra.mxu2 %v11536_v10 }
 0x3f3   :  { %v1422_v31 = vpop.f32.mrf.mxu2  ;;  %v1513_v39 = vpop.f32.mrf.mxu3 }
 0x3f4   :  { %v11739_v27 = vadd.f32 %v1513_v39, %v1422_v31  ;;  %v10413_v31 = vld [vmem:[%s14361_s0 + $0x118] sm:$0xff]  ;;  %v10414_v39 = vld [vmem:[%s14361_s0 + $0x120] sm:$0xff] }
 0x3f5   :  { %2323 = vmatpush.bf16.msra.mxu2 %v11528_v56  ;;  %2106 = vmatmul.bf16.gmra.mxu0 %v10413_v31  ;;  %v10431_v31 = vld [vmem:[%s14361_s0 + $0x188] sm:$0xff] }
 0x3f9   :  { %2324 = vmatpush.bf16.msra.mxu2 %v11520_v58 }
 0x3fb   :  { %v11743_v26 = vpop.f32.mrf.mxu2  ;;  %v11745_v43 = vpop.f32.mrf.mxu3 }
 0x3fd   :  { %2325 = vmatpush.bf16.msra.mxu2 %v11512_v20 }
 0x400   :  { %1631 = vmatmul.bf16.gmra.mxu2 %v10392_v45 }
 0x403   :  { %v1518_v41 = vpop.f32.mrf.mxu3  ;;  %v1427_v57 = vpop.f32.mrf.mxu2 }
 0x404   :  { %v11751_v47 = vadd.f32 %v1518_v41, %v1427_v57  ;;  %v10418_v41 = vld [vmem:[%s14360_s2 + $0x50] sm:$0xff] }
 0x405   :  { %2111 = vmatmul.bf16.gmra.mxu0 %v10414_v39  ;;  %2195 = vmatpush.bf16.msrb.mxu1 %v10418_v41 }
 0x40b   :  { %v11753_v7 = vpop.f32.mrf.mxu3  ;;  %v11755_v40 = vpop.f32.mrf.mxu2 }
 0x410   :  { %1636 = vmatmul.bf16.gmra.mxu2 %v10393_v13 }
 0x413   :  { %v1523_v37 = vpop.f32.mrf.mxu3  ;;  %v1432_v0 = vpop.f32.mrf.mxu2 }
 0x414   :  { %v11760_v42 = vadd.f32 %v1523_v37, %v1432_v0  ;;  %v10404_v0 = vld [vmem:[%s14361_s0 + $0xe0] sm:$0xff] }
 0x41b   :  { %v11762_v49 = vpop.f32.mrf.mxu3  ;;  %v11764_v54 = vpop.f32.mrf.mxu2 }
 0x420   :  { %1641 = vmatmul.bf16.gmra.mxu2 %v10394_v46  ;;  %v10416_v46 = vld [vmem:[%s14361_s0 + $0x130] sm:$0xff] }
 0x423   :  { %v1528_v59 = vpop.f32.mrf.mxu3  ;;  %v1437_v34 = vpop.f32.mrf.mxu2 }
 0x424   :  { %v11769_v52 = vadd.f32 %v1528_v59, %v1437_v34 }
 0x42b   :  { %v11771_v60 = vpop.f32.mrf.mxu3  ;;  %v11773_v9 = vpop.f32.mrf.mxu2 }
 0x430   :  { %1646 = vmatmul.bf16.gmra.mxu2 %v10395_v61 }
 0x433   :  { %v1533_v38 = vpop.f32.mrf.mxu3  ;;  %v1442_v63 = vpop.f32.mrf.mxu2 }
 0x434   :  { %v11782_v51 = vadd.f32 %v1533_v38, %v1442_v63  ;;  %v1923_v38 = vpack.c.b16 %v1920_v33, %v1920_v33  ;;  %v1511_v33 = vadd.f32 %v11732_v35, %v11730_v16 }
 0x43b   :  { %v11784_v55 = vpop.f32.mrf.mxu3  ;;  %v11786_v4 = vpop.f32.mrf.mxu2 }
 0x440   :  { %1651 = vmatmul.bf16.gmra.mxu2 %v10396_v5  ;;  %v1951_v5 = vsel %vm1404_vm3, %v1923_v38, 0 }
 0x441   :  { %1958 = vmatpush.bf16.msrb.mxu3 %v1951_v5 }
 0x443   :  { %v1538_v6 = vpop.f32.mrf.mxu3  ;;  %v1447_v8 = vpop.f32.mrf.mxu2 }
 0x444   :  { %v11791_v3 = vadd.f32 %v1538_v6, %v1447_v8 }
 0x44b   :  { %v11796_v44 = vpop.f32.mrf.mxu3  ;;  %v11801_v14 = vpop.f32.mrf.mxu2 }
 0x450   :  { %1656 = vmatmul.bf16.gmra.mxu2 %v10397_v17  ;;  %v10430_v17 = vld [vmem:[%s14361_s0 + $0x180] sm:$0xff] }
 0x453   :  { %v1543_v19 = vpop.f32.mrf.mxu3  ;;  %v1452_v62 = vpop.f32.mrf.mxu2 }
 0x454   :  { %v11809_v1 = vadd.f32 %v1543_v19, %v1452_v62  ;;  %v10409_v19 = vld [vmem:[%s14360_s2 + $0x44] sm:$0xff]  ;;  %v2094_v62 = vpop.f32.mrf.mxu0 }
 0x455   :  { %1959 = vmatpush.bf16.msrb.mxu3 %v10409_v19  ;;  %v1516_v19 = vadd.f32 %v11745_v43, %v11743_v26 }
 0x459   :  { %1960 = vmatpush.bf16.msrb.mxu3 %v10408_v23 }
 0x45b   :  { %v11811_v24 = vpop.f32.mrf.mxu2 }
 0x460   :  { %1856 = vmatmul.bf16.vlgmr.msrb.gmra.mxu2 %v10400_v53  ;;  %v2132_v53 = vpack.c.bf16 %v2094_v62, %v2092_v2 }
 0x461   :  { %2788 = vmatpush.bf16.msrb.mxu2 %v11570_v32 }
 0x462   :  { %8916 = vmatmul.msk.bf16.vlgmr.msrb.gmra.mxu1 %vm1379_vm4, %v2132_v53 }
 0x463   :  { %v1622_v48 = vpop.f32.mrf.mxu2 }
 0x465   :  { %2789 = vmatpush.bf16.msrb.mxu2 %v11563_v21 }
 0x469   :  { %2790 = vmatpush.bf16.msrb.mxu2 %v11556_v25 }
 0x46b   :  { %v1624_v11 = vpop.f32.mrf.mxu2 }
 0x46c   :  { %v1662_v50 = vpack.c.bf16 %v1624_v11, %v1622_v48 }
 0x46d   :  { %2791 = vmatpush.bf16.msrb.mxu2 %v11546_v36  ;;  %v10402_v36 = vld [vmem:[%s14361_s0 + $0xd0] sm:$0xff] }
 0x46e   :  { %8778 = vmatmul.msk.bf16.vlgmr.msra.gmra.mxu3 %vm1379_vm4, %v1662_v50  ;;  %v10407_v50 = vld [vmem:[%s14361_s0 + $0xf8] sm:$0xff] }
 0x470   :  { %1861 = vmatmul.bf16.gmra.mxu2 %v10401_v22  ;;  %v2097_v22 = vpop.f32.mrf.mxu0 }
 0x471   :  { %2792 = vmatpush.bf16.msrb.mxu2 %v11536_v10 }
 0x473   :  { %v1627_v21 = vpop.f32.mrf.mxu2 }
 0x475   :  { %2793 = vmatpush.bf16.msrb.mxu2 %v11528_v56 }
 0x479   :  { %2794 = vmatpush.bf16.msrb.mxu2 %v11520_v58  ;;  %v10403_v58 = vld [vmem:[%s14361_s0 + $0xd8] sm:$0xff] }
 0x47b   :  { %v1629_v25 = vpop.f32.mrf.mxu2 }
 0x47c   :  { %v1663_v32 = vpack.c.bf16 %v1629_v25, %v1627_v21  ;;  %v2099_v25 = vpop.f32.mrf.mxu0 }
 0x47d   :  { %2795 = vmatpush.bf16.msrb.mxu2 %v11512_v20  ;;  %v10415_v20 = vld [vmem:[%s14361_s0 + $0x128] sm:$0xff] }
 0x47e   :  { %8779 = vmatmul.msk.bf16.gmra.mxu3 %vm1379_vm4, %v1663_v32  ;;  %2116 = vmatmul.bf16.gmra.mxu0 %v10415_v20  ;;  %v2133_v32 = vpack.c.bf16 %v2099_v25, %v2097_v22  ;;  %v1521_v25 = vadd.f32 %v11753_v7, %v11755_v40 }
 0x480   :  { %1866 = vmatmul.bf16.gmra.mxu2 %v10402_v36  ;;  %8917 = vmatmul.msk.bf16.gmra.mxu1 %vm1379_vm4, %v2133_v32 }
 0x483   :  { %v1632_v10 = vpop.f32.mrf.mxu2 }
 0x48b   :  { %v1634_v56 = vpop.f32.mrf.mxu2 }
 0x48c   :  { %v1664_v45 = vpack.c.bf16 %v1634_v56, %v1632_v10  ;;  %v10420_v10 = vld [vmem:[%s14361_s0 + $0x140] sm:$0xff]  ;;  %v2102_v56 = vpop.f32.mrf.mxu0 }
 0x48e   :  { %8780 = vmatmul.msk.bf16.gmra.mxu3 %vm1379_vm4, %v1664_v45  ;;  %2121 = vmatmul.bf16.gmra.mxu0 %v10416_v46  ;;  %v10432_v45 = vld [vmem:[%s14361_s0 + $0x190] sm:$0xff] }
 0x490   :  { %1871 = vmatmul.bf16.gmra.mxu2 %v10403_v58 }
 0x493   :  { %v1637_v57 = vpop.f32.mrf.mxu2 }
 0x494   :  { %v2104_v41 = vpop.f32.mrf.mxu0 }
 0x495   :  { %v2134_v20 = vpack.c.bf16 %v2104_v41, %v2102_v56  ;;  %v10424_v56 = vld [vmem:[%s14361_s0 + $0x160] sm:$0xff] }
 0x497   :  { %8918 = vmatmul.msk.bf16.gmra.mxu1 %vm1379_vm4, %v2134_v20 }
 0x49b   :  { %v1639_v13 = vpop.f32.mrf.mxu2 }
 0x49c   :  { %v1665_v37 = vpack.c.bf16 %v1639_v13, %v1637_v57  ;;  %v11899_v57 = vpop.f32.mrf.mxu3  ;;  %v2107_v46 = vpop.f32.mrf.mxu0 }
 0x49e   :  { %8781 = vmatmul.msk.bf16.gmra.mxu3 %vm1379_vm4, %v1665_v37  ;;  %2126 = vmatmul.bf16.gmra.mxu0 %v10417_v28 }
 0x4a0   :  { %1876 = vmatmul.bf16.gmra.mxu2 %v10404_v0  ;;  %v10421_v0 = vld [vmem:[%s14361_s0 + $0x148] sm:$0xff] }
 0x4a3   :  { %v1642_v59 = vpop.f32.mrf.mxu2 }
 0x4a4   :  { %v2109_v28 = vpop.f32.mrf.mxu0 }
 0x4a5   :  { %v2135_v29 = vpack.c.bf16 %v2109_v28, %v2107_v46 }
 0x4a7   :  { %8919 = vmatmul.msk.bf16.gmra.mxu1 %vm1379_vm4, %v2135_v29 }
 0x4ab   :  { %v1644_v34 = vpop.f32.mrf.mxu2 }
 0x4ac   :  { %v1666_v61 = vpack.c.bf16 %v1644_v34, %v1642_v59  ;;  %v10433_v59 = vld [vmem:[%s14361_s0 + $0x198] sm:$0xff] }
 0x4ae   :  { %8782 = vmatmul.msk.bf16.gmra.mxu3 %vm1379_vm4, %v1666_v61  ;;  %2561 = vmatmul.bf16.vlgmr.msra.gmra.mxu0 %v10430_v17 }
 0x4b0   :  { %1881 = vmatmul.bf16.gmra.mxu2 %v10405_v12 }
 0x4b3   :  { %v1647_v63 = vpop.f32.mrf.mxu2 }
 0x4bb   :  { %v1649_v6 = vpop.f32.mrf.mxu2 }
 0x4bc   :  { %v1667_v8 = vpack.c.bf16 %v1649_v6, %v1647_v63 }
 0x4be   :  { %8783 = vmatmul.msk.bf16.gmra.mxu3 %vm1379_vm4, %v1667_v8  ;;  %2566 = vmatmul.bf16.gmra.mxu0 %v10431_v31  ;;  %v10422_v8 = vld [vmem:[%s14361_s0 + $0x150] sm:$0xff] }
 0x4c0   :  { %1886 = vmatmul.bf16.gmra.mxu2 %v10406_v15  ;;  %v2112_v15 = vpop.f32.mrf.mxu0 }
 0x4c3   :  { %v1652_v30 = vpop.f32.mrf.mxu2 }
 0x4c8   :  { %v2114_v17 = vpop.f32.mrf.mxu0 }
 0x4cb   :  { %v1654_v48 = vpop.f32.mrf.mxu2 }
 0x4cc   :  { %v1668_v11 = vpack.c.bf16 %v1654_v48, %v1652_v30  ;;  %v2136_v30 = vpack.c.bf16 %v2114_v17, %v2112_v15 }
 0x4ce   :  { %8784 = vmatmul.msk.bf16.gmra.mxu3 %vm1379_vm4, %v1668_v11  ;;  %2571 = vmatmul.bf16.gmra.mxu0 %v10432_v45  ;;  %v10423_v11 = vld [vmem:[%s14361_s0 + $0x158] sm:$0xff] }
 0x4cf   :  { %8920 = vmatmul.msk.bf16.gmra.mxu1 %vm1379_vm4, %v2136_v30 }
 0x4d0   :  { %1891 = vmatmul.bf16.gmra.mxu2 %v10407_v50 }
 0x4d3   :  { %v1657_v21 = vpop.f32.mrf.mxu2 }
 0x4db   :  { %v1659_v36 = vpop.f32.mrf.mxu2 }
 0x4dc   :  { %v1669_v39 = vpack.c.bf16 %v1659_v36, %v1657_v21 }
 0x4de   :  { %8785 = vmatmul.msk.bf16.gmra.mxu3 %vm1379_vm4, %v1669_v39  ;;  %2576 = vmatmul.bf16.gmra.mxu0 %v10433_v59 }
 0x4e0   :  { %2326 = vmatmul.bf16.vlgmr.msra.gmra.mxu2 %v10420_v10 }
 0x4e3   :  { %v1857_v58 = vpop.f32.mrf.mxu2 }
 0x4eb   :  { %v1859_v13 = vpop.f32.mrf.mxu2 }
 0x4ec   :  { %v1897_v37 = vpack.c.bf16 %v1859_v13, %v1857_v58  ;;  %v1526_v13 = vadd.f32 %v11762_v49, %v11764_v54  ;;  %v8976_v49 = vld [vmem:[%s14360_s2 + $0x74] sm:$0xf] }
 0x4ed   :  { %v2390_v54 = vunpack.c.l.b16 %v8976_v49 }
 0x4ee   :  { %8847 = vmatmul.msk.bf16.vlgmr.msrb.gmra.mxu3 %vm1379_vm4, %v1897_v37 }
 0x4ef   :  { %v2393_v29 = vpack.c.b16 %v2390_v54, %v2390_v54  ;;  %v10440_v54 = vld [vmem:[%s14361_s0 + $0x1c0] sm:$0xff] }
 0x4f0   :  { %2331 = vmatmul.bf16.gmra.mxu2 %v10421_v0 }
 0x4f1   :  { %v1727_v34 = vpop.f32.mrf.mxu3 }
 0x4f2   :  { %v11909_v61 = vadd.f32 %v1727_v34, %v11726_v18  ;;  %v10434_v18 = vld [vmem:[%s14361_s0 + $0x1a0] sm:$0xff]  ;;  %v10425_v34 = vld [vmem:[%s14361_s0 + $0x168] sm:$0xff] }
 0x4f3   :  { %v1862_v12 = vpop.f32.mrf.mxu2  ;;  %2581 = vmatmul.bf16.gmra.mxu0 %v10434_v18 }
 0x4f9   :  { %v1729_v38 = vpop.f32.mrf.mxu3 }
 0x4fa   :  { %v11914_v63 = vadd.f32 %v1729_v38, %v1511_v33 }
 0x4fb   :  { %v1864_v5 = vpop.f32.mrf.mxu2  ;;  %v2117_v50 = vpop.f32.mrf.mxu0 }
 0x4fc   :  { %v1898_v6 = vpack.c.bf16 %v1864_v5, %v1862_v12  ;;  %v2421_v5 = vsel %vm1404_vm3, %v2393_v29, 0  ;;  %v10452_v29 = vld [vmem:[%s14361_s0 + $0x210] sm:$0xff] }
 0x4fd   :  { %2428 = vmatpush.bf16.msra.mxu3 %v2421_v5 }
 0x4fe   :  { %8848 = vmatmul.msk.bf16.gmra.mxu3 %vm1379_vm4, %v1898_v6  ;;  %v9045_v6 = vld [vmem:[%s14360_s2 + $0x88] sm:$0xf] }
 0x4ff   :  { %v2625_v15 = vunpack.c.l.b16 %v9045_v6 }
 0x500   :  { %2336 = vmatmul.bf16.gmra.mxu2 %v10422_v8 }
 0x501   :  { %v1732_v2 = vpop.f32.mrf.mxu3 }
 0x502   :  { %v11924_v16 = vadd.f32 %v1732_v2, %v11739_v27  ;;  %v10435_v27 = vld [vmem:[%s14361_s0 + $0x1a8] sm:$0xff]  ;;  %v2628_v2 = vpack.c.b16 %v2625_v15, %v2625_v15  ;;  %v1546_v15 = vadd.f32 %v11899_v57, %v11811_v24 }
 0x503   :  { %v1867_v35 = vpop.f32.mrf.mxu2  ;;  %2586 = vmatmul.bf16.gmra.mxu0 %v10435_v27  ;;  %v2119_v31 = vpop.f32.mrf.mxu0  ;;  %v10438_v27 = vld [vmem:[%s14360_s2 + $0x78] sm:$0xff] }
 0x504   :  { %v2137_v21 = vpack.c.bf16 %v2119_v31, %v2117_v50  ;;  %v12003_v31 = vpop.f32.mrf.mxu1 }
 0x506   :  { %8921 = vmatmul.msk.bf16.gmra.mxu1 %vm1379_vm4, %v2137_v21 }
 0x509   :  { %v1734_v62 = vpop.f32.mrf.mxu3 }
 0x50a   :  { %v11929_v53 = vadd.f32 %v1734_v62, %v1516_v19 }
 0x50b   :  { %v1869_v23 = vpop.f32.mrf.mxu2  ;;  %v2122_v45 = vpop.f32.mrf.mxu0 }
 0x50c   :  { %v1899_v48 = vpack.c.bf16 %v1869_v23, %v1867_v35  ;;  %v1531_v35 = vadd.f32 %v11771_v60, %v11773_v9  ;;  %v10426_v23 = vld [vmem:[%s14361_s0 + $0x170] sm:$0xff]  ;;  %v10439_v60 = vld [vmem:[%s14360_s2 + $0x80] sm:$0xff] }
 0x50e   :  { %8849 = vmatmul.msk.bf16.gmra.mxu3 %vm1379_vm4, %v1899_v48 }
 0x510   :  { %2341 = vmatmul.bf16.gmra.mxu2 %v10423_v11  ;;  %v10450_v11 = vld [vmem:[%s14361_s0 + $0x200] sm:$0xff] }
 0x511   :  { %v1737_v22 = vpop.f32.mrf.mxu3 }
 0x512   :  { %v11939_v26 = vadd.f32 %v1737_v22, %v11751_v47  ;;  %v10436_v47 = vld [vmem:[%s14361_s0 + $0x1b0] sm:$0xff] }
 0x513   :  { %v1872_v43 = vpop.f32.mrf.mxu2  ;;  %2591 = vmatmul.bf16.gmra.mxu0 %v10436_v47  ;;  %v2124_v41 = vpop.f32.mrf.mxu0  ;;  %v10427_v47 = vld [vmem:[%s14361_s0 + $0x178] sm:$0xff] }
 0x514   :  { %v2138_v20 = vpack.c.bf16 %v2124_v41, %v2122_v45 }
 0x516   :  { %8922 = vmatmul.msk.bf16.gmra.mxu1 %vm1379_vm4, %v2138_v20 }
 0x519   :  { %v1739_v32 = vpop.f32.mrf.mxu3 }
 0x51a   :  { %v11944_v36 = vadd.f32 %v1739_v32, %v1521_v25 }
 0x51b   :  { %v1874_v39 = vpop.f32.mrf.mxu2  ;;  %v2127_v12 = vpop.f32.mrf.mxu0 }
 0x51c   :  { %v1900_v10 = vpack.c.bf16 %v1874_v39, %v1872_v43  ;;  %v10429_v43 = vld [vmem:[%s14360_s2 + $0x6c] sm:$0xff] }
 0x51d   :  { %2429 = vmatpush.bf16.msra.mxu3 %v10429_v43 }
 0x51e   :  { %8850 = vmatmul.msk.bf16.gmra.mxu3 %vm1379_vm4, %v1900_v10  ;;  %v10428_v10 = vld [vmem:[%s14360_s2 + $0x64] sm:$0xff] }
 0x520   :  { %2346 = vmatmul.bf16.gmra.mxu2 %v10424_v56 }
 0x521   :  { %v1742_v58 = vpop.f32.mrf.mxu3  ;;  %2430 = vmatpush.bf16.msra.mxu3 %v10428_v10 }
 0x522   :  { %v11954_v7 = vadd.f32 %v1742_v58, %v11760_v42  ;;  %v10437_v42 = vld [vmem:[%s14361_s0 + $0x1b8] sm:$0xff]  ;;  %v2199_v58 = vpop.f32.mrf.mxu1 }
 0x523   :  { %v1877_v40 = vpop.f32.mrf.mxu2  ;;  %2596 = vmatmul.bf16.gmra.mxu0 %v10437_v42  ;;  %v2129_v8 = vpop.f32.mrf.mxu0 }
 0x524   :  { %v2139_v18 = vpack.c.bf16 %v2129_v8, %v2127_v12 }
 0x526   :  { %8923 = vmatmul.msk.bf16.gmra.mxu1 %vm1379_vm4, %v2139_v18 }
 0x529   :  { %v1744_v37 = vpop.f32.mrf.mxu3 }
 0x52a   :  { %v11959_v0 = vadd.f32 %v1744_v37, %v1526_v13  ;;  %v2202_v13 = vpop.f32.mrf.mxu1 }
 0x52b   :  { %v1879_v46 = vpop.f32.mrf.mxu2  ;;  %v2562_v48 = vpop.f32.mrf.mxu0 }
 0x52c   :  { %v1901_v59 = vpack.c.bf16 %v1879_v46, %v1877_v40 }
 0x52e   :  { %8851 = vmatmul.msk.bf16.gmra.mxu3 %vm1379_vm4, %v1901_v59  ;;  %v1541_v59 = vadd.f32 %v11796_v44, %v11801_v14 }
 0x530   :  { %2351 = vmatmul.bf16.gmra.mxu2 %v10425_v34 }
 0x531   :  { %v1747_v28 = vpop.f32.mrf.mxu3 }
 0x532   :  { %v11972_v33 = vadd.f32 %v1747_v28, %v11769_v52  ;;  %v2656_v52 = vsel %vm1404_vm3, %v2628_v2, 0 }
 0x533   :  { %v1882_v38 = vpop.f32.mrf.mxu2  ;;  %2663 = vmatpush.bf16.msra.mxu1 %v2656_v52  ;;  %3031 = vmatmul.bf16.vlgmr.msrb.gmra.mxu0 %v10450_v11  ;;  %v2564_v21 = vpop.f32.mrf.mxu0 }
 0x534   :  { %v2602_v25 = vpack.c.bf16 %v2564_v21, %v2562_v48 }
 0x537   :  { %2664 = vmatpush.bf16.msra.mxu1 %v10439_v60 }
 0x539   :  { %v1749_v17 = vpop.f32.mrf.mxu3 }
 0x53a   :  { %v11982_v30 = vadd.f32 %v1749_v17, %v1531_v35  ;;  %v10441_v17 = vld [vmem:[%s14361_s0 + $0x1c8] sm:$0xff] }
 0x53b   :  { %v1884_v19 = vpop.f32.mrf.mxu2  ;;  %2665 = vmatpush.bf16.msra.mxu1 %v10438_v27  ;;  %v2567_v40 = vpop.f32.mrf.mxu0 }
 0x53c   :  { %v1902_v62 = vpack.c.bf16 %v1884_v19, %v1882_v38 }
 0x53e   :  { %8852 = vmatmul.msk.bf16.gmra.mxu3 %vm1379_vm4, %v1902_v62  ;;  %9054 = vmatmul.msk.bf16.vlgmr.msra.gmra.mxu1 %vm1379_vm4, %v2602_v25  ;;  %v10453_v62 = vld [vmem:[%s14361_s0 + $0x218] sm:$0xff]  ;;  %v10442_v25 = vld [vmem:[%s14361_s0 + $0x1d0] sm:$0xff] }
 0x540   :  { %2356 = vmatmul.bf16.gmra.mxu2 %v10426_v23 }
 0x541   :  { %v1752_v9 = vpop.f32.mrf.mxu3 }
 0x542   :  { %v11995_v50 = vadd.f32 %v1752_v9, %v11782_v51  ;;  %v1536_v51 = vadd.f32 %v11784_v55, %v11786_v4  ;;  %v10451_v55 = vld [vmem:[%s14361_s0 + $0x208] sm:$0xff] }
 0x543   :  { %v1887_v22 = vpop.f32.mrf.mxu2  ;;  %3036 = vmatmul.bf16.gmra.mxu0 %v10451_v55  ;;  %v2569_v37 = vpop.f32.mrf.mxu0 }
 0x544   :  { %v2603_v46 = vpack.c.bf16 %v2569_v37, %v2567_v40 }
 0x549   :  { %v1754_v32 = vpop.f32.mrf.mxu3 }
 0x54a   :  { %v12008_v39 = vadd.f32 %v1754_v32, %v1536_v51 }
 0x54b   :  { %v1889_v56 = vpop.f32.mrf.mxu2  ;;  %v2572_v28 = vpop.f32.mrf.mxu0 }
 0x54c   :  { %v1903_v45 = vpack.c.bf16 %v1889_v56, %v1887_v22 }
 0x54e   :  { %8853 = vmatmul.msk.bf16.gmra.mxu3 %vm1379_vm4, %v1903_v45  ;;  %9055 = vmatmul.msk.bf16.gmra.mxu1 %vm1379_vm4, %v2603_v46  ;;  %v10443_v46 = vld [vmem:[%s14361_s0 + $0x1d8] sm:$0xff] }
 0x550   :  { %2361 = vmatmul.bf16.gmra.mxu2 %v10427_v47 }
 0x551   :  { %v1757_v4 = vpop.f32.mrf.mxu3 }
 0x552   :  { %v12021_v41 = vadd.f32 %v1757_v4, %v11791_v3  ;;  %v2204_v3 = vpop.f32.mrf.mxu1 }
 0x553   :  { %v1892_v20 = vpop.f32.mrf.mxu2  ;;  %3041 = vmatmul.bf16.gmra.mxu0 %v10452_v29  ;;  %v2574_v6 = vpop.f32.mrf.mxu0 }
 0x554   :  { %v2604_v8 = vpack.c.bf16 %v2574_v6, %v2572_v28 }
 0x559   :  { %v1759_v34 = vpop.f32.mrf.mxu3 }
 0x55a   :  { %v12026_v12 = vadd.f32 %v1759_v34, %v1541_v59  ;;  %v2207_v5 = vpop.f32.mrf.mxu1 }
 0x55b   :  { %v1894_v42 = vpop.f32.mrf.mxu2  ;;  %v2577_v19 = vpop.f32.mrf.mxu0 }
 0x55c   :  { %v1904_v49 = vpack.c.bf16 %v1894_v42, %v1892_v20 }
 0x55e   :  { %8854 = vmatmul.msk.bf16.gmra.mxu3 %vm1379_vm4, %v1904_v49  ;;  %9056 = vmatmul.msk.bf16.gmra.mxu1 %vm1379_vm4, %v2604_v8 }
 0x560   :  { %2796 = vmatmul.bf16.vlgmr.msrb.gmra.mxu2 %v10440_v54 }
 0x561   :  { %v1762_v44 = vpop.f32.mrf.mxu3 }
 0x562   :  { %v12036_v14 = vadd.f32 %v1762_v44, %v11809_v1  ;;  %v2209_v1 = vpop.f32.mrf.mxu1 }
 0x563   :  { %v2327_v38 = vpop.f32.mrf.mxu2  ;;  %3046 = vmatmul.bf16.gmra.mxu0 %v10453_v62  ;;  %v2579_v11 = vpop.f32.mrf.mxu0 }
 0x564   :  { %v2605_v9 = vpack.c.bf16 %v2579_v11, %v2577_v19 }
 0x569   :  { %v1764_v18 = vpop.f32.mrf.mxu3 }
 0x56a   :  { %v12041_v2 = vadd.f32 %v1764_v18, %v1546_v15  ;;  %v2212_v48 = vpop.f32.mrf.mxu1  ;;  %v10444_v15 = vld [vmem:[%s14361_s0 + $0x1e0] sm:$0xff] }
 0x56b   :  { %v2329_v35 = vpop.f32.mrf.mxu2 }
 0x56c   :  { %v2367_v52 = vpack.c.bf16 %v2329_v35, %v2327_v38 }
 0x56e   :  { %8985 = vmatmul.msk.bf16.vlgmr.msra.gmra.mxu3 %vm1379_vm4, %v2367_v52  ;;  %9057 = vmatmul.msk.bf16.gmra.mxu1 %vm1379_vm4, %v2605_v9 }
 0x570   :  { %2801 = vmatmul.bf16.gmra.mxu2 %v10441_v17 }
 0x571   :  { %v1962_v24 = vpop.f32.mrf.mxu3 }
 0x572   :  { %v2002_v57 = vadd.f32 %v1962_v24, %v11909_v61  ;;  %v2214_v51 = vpop.f32.mrf.mxu1  ;;  %v2582_v61 = vpop.f32.mrf.mxu0 }
 0x573   :  { %v2332_v23 = vpop.f32.mrf.mxu2 }
 0x574   :  { %v12052_v60 = vadd.f32 %v12003_v31, %v2002_v57  ;;  %v10454_v31 = vld [vmem:[%s14361_s0 + $0x220] sm:$0xff] }
 0x575   :  { %3051 = vmatmul.bf16.gmra.mxu0 %v10454_v31 }
 0x579   :  { %v1964_v27 = vpop.f32.mrf.mxu3 }
 0x57a   :  { %v2003_v22 = vadd.f32 %v1964_v27, %v11914_v63  ;;  %v12066_v45 = vpop.f32.mrf.mxu1  ;;  %v2584_v47 = vpop.f32.mrf.mxu0  ;;  %v10445_v27 = vld [vmem:[%s14361_s0 + $0x1e8] sm:$0xff] }
 0x57b   :  { %v2334_v43 = vpop.f32.mrf.mxu2  ;;  %v2606_v55 = vpack.c.bf16 %v2584_v47, %v2582_v61 }
 0x57c   :  { %v2368_v21 = vpack.c.bf16 %v2334_v43, %v2332_v23  ;;  %v12059_v32 = vadd.f32 %v2199_v58, %v2003_v22 }
 0x57e   :  { %8986 = vmatmul.msk.bf16.gmra.mxu3 %vm1379_vm4, %v2368_v21  ;;  %9058 = vmatmul.msk.bf16.gmra.mxu1 %vm1379_vm4, %v2606_v55 }
 0x580   :  { %2806 = vmatmul.bf16.gmra.mxu2 %v10442_v25 }
 0x581   :  { %v1967_v10 = vpop.f32.mrf.mxu3 }
 0x582   :  { %v2004_v63 = vadd.f32 %v1967_v10, %v11924_v16  ;;  %v12075_v59 = vpop.f32.mrf.mxu1  ;;  %v2587_v16 = vpop.f32.mrf.mxu0 }
 0x583   :  { %v2337_v56 = vpop.f32.mrf.mxu2 }
 0x584   :  { %v12068_v40 = vadd.f32 %v2202_v13, %v2004_v63  ;;  %v10455_v13 = vld [vmem:[%s14361_s0 + $0x228] sm:$0xff]  ;;  %v9183_v63 = vld [vmem:[%s14360_s2 + $0xb0] sm:$0xf] }
 0x585   :  { %3056 = vmatmul.bf16.gmra.mxu0 %v10455_v13  ;;  %v3095_v55 = vunpack.c.l.b16 %v9183_v63 }
 0x589   :  { %v1969_v58 = vpop.f32.mrf.mxu3 }
 0x58a   :  { %v2005_v4 = vadd.f32 %v1969_v58, %v11929_v53  ;;  %v12084_v54 = vpop.f32.mrf.mxu1  ;;  %v2589_v28 = vpop.f32.mrf.mxu0 }
 0x58b   :  { %v2339_v20 = vpop.f32.mrf.mxu2  ;;  %v2607_v44 = vpack.c.bf16 %v2589_v28, %v2587_v16  ;;  %v10459_v28 = vld [vmem:[%s14360_s2 + $0xa8] sm:$0xff] }
 0x58c   :  { %v2369_v37 = vpack.c.bf16 %v2339_v20, %v2337_v56  ;;  %v12077_v34 = vadd.f32 %v2204_v3, %v2005_v4  ;;  %v3098_v20 = vpack.c.b16 %v3095_v55, %v3095_v55 }
 0x58e   :  { %8987 = vmatmul.msk.bf16.gmra.mxu3 %vm1379_vm4, %v2369_v37  ;;  %9059 = vmatmul.msk.bf16.gmra.mxu1 %vm1379_vm4, %v2607_v44 }
 0x590   :  { %2811 = vmatmul.bf16.gmra.mxu2 %v10443_v46 }
 0x591   :  { %v1972_v53 = vpop.f32.mrf.mxu3 }
 0x592   :  { %v2006_v42 = vadd.f32 %v1972_v53, %v11939_v26  ;;  %v12093_v18 = vpop.f32.mrf.mxu1  ;;  %v2592_v26 = vpop.f32.mrf.mxu0  ;;  %v10446_v53 = vld [vmem:[%s14361_s0 + $0x1f0] sm:$0xff] }
 0x593   :  { %v2342_v49 = vpop.f32.mrf.mxu2 }
 0x594   :  { %v12086_v29 = vadd.f32 %v2207_v5, %v2006_v42  ;;  %v10456_v5 = vld [vmem:[%s14361_s0 + $0x230] sm:$0xff] }
 0x595   :  { %3061 = vmatmul.bf16.gmra.mxu0 %v10456_v5 }
 0x599   :  { %v1974_v3 = vpop.f32.mrf.mxu3 }
 0x59a   :  { %v2007_v38 = vadd.f32 %v1974_v3, %v11944_v36  ;;  %v12102_v19 = vpop.f32.mrf.mxu1  ;;  %v2594_v62 = vpop.f32.mrf.mxu0  ;;  %v10458_v3 = vld [vmem:[%s14360_s2 + $0xa0] sm:$0xff] }
 0x59b   :  { %v2344_v6 = vpop.f32.mrf.mxu2  ;;  %v2608_v57 = vpack.c.bf16 %v2594_v62, %v2592_v26  ;;  %v10447_v62 = vld [vmem:[%s14361_s0 + $0x1f8] sm:$0xff] }
 0x59c   :  { %v2370_v8 = vpack.c.bf16 %v2344_v6, %v2342_v49  ;;  %v12095_v35 = vadd.f32 %v2209_v1, %v2007_v38 }
 0x59e   :  { %8988 = vmatmul.msk.bf16.gmra.mxu3 %vm1379_vm4, %v2370_v8  ;;  %9060 = vmatmul.msk.bf16.gmra.mxu1 %vm1379_vm4, %v2608_v57 }
 0x5a0   :  { %2816 = vmatmul.bf16.gmra.mxu2 %v10444_v15 }
 0x5a1   :  { %v1977_v36 = vpop.f32.mrf.mxu3 }
 0x5a2   :  { %v2008_v52 = vadd.f32 %v1977_v36, %v11954_v7  ;;  %v12111_v22 = vpop.f32.mrf.mxu1  ;;  %v2597_v7 = vpop.f32.mrf.mxu0  ;;  %v10448_v36 = vld [vmem:[%s14360_s2 + $0x8c] sm:$0xff] }
 0x5a3   :  { %v2347_v17 = vpop.f32.mrf.mxu2 }
 0x5a4   :  { %v12104_v24 = vadd.f32 %v2212_v48, %v2008_v52  ;;  %v10457_v48 = vld [vmem:[%s14361_s0 + $0x238] sm:$0xff] }
 0x5a5   :  { %3066 = vmatmul.bf16.gmra.mxu0 %v10457_v48 }
 0x5a9   :  { %v1979_v1 = vpop.f32.mrf.mxu3 }
 0x5aa   :  { %v2009_v23 = vadd.f32 %v1979_v1, %v11959_v0  ;;  %v9114_v0 = vld [vmem:[%s14360_s2 + $0x9c] sm:$0xf]  ;;  %v12127_v56 = vpop.f32.mrf.mxu1  ;;  %v2599_v47 = vpop.f32.mrf.mxu0 }
 0x5ab   :  { %v2349_v11 = vpop.f32.mrf.mxu2  ;;  %v2860_v21 = vunpack.c.l.b16 %v9114_v0  ;;  %v2609_v4 = vpack.c.bf16 %v2599_v47, %v2597_v7 }
 0x5ac   :  { %v2371_v9 = vpack.c.bf16 %v2349_v11, %v2347_v17  ;;  %v12113_v43 = vadd.f32 %v2214_v51, %v2009_v23 }
 0x5ad   :  { %v2863_v61 = vpack.c.b16 %v2860_v21, %v2860_v21 }
 0x5ae   :  { %8989 = vmatmul.msk.bf16.gmra.mxu3 %vm1379_vm4, %v2371_v9  ;;  %9061 = vmatmul.msk.bf16.gmra.mxu1 %vm1379_vm4, %v2609_v4 }
 0x5af   :  { %v2891_v51 = vsel %vm1404_vm3, %v2863_v61, 0 }
 0x5b0   :  { %2821 = vmatmul.bf16.gmra.mxu2 %v10445_v27  ;;  %2898 = vmatpush.bf16.msrb.mxu3 %v2891_v51 }
 0x5b1   :  { %v1982_v25 = vpop.f32.mrf.mxu3 }
 0x5b2   :  { %v2010_v31 = vadd.f32 %v1982_v25, %v11972_v33  ;;  %v3126_v33 = vsel %vm1404_vm3, %v3098_v20, 0  ;;  %v2234_v42 = vpop.f32.mrf.mxu1  ;;  %v3032_v49 = vpop.f32.mrf.mxu0 }
 0x5b3   :  { %v2352_v10 = vpop.f32.mrf.mxu2  ;;  %3133 = vmatpush.bf16.msrb.mxu1 %v3126_v33 }
 0x5b4   :  { %v12130_v58 = vadd.f32 %v12066_v45, %v2010_v31 }
 0x5b7   :  { %3134 = vmatpush.bf16.msrb.mxu1 %v10459_v28 }
 0x5b9   :  { %v1984_v37 = vpop.f32.mrf.mxu3 }
 0x5ba   :  { %v2011_v46 = vadd.f32 %v1984_v37, %v11982_v30  ;;  %v3034_v8 = vpop.f32.mrf.mxu0 }
 0x5bb   :  { %v2354_v16 = vpop.f32.mrf.mxu2  ;;  %v2667_v6 = vpop.f32.mrf.mxu1  ;;  %3135 = vmatpush.bf16.msrb.mxu1 %v10458_v3  ;;  %v3072_v26 = vpack.c.bf16 %v3034_v8, %v3032_v49 }
 0x5bc   :  { %v2372_v13 = vpack.c.bf16 %v2354_v16, %v2352_v10  ;;  %v12139_v45 = vadd.f32 %v12075_v59, %v2011_v46  ;;  %v10449_v59 = vld [vmem:[%s14360_s2 + $0x94] sm:$0xff] }
 0x5bd   :  { %2899 = vmatpush.bf16.msrb.mxu3 %v10449_v59 }
 0x5be   :  { %8990 = vmatmul.msk.bf16.gmra.mxu3 %vm1379_vm4, %v2372_v13  ;;  %9192 = vmatmul.msk.bf16.vlgmr.msrb.gmra.mxu1 %vm1379_vm4, %v3072_v26 }
 0x5c0   :  { %2826 = vmatmul.bf16.gmra.mxu2 %v10446_v53 }
 0x5c1   :  { %v1987_v30 = vpop.f32.mrf.mxu3  ;;  %2900 = vmatpush.bf16.msrb.mxu3 %v10448_v36 }
 0x5c2   :  { %v2012_v44 = vadd.f32 %v1987_v30, %v11995_v50 }
 0x5c3   :  { %v2357_v38 = vpop.f32.mrf.mxu2  ;;  %v2669_v57 = vpop.f32.mrf.mxu1 }
 0x5c4   :  { %v12153_v15 = vadd.f32 %v12084_v54, %v2012_v44  ;;  %v3037_v54 = vpop.f32.mrf.mxu0 }
 0x5c9   :  { %v1989_v50 = vpop.f32.mrf.mxu3 }
 0x5ca   :  { %v2013_v5 = vadd.f32 %v1989_v50, %v12008_v39 }
 0x5cb   :  { %v2359_v52 = vpop.f32.mrf.mxu2  ;;  %v2672_v9 = vpop.f32.mrf.mxu1 }
 0x5cc   :  { %v2373_v17 = vpack.c.bf16 %v2359_v52, %v2357_v38  ;;  %v12164_v1 = vadd.f32 %v12093_v18, %v2013_v5  ;;  %v3039_v27 = vpop.f32.mrf.mxu0 }
 0x5cd   :  { %v3073_v48 = vpack.c.bf16 %v3039_v27, %v3037_v54 }
 0x5ce   :  { %8991 = vmatmul.msk.bf16.gmra.mxu3 %vm1379_vm4, %v2373_v17 }
 0x5cf   :  { %9193 = vmatmul.msk.bf16.gmra.mxu1 %vm1379_vm4, %v3073_v48 }
 0x5d0   :  { %2831 = vmatmul.bf16.gmra.mxu2 %v10447_v62 }
 0x5d1   :  { %v1992_v39 = vpop.f32.mrf.mxu3 }
 0x5d2   :  { %v2014_v23 = vadd.f32 %v1992_v39, %v12021_v41 }
 0x5d3   :  { %v2362_v11 = vpop.f32.mrf.mxu2  ;;  %v2674_v61 = vpop.f32.mrf.mxu1 }
 0x5d4   :  { %v12169_v7 = vadd.f32 %v12102_v19, %v2014_v23  ;;  %v3042_v31 = vpop.f32.mrf.mxu0 }
 0x5d9   :  { %v1994_v0 = vpop.f32.mrf.mxu3 }
 0x5da   :  { %v2015_v21 = vadd.f32 %v1994_v0, %v12026_v12 }
 0x5db   :  { %v2364_v18 = vpop.f32.mrf.mxu2  ;;  %v2677_v63 = vpop.f32.mrf.mxu1 }
 0x5dc   :  { %v2374_v25 = vpack.c.bf16 %v2364_v18, %v2362_v11  ;;  %v12174_v10 = vadd.f32 %v12111_v22, %v2015_v21  ;;  %v3044_v47 = vpop.f32.mrf.mxu0 }
 0x5dd   :  { %v3074_v4 = vpack.c.bf16 %v3044_v47, %v3042_v31 }
 0x5de   :  { %8992 = vmatmul.msk.bf16.gmra.mxu3 %vm1379_vm4, %v2374_v25 }
 0x5df   :  { %9194 = vmatmul.msk.bf16.gmra.mxu1 %vm1379_vm4, %v3074_v4 }
 0x5e1   :  { %v1997_v41 = vpop.f32.mrf.mxu3 }
 0x5e2   :  { %v2016_v51 = vadd.f32 %v1997_v41, %v12036_v14 }
 0x5e3   :  { %v2797_v19 = vpop.f32.mrf.mxu2  ;;  %v2679_v37 = vpop.f32.mrf.mxu1 }
 0x5e4   :  { %v12179_v55 = vadd.f32 %v12127_v56, %v2016_v51  ;;  %v3047_v46 = vpop.f32.mrf.mxu0 }
 0x5e9   :  { %v1999_v12 = vpop.f32.mrf.mxu3 }
 0x5ea   :  { %v2017_v20 = vadd.f32 %v1999_v12, %v12041_v2 }
 0x5eb   :  { %v2799_v33 = vpop.f32.mrf.mxu2  ;;  %v2682_v56 = vpop.f32.mrf.mxu1 }
 0x5ec   :  { %v2837_v22 = vpack.c.bf16 %v2799_v33, %v2797_v19  ;;  %v12183_v16 = vadd.f32 %v2234_v42, %v2017_v20  ;;  %v3049_v49 = vpop.f32.mrf.mxu0 }
 0x5ed   :  { %v3075_v30 = vpack.c.bf16 %v3049_v49, %v3047_v46 }
 0x5ee   :  { %9123 = vmatmul.msk.bf16.vlgmr.msrb.gmra.mxu3 %vm1379_vm4, %v2837_v22 }
 0x5ef   :  { %9195 = vmatmul.msk.bf16.gmra.mxu1 %vm1379_vm4, %v3075_v30 }
 0x5f1   :  { %v2432_v14 = vpop.f32.mrf.mxu3 }
 0x5f2   :  { %v2472_v13 = vadd.f32 %v2432_v14, %v12052_v60 }
 0x5f3   :  { %v2802_v53 = vpop.f32.mrf.mxu2  ;;  %v2684_v42 = vpop.f32.mrf.mxu1 }
 0x5f4   :  { %v12187_v28 = vadd.f32 %v2667_v6, %v2472_v13  ;;  %v3052_v59 = vpop.f32.mrf.mxu0 }
 0x5f9   :  { %v2434_v2 = vpop.f32.mrf.mxu3 }
 0x5fa   :  { %v2473_v44 = vadd.f32 %v2434_v2, %v12059_v32 }
 0x5fb   :  { %v2804_v3 = vpop.f32.mrf.mxu2  ;;  %v2687_v36 = vpop.f32.mrf.mxu1 }
 0x5fc   :  { %v2838_v38 = vpack.c.bf16 %v2804_v3, %v2802_v53  ;;  %v12191_v8 = vadd.f32 %v2669_v57, %v2473_v44  ;;  %v3054_v6 = vpop.f32.mrf.mxu0 }
 0x5fd   :  { %v3076_v52 = vpack.c.bf16 %v3054_v6, %v3052_v59 }
 0x5fe   :  { %9124 = vmatmul.msk.bf16.gmra.mxu3 %vm1379_vm4, %v2838_v38 }
 0x5ff   :  { %9196 = vmatmul.msk.bf16.gmra.mxu1 %vm1379_vm4, %v3076_v52 }
 0x601   :  { %v2437_v60 = vpop.f32.mrf.mxu3 }
 0x602   :  { %v2474_v26 = vadd.f32 %v2437_v60, %v12068_v40 }
 0x603   :  { %v2807_v50 = vpop.f32.mrf.mxu2  ;;  %v12202_v23 = vpop.f32.mrf.mxu1 }
 0x604   :  { %v12195_v5 = vadd.f32 %v2672_v9, %v2474_v26  ;;  %v3057_v57 = vpop.f32.mrf.mxu0 }
 0x609   :  { %v2439_v32 = vpop.f32.mrf.mxu3 }
 0x60a   :  { %v2475_v17 = vadd.f32 %v2439_v32, %v12077_v34 }
 0x60b   :  { %v2809_v62 = vpop.f32.mrf.mxu2  ;;  %v2692_v21 = vpop.f32.mrf.mxu1 }
 0x60c   :  { %v2839_v54 = vpack.c.bf16 %v2809_v62, %v2807_v50  ;;  %v12199_v39 = vadd.f32 %v2674_v61, %v2475_v17  ;;  %v3059_v27 = vpop.f32.mrf.mxu0 }
 0x60d   :  { %v3077_v0 = vpack.c.bf16 %v3059_v27, %v3057_v57 }
 0x60e   :  { %9125 = vmatmul.msk.bf16.gmra.mxu3 %vm1379_vm4, %v2839_v54 }
 0x60f   :  { %9197 = vmatmul.msk.bf16.gmra.mxu1 %vm1379_vm4, %v3077_v0 }
 0x611   :  { %v2442_v40 = vpop.f32.mrf.mxu3 }
 0x612   :  { %v2476_v11 = vadd.f32 %v2442_v40, %v12086_v29 }
 0x613   :  { %v2812_v9 = vpop.f32.mrf.mxu2 }
 0x614   :  { %v12205_v48 = vadd.f32 %v2677_v63, %v2476_v11  ;;  %v3062_v31 = vpop.f32.mrf.mxu0  ;;  %v12213_v63 = vpop.f32.mrf.mxu1 }
 0x619   :  { %v2444_v34 = vpop.f32.mrf.mxu3 }
 0x61a   :  { %v2477_v18 = vadd.f32 %v2444_v34, %v12095_v35 }
 0x61b   :  { %v2814_v25 = vpop.f32.mrf.mxu2 }
 0x61c   :  { %v2840_v61 = vpack.c.bf16 %v2814_v25, %v2812_v9  ;;  %v12209_v41 = vadd.f32 %v2679_v37, %v2477_v18  ;;  %v3064_v47 = vpop.f32.mrf.mxu0  ;;  %v2697_v14 = vpop.f32.mrf.mxu1 }
 0x61d   :  { %v3078_v12 = vpack.c.bf16 %v3064_v47, %v3062_v31  ;;  %v12254_v31 = vld [vmem:[%s14331_s9] ss:$0 sm:$0xff] }
 0x61e   :  { %9126 = vmatmul.msk.bf16.gmra.mxu3 %vm1379_vm4, %v2840_v61 }
 0x61f   :  { %9198 = vmatmul.msk.bf16.gmra.mxu1 %vm1379_vm4, %v3078_v12 }
 0x621   :  { %v2447_v51 = vpop.f32.mrf.mxu3 }
 0x622   :  { %v2478_v29 = vadd.f32 %v2447_v51, %v12104_v24 }
 0x623   :  { %v2817_v19 = vpop.f32.mrf.mxu2 }
 0x624   :  { %v12215_v4 = vadd.f32 %v2682_v56, %v2478_v29  ;;  %v3067_v37 = vpop.f32.mrf.mxu0  ;;  %v12225_v2 = vpop.f32.mrf.mxu1 }
 0x629   :  { %v2449_v35 = vpop.f32.mrf.mxu3 }
 0x62a   :  { %v2479_v20 = vadd.f32 %v2449_v35, %v12113_v43 }
 0x62b   :  { %v2819_v33 = vpop.f32.mrf.mxu2 }
 0x62c   :  { %v2841_v22 = vpack.c.bf16 %v2819_v33, %v2817_v19  ;;  %v12219_v46 = vadd.f32 %v2684_v42, %v2479_v20  ;;  %v3069_v56 = vpop.f32.mrf.mxu0  ;;  %v2702_v42 = vpop.f32.mrf.mxu1 }
 0x62d   :  { %v3079_v30 = vpack.c.bf16 %v3069_v56, %v3067_v37 }
 0x62e   :  { %9127 = vmatmul.msk.bf16.gmra.mxu3 %vm1379_vm4, %v2841_v22 }
 0x62f   :  { %9199 = vmatmul.msk.bf16.gmra.mxu1 %vm1379_vm4, %v3079_v30 }
 0x631   :  { %v2452_v24 = vpop.f32.mrf.mxu3 }
 0x632   :  { %v2480_v13 = vadd.f32 %v2452_v24, %v12130_v58 }
 0x633   :  { %v2822_v53 = vpop.f32.mrf.mxu2 }
 0x634   :  { %v12223_v49 = vadd.f32 %v2687_v36, %v2480_v13  ;;  %v12236_v6 = vpop.f32.mrf.mxu1 }
 0x639   :  { %v12228_v43 = vpop.f32.mrf.mxu3 }
 0x63b   :  { %v2824_v44 = vpop.f32.mrf.mxu2 }
 0x63c   :  { %v2842_v3 = vpack.c.bf16 %v2824_v44, %v2822_v53  ;;  %v3137_v54 = vpop.f32.mrf.mxu1 }
 0x63e   :  { %9128 = vmatmul.msk.bf16.gmra.mxu3 %vm1379_vm4, %v2842_v3 }
 0x641   :  { %v2457_v38 = vpop.f32.mrf.mxu3 }
 0x642   :  { %v2482_v59 = vadd.f32 %v2457_v38, %v12153_v15 }
 0x643   :  { %v2827_v58 = vpop.f32.mrf.mxu2 }
 0x644   :  { %v12232_v60 = vadd.f32 %v2692_v21, %v2482_v59  ;;  %v3139_v11 = vpop.f32.mrf.mxu1 }
 0x649   :  { %v12234_v26 = vpop.f32.mrf.mxu3 }
 0x64b   :  { %v2829_v50 = vpop.f32.mrf.mxu2 }
 0x64c   :  { %v2843_v36 = vpack.c.bf16 %v2829_v50, %v2827_v58  ;;  %v3142_v21 = vpop.f32.mrf.mxu1 }
 0x64e   :  { %9129 = vmatmul.msk.bf16.gmra.mxu3 %vm1379_vm4, %v2843_v36 }
 0x651   :  { %v2462_v52 = vpop.f32.mrf.mxu3 }
 0x652   :  { %v2484_v32 = vadd.f32 %v2462_v52, %v12169_v7 }
 0x653   :  { %v2832_v17 = vpop.f32.mrf.mxu2 }
 0x654   :  { %v12240_v62 = vadd.f32 %v2697_v14, %v2484_v32  ;;  %v3144_v25 = vpop.f32.mrf.mxu1 }
 0x659   :  { %v12242_v57 = vpop.f32.mrf.mxu3 }
 0x65b   :  { %v2834_v15 = vpop.f32.mrf.mxu2 }
 0x65c   :  { %v2844_v40 = vpack.c.bf16 %v2834_v15, %v2832_v17  ;;  %v3147_v47 = vpop.f32.mrf.mxu1 }
 0x65e   :  { %9130 = vmatmul.msk.bf16.gmra.mxu3 %vm1379_vm4, %v2844_v40 }
 0x661   :  { %v2467_v9 = vpop.f32.mrf.mxu3 }
 0x662   :  { %v2486_v27 = vadd.f32 %v2467_v9, %v12179_v55 }
 0x664   :  { %v12246_v0 = vadd.f32 %v2702_v42, %v2486_v27  ;;  %v3149_v14 = vpop.f32.mrf.mxu1 }
 0x669   :  { %v12248_v34 = vpop.f32.mrf.mxu3 }
 0x66c   :  { %v3152_v38 = vpop.f32.mrf.mxu1 }
 0x671   :  { %v2902_v7 = vpop.f32.mrf.mxu3 }
 0x672   :  { %v2942_v18 = vadd.f32 %v2902_v7, %v12187_v28 }
 0x674   :  { %v3177_v61 = vadd.f32 %v3137_v54, %v2942_v18  ;;  %v3154_v36 = vpop.f32.mrf.mxu1 }
 0x676   :  { %v3197_v55 = vadd.f32 %v12254_v31, %v3177_v61 }
 0x678   :  { %v3213_v35 = vmax.f32 %v3197_v55, 0.0 }
 0x679   :  { %v2904_v51 = vpop.f32.mrf.mxu3 }
 0x67a   :  { %v2943_v29 = vadd.f32 %v2904_v51, %v12191_v8 }
 0x67c   :  { %v3178_v19 = vadd.f32 %v3139_v11, %v2943_v29  ;;  %v3157_v27 = vpop.f32.mrf.mxu1 }
 0x67e   :  { %v3198_v12 = vadd.f32 %v12254_v31, %v3178_v19 }
 0x680   :  { %v3214_v20 = vmax.f32 %v3198_v12, 0.0 }
 0x681   :  { %v2907_v33 = vpop.f32.mrf.mxu3 }
 0x682   :  { %v12259_v28 = vpack.c.bf16 %v3214_v20, %v3213_v35  ;;  %v2944_v22 = vadd.f32 %v2907_v33, %v12195_v5 }
 0x684   :  { %v3179_v37 = vadd.f32 %v3142_v21, %v2944_v22 }
 0x686   :  { %v3199_v8 = vadd.f32 %v12254_v31, %v3179_v37 }
 0x688   :  { %v3215_v30 = vmax.f32 %v3199_v8, 0.0 }
 0x689   :  { %v2909_v24 = vpop.f32.mrf.mxu3 }
 0x68a   :  { %v2945_v13 = vadd.f32 %v2909_v24, %v12199_v39 }
 0x68c   :  { %v3180_v53 = vadd.f32 %v3144_v25, %v2945_v13  ;;  %v3159_v25 = vpop.f32.mrf.mxu1 }
 0x68e   :  { %v3200_v56 = vadd.f32 %v12254_v31, %v3180_v53  ;;  %v10467_v53 = vld [vmem:[%s14332_s10 + $0x38] sm:$0x30] }
 0x690   :  { %v3216_v44 = vmax.f32 %v3200_v56, 0.0 }
 0x691   :  { %v2912_v3 = vpop.f32.mrf.mxu3 }
 0x692   :  { %v12265_v42 = vpack.c.bf16 %v3216_v44, %v3215_v30  ;;  %v2946_v59 = vadd.f32 %v2912_v3, %v12205_v48 }
 0x694   :  { %v3181_v58 = vadd.f32 %v3147_v47, %v2946_v59 }
 0x696   :  { %v3201_v39 = vadd.f32 %v12254_v31, %v3181_v58 }
 0x698   :  { %v3217_v17 = vmax.f32 %v3201_v39, 0.0 }
 0x699   :  { %v2914_v5 = vpop.f32.mrf.mxu3 }
 0x69a   :  { %v2947_v50 = vadd.f32 %v2914_v5, %v12209_v41 }
 0x69c   :  { %v3182_v52 = vadd.f32 %v3149_v14, %v2947_v50  ;;  %v10465_v50 = vld [vmem:[%s14332_s10 + $0x28] sm:$0xff] }
 0x69e   :  { %v3202_v32 = vadd.f32 %v12254_v31, %v3182_v52 }
 0x6a0   :  { %v3218_v54 = vmax.f32 %v3202_v32, 0.0  ;;  %v10464_v32 = vld [vmem:[%s14332_s10 + $0x20] sm:$0xff] }
 0x6a1   :  { %v2917_v15 = vpop.f32.mrf.mxu3 }
 0x6a2   :  { %v12271_v40 = vpack.c.bf16 %v3218_v54, %v3217_v17  ;;  %v2948_v11 = vadd.f32 %v2917_v15, %v12215_v4  ;;  %v2481_v4 = vadd.f32 %v12228_v43, %v12139_v45  ;;  %v2483_v45 = vadd.f32 %v12234_v26, %v12164_v1 }
 0x6a3   :  { %v2485_v17 = vadd.f32 %v12242_v57, %v12174_v10  ;;  %v2487_v10 = vadd.f32 %v12248_v34, %v12183_v16  ;;  %v10621_v16 = vld [vmem:[%s14361_s0] sm:$0xff]  ;;  %v10624_v34 = vld [vmem:[%s14361_s0 + $0x48] sm:$0xff] }
 0x6a4   :  { %v3183_v9 = vadd.f32 %v3152_v38, %v2948_v11  ;;  %v2716_v12 = vadd.f32 %v12202_v23, %v2481_v4  ;;  %v9222_v23 = vld [vmem:[%s14332_s10 + $0x38] sm:$0xf]  ;;  %v2718_v3 = vadd.f32 %v12213_v63, %v2483_v45  ;;  %v10631_v45 = vld [vmem:[%s14361_s0 + $0x28] sm:$0xff] }
 0x6a5   :  { %v9223_v56 = vor.u32 %v10467_v53, %v9222_v23  ;;  %v9246_v23 = vld [vmem:[%s14332_s10 + $0x18] sm:$0xf]  ;;  %v10463_v53 = vld [vmem:[%s14332_s10 + $0x18] sm:$0x30] }
 0x6a6   :  { %v3203_v41 = vadd.f32 %v12254_v31, %v3183_v9  ;;  %v2720_v9 = vadd.f32 %v12225_v2, %v2485_v17  ;;  %v2722_v2 = vadd.f32 %v12236_v6, %v2487_v10  ;;  %v10622_v6 = vld [vmem:[%s14361_s0 + $0x40] sm:$0xff]  ;;  %v10638_v17 = vld [vmem:[%s14361_s0 + $0x88] sm:$0xff]  ;;  %v10640_v10 = vld [vmem:[%s14361_s0 + $0x98] sm:$0xff] }
 0x6a7   :  { %v3418_v30 = vsel %vm3416_vm5, %v9223_v56, 0  ;;  %v9247_v56 = vor.u32 %v10463_v53, %v9246_v23  ;;  %v10643_v53 = vld [vmem:[%s14361_s0 + $0xb0] sm:$0xff] }
 0x6a8   :  { %v3219_v61 = vmax.f32 %v3203_v41, 0.0  ;;  %3424 = vmatpush.bf16.msra.mxu0 %v3418_v30 }
 0x6a9   :  { %v2919_v48 = vpop.f32.mrf.mxu3  ;;  %v3517_v30 = vsel %vm3416_vm5, %v9247_v56, 0  ;;  %v10470_v56 = vld [vmem:[%s14332_s10 + $0x50] sm:$0xff] }
 0x6aa   :  { %v2949_v21 = vadd.f32 %v2919_v48, %v12219_v46  ;;  %v3162_v46 = vpop.f32.mrf.mxu1  ;;  %3523 = vmatpush.bf16.msra.mxu1 %v3517_v30 }
 0x6ac   :  { %v3184_v7 = vadd.f32 %v3154_v36, %v2949_v21 }
 0x6ae   :  { %v3204_v18 = vadd.f32 %v12254_v31, %v3184_v7 }
 0x6b0   :  { %v3220_v51 = vmax.f32 %v3204_v18, 0.0 }
 0x6b1   :  { %v2922_v29 = vpop.f32.mrf.mxu3 }
 0x6b2   :  { %v12277_v55 = vpack.c.bf16 %v3220_v51, %v3219_v61  ;;  %v2950_v19 = vadd.f32 %v2922_v29, %v12223_v49  ;;  %v3164_v49 = vpop.f32.mrf.mxu1 }
 0x6b4   :  { %v3185_v47 = vadd.f32 %v3157_v27, %v2950_v19 }
 0x6b6   :  { %v3205_v33 = vadd.f32 %v12254_v31, %v3185_v47 }
 0x6b8   :  { %v3221_v14 = vmax.f32 %v3205_v33, 0.0 }
 0x6b9   :  { %v2924_v35 = vpop.f32.mrf.mxu3 }
 0x6ba   :  { %v2951_v20 = vadd.f32 %v2924_v35, %v2716_v12  ;;  %v3167_v58 = vpop.f32.mrf.mxu1 }
 0x6bc   :  { %v3186_v22 = vadd.f32 %v3159_v25, %v2951_v20 }
 0x6be   :  { %v3206_v37 = vadd.f32 %v12254_v31, %v3186_v22 }
 0x6c0   :  { %v3222_v24 = vmax.f32 %v3206_v37, 0.0  ;;  %v10626_v37 = vld [vmem:[%s14361_s0 + $0x50] sm:$0xff] }
 0x6c1   :  { %v2927_v13 = vpop.f32.mrf.mxu3 }
 0x6c2   :  { %v12285_v8 = vpack.c.bf16 %v3222_v24, %v3221_v14  ;;  %v2952_v43 = vadd.f32 %v2927_v13, %v12232_v60  ;;  %v10466_v60 = vld [vmem:[%s14332_s10 + $0x30] sm:$0xff]  ;;  %v3169_v15 = vpop.f32.mrf.mxu1  ;;  %v10627_v14 = vld [vmem:[%s14361_s0 + $0x18] sm:$0xff]  ;;  %v10629_v13 = vld [vmem:[%s14361_s0 + $0x20] sm:$0xff] }
 0x6c3   :  { %3425 = vmatpush.bf16.msra.mxu0 %v10466_v60  ;;  %v10628_v24 = vld [vmem:[%s14361_s0 + $0x58] sm:$0xff]  ;;  %v10460_v60 = vld [vmem:[%s14332_s10] sm:$0xff] }
 0x6c4   :  { %v3187_v44 = vadd.f32 %v3162_v46, %v2952_v43  ;;  %v10632_v43 = vld [vmem:[%s14361_s0 + $0x68] sm:$0xff] }
 0x6c6   :  { %v3207_v26 = vadd.f32 %v12254_v31, %v3187_v44  ;;  %v10633_v44 = vld [vmem:[%s14361_s0 + $0x30] sm:$0xff] }
 0x6c7   :  { %3426 = vmatpush.bf16.msra.mxu0 %v10465_v50 }
 0x6c8   :  { %v3223_v36 = vmax.f32 %v3207_v26, 0.0  ;;  %v10635_v26 = vld [vmem:[%s14361_s0 + $0x38] sm:$0xff] }
 0x6c9   :  { %v2929_v38 = vpop.f32.mrf.mxu3 }
 0x6ca   :  { %v2953_v1 = vadd.f32 %v2929_v38, %v2718_v3  ;;  %v3172_v61 = vpop.f32.mrf.mxu1  ;;  %v10634_v3 = vld [vmem:[%s14361_s0 + $0x70] sm:$0xff] }
 0x6cb   :  { %3427 = vmatpush.bf16.msra.mxu0 %v10464_v32  ;;  %v10462_v38 = vld [vmem:[%s14332_s10 + $0x10] sm:$0xff] }
 0x6cc   :  { %v3188_v59 = vadd.f32 %v3164_v49, %v2953_v1  ;;  %v10630_v49 = vld [vmem:[%s14361_s0 + $0x60] sm:$0xff]  ;;  %3524 = vmatpush.bf16.msra.mxu1 %v10462_v38  ;;  %v10461_v1 = vld [vmem:[%s14332_s10 + $0x8] sm:$0xff] }
 0x6cd   :  { %v10468_v38 = vld [vmem:[%s14332_s10 + $0x40] sm:$0xff] }
 0x6ce   :  { %v3208_v5 = vadd.f32 %v12254_v31, %v3188_v59  ;;  %v10636_v59 = vld [vmem:[%s14361_s0 + $0x78] sm:$0xff] }
 0x6d0   :  { %v3224_v63 = vmax.f32 %v3208_v5, 0.0  ;;  %3525 = vmatpush.bf16.msra.mxu1 %v10461_v1 }
 0x6d1   :  { %v2932_v39 = vpop.f32.mrf.mxu3 }
 0x6d2   :  { %v12306_v52 = vpack.c.bf16 %v3224_v63, %v3223_v36  ;;  %v2954_v54 = vadd.f32 %v2932_v39, %v12240_v62  ;;  %v3174_v47 = vpop.f32.mrf.mxu1 }
 0x6d4   :  { %v3189_v11 = vadd.f32 %v3167_v58, %v2954_v54  ;;  %3526 = vmatpush.bf16.msra.mxu1 %v10460_v60  ;;  %v10637_v58 = vld [vmem:[%s14361_s0 + $0x80] sm:$0xff] }
 0x6d6   :  { %v3209_v21 = vadd.f32 %v12254_v31, %v3189_v11 }
 0x6d8   :  { %v3225_v18 = vmax.f32 %v3209_v21, 0.0  ;;  %v10639_v21 = vld [vmem:[%s14361_s0 + $0x90] sm:$0xff] }
 0x6d9   :  { %v2934_v27 = vpop.f32.mrf.mxu3 }
 0x6da   :  { %v2955_v48 = vadd.f32 %v2934_v27, %v2720_v9 }
 0x6dc   :  { %v3190_v41 = vadd.f32 %v3169_v15, %v2955_v48 }
 0x6de   :  { %v3210_v7 = vadd.f32 %v12254_v31, %v3190_v41 }
 0x6e0   :  { %v3226_v25 = vmax.f32 %v3210_v7, 0.0 }
 0x6e1   :  { %v2937_v51 = vpop.f32.mrf.mxu3 }
 0x6e2   :  { %v12317_v29 = vpack.c.bf16 %v3226_v25, %v3225_v18  ;;  %v2956_v62 = vadd.f32 %v2937_v51, %v12246_v0  ;;  %v10623_v0 = vld [vmem:[%s14361_s0 + $0x8] sm:$0xff] }
 0x6e4   :  { %v3191_v57 = vadd.f32 %v3172_v61, %v2956_v62 }
 0x6e6   :  { %v3211_v12 = vadd.f32 %v12254_v31, %v3191_v57 }
 0x6e8   :  { %v3227_v20 = vmax.f32 %v3211_v12, 0.0  ;;  %v10641_v12 = vld [vmem:[%s14361_s0 + $0xa0] sm:$0xff] }
 0x6e9   :  { %v2939_v19 = vpop.f32.mrf.mxu3 }
 0x6ea   :  { %v2957_v4 = vadd.f32 %v2939_v19, %v2722_v2 }
 0x6ec   :  { %v3192_v46 = vadd.f32 %v3174_v47, %v2957_v4 }
 0x6ee   :  { %v3212_v35 = vadd.f32 %v12254_v31, %v3192_v46  ;;  %v10625_v31 = vld [vmem:[%s14361_s0 + $0x10] sm:$0xff] }
 0x6f0   :  { %v3228_v33 = vmax.f32 %v3212_v35, 0.0 }
 0x6f2   :  { %v12325_v22 = vpack.c.bf16 %v3228_v33, %v3227_v20 }
 0x6f4   :  { %3237 = vmatpush.bf16.msra.mxu2 %v12325_v22  ;;  %3302 = vmatpush.bf16.msra.mxu3 %v12325_v22 }
 0x6f5   :  { %3749 = vmatpush.bf16.msrb.mxu0 %v12325_v22 }
 0x6f8   :  { %3238 = vmatpush.bf16.msra.mxu2 %v12317_v29  ;;  %3303 = vmatpush.bf16.msra.mxu3 %v12317_v29 }
 0x6f9   :  { %3750 = vmatpush.bf16.msrb.mxu0 %v12317_v29 }
 0x6fc   :  { %3239 = vmatpush.bf16.msra.mxu2 %v12306_v52  ;;  %3304 = vmatpush.bf16.msra.mxu3 %v12306_v52 }
 0x6fd   :  { %3751 = vmatpush.bf16.msrb.mxu0 %v12306_v52 }
 0x700   :  { %3240 = vmatpush.bf16.msra.mxu2 %v12285_v8  ;;  %3305 = vmatpush.bf16.msra.mxu3 %v12285_v8 }
 0x701   :  { %3752 = vmatpush.bf16.msrb.mxu0 %v12285_v8 }
 0x704   :  { %3241 = vmatpush.bf16.msra.mxu2 %v12277_v55  ;;  %3306 = vmatpush.bf16.msra.mxu3 %v12277_v55 }
 0x705   :  { %3753 = vmatpush.bf16.msrb.mxu0 %v12277_v55 }
 0x708   :  { %3242 = vmatpush.bf16.msra.mxu2 %v12271_v40  ;;  %3307 = vmatpush.bf16.msra.mxu3 %v12271_v40 }
 0x709   :  { %3754 = vmatpush.bf16.msrb.mxu0 %v12271_v40 }
 0x70c   :  { %3243 = vmatpush.bf16.msra.mxu2 %v12265_v42  ;;  %3308 = vmatpush.bf16.msra.mxu3 %v12265_v42 }
 0x70d   :  { %3755 = vmatpush.bf16.msrb.mxu0 %v12265_v42 }
 0x710   :  { %3244 = vmatpush.bf16.msra.mxu2 %v12259_v28  ;;  %3309 = vmatpush.bf16.msra.mxu3 %v12259_v28 }
 0x711   :  { %3756 = vmatpush.bf16.msrb.mxu0 %v12259_v28 }
 0x713   :  { %3245 = vmatmul.bf16.vlgmr.msra.gmra.mxu2 %v10621_v16  ;;  %3310 = vmatmul.bf16.vlgmr.msra.gmra.mxu3 %v10622_v6 }
 0x714   :  { %3568 = vmatpush.bf16.msrb.mxu2 %v12325_v22 }
 0x718   :  { %3569 = vmatpush.bf16.msrb.mxu2 %v12317_v29 }
 0x71c   :  { %3570 = vmatpush.bf16.msrb.mxu2 %v12306_v52 }
 0x720   :  { %3571 = vmatpush.bf16.msrb.mxu2 %v12285_v8 }
 0x723   :  { %3250 = vmatmul.bf16.gmra.mxu2 %v10623_v0  ;;  %3315 = vmatmul.bf16.gmra.mxu3 %v10624_v34  ;;  %v10642_v0 = vld [vmem:[%s14361_s0 + $0xa8] sm:$0xff] }
 0x724   :  { %3572 = vmatpush.bf16.msrb.mxu2 %v12277_v55 }
 0x728   :  { %3573 = vmatpush.bf16.msrb.mxu2 %v12271_v40 }
 0x72c   :  { %3574 = vmatpush.bf16.msrb.mxu2 %v12265_v42 }
 0x730   :  { %3575 = vmatpush.bf16.msrb.mxu2 %v12259_v28 }
 0x733   :  { %3255 = vmatmul.bf16.gmra.mxu2 %v10625_v31  ;;  %3320 = vmatmul.bf16.gmra.mxu3 %v10626_v37  ;;  %v9278_v37 = vld [vmem:[%s14332_s10 + $0x58] sm:$0xf] }
 0x734   :  { %3930 = vmatpush.bf16.msra.mxu2 %v12325_v22 }
 0x738   :  { %3931 = vmatpush.bf16.msra.mxu2 %v12317_v29 }
 0x73c   :  { %3932 = vmatpush.bf16.msra.mxu2 %v12306_v52 }
 0x740   :  { %3933 = vmatpush.bf16.msra.mxu2 %v12285_v8 }
 0x743   :  { %3260 = vmatmul.bf16.gmra.mxu2 %v10627_v14  ;;  %3325 = vmatmul.bf16.gmra.mxu3 %v10628_v24  ;;  %v10471_v14 = vld [vmem:[%s14332_s10 + $0x58] sm:$0x30] }
 0x744   :  { %3934 = vmatpush.bf16.msra.mxu2 %v12277_v55  ;;  %v9279_v24 = vor.u32 %v10471_v14, %v9278_v37 }
 0x748   :  { %3935 = vmatpush.bf16.msra.mxu2 %v12271_v40 }
 0x74c   :  { %3936 = vmatpush.bf16.msra.mxu2 %v12265_v42 }
 0x750   :  { %3937 = vmatpush.bf16.msra.mxu2 %v12259_v28 }
 0x753   :  { %3265 = vmatmul.bf16.gmra.mxu2 %v10629_v13  ;;  %3330 = vmatmul.bf16.gmra.mxu3 %v10630_v49  ;;  %v3682_v13 = vsel %vm3416_vm5, %v9279_v24, 0 }
 0x754   :  { %3688 = vmatpush.bf16.msrb.mxu3 %v3682_v13 }
 0x758   :  { %3689 = vmatpush.bf16.msrb.mxu3 %v10470_v56  ;;  %v10655_v56 = vld [vmem:[%s14361_s0 + $0x128] sm:$0xff] }
 0x763   :  { %3270 = vmatmul.bf16.gmra.mxu2 %v10631_v45  ;;  %3335 = vmatmul.bf16.gmra.mxu3 %v10632_v43 }
 0x773   :  { %3275 = vmatmul.bf16.gmra.mxu2 %v10633_v44  ;;  %3340 = vmatmul.bf16.gmra.mxu3 %v10634_v3  ;;  %v10469_v3 = vld [vmem:[%s14332_s10 + $0x48] sm:$0xff] }
 0x774   :  { %3690 = vmatpush.bf16.msrb.mxu3 %v10469_v3 }
 0x778   :  { %3691 = vmatpush.bf16.msrb.mxu3 %v10468_v38  ;;  %v9342_v38 = vld [vmem:[%s14332_s10 + $0x98] sm:$0xf] }
 0x783   :  { %3280 = vmatmul.bf16.gmra.mxu2 %v10635_v26  ;;  %3345 = vmatmul.bf16.gmra.mxu3 %v10636_v59 }
 0x793   :  { %3576 = vmatmul.bf16.vlgmr.msrb.gmra.mxu2 %v10637_v58  ;;  %v10644_v58 = vld [vmem:[%s14361_s0 + $0xb8] sm:$0xff] }
 0x794   :  { %4292 = vmatpush.bf16.msrb.mxu2 %v12325_v22 }
 0x796   :  { %v3246_v5 = vpop.f32.mrf.mxu2  ;;  %v3311_v50 = vpop.f32.mrf.mxu3 }
 0x798   :  { %4293 = vmatpush.bf16.msrb.mxu2 %v12317_v29 }
 0x79c   :  { %4294 = vmatpush.bf16.msrb.mxu2 %v12306_v52 }
 0x79e   :  { %v3248_v36 = vpop.f32.mrf.mxu2  ;;  %v3313_v63 = vpop.f32.mrf.mxu3 }
 0x79f   :  { %v3286_v39 = vpack.c.bf16 %v3248_v36, %v3246_v5  ;;  %v3351_v32 = vpack.c.bf16 %v3313_v63, %v3311_v50 }
 0x7a0   :  { %4295 = vmatpush.bf16.msrb.mxu2 %v12285_v8 }
 0x7a1   :  { %9224 = vmatmul.msk.bf16.vlgmr.msra.gmra.mxu0 %vm3391_vm6, %v3351_v32  ;;  %9248 = vmatmul.msk.bf16.vlgmr.msra.gmra.mxu1 %vm3391_vm6, %v3286_v39 }
 0x7a2   :  { %4111 = vmatpush.bf16.msra.mxu0 %v12325_v22 }
 0x7a3   :  { %3581 = vmatmul.bf16.gmra.mxu2 %v10638_v17  ;;  %v10645_v17 = vld [vmem:[%s14361_s0 + $0x100] sm:$0xff] }
 0x7a4   :  { %4296 = vmatpush.bf16.msrb.mxu2 %v12277_v55 }
 0x7a6   :  { %4112 = vmatpush.bf16.msra.mxu0 %v12317_v29  ;;  %v3251_v54 = vpop.f32.mrf.mxu2  ;;  %v3316_v15 = vpop.f32.mrf.mxu3 }
 0x7a8   :  { %4297 = vmatpush.bf16.msrb.mxu2 %v12271_v40 }
 0x7aa   :  { %4113 = vmatpush.bf16.msra.mxu0 %v12306_v52 }
 0x7ac   :  { %4298 = vmatpush.bf16.msrb.mxu2 %v12265_v42 }
 0x7ae   :  { %4114 = vmatpush.bf16.msra.mxu0 %v12285_v8  ;;  %v3253_v11 = vpop.f32.mrf.mxu2  ;;  %v3318_v9 = vpop.f32.mrf.mxu3 }
 0x7af   :  { %v3287_v27 = vpack.c.bf16 %v3253_v11, %v3251_v54  ;;  %v3352_v48 = vpack.c.bf16 %v3318_v9, %v3316_v15 }
 0x7b0   :  { %4299 = vmatpush.bf16.msrb.mxu2 %v12259_v28 }
 0x7b1   :  { %9225 = vmatmul.msk.bf16.gmra.mxu0 %vm3391_vm6, %v3352_v48  ;;  %9249 = vmatmul.msk.bf16.gmra.mxu1 %vm3391_vm6, %v3287_v27 }
 0x7b2   :  { %4115 = vmatpush.bf16.msra.mxu0 %v12277_v55 }
 0x7b3   :  { %3586 = vmatmul.bf16.gmra.mxu2 %v10639_v21  ;;  %v10646_v21 = vld [vmem:[%s14361_s0 + $0xc0] sm:$0xff] }
 0x7b6   :  { %4116 = vmatpush.bf16.msra.mxu0 %v12271_v40  ;;  %v3256_v41 = vpop.f32.mrf.mxu2  ;;  %v3321_v7 = vpop.f32.mrf.mxu3 }
 0x7ba   :  { %4117 = vmatpush.bf16.msra.mxu0 %v12265_v42 }
 0x7be   :  { %4118 = vmatpush.bf16.msra.mxu0 %v12259_v28  ;;  %v3258_v18 = vpop.f32.mrf.mxu2  ;;  %v3323_v25 = vpop.f32.mrf.mxu3 }
 0x7bf   :  { %v3288_v61 = vpack.c.bf16 %v3258_v18, %v3256_v41  ;;  %v3353_v51 = vpack.c.bf16 %v3323_v25, %v3321_v7  ;;  %v10647_v41 = vld [vmem:[%s14361_s0 + $0x108] sm:$0xff] }
 0x7c1   :  { %9226 = vmatmul.msk.bf16.gmra.mxu0 %vm3391_vm6, %v3353_v51  ;;  %9250 = vmatmul.msk.bf16.gmra.mxu1 %vm3391_vm6, %v3288_v61 }
 0x7c3   :  { %3591 = vmatmul.bf16.gmra.mxu2 %v10640_v10 }
 0x7c6   :  { %v3261_v62 = vpop.f32.mrf.mxu2  ;;  %v3326_v57 = vpop.f32.mrf.mxu3 }
 0x7ce   :  { %v3263_v2 = vpop.f32.mrf.mxu2  ;;  %v3328_v19 = vpop.f32.mrf.mxu3 }
 0x7cf   :  { %v3289_v4 = vpack.c.bf16 %v3263_v2, %v3261_v62  ;;  %v3354_v47 = vpack.c.bf16 %v3328_v19, %v3326_v57 }
 0x7d1   :  { %9227 = vmatmul.msk.bf16.gmra.mxu0 %vm3391_vm6, %v3354_v47  ;;  %9251 = vmatmul.msk.bf16.gmra.mxu1 %vm3391_vm6, %v3289_v4 }
 0x7d3   :  { %3596 = vmatmul.bf16.gmra.mxu2 %v10641_v12 }
 0x7d6   :  { %v3266_v46 = vpop.f32.mrf.mxu2  ;;  %v3331_v35 = vpop.f32.mrf.mxu3 }
 0x7de   :  { %v3268_v20 = vpop.f32.mrf.mxu2  ;;  %v3333_v33 = vpop.f32.mrf.mxu3 }
 0x7df   :  { %v3290_v16 = vpack.c.bf16 %v3268_v20, %v3266_v46  ;;  %v3355_v6 = vpack.c.bf16 %v3333_v33, %v3331_v35  ;;  %v10650_v46 = vld [vmem:[%s14361_s0 + $0xd0] sm:$0xff] }
 0x7e1   :  { %9228 = vmatmul.msk.bf16.gmra.mxu0 %vm3391_vm6, %v3355_v6  ;;  %9252 = vmatmul.msk.bf16.gmra.mxu1 %vm3391_vm6, %v3290_v16 }
 0x7e3   :  { %3601 = vmatmul.bf16.gmra.mxu2 %v10642_v0 }
 0x7e6   :  { %v3271_v34 = vpop.f32.mrf.mxu2  ;;  %v3336_v31 = vpop.f32.mrf.mxu3 }
 0x7ee   :  { %v3273_v49 = vpop.f32.mrf.mxu2  ;;  %v3338_v45 = vpop.f32.mrf.mxu3 }
 0x7ef   :  { %v3291_v43 = vpack.c.bf16 %v3273_v49, %v3271_v34  ;;  %v3356_v23 = vpack.c.bf16 %v3338_v45, %v3336_v31  ;;  %v10652_v34 = vld [vmem:[%s14361_s0 + $0xd8] sm:$0xff]  ;;  %v10653_v31 = vld [vmem:[%s14361_s0 + $0x120] sm:$0xff] }
 0x7f1   :  { %9229 = vmatmul.msk.bf16.gmra.mxu0 %vm3391_vm6, %v3356_v23  ;;  %9253 = vmatmul.msk.bf16.gmra.mxu1 %vm3391_vm6, %v3291_v43 }
 0x7f3   :  { %3606 = vmatmul.bf16.gmra.mxu2 %v10643_v53  ;;  %v10654_v53 = vld [vmem:[%s14361_s0 + $0xe0] sm:$0xff] }
 0x7f6   :  { %v3276_v30 = vpop.f32.mrf.mxu2  ;;  %v3341_v44 = vpop.f32.mrf.mxu3 }
 0x7fe   :  { %v3278_v1 = vpop.f32.mrf.mxu2  ;;  %v3343_v60 = vpop.f32.mrf.mxu3 }
 0x7ff   :  { %v3292_v26 = vpack.c.bf16 %v3278_v1, %v3276_v30  ;;  %v3357_v59 = vpack.c.bf16 %v3343_v60, %v3341_v44  ;;  %v10479_v1 = vld [vmem:[%s14332_s10 + $0x98] sm:$0x30]  ;;  %v9310_v60 = vld [vmem:[%s14332_s10 + $0x78] sm:$0xf] }
 0x801   :  { %9230 = vmatmul.msk.bf16.gmra.mxu0 %vm3391_vm6, %v3357_v59  ;;  %9254 = vmatmul.msk.bf16.gmra.mxu1 %vm3391_vm6, %v3292_v26  ;;  %v9343_v26 = vor.u32 %v10479_v1, %v9342_v38  ;;  %v10475_v59 = vld [vmem:[%s14332_s10 + $0x78] sm:$0x30] }
 0x803   :  { %3611 = vmatmul.bf16.gmra.mxu2 %v10644_v58  ;;  %v9311_v58 = vor.u32 %v10475_v59, %v9310_v60 }
 0x806   :  { %v3281_v5 = vpop.f32.mrf.mxu2  ;;  %v3346_v50 = vpop.f32.mrf.mxu3 }
 0x80e   :  { %v3283_v36 = vpop.f32.mrf.mxu2  ;;  %v3348_v63 = vpop.f32.mrf.mxu3 }
 0x80f   :  { %v3293_v39 = vpack.c.bf16 %v3283_v36, %v3281_v5  ;;  %v3358_v32 = vpack.c.bf16 %v3348_v63, %v3346_v50  ;;  %v4044_v5 = vsel %vm3416_vm5, %v9343_v26, 0  ;;  %v3863_v50 = vsel %vm3416_vm5, %v9311_v58, 0 }
 0x810   :  { %4050 = vmatpush.bf16.msra.mxu3 %v4044_v5  ;;  %3869 = vmatpush.bf16.msrb.mxu1 %v3863_v50 }
 0x811   :  { %9231 = vmatmul.msk.bf16.gmra.mxu0 %vm3391_vm6, %v3358_v32  ;;  %9255 = vmatmul.msk.bf16.gmra.mxu1 %vm3391_vm6, %v3293_v39 }
 0x813   :  { %3938 = vmatmul.bf16.vlgmr.msra.gmra.mxu2 %v10645_v17 }
 0x814   :  { %4654 = vmatpush.bf16.msra.mxu2 %v12325_v22 }
 0x816   :  { %v3577_v54 = vpop.f32.mrf.mxu2 }
 0x818   :  { %4655 = vmatpush.bf16.msra.mxu2 %v12317_v29 }
 0x81c   :  { %4656 = vmatpush.bf16.msra.mxu2 %v12306_v52 }
 0x81e   :  { %v3429_v15 = vpop.f32.mrf.mxu0  ;;  %v3528_v11 = vpop.f32.mrf.mxu1 }
 0x81f   :  { %v12509_v9 = vadd.f32 %v3528_v11, %v3429_v15  ;;  %v3579_v27 = vpop.f32.mrf.mxu2  ;;  %v10657_v15 = vld [vmem:[%s14361_s0 + $0x130] sm:$0xff] }
 0x820   :  { %v3617_v48 = vpack.c.bf16 %v3579_v27, %v3577_v54  ;;  %4657 = vmatpush.bf16.msra.mxu2 %v12285_v8  ;;  %v10656_v54 = vld [vmem:[%s14361_s0 + $0xe8] sm:$0xff]  ;;  %v10478_v11 = vld [vmem:[%s14332_s10 + $0x90] sm:$0xff] }
 0x821   :  { %3757 = vmatmul.bf16.vlgmr.msrb.gmra.mxu0 %v10646_v21  ;;  %4051 = vmatpush.bf16.msra.mxu3 %v10478_v11 }
 0x822   :  { %9280 = vmatmul.msk.bf16.vlgmr.msrb.gmra.mxu3 %vm3391_vm6, %v3617_v48  ;;  %4473 = vmatpush.bf16.msrb.mxu0 %v12325_v22 }
 0x823   :  { %3943 = vmatmul.bf16.gmra.mxu2 %v10647_v41  ;;  %v10477_v41 = vld [vmem:[%s14332_s10 + $0x88] sm:$0xff] }
 0x824   :  { %4658 = vmatpush.bf16.msra.mxu2 %v12277_v55 }
 0x825   :  { %4052 = vmatpush.bf16.msra.mxu3 %v10477_v41 }
 0x826   :  { %4474 = vmatpush.bf16.msrb.mxu0 %v12317_v29  ;;  %v12522_v7 = vpop.f32.mrf.mxu0  ;;  %v12524_v18 = vpop.f32.mrf.mxu1  ;;  %v10648_v29 = vld [vmem:[%s14361_s0 + $0xc8] sm:$0xff] }
 0x827   :  { %v3582_v25 = vpop.f32.mrf.mxu2  ;;  %v3531_v59 = vadd.f32 %v12524_v18, %v12522_v7 }
 0x828   :  { %4659 = vmatpush.bf16.msra.mxu2 %v12271_v40 }
 0x82a   :  { %4475 = vmatpush.bf16.msrb.mxu0 %v12306_v52 }
 0x82c   :  { %4660 = vmatpush.bf16.msra.mxu2 %v12265_v42 }
 0x82e   :  { %4476 = vmatpush.bf16.msrb.mxu0 %v12285_v8  ;;  %v3434_v22 = vpop.f32.mrf.mxu0  ;;  %v3533_v61 = vpop.f32.mrf.mxu1  ;;  %v10649_v8 = vld [vmem:[%s14361_s0 + $0x110] sm:$0xff] }
 0x82f   :  { %v12530_v51 = vadd.f32 %v3533_v61, %v3434_v22  ;;  %v3584_v10 = vpop.f32.mrf.mxu2  ;;  %v10476_v22 = vld [vmem:[%s14332_s10 + $0x80] sm:$0xff] }
 0x830   :  { %v3618_v62 = vpack.c.bf16 %v3584_v10, %v3582_v25  ;;  %4661 = vmatpush.bf16.msra.mxu2 %v12259_v28  ;;  %v10474_v25 = vld [vmem:[%s14332_s10 + $0x70] sm:$0xff]  ;;  %4053 = vmatpush.bf16.msra.mxu3 %v10476_v22 }
 0x831   :  { %3762 = vmatmul.bf16.gmra.mxu0 %v10648_v29  ;;  %3870 = vmatpush.bf16.msrb.mxu1 %v10474_v25 }
 0x832   :  { %9281 = vmatmul.msk.bf16.gmra.mxu3 %vm3391_vm6, %v3618_v62  ;;  %4477 = vmatpush.bf16.msrb.mxu0 %v12277_v55 }
 0x833   :  { %3948 = vmatmul.bf16.gmra.mxu2 %v10649_v8 }
 0x836   :  { %4478 = vmatpush.bf16.msrb.mxu0 %v12271_v40  ;;  %v12542_v52 = vpop.f32.mrf.mxu0  ;;  %v12544_v57 = vpop.f32.mrf.mxu1  ;;  %v10651_v40 = vld [vmem:[%s14361_s0 + $0x118] sm:$0xff] }
 0x837   :  { %v3587_v2 = vpop.f32.mrf.mxu2  ;;  %v3536_v11 = vadd.f32 %v12544_v57, %v12542_v52 }
 0x83a   :  { %4479 = vmatpush.bf16.msrb.mxu0 %v12265_v42 }
 0x83e   :  { %4480 = vmatpush.bf16.msrb.mxu0 %v12259_v28  ;;  %v3439_v19 = vpop.f32.mrf.mxu0  ;;  %v3538_v4 = vpop.f32.mrf.mxu1 }
 0x83f   :  { %v12548_v47 = vadd.f32 %v3538_v4, %v3439_v19  ;;  %v3589_v55 = vpop.f32.mrf.mxu2  ;;  %v10473_v19 = vld [vmem:[%s14332_s10 + $0x68] sm:$0xff]  ;;  %v10659_v4 = vld [vmem:[%s14361_s0 + $0x138] sm:$0xff] }
 0x840   :  { %v3619_v12 = vpack.c.bf16 %v3589_v55, %v3587_v2  ;;  %v10658_v2 = vld [vmem:[%s14361_s0 + $0xf0] sm:$0xff]  ;;  %3871 = vmatpush.bf16.msrb.mxu1 %v10473_v19  ;;  %v10472_v55 = vld [vmem:[%s14332_s10 + $0x60] sm:$0xff] }
 0x841   :  { %3767 = vmatmul.bf16.gmra.mxu0 %v10650_v46 }
 0x842   :  { %9282 = vmatmul.msk.bf16.gmra.mxu3 %vm3391_vm6, %v3619_v12 }
 0x843   :  { %3953 = vmatmul.bf16.gmra.mxu2 %v10651_v40 }
 0x844   :  { %3872 = vmatpush.bf16.msrb.mxu1 %v10472_v55 }
 0x846   :  { %v12557_v42 = vpop.f32.mrf.mxu0  ;;  %v12559_v28 = vpop.f32.mrf.mxu1 }
 0x847   :  { %v3592_v35 = vpop.f32.mrf.mxu2  ;;  %v3541_v19 = vadd.f32 %v12559_v28, %v12557_v42 }
 0x84e   :  { %v3444_v20 = vpop.f32.mrf.mxu0  ;;  %v3543_v33 = vpop.f32.mrf.mxu1 }
 0x84f   :  { %v12561_v16 = vadd.f32 %v3543_v33, %v3444_v20  ;;  %v3594_v6 = vpop.f32.mrf.mxu2 }
 0x850   :  { %v3620_v0 = vpack.c.bf16 %v3594_v6, %v3592_v35 }
 0x851   :  { %3772 = vmatmul.bf16.gmra.mxu0 %v10652_v34  ;;  %v10660_v34 = vld [vmem:[%s14361_s0 + $0xf8] sm:$0xff] }
 0x852   :  { %9283 = vmatmul.msk.bf16.gmra.mxu3 %vm3391_vm6, %v3620_v0 }
 0x853   :  { %3958 = vmatmul.bf16.gmra.mxu2 %v10653_v31  ;;  %v10661_v31 = vld [vmem:[%s14361_s0 + $0x180] sm:$0xff] }
 0x856   :  { %v12570_v37 = vpop.f32.mrf.mxu0  ;;  %v12572_v14 = vpop.f32.mrf.mxu1 }
 0x857   :  { %v3597_v24 = vpop.f32.mrf.mxu2 }
 0x85e   :  { %v3449_v13 = vpop.f32.mrf.mxu0  ;;  %v3548_v49 = vpop.f32.mrf.mxu1 }
 0x85f   :  { %v12574_v45 = vadd.f32 %v3548_v49, %v3449_v13  ;;  %v3599_v43 = vpop.f32.mrf.mxu2 }
 0x860   :  { %v3621_v23 = vpack.c.bf16 %v3599_v43, %v3597_v24 }
 0x861   :  { %3777 = vmatmul.bf16.gmra.mxu0 %v10654_v53  ;;  %v10662_v53 = vld [vmem:[%s14361_s0 + $0x140] sm:$0xff] }
 0x862   :  { %9284 = vmatmul.msk.bf16.gmra.mxu3 %vm3391_vm6, %v3621_v23 }
 0x863   :  { %3963 = vmatmul.bf16.gmra.mxu2 %v10655_v56  ;;  %v10663_v56 = vld [vmem:[%s14361_s0 + $0x188] sm:$0xff] }
 0x866   :  { %v12583_v30 = vpop.f32.mrf.mxu0  ;;  %v12585_v44 = vpop.f32.mrf.mxu1 }
 0x867   :  { %v3602_v3 = vpop.f32.mrf.mxu2 }
 0x86e   :  { %v3454_v36 = vpop.f32.mrf.mxu0  ;;  %v3553_v63 = vpop.f32.mrf.mxu1 }
 0x86f   :  { %v12601_v39 = vadd.f32 %v3553_v63, %v3454_v36  ;;  %v3604_v32 = vpop.f32.mrf.mxu2 }
 0x870   :  { %v3622_v17 = vpack.c.bf16 %v3604_v32, %v3602_v3  ;;  %v10664_v32 = vld [vmem:[%s14361_s0 + $0x148] sm:$0xff] }
 0x871   :  { %3782 = vmatmul.bf16.gmra.mxu0 %v10656_v54 }
 0x872   :  { %9285 = vmatmul.msk.bf16.gmra.mxu3 %vm3391_vm6, %v3622_v17 }
 0x873   :  { %3968 = vmatmul.bf16.gmra.mxu2 %v10657_v15 }
 0x876   :  { %v12613_v27 = vpop.f32.mrf.mxu0  ;;  %v12615_v48 = vpop.f32.mrf.mxu1 }
 0x877   :  { %v3607_v21 = vpop.f32.mrf.mxu2 }
 0x87e   :  { %v3459_v61 = vpop.f32.mrf.mxu0  ;;  %v3558_v10 = vpop.f32.mrf.mxu1 }
 0x87f   :  { %v12626_v62 = vadd.f32 %v3558_v10, %v3459_v61  ;;  %v3609_v29 = vpop.f32.mrf.mxu2  ;;  %v10666_v10 = vld [vmem:[%s14361_s0 + $0x150] sm:$0xff] }
 0x880   :  { %v3623_v8 = vpack.c.bf16 %v3609_v29, %v3607_v21 }
 0x881   :  { %3787 = vmatmul.bf16.gmra.mxu0 %v10658_v2 }
 0x882   :  { %9286 = vmatmul.msk.bf16.gmra.mxu3 %vm3391_vm6, %v3623_v8 }
 0x883   :  { %3973 = vmatmul.bf16.gmra.mxu2 %v10659_v4 }
 0x886   :  { %v12641_v12 = vpop.f32.mrf.mxu0  ;;  %v12643_v46 = vpop.f32.mrf.mxu1 }
 0x887   :  { %v3612_v40 = vpop.f32.mrf.mxu2 }
 0x88e   :  { %v3464_v35 = vpop.f32.mrf.mxu0  ;;  %v3563_v20 = vpop.f32.mrf.mxu1 }
 0x88f   :  { %v12645_v33 = vadd.f32 %v3563_v20, %v3464_v35  ;;  %v3614_v6 = vpop.f32.mrf.mxu2 }
 0x890   :  { %v3624_v0 = vpack.c.bf16 %v3614_v6, %v3612_v40  ;;  %v10668_v6 = vld [vmem:[%s14361_s0 + $0x158] sm:$0xff] }
 0x891   :  { %3792 = vmatmul.bf16.gmra.mxu0 %v10660_v34 }
 0x892   :  { %9287 = vmatmul.msk.bf16.gmra.mxu3 %vm3391_vm6, %v3624_v0 }
 0x893   :  { %4300 = vmatmul.bf16.vlgmr.msrb.gmra.mxu2 %v10661_v31 }
 0x896   :  { %v12654_v24 = vpop.f32.mrf.mxu0 }
 0x897   :  { %v3939_v13 = vpop.f32.mrf.mxu2 }
 0x89e   :  { %v3758_v49 = vpop.f32.mrf.mxu0 }
 0x89f   :  { %v3941_v43 = vpop.f32.mrf.mxu2 }
 0x8a0   :  { %v3979_v23 = vpack.c.bf16 %v3941_v43, %v3939_v13  ;;  %v3546_v13 = vadd.f32 %v12572_v14, %v12570_v37 }
 0x8a1   :  { %4119 = vmatmul.bf16.vlgmr.msra.gmra.mxu0 %v10662_v53 }
 0x8a2   :  { %9344 = vmatmul.msk.bf16.vlgmr.msra.gmra.mxu3 %vm3391_vm6, %v3979_v23 }
 0x8a3   :  { %4305 = vmatmul.bf16.gmra.mxu2 %v10663_v56 }
 0x8a5   :  { %v3693_v3 = vpop.f32.mrf.mxu3 }
 0x8a6   :  { %v12664_v38 = vadd.f32 %v3693_v3, %v12509_v9  ;;  %v3760_v1 = vpop.f32.mrf.mxu0  ;;  %v10665_v9 = vld [vmem:[%s14361_s0 + $0x190] sm:$0xff]  ;;  %v10670_v3 = vld [vmem:[%s14361_s0 + $0x160] sm:$0xff] }
 0x8a7   :  { %v3798_v60 = vpack.c.bf16 %v3760_v1, %v3758_v49  ;;  %v3944_v26 = vpop.f32.mrf.mxu2 }
 0x8a9   :  { %9312 = vmatmul.msk.bf16.vlgmr.msrb.gmra.mxu1 %vm3391_vm6, %v3798_v60 }
 0x8ad   :  { %v3695_v58 = vpop.f32.mrf.mxu3 }
 0x8ae   :  { %v12669_v5 = vadd.f32 %v3695_v58, %v3531_v59  ;;  %v3763_v50 = vpop.f32.mrf.mxu0  ;;  %v9406_v59 = vld [vmem:[%s14332_s10 + $0xd8] sm:$0xf]  ;;  %v10487_v58 = vld [vmem:[%s14332_s10 + $0xd8] sm:$0x30] }
 0x8af   :  { %v3946_v36 = vpop.f32.mrf.mxu2 }
 0x8b0   :  { %v3980_v63 = vpack.c.bf16 %v3946_v36, %v3944_v26  ;;  %v9374_v36 = vld [vmem:[%s14332_s10 + $0xb8] sm:$0xf] }
 0x8b1   :  { %4124 = vmatmul.bf16.gmra.mxu0 %v10664_v32 }
 0x8b2   :  { %9345 = vmatmul.msk.bf16.gmra.mxu3 %vm3391_vm6, %v3980_v63 }
 0x8b3   :  { %4310 = vmatmul.bf16.gmra.mxu2 %v10665_v9  ;;  %v3551_v9 = vadd.f32 %v12585_v44, %v12583_v30  ;;  %v10673_v30 = vld [vmem:[%s14361_s0 + $0x1b0] sm:$0xff] }
 0x8b5   :  { %v3698_v17 = vpop.f32.mrf.mxu3 }
 0x8b6   :  { %v12679_v7 = vadd.f32 %v3698_v17, %v12530_v51  ;;  %v3765_v18 = vpop.f32.mrf.mxu0  ;;  %v10667_v51 = vld [vmem:[%s14361_s0 + $0x198] sm:$0xff] }
 0x8b7   :  { %v3799_v54 = vpack.c.bf16 %v3765_v18, %v3763_v50  ;;  %v3949_v15 = vpop.f32.mrf.mxu2  ;;  %v9407_v50 = vor.u32 %v10487_v58, %v9406_v59  ;;  %v3565_v59 = vpop.f32.mrf.mxu1 }
 0x8b8   :  { %v3566_v58 = vadd.f32 %v3565_v59, %v12654_v24 }
 0x8b9   :  { %9313 = vmatmul.msk.bf16.gmra.mxu1 %vm3391_vm6, %v3799_v54  ;;  %v4406_v63 = vsel %vm3416_vm5, %v9407_v50, 0 }
 0x8ba   :  { %4412 = vmatpush.bf16.msrb.mxu3 %v4406_v63 }
 0x8bd   :  { %v3700_v21 = vpop.f32.mrf.mxu3 }
 0x8be   :  { %v12684_v41 = vadd.f32 %v3700_v21, %v3536_v11  ;;  %v3768_v25 = vpop.f32.mrf.mxu0 }
 0x8bf   :  { %v3951_v22 = vpop.f32.mrf.mxu2 }
 0x8c0   :  { %v3981_v61 = vpack.c.bf16 %v3951_v22, %v3949_v15  ;;  %v10486_v22 = vld [vmem:[%s14332_s10 + $0xd0] sm:$0xff] }
 0x8c1   :  { %4129 = vmatmul.bf16.gmra.mxu0 %v10666_v10  ;;  %4413 = vmatpush.bf16.msrb.mxu3 %v10486_v22 }
 0x8c2   :  { %9346 = vmatmul.msk.bf16.gmra.mxu3 %vm3391_vm6, %v3981_v61 }
 0x8c3   :  { %4315 = vmatmul.bf16.gmra.mxu2 %v10667_v51 }
 0x8c5   :  { %v3703_v29 = vpop.f32.mrf.mxu3 }
 0x8c6   :  { %v12694_v52 = vadd.f32 %v3703_v29, %v12548_v47  ;;  %v3770_v57 = vpop.f32.mrf.mxu0  ;;  %v10669_v47 = vld [vmem:[%s14361_s0 + $0x1a0] sm:$0xff] }
 0x8c7   :  { %v3800_v8 = vpack.c.bf16 %v3770_v57, %v3768_v25  ;;  %v3954_v2 = vpop.f32.mrf.mxu2  ;;  %v10672_v25 = vld [vmem:[%s14361_s0 + $0x168] sm:$0xff] }
 0x8c8   :  { %v10485_v57 = vld [vmem:[%s14332_s10 + $0xc8] sm:$0xff] }
 0x8c9   :  { %9314 = vmatmul.msk.bf16.gmra.mxu1 %vm3391_vm6, %v3800_v8  ;;  %4414 = vmatpush.bf16.msrb.mxu3 %v10485_v57  ;;  %v3556_v8 = vadd.f32 %v12615_v48, %v12613_v27  ;;  %v10674_v27 = vld [vmem:[%s14361_s0 + $0x170] sm:$0xff]  ;;  %v10481_v48 = vld [vmem:[%s14332_s10 + $0xa8] sm:$0xff] }
 0x8ca   :  { %v10680_v57 = vld [vmem:[%s14361_s0 + $0x1c8] sm:$0xff] }
 0x8cd   :  { %v3705_v4 = vpop.f32.mrf.mxu3 }
 0x8ce   :  { %v12699_v55 = vadd.f32 %v3705_v4, %v3541_v19  ;;  %v3773_v40 = vpop.f32.mrf.mxu0  ;;  %v10484_v19 = vld [vmem:[%s14332_s10 + $0xc0] sm:$0xff] }
 0x8cf   :  { %v3956_v35 = vpop.f32.mrf.mxu2  ;;  %4415 = vmatpush.bf16.msrb.mxu3 %v10484_v19 }
 0x8d0   :  { %v3982_v20 = vpack.c.bf16 %v3956_v35, %v3954_v2 }
 0x8d1   :  { %4134 = vmatmul.bf16.gmra.mxu0 %v10668_v6  ;;  %v10675_v6 = vld [vmem:[%s14361_s0 + $0x1b8] sm:$0xff] }
 0x8d2   :  { %9347 = vmatmul.msk.bf16.gmra.mxu3 %vm3391_vm6, %v3982_v20 }
 0x8d3   :  { %4320 = vmatmul.bf16.gmra.mxu2 %v10669_v47 }
 0x8d5   :  { %v3708_v0 = vpop.f32.mrf.mxu3 }
 0x8d6   :  { %v12709_v42 = vadd.f32 %v3708_v0, %v12561_v16  ;;  %v3775_v28 = vpop.f32.mrf.mxu0  ;;  %v10671_v16 = vld [vmem:[%s14361_s0 + $0x1a8] sm:$0xff]  ;;  %v10480_v0 = vld [vmem:[%s14332_s10 + $0xa0] sm:$0xff] }
 0x8d7   :  { %v3801_v34 = vpack.c.bf16 %v3775_v28, %v3773_v40  ;;  %v3959_v31 = vpop.f32.mrf.mxu2 }
 0x8d9   :  { %9315 = vmatmul.msk.bf16.gmra.mxu1 %vm3391_vm6, %v3801_v34 }
 0x8dd   :  { %v3710_v49 = vpop.f32.mrf.mxu3 }
 0x8de   :  { %v12714_v43 = vadd.f32 %v3710_v49, %v3546_v13  ;;  %v3778_v23 = vpop.f32.mrf.mxu0  ;;  %v3561_v49 = vadd.f32 %v12643_v46, %v12641_v12 }
 0x8df   :  { %v3961_v53 = vpop.f32.mrf.mxu2 }
 0x8e0   :  { %v3983_v56 = vpack.c.bf16 %v3961_v53, %v3959_v31 }
 0x8e1   :  { %4139 = vmatmul.bf16.gmra.mxu0 %v10670_v3 }
 0x8e2   :  { %9348 = vmatmul.msk.bf16.gmra.mxu3 %vm3391_vm6, %v3983_v56 }
 0x8e3   :  { %4325 = vmatmul.bf16.gmra.mxu2 %v10671_v16 }
 0x8e5   :  { %v3713_v1 = vpop.f32.mrf.mxu3 }
 0x8e6   :  { %v12724_v37 = vadd.f32 %v3713_v1, %v12574_v45  ;;  %v3780_v14 = vpop.f32.mrf.mxu0  ;;  %v10483_v45 = vld [vmem:[%s14332_s10 + $0xb8] sm:$0x30]  ;;  %v10677_v1 = vld [vmem:[%s14361_s0 + $0x200] sm:$0xff] }
 0x8e7   :  { %v3802_v60 = vpack.c.bf16 %v3780_v14, %v3778_v23  ;;  %v3964_v26 = vpop.f32.mrf.mxu2  ;;  %v9375_v32 = vor.u32 %v10483_v45, %v9374_v36 }
 0x8e9   :  { %9316 = vmatmul.msk.bf16.gmra.mxu1 %vm3391_vm6, %v3802_v60  ;;  %v4225_v17 = vsel %vm3416_vm5, %v9375_v32, 0 }
 0x8ea   :  { %4231 = vmatpush.bf16.msra.mxu1 %v4225_v17 }
 0x8ed   :  { %v3715_v18 = vpop.f32.mrf.mxu3 }
 0x8ee   :  { %v12743_v54 = vadd.f32 %v3715_v18, %v3551_v9  ;;  %v3783_v15 = vpop.f32.mrf.mxu0  ;;  %v10678_v9 = vld [vmem:[%s14361_s0 + $0x1c0] sm:$0xff] }
 0x8ef   :  { %v3966_v11 = vpop.f32.mrf.mxu2 }
 0x8f0   :  { %v3984_v21 = vpack.c.bf16 %v3966_v11, %v3964_v26 }
 0x8f1   :  { %4144 = vmatmul.bf16.gmra.mxu0 %v10672_v25 }
 0x8f2   :  { %9349 = vmatmul.msk.bf16.gmra.mxu3 %vm3391_vm6, %v3984_v21 }
 0x8f3   :  { %4330 = vmatmul.bf16.gmra.mxu2 %v10673_v30 }
 0x8f5   :  { %v3718_v44 = vpop.f32.mrf.mxu3 }
 0x8f6   :  { %v12756_v61 = vadd.f32 %v3718_v44, %v12601_v39  ;;  %v3785_v10 = vpop.f32.mrf.mxu0  ;;  %v10482_v39 = vld [vmem:[%s14332_s10 + $0xb0] sm:$0xff] }
 0x8f7   :  { %v3803_v51 = vpack.c.bf16 %v3785_v10, %v3783_v15  ;;  %v3969_v29 = vpop.f32.mrf.mxu2  ;;  %4232 = vmatpush.bf16.msra.mxu1 %v10482_v39 }
 0x8f9   :  { %9317 = vmatmul.msk.bf16.gmra.mxu1 %vm3391_vm6, %v3803_v51 }
 0x8fb   :  { %4233 = vmatpush.bf16.msra.mxu1 %v10481_v48 }
 0x8fd   :  { %v3720_v2 = vpop.f32.mrf.mxu3 }
 0x8fe   :  { %v12770_v4 = vadd.f32 %v3720_v2, %v3556_v8  ;;  %v3788_v40 = vpop.f32.mrf.mxu0 }
 0x8ff   :  { %v3971_v35 = vpop.f32.mrf.mxu2  ;;  %4234 = vmatpush.bf16.msra.mxu1 %v10480_v0 }
 0x900   :  { %v3985_v20 = vpack.c.bf16 %v3971_v35, %v3969_v29 }
 0x901   :  { %4149 = vmatmul.bf16.gmra.mxu0 %v10674_v27 }
 0x902   :  { %9350 = vmatmul.msk.bf16.gmra.mxu3 %vm3391_vm6, %v3985_v20 }
 0x903   :  { %4335 = vmatmul.bf16.gmra.mxu2 %v10675_v6 }
 0x905   :  { %v3723_v47 = vpop.f32.mrf.mxu3 }
 0x906   :  { %v12786_v28 = vadd.f32 %v3723_v47, %v12626_v62  ;;  %v3790_v34 = vpop.f32.mrf.mxu0  ;;  %v10676_v62 = vld [vmem:[%s14361_s0 + $0x178] sm:$0xff] }
 0x907   :  { %v3804_v31 = vpack.c.bf16 %v3790_v34, %v3788_v40  ;;  %v3974_v13 = vpop.f32.mrf.mxu2 }
 0x909   :  { %9318 = vmatmul.msk.bf16.gmra.mxu1 %vm3391_vm6, %v3804_v31  ;;  %v10682_v31 = vld [vmem:[%s14361_s0 + $0x1d0] sm:$0xff] }
 0x90d   :  { %v3725_v23 = vpop.f32.mrf.mxu3 }
 0x90e   :  { %v12791_v53 = vadd.f32 %v3725_v23, %v3561_v49  ;;  %v3793_v56 = vpop.f32.mrf.mxu0 }
 0x90f   :  { %v3976_v3 = vpop.f32.mrf.mxu2 }
 0x910   :  { %v3986_v16 = vpack.c.bf16 %v3976_v3, %v3974_v13 }
 0x911   :  { %4154 = vmatmul.bf16.gmra.mxu0 %v10676_v62 }
 0x912   :  { %9351 = vmatmul.msk.bf16.gmra.mxu3 %vm3391_vm6, %v3986_v16 }
 0x913   :  { %4662 = vmatmul.bf16.vlgmr.msra.gmra.mxu2 %v10677_v1 }
 0x915   :  { %v3728_v14 = vpop.f32.mrf.mxu3 }
 0x916   :  { %v12801_v12 = vadd.f32 %v3728_v14, %v12645_v33  ;;  %v3795_v46 = vpop.f32.mrf.mxu0  ;;  %v10679_v33 = vld [vmem:[%s14361_s0 + $0x208] sm:$0xff] }
 0x917   :  { %v3805_v60 = vpack.c.bf16 %v3795_v46, %v3793_v56  ;;  %v4301_v26 = vpop.f32.mrf.mxu2 }
 0x919   :  { %9319 = vmatmul.msk.bf16.gmra.mxu1 %vm3391_vm6, %v3805_v60 }
 0x91d   :  { %v3730_v50 = vpop.f32.mrf.mxu3 }
 0x91e   :  { %v12805_v36 = vadd.f32 %v3730_v50, %v3566_v58  ;;  %v4120_v45 = vpop.f32.mrf.mxu0  ;;  %v10684_v58 = vld [vmem:[%s14361_s0 + $0x1d8] sm:$0xff] }
 0x91f   :  { %v4303_v63 = vpop.f32.mrf.mxu2 }
 0x920   :  { %v4341_v32 = vpack.c.bf16 %v4303_v63, %v4301_v26 }
 0x921   :  { %4481 = vmatmul.bf16.vlgmr.msrb.gmra.mxu0 %v10678_v9 }
 0x922   :  { %9408 = vmatmul.msk.bf16.vlgmr.msrb.gmra.mxu3 %vm3391_vm6, %v4341_v32 }
 0x923   :  { %4667 = vmatmul.bf16.gmra.mxu2 %v10679_v33 }
 0x925   :  { %v4055_v17 = vpop.f32.mrf.mxu3 }
 0x926   :  { %v3874_v24 = vpop.f32.mrf.mxu1  ;;  %v4122_v18 = vpop.f32.mrf.mxu0 }
 0x927   :  { %v3914_v15 = vadd.f32 %v3874_v24, %v12664_v38  ;;  %v4160_v11 = vpack.c.bf16 %v4122_v18, %v4120_v45  ;;  %v4306_v21 = vpop.f32.mrf.mxu2  ;;  %v10681_v38 = vld [vmem:[%s14361_s0 + $0x210] sm:$0xff] }
 0x929   :  { %9376 = vmatmul.msk.bf16.vlgmr.msra.gmra.mxu1 %vm3391_vm6, %v4160_v11  ;;  %v12816_v25 = vadd.f32 %v4055_v17, %v3914_v15 }
 0x92d   :  { %v4057_v30 = vpop.f32.mrf.mxu3 }
 0x92e   :  { %v3876_v44 = vpop.f32.mrf.mxu1  ;;  %v4125_v22 = vpop.f32.mrf.mxu0 }
 0x92f   :  { %v3915_v10 = vadd.f32 %v3876_v44, %v12669_v5  ;;  %v4308_v51 = vpop.f32.mrf.mxu2  ;;  %v10686_v44 = vld [vmem:[%s14361_s0 + $0x1e0] sm:$0xff] }
 0x930   :  { %v4342_v29 = vpack.c.bf16 %v4308_v51, %v4306_v21 }
 0x931   :  { %4486 = vmatmul.bf16.gmra.mxu0 %v10680_v57  ;;  %v12822_v8 = vadd.f32 %v4057_v30, %v3915_v10 }
 0x932   :  { %9409 = vmatmul.msk.bf16.gmra.mxu3 %vm3391_vm6, %v4342_v29 }
 0x933   :  { %4672 = vmatmul.bf16.gmra.mxu2 %v10681_v38 }
 0x935   :  { %v4060_v2 = vpop.f32.mrf.mxu3 }
 0x936   :  { %v3879_v39 = vpop.f32.mrf.mxu1  ;;  %v4127_v19 = vpop.f32.mrf.mxu0 }
 0x937   :  { %v3916_v5 = vadd.f32 %v3879_v39, %v12679_v7  ;;  %v4161_v40 = vpack.c.bf16 %v4127_v19, %v4125_v22  ;;  %v4311_v35 = vpop.f32.mrf.mxu2  ;;  %v10683_v7 = vld [vmem:[%s14361_s0 + $0x218] sm:$0xff] }
 0x938   :  { %v10495_v39 = vld [vmem:[%s14332_s10 + $0x118] sm:$0x30] }
 0x939   :  { %9377 = vmatmul.msk.bf16.gmra.mxu1 %vm3391_vm6, %v4161_v40  ;;  %v12830_v20 = vadd.f32 %v4060_v2, %v3916_v5  ;;  %v9470_v2 = vld [vmem:[%s14332_s10 + $0x118] sm:$0xf] }
 0x93a   :  { %v9471_v19 = vor.u32 %v10495_v39, %v9470_v2  ;;  %v9438_v5 = vld [vmem:[%s14332_s10 + $0xf8] sm:$0xf] }
 0x93b   :  { %v10692_v39 = vld [vmem:[%s14361_s0 + $0x1f8] sm:$0xff] }
 0x93d   :  { %v4062_v27 = vpop.f32.mrf.mxu3 }
 0x93e   :  { %v3881_v48 = vpop.f32.mrf.mxu1  ;;  %v4130_v6 = vpop.f32.mrf.mxu0 }
 0x93f   :  { %v3917_v47 = vadd.f32 %v3881_v48, %v12684_v41  ;;  %v4313_v0 = vpop.f32.mrf.mxu2 }
 0x940   :  { %v4343_v34 = vpack.c.bf16 %v4313_v0, %v4311_v35  ;;  %v4768_v35 = vsel %vm3416_vm5, %v9471_v19, 0 }
 0x941   :  { %4491 = vmatmul.bf16.gmra.mxu0 %v10682_v31  ;;  %v12836_v13 = vadd.f32 %v4062_v27, %v3917_v47  ;;  %4774 = vmatpush.bf16.msra.mxu3 %v4768_v35 }
 0x942   :  { %9410 = vmatmul.msk.bf16.gmra.mxu3 %vm3391_vm6, %v4343_v34 }
 0x943   :  { %4677 = vmatmul.bf16.gmra.mxu2 %v10683_v7 }
 0x945   :  { %v4065_v49 = vpop.f32.mrf.mxu3 }
 0x946   :  { %v3884_v23 = vpop.f32.mrf.mxu1  ;;  %v4132_v56 = vpop.f32.mrf.mxu0 }
 0x947   :  { %v3918_v41 = vadd.f32 %v3884_v23, %v12694_v52  ;;  %v4162_v3 = vpack.c.bf16 %v4132_v56, %v4130_v6  ;;  %v4316_v16 = vpop.f32.mrf.mxu2  ;;  %v10685_v52 = vld [vmem:[%s14361_s0 + $0x220] sm:$0xff]  ;;  %v10689_v56 = vld [vmem:[%s14361_s0 + $0x230] sm:$0xff] }
 0x949   :  { %9378 = vmatmul.msk.bf16.gmra.mxu1 %vm3391_vm6, %v4162_v3  ;;  %v12844_v62 = vadd.f32 %v4065_v49, %v3918_v41  ;;  %v10688_v49 = vld [vmem:[%s14361_s0 + $0x1e8] sm:$0xff] }
 0x94d   :  { %v4067_v1 = vpop.f32.mrf.mxu3 }
 0x94e   :  { %v3886_v14 = vpop.f32.mrf.mxu1  ;;  %v4135_v46 = vpop.f32.mrf.mxu0 }
 0x94f   :  { %v3919_v60 = vadd.f32 %v3886_v14, %v12699_v55  ;;  %v4318_v26 = vpop.f32.mrf.mxu2 }
 0x950   :  { %v4344_v59 = vpack.c.bf16 %v4318_v26, %v4316_v16 }
 0x951   :  { %4496 = vmatmul.bf16.gmra.mxu0 %v10684_v58  ;;  %v12850_v50 = vadd.f32 %v4067_v1, %v3919_v60  ;;  %v10493_v60 = vld [vmem:[%s14332_s10 + $0x108] sm:$0xff]  ;;  %v10490_v58 = vld [vmem:[%s14332_s10 + $0xf0] sm:$0xff] }
 0x952   :  { %9411 = vmatmul.msk.bf16.gmra.mxu3 %vm3391_vm6, %v4344_v59 }
 0x953   :  { %4682 = vmatmul.bf16.gmra.mxu2 %v10685_v52 }
 0x955   :  { %v4070_v45 = vpop.f32.mrf.mxu3 }
 0x956   :  { %v3889_v63 = vpop.f32.mrf.mxu1  ;;  %v4137_v32 = vpop.f32.mrf.mxu0 }
 0x957   :  { %v3920_v55 = vadd.f32 %v3889_v63, %v12709_v42  ;;  %v4163_v9 = vpack.c.bf16 %v4137_v32, %v4135_v46  ;;  %v4321_v33 = vpop.f32.mrf.mxu2  ;;  %v10687_v42 = vld [vmem:[%s14361_s0 + $0x228] sm:$0xff] }
 0x959   :  { %9379 = vmatmul.msk.bf16.gmra.mxu1 %vm3391_vm6, %v4163_v9  ;;  %v12858_v17 = vadd.f32 %v4070_v45, %v3920_v55  ;;  %v10690_v9 = vld [vmem:[%s14361_s0 + $0x1f0] sm:$0xff] }
 0x95d   :  { %v4072_v24 = vpop.f32.mrf.mxu3 }
 0x95e   :  { %v3891_v18 = vpop.f32.mrf.mxu1  ;;  %v4140_v15 = vpop.f32.mrf.mxu0 }
 0x95f   :  { %v3921_v11 = vadd.f32 %v3891_v18, %v12714_v43  ;;  %v4323_v21 = vpop.f32.mrf.mxu2 }
 0x960   :  { %v4345_v30 = vpack.c.bf16 %v4323_v21, %v4321_v33  ;;  %v10489_v33 = vld [vmem:[%s14332_s10 + $0xe8] sm:$0xff] }
 0x961   :  { %4501 = vmatmul.bf16.gmra.mxu0 %v10686_v44  ;;  %v12864_v22 = vadd.f32 %v4072_v24, %v3921_v11 }
 0x962   :  { %9412 = vmatmul.msk.bf16.gmra.mxu3 %vm3391_vm6, %v4345_v30 }
 0x963   :  { %4687 = vmatmul.bf16.gmra.mxu2 %v10687_v42 }
 0x965   :  { %v4075_v10 = vpop.f32.mrf.mxu3 }
 0x966   :  { %v3894_v51 = vpop.f32.mrf.mxu1  ;;  %v4142_v29 = vpop.f32.mrf.mxu0 }
 0x967   :  { %v3922_v43 = vadd.f32 %v3894_v51, %v12724_v37  ;;  %v4164_v57 = vpack.c.bf16 %v4142_v29, %v4140_v15  ;;  %v4326_v38 = vpop.f32.mrf.mxu2  ;;  %v10491_v37 = vld [vmem:[%s14332_s10 + $0xf8] sm:$0x30]  ;;  %v10488_v15 = vld [vmem:[%s14332_s10 + $0xe0] sm:$0xff] }
 0x968   :  { %v9439_v27 = vor.u32 %v10491_v37, %v9438_v5 }
 0x969   :  { %9380 = vmatmul.msk.bf16.gmra.mxu1 %vm3391_vm6, %v4164_v57  ;;  %v12884_v40 = vadd.f32 %v4075_v10, %v3922_v43 }
 0x96a   :  { %v4587_v48 = vsel %vm3416_vm5, %v9439_v27, 0 }
 0x96b   :  { %4593 = vmatpush.bf16.msrb.mxu1 %v4587_v48 }
 0x96d   :  { %v4077_v6 = vpop.f32.mrf.mxu3 }
 0x96e   :  { %v3896_v47 = vpop.f32.mrf.mxu1  ;;  %v4145_v0 = vpop.f32.mrf.mxu0 }
 0x96f   :  { %v3923_v34 = vadd.f32 %v3896_v47, %v12743_v54  ;;  %v4328_v31 = vpop.f32.mrf.mxu2  ;;  %v10494_v54 = vld [vmem:[%s14332_s10 + $0x110] sm:$0xff]  ;;  %4594 = vmatpush.bf16.msrb.mxu1 %v10490_v58 }
 0x970   :  { %v4346_v7 = vpack.c.bf16 %v4328_v31, %v4326_v38  ;;  %4775 = vmatpush.bf16.msra.mxu3 %v10494_v54 }
 0x971   :  { %4506 = vmatmul.bf16.gmra.mxu0 %v10688_v49  ;;  %v12892_v23 = vadd.f32 %v4077_v6, %v3923_v34 }
 0x972   :  { %9413 = vmatmul.msk.bf16.gmra.mxu3 %vm3391_vm6, %v4346_v7 }
 0x973   :  { %4692 = vmatmul.bf16.gmra.mxu2 %v10689_v56  ;;  %4595 = vmatpush.bf16.msrb.mxu1 %v10489_v33 }
 0x974   :  { %4776 = vmatpush.bf16.msra.mxu3 %v10493_v60 }
 0x975   :  { %v4080_v41 = vpop.f32.mrf.mxu3 }
 0x976   :  { %v3899_v3 = vpop.f32.mrf.mxu1  ;;  %v4147_v16 = vpop.f32.mrf.mxu0 }
 0x977   :  { %v3924_v1 = vadd.f32 %v3899_v3, %v12756_v61  ;;  %v4165_v14 = vpack.c.bf16 %v4147_v16, %v4145_v0  ;;  %v4331_v46 = vpop.f32.mrf.mxu2  ;;  %v10492_v61 = vld [vmem:[%s14332_s10 + $0x100] sm:$0xff]  ;;  %4596 = vmatpush.bf16.msrb.mxu1 %v10488_v15 }
 0x978   :  { %4777 = vmatpush.bf16.msra.mxu3 %v10492_v61 }
 0x979   :  { %9381 = vmatmul.msk.bf16.gmra.mxu1 %vm3391_vm6, %v4165_v14  ;;  %v12906_v26 = vadd.f32 %v4080_v41, %v3924_v1 }
 0x97d   :  { %v4082_v59 = vpop.f32.mrf.mxu3 }
 0x97e   :  { %v3901_v52 = vpop.f32.mrf.mxu1  ;;  %v4150_v45 = vpop.f32.mrf.mxu0 }
 0x97f   :  { %v3925_v63 = vadd.f32 %v3901_v52, %v12770_v4  ;;  %v4333_v32 = vpop.f32.mrf.mxu2  ;;  %v10691_v4 = vld [vmem:[%s14361_s0 + $0x238] sm:$0xff] }
 0x980   :  { %v4347_v55 = vpack.c.bf16 %v4333_v32, %v4331_v46 }
 0x981   :  { %4511 = vmatmul.bf16.gmra.mxu0 %v10690_v9  ;;  %v12921_v24 = vadd.f32 %v4082_v59, %v3925_v63 }
 0x982   :  { %9414 = vmatmul.msk.bf16.gmra.mxu3 %vm3391_vm6, %v4347_v55 }
 0x983   :  { %4697 = vmatmul.bf16.gmra.mxu2 %v10691_v4 }
 0x985   :  { %v4085_v18 = vpop.f32.mrf.mxu3 }
 0x986   :  { %v3904_v11 = vpop.f32.mrf.mxu1  ;;  %v4152_v21 = vpop.f32.mrf.mxu0 }
 0x987   :  { %v3926_v30 = vadd.f32 %v3904_v11, %v12786_v28  ;;  %v4166_v44 = vpack.c.bf16 %v4152_v21, %v4150_v45  ;;  %v4336_v42 = vpop.f32.mrf.mxu2 }
 0x989   :  { %9382 = vmatmul.msk.bf16.gmra.mxu1 %vm3391_vm6, %v4166_v44  ;;  %v12932_v10 = vadd.f32 %v4085_v18, %v3926_v30 }
 0x98d   :  { %v4087_v51 = vpop.f32.mrf.mxu3 }
 0x98e   :  { %v3906_v29 = vpop.f32.mrf.mxu1  ;;  %v4155_v43 = vpop.f32.mrf.mxu0 }
 0x98f   :  { %v3927_v57 = vadd.f32 %v3906_v29, %v12791_v53  ;;  %v4338_v38 = vpop.f32.mrf.mxu2 }
 0x990   :  { %v4348_v2 = vpack.c.bf16 %v4338_v38, %v4336_v42 }
 0x991   :  { %4516 = vmatmul.bf16.gmra.mxu0 %v10692_v39  ;;  %v12938_v28 = vadd.f32 %v4087_v51, %v3927_v57 }
 0x992   :  { %9415 = vmatmul.msk.bf16.gmra.mxu3 %vm3391_vm6, %v4348_v2 }
 0x995   :  { %v4090_v19 = vpop.f32.mrf.mxu3 }
 0x996   :  { %v3909_v5 = vpop.f32.mrf.mxu1  ;;  %v4157_v37 = vpop.f32.mrf.mxu0 }
 0x997   :  { %v3928_v35 = vadd.f32 %v3909_v5, %v12801_v12  ;;  %v4167_v27 = vpack.c.bf16 %v4157_v37, %v4155_v43  ;;  %v4663_v48 = vpop.f32.mrf.mxu2 }
 0x999   :  { %9383 = vmatmul.msk.bf16.gmra.mxu1 %vm3391_vm6, %v4167_v27  ;;  %v12943_v53 = vadd.f32 %v4090_v19, %v3928_v35 }
 0x99d   :  { %v4092_v6 = vpop.f32.mrf.mxu3 }
 0x99e   :  { %v3911_v47 = vpop.f32.mrf.mxu1  ;;  %v4482_v0 = vpop.f32.mrf.mxu0 }
 0x99f   :  { %v3929_v34 = vadd.f32 %v3911_v47, %v12805_v36  ;;  %v4665_v31 = vpop.f32.mrf.mxu2 }
 0x9a0   :  { %v4703_v7 = vpack.c.bf16 %v4665_v31, %v4663_v48 }
 0x9a1   :  { %v12946_v49 = vadd.f32 %v4092_v6, %v3929_v34 }
 0x9a2   :  { %9472 = vmatmul.msk.bf16.vlgmr.msra.gmra.mxu3 %vm3391_vm6, %v4703_v7 }
 0x9a5   :  { %v4417_v56 = vpop.f32.mrf.mxu3 }
 0x9a6   :  { %v4236_v41 = vpop.f32.mrf.mxu1  ;;  %v4484_v12 = vpop.f32.mrf.mxu0 }
 0x9a7   :  { %v4276_v54 = vadd.f32 %v4236_v41, %v12816_v25  ;;  %v4522_v3 = vpack.c.bf16 %v4484_v12, %v4482_v0  ;;  %v4668_v16 = vpop.f32.mrf.mxu2 }
 0x9a9   :  { %9440 = vmatmul.msk.bf16.vlgmr.msrb.gmra.mxu1 %vm3391_vm6, %v4522_v3  ;;  %v12951_v1 = vadd.f32 %v4417_v56, %v4276_v54 }
 0x9ad   :  { %v4419_v14 = vpop.f32.mrf.mxu3 }
 0x9ae   :  { %v4238_v46 = vpop.f32.mrf.mxu1  ;;  %v4487_v36 = vpop.f32.mrf.mxu0 }
 0x9af   :  { %v4277_v60 = vadd.f32 %v4238_v46, %v12822_v8  ;;  %v4670_v59 = vpop.f32.mrf.mxu2 }
 0x9b0   :  { %v4704_v58 = vpack.c.bf16 %v4670_v59, %v4668_v16 }
 0x9b1   :  { %v12954_v61 = vadd.f32 %v4419_v14, %v4277_v60 }
 0x9b2   :  { %9473 = vmatmul.msk.bf16.gmra.mxu3 %vm3391_vm6, %v4704_v58 }
 0x9b5   :  { %v4422_v52 = vpop.f32.mrf.mxu3 }
 0x9b6   :  { %v4241_v45 = vpop.f32.mrf.mxu1  ;;  %v4489_v25 = vpop.f32.mrf.mxu0 }
 0x9b7   :  { %v4278_v63 = vadd.f32 %v4241_v45, %v12830_v20  ;;  %v4523_v32 = vpack.c.bf16 %v4489_v25, %v4487_v36  ;;  %v4673_v55 = vpop.f32.mrf.mxu2 }
 0x9b9   :  { %9441 = vmatmul.msk.bf16.gmra.mxu1 %vm3391_vm6, %v4523_v32  ;;  %v12959_v9 = vadd.f32 %v4422_v52, %v4278_v63 }
 0x9bd   :  { %v4424_v33 = vpop.f32.mrf.mxu3 }
 0x9be   :  { %v4243_v4 = vpop.f32.mrf.mxu1  ;;  %v4492_v8 = vpop.f32.mrf.mxu0 }
 0x9bf   :  { %v4279_v18 = vadd.f32 %v4243_v4, %v12836_v13  ;;  %v4675_v15 = vpop.f32.mrf.mxu2 }
 0x9c0   :  { %v4705_v11 = vpack.c.bf16 %v4675_v15, %v4673_v55 }
 0x9c1   :  { %v12962_v21 = vadd.f32 %v4424_v33, %v4279_v18 }
 0x9c2   :  { %9474 = vmatmul.msk.bf16.gmra.mxu3 %vm3391_vm6, %v4705_v11 }
 0x9c5   :  { %v4427_v30 = vpop.f32.mrf.mxu3 }
 0x9c6   :  { %v4246_v44 = vpop.f32.mrf.mxu1  ;;  %v4494_v20 = vpop.f32.mrf.mxu0 }
 0x9c7   :  { %v4280_v42 = vadd.f32 %v4246_v44, %v12844_v62  ;;  %v4524_v51 = vpack.c.bf16 %v4494_v20, %v4492_v8  ;;  %v4678_v29 = vpop.f32.mrf.mxu2 }
 0x9c9   :  { %9442 = vmatmul.msk.bf16.gmra.mxu1 %vm3391_vm6, %v4524_v51  ;;  %v12967_v43 = vadd.f32 %v4427_v30, %v4280_v42 }
 0x9cd   :  { %v4429_v57 = vpop.f32.mrf.mxu3 }
 0x9ce   :  { %v4248_v38 = vpop.f32.mrf.mxu1  ;;  %v4497_v13 = vpop.f32.mrf.mxu0 }
 0x9cf   :  { %v4281_v2 = vadd.f32 %v4248_v38, %v12850_v50  ;;  %v4680_v39 = vpop.f32.mrf.mxu2 }
 0x9d0   :  { %v4706_v19 = vpack.c.bf16 %v4680_v39, %v4678_v29 }
 0x9d1   :  { %v12970_v5 = vadd.f32 %v4429_v57, %v4281_v2 }
 0x9d2   :  { %9475 = vmatmul.msk.bf16.gmra.mxu3 %vm3391_vm6, %v4706_v19 }
 0x9d5   :  { %v4432_v37 = vpop.f32.mrf.mxu3 }
 0x9d6   :  { %v4251_v35 = vpop.f32.mrf.mxu1  ;;  %v4499_v62 = vpop.f32.mrf.mxu0 }
 0x9d7   :  { %v4282_v27 = vadd.f32 %v4251_v35, %v12858_v17  ;;  %v4525_v48 = vpack.c.bf16 %v4499_v62, %v4497_v13  ;;  %v4683_v6 = vpop.f32.mrf.mxu2 }
 0x9d9   :  { %9443 = vmatmul.msk.bf16.gmra.mxu1 %vm3391_vm6, %v4525_v48  ;;  %v12975_v47 = vadd.f32 %v4432_v37, %v4282_v27 }
 0x9dd   :  { %v4434_v0 = vpop.f32.mrf.mxu3 }
 0x9de   :  { %v4253_v34 = vpop.f32.mrf.mxu1  ;;  %v4502_v50 = vpop.f32.mrf.mxu0 }
 0x9df   :  { %v4283_v31 = vadd.f32 %v4253_v34, %v12864_v22  ;;  %v4685_v7 = vpop.f32.mrf.mxu2 }
 0x9e0   :  { %v4707_v56 = vpack.c.bf16 %v4685_v7, %v4683_v6 }
 0x9e1   :  { %v12978_v41 = vadd.f32 %v4434_v0, %v4283_v31  ;;  %v13020_v31 = vld [vmem:[%s14333_s11] ss:$0 sm:$0xff] }
 0x9e2   :  { %9476 = vmatmul.msk.bf16.gmra.mxu3 %vm3391_vm6, %v4707_v56 }
 0x9e5   :  { %v4437_v12 = vpop.f32.mrf.mxu3 }
 0x9e6   :  { %v4256_v54 = vpop.f32.mrf.mxu1  ;;  %v4504_v17 = vpop.f32.mrf.mxu0 }
 0x9e7   :  { %v4284_v3 = vadd.f32 %v4256_v54, %v12884_v40  ;;  %v4526_v16 = vpack.c.bf16 %v4504_v17, %v4502_v50  ;;  %v4688_v14 = vpop.f32.mrf.mxu2 }
 0x9e9   :  { %9444 = vmatmul.msk.bf16.gmra.mxu1 %vm3391_vm6, %v4526_v16  ;;  %v12983_v46 = vadd.f32 %v4437_v12, %v4284_v3 }
 0x9ed   :  { %v12985_v36 = vpop.f32.mrf.mxu3 }
 0x9ee   :  { %v12987_v22 = vpop.f32.mrf.mxu1  ;;  %v4507_v60 = vpop.f32.mrf.mxu0 }
 0x9ef   :  { %v4690_v59 = vpop.f32.mrf.mxu2 }
 0x9f0   :  { %v4708_v58 = vpack.c.bf16 %v4690_v59, %v4688_v14 }
 0x9f2   :  { %9477 = vmatmul.msk.bf16.gmra.mxu3 %vm3391_vm6, %v4708_v58 }
 0x9f5   :  { %v4442_v52 = vpop.f32.mrf.mxu3 }
 0x9f6   :  { %v4261_v45 = vpop.f32.mrf.mxu1  ;;  %v4509_v25 = vpop.f32.mrf.mxu0 }
 0x9f7   :  { %v4286_v40 = vadd.f32 %v4261_v45, %v12906_v26  ;;  %v4527_v63 = vpack.c.bf16 %v4509_v25, %v4507_v60  ;;  %v4693_v32 = vpop.f32.mrf.mxu2 }
 0x9f9   :  { %9445 = vmatmul.msk.bf16.gmra.mxu1 %vm3391_vm6, %v4527_v63  ;;  %v12992_v55 = vadd.f32 %v4442_v52, %v4286_v40 }
 0x9fd   :  { %v12994_v33 = vpop.f32.mrf.mxu3 }
 0x9fe   :  { %v12996_v4 = vpop.f32.mrf.mxu1  ;;  %v4512_v8 = vpop.f32.mrf.mxu0 }
 0x9ff   :  { %v4695_v18 = vpop.f32.mrf.mxu2 }
 0xa00   :  { %v4709_v15 = vpack.c.bf16 %v4695_v18, %v4693_v32 }
 0xa02   :  { %9478 = vmatmul.msk.bf16.gmra.mxu3 %vm3391_vm6, %v4709_v15 }
 0xa05   :  { %v4447_v11 = vpop.f32.mrf.mxu3 }
 0xa06   :  { %v4266_v30 = vpop.f32.mrf.mxu1  ;;  %v4514_v44 = vpop.f32.mrf.mxu0 }
 0xa07   :  { %v4288_v26 = vadd.f32 %v4266_v30, %v12932_v10  ;;  %v4528_v20 = vpack.c.bf16 %v4514_v44, %v4512_v8  ;;  %v4698_v42 = vpop.f32.mrf.mxu2 }
 0xa09   :  { %9446 = vmatmul.msk.bf16.gmra.mxu1 %vm3391_vm6, %v4528_v20  ;;  %v13001_v51 = vadd.f32 %v4447_v11, %v4288_v26 }
 0xa0d   :  { %v13003_v29 = vpop.f32.mrf.mxu3 }
 0xa0e   :  { %v13005_v57 = vpop.f32.mrf.mxu1  ;;  %v4517_v38 = vpop.f32.mrf.mxu0 }
 0xa0f   :  { %v4700_v13 = vpop.f32.mrf.mxu2 }
 0xa10   :  { %v4710_v2 = vpack.c.bf16 %v4700_v13, %v4698_v42 }
 0xa12   :  { %9479 = vmatmul.msk.bf16.gmra.mxu3 %vm3391_vm6, %v4710_v2 }
 0xa15   :  { %v4452_v39 = vpop.f32.mrf.mxu3 }
 0xa16   :  { %v4271_v19 = vpop.f32.mrf.mxu1  ;;  %v4519_v37 = vpop.f32.mrf.mxu0 }
 0xa17   :  { %v4290_v10 = vadd.f32 %v4271_v19, %v12943_v53  ;;  %v4529_v35 = vpack.c.bf16 %v4519_v37, %v4517_v38 }
 0xa19   :  { %9447 = vmatmul.msk.bf16.gmra.mxu1 %vm3391_vm6, %v4529_v35  ;;  %v13010_v62 = vadd.f32 %v4452_v39, %v4290_v10 }
 0xa1d   :  { %v13012_v27 = vpop.f32.mrf.mxu3 }
 0xa1e   :  { %v13014_v48 = vpop.f32.mrf.mxu1 }
 0xa25   :  { %v4779_v6 = vpop.f32.mrf.mxu3 }
 0xa26   :  { %v4598_v0 = vpop.f32.mrf.mxu1 }
 0xa27   :  { %v4638_v34 = vadd.f32 %v4598_v0, %v12951_v1 }
 0xa29   :  { %v4819_v50 = vadd.f32 %v4779_v6, %v4638_v34 }
 0xa2b   :  { %v4839_v12 = vadd.f32 %v13020_v31, %v4819_v50 }
 0xa2d   :  { %v4781_v53 = vpop.f32.mrf.mxu3  ;;  %v4855_v3 = vmax.f32 %v4839_v12, 0.0 }
 0xa2e   :  { %v4600_v7 = vpop.f32.mrf.mxu1 }
 0xa2f   :  { %v4639_v56 = vadd.f32 %v4600_v7, %v12954_v61 }
 0xa31   :  { %v4820_v54 = vadd.f32 %v4781_v53, %v4639_v56 }
 0xa33   :  { %v4840_v17 = vadd.f32 %v13020_v31, %v4820_v54 }
 0xa35   :  { %v4856_v16 = vmax.f32 %v4840_v17, 0.0  ;;  %v4784_v14 = vpop.f32.mrf.mxu3 }
 0xa36   :  { %v4603_v60 = vpop.f32.mrf.mxu1 }
 0xa37   :  { %v13025_v1 = vpack.c.bf16 %v4856_v16, %v4855_v3  ;;  %v4640_v59 = vadd.f32 %v4603_v60, %v12959_v9 }
 0xa39   :  { %v4821_v58 = vadd.f32 %v4784_v14, %v4640_v59 }
 0xa3b   :  { %v4841_v61 = vadd.f32 %v13020_v31, %v4821_v58 }
 0xa3d   :  { %v4786_v52 = vpop.f32.mrf.mxu3  ;;  %v4857_v32 = vmax.f32 %v4841_v61, 0.0 }
 0xa3e   :  { %v4605_v45 = vpop.f32.mrf.mxu1 }
 0xa3f   :  { %v4641_v25 = vadd.f32 %v4605_v45, %v12962_v21 }
 0xa41   :  { %v4822_v40 = vadd.f32 %v4786_v52, %v4641_v25 }
 0xa43   :  { %v4842_v63 = vadd.f32 %v13020_v31, %v4822_v40 }
 0xa45   :  { %v4858_v8 = vmax.f32 %v4842_v63, 0.0  ;;  %v4789_v18 = vpop.f32.mrf.mxu3 }
 0xa46   :  { %v4608_v15 = vpop.f32.mrf.mxu1 }
 0xa47   :  { %v13031_v11 = vpack.c.bf16 %v4858_v8, %v4857_v32  ;;  %v4642_v30 = vadd.f32 %v4608_v15, %v12967_v43 }
 0xa49   :  { %v4823_v44 = vadd.f32 %v4789_v18, %v4642_v30 }
 0xa4b   :  { %v4843_v21 = vadd.f32 %v13020_v31, %v4823_v44 }
 0xa4d   :  { %v4791_v9 = vpop.f32.mrf.mxu3  ;;  %v4859_v13 = vmax.f32 %v4843_v21, 0.0 }
 0xa4e   :  { %v4610_v26 = vpop.f32.mrf.mxu1 }
 0xa4f   :  { %v4643_v20 = vadd.f32 %v4610_v26, %v12970_v5 }
 0xa51   :  { %v4824_v42 = vadd.f32 %v4791_v9, %v4643_v20  ;;  %v10501_v20 = vld [vmem:[%s14334_s12 + $0x28] sm:$0xff] }
 0xa53   :  { %v4844_v38 = vadd.f32 %v13020_v31, %v4824_v42 }
 0xa55   :  { %v4860_v2 = vmax.f32 %v4844_v38, 0.0  ;;  %v4794_v39 = vpop.f32.mrf.mxu3 }
 0xa56   :  { %v4613_v19 = vpop.f32.mrf.mxu1 }
 0xa57   :  { %v13037_v37 = vpack.c.bf16 %v4860_v2, %v4859_v13  ;;  %v4644_v10 = vadd.f32 %v4613_v19, %v12975_v47  ;;  %v4285_v47 = vadd.f32 %v12987_v22, %v12892_v23  ;;  %v4287_v23 = vadd.f32 %v12996_v4, %v12921_v24  ;;  %v10503_v22 = vld [vmem:[%s14334_s12 + $0x38] sm:$0x30]  ;;  %v10500_v2 = vld [vmem:[%s14334_s12 + $0x20] sm:$0xff] }
 0xa59   :  { %v4825_v35 = vadd.f32 %v4794_v39, %v4644_v10  ;;  %v4468_v30 = vadd.f32 %v12994_v33, %v4287_v23  ;;  %v4289_v39 = vadd.f32 %v13005_v57, %v12938_v28  ;;  %v4291_v28 = vadd.f32 %v13014_v48, %v12946_v49  ;;  %v10693_v49 = vld [vmem:[%s14361_s0] sm:$0xff]  ;;  %v10696_v48 = vld [vmem:[%s14361_s0 + $0x48] sm:$0xff] }
 0xa5a   :  { %v10702_v23 = vld [vmem:[%s14361_s0 + $0x60] sm:$0xff] }
 0xa5b   :  { %v4845_v5 = vadd.f32 %v13020_v31, %v4825_v35 }
 0xa5d   :  { %v4796_v43 = vpop.f32.mrf.mxu3  ;;  %v4861_v53 = vmax.f32 %v4845_v5, 0.0 }
 0xa5e   :  { %v4615_v6 = vpop.f32.mrf.mxu1 }
 0xa5f   :  { %v4645_v0 = vadd.f32 %v4615_v6, %v12978_v41  ;;  %v4466_v41 = vadd.f32 %v12985_v36, %v4285_v47  ;;  %v9502_v36 = vld [vmem:[%s14334_s12 + $0x38] sm:$0xf] }
 0xa60   :  { %v9503_v32 = vor.u32 %v10503_v22, %v9502_v36  ;;  %v10704_v36 = vld [vmem:[%s14361_s0 + $0x68] sm:$0xff]  ;;  %v9526_v22 = vld [vmem:[%s14334_s12 + $0x18] sm:$0xf] }
 0xa61   :  { %v4826_v34 = vadd.f32 %v4796_v43, %v4645_v0  ;;  %v4470_v43 = vadd.f32 %v13003_v29, %v4289_v39  ;;  %v4472_v29 = vadd.f32 %v13012_v27, %v4291_v28  ;;  %v10695_v27 = vld [vmem:[%s14361_s0 + $0x8] sm:$0xff] }
 0xa62   :  { %v5058_v8 = vsel %vm3416_vm5, %v9503_v32, 0  ;;  %v10499_v32 = vld [vmem:[%s14334_s12 + $0x18] sm:$0x30] }
 0xa63   :  { %v4846_v50 = vadd.f32 %v13020_v31, %v4826_v34  ;;  %5064 = vmatpush.bf16.msrb.mxu2 %v5058_v8  ;;  %v9527_v8 = vor.u32 %v10499_v32, %v9526_v22  ;;  %v10506_v32 = vld [vmem:[%s14334_s12 + $0x50] sm:$0xff] }
 0xa65   :  { %v4862_v7 = vmax.f32 %v4846_v50, 0.0  ;;  %v4799_v56 = vpop.f32.mrf.mxu3 }
 0xa66   :  { %v4618_v12 = vpop.f32.mrf.mxu1 }
 0xa67   :  { %v13043_v54 = vpack.c.bf16 %v4862_v7, %v4861_v53  ;;  %v4646_v17 = vadd.f32 %v4618_v12, %v12983_v46 }
 0xa69   :  { %v4827_v3 = vadd.f32 %v4799_v56, %v4646_v17 }
 0xa6b   :  { %v4847_v59 = vadd.f32 %v13020_v31, %v4827_v3 }
 0xa6d   :  { %v4801_v16 = vpop.f32.mrf.mxu3  ;;  %v4863_v45 = vmax.f32 %v4847_v59, 0.0 }
 0xa6e   :  { %v4620_v14 = vpop.f32.mrf.mxu1 }
 0xa6f   :  { %v4647_v60 = vadd.f32 %v4620_v14, %v4466_v41 }
 0xa71   :  { %v4828_v58 = vadd.f32 %v4801_v16, %v4647_v60 }
 0xa73   :  { %v4848_v52 = vadd.f32 %v13020_v31, %v4828_v58 }
 0xa75   :  { %v4864_v25 = vmax.f32 %v4848_v52, 0.0  ;;  %v4804_v61 = vpop.f32.mrf.mxu3 }
 0xa76   :  { %v4623_v40 = vpop.f32.mrf.mxu1 }
 0xa77   :  { %v13051_v63 = vpack.c.bf16 %v4864_v25, %v4863_v45  ;;  %v4648_v46 = vadd.f32 %v4623_v40, %v12992_v55  ;;  %v10502_v55 = vld [vmem:[%s14334_s12 + $0x30] sm:$0xff]  ;;  %v10699_v25 = vld [vmem:[%s14361_s0 + $0x18] sm:$0xff]  ;;  %v10701_v40 = vld [vmem:[%s14361_s0 + $0x20] sm:$0xff] }
 0xa78   :  { %5065 = vmatpush.bf16.msrb.mxu2 %v10502_v55  ;;  %v10698_v45 = vld [vmem:[%s14361_s0 + $0x50] sm:$0xff]  ;;  %v10496_v55 = vld [vmem:[%s14334_s12] sm:$0xff] }
 0xa79   :  { %v4829_v18 = vadd.f32 %v4804_v61, %v4648_v46  ;;  %v10700_v61 = vld [vmem:[%s14361_s0 + $0x58] sm:$0xff]  ;;  %v10703_v46 = vld [vmem:[%s14361_s0 + $0x28] sm:$0xff] }
 0xa7b   :  { %v4849_v4 = vadd.f32 %v13020_v31, %v4829_v18  ;;  %v5157_v18 = vsel %vm3416_vm5, %v9527_v8, 0 }
 0xa7c   :  { %5066 = vmatpush.bf16.msrb.mxu2 %v10501_v20  ;;  %5163 = vmatpush.bf16.msrb.mxu3 %v5157_v18 }
 0xa7d   :  { %v4806_v15 = vpop.f32.mrf.mxu3  ;;  %v4865_v21 = vmax.f32 %v4849_v4, 0.0  ;;  %v10707_v4 = vld [vmem:[%s14361_s0 + $0x38] sm:$0xff] }
 0xa7e   :  { %v4625_v44 = vpop.f32.mrf.mxu1 }
 0xa7f   :  { %v4649_v24 = vadd.f32 %v4625_v44, %v4468_v30  ;;  %v10705_v30 = vld [vmem:[%s14361_s0 + $0x30] sm:$0xff] }
 0xa80   :  { %5067 = vmatpush.bf16.msrb.mxu2 %v10500_v2  ;;  %v10706_v44 = vld [vmem:[%s14361_s0 + $0x70] sm:$0xff] }
 0xa81   :  { %v4830_v9 = vadd.f32 %v4806_v15, %v4649_v24  ;;  %v10498_v15 = vld [vmem:[%s14334_s12 + $0x10] sm:$0xff]  ;;  %v10497_v24 = vld [vmem:[%s14334_s12 + $0x8] sm:$0xff] }
 0xa82   :  { %5164 = vmatpush.bf16.msrb.mxu3 %v10498_v15  ;;  %v10715_v15 = vld [vmem:[%s14361_s0 + $0xb0] sm:$0xff] }
 0xa83   :  { %v4850_v26 = vadd.f32 %v13020_v31, %v4830_v9  ;;  %v10708_v9 = vld [vmem:[%s14361_s0 + $0x78] sm:$0xff] }
 0xa85   :  { %v4866_v42 = vmax.f32 %v4850_v26, 0.0  ;;  %v4809_v33 = vpop.f32.mrf.mxu3 }
 0xa86   :  { %v4628_v38 = vpop.f32.mrf.mxu1  ;;  %5165 = vmatpush.bf16.msrb.mxu3 %v10497_v24 }
 0xa87   :  { %v13072_v13 = vpack.c.bf16 %v4866_v42, %v4865_v21  ;;  %v4650_v19 = vadd.f32 %v4628_v38, %v13001_v51  ;;  %v10709_v21 = vld [vmem:[%s14361_s0 + $0x80] sm:$0xff] }
 0xa89   :  { %v4831_v10 = vadd.f32 %v4809_v33, %v4650_v19 }
 0xa8a   :  { %5166 = vmatpush.bf16.msrb.mxu3 %v10496_v55 }
 0xa8b   :  { %v4851_v5 = vadd.f32 %v13020_v31, %v4831_v10  ;;  %v10710_v10 = vld [vmem:[%s14361_s0 + $0x88] sm:$0xff] }
 0xa8d   :  { %v4811_v35 = vpop.f32.mrf.mxu3  ;;  %v4867_v53 = vmax.f32 %v4851_v5, 0.0 }
 0xa8e   :  { %v4630_v6 = vpop.f32.mrf.mxu1 }
 0xa8f   :  { %v4651_v0 = vadd.f32 %v4630_v6, %v4470_v43 }
 0xa91   :  { %v4832_v34 = vadd.f32 %v4811_v35, %v4651_v0 }
 0xa93   :  { %v4852_v50 = vadd.f32 %v13020_v31, %v4832_v34 }
 0xa95   :  { %v4868_v7 = vmax.f32 %v4852_v50, 0.0  ;;  %v4814_v56 = vpop.f32.mrf.mxu3  ;;  %v10711_v50 = vld [vmem:[%s14361_s0 + $0x90] sm:$0xff] }
 0xa96   :  { %v4633_v12 = vpop.f32.mrf.mxu1 }
 0xa97   :  { %v13083_v17 = vpack.c.bf16 %v4868_v7, %v4867_v53  ;;  %v4652_v51 = vadd.f32 %v4633_v12, %v13010_v62  ;;  %v10694_v62 = vld [vmem:[%s14361_s0 + $0x40] sm:$0xff] }
 0xa99   :  { %v4833_v57 = vadd.f32 %v4814_v56, %v4652_v51 }
 0xa9b   :  { %v4853_v41 = vadd.f32 %v13020_v31, %v4833_v57  ;;  %v10712_v57 = vld [vmem:[%s14361_s0 + $0x98] sm:$0xff] }
 0xa9d   :  { %v4816_v16 = vpop.f32.mrf.mxu3  ;;  %v4869_v59 = vmax.f32 %v4853_v41, 0.0 }
 0xa9e   :  { %v4635_v47 = vpop.f32.mrf.mxu1 }
 0xa9f   :  { %v4653_v3 = vadd.f32 %v4635_v47, %v4472_v29 }
 0xaa1   :  { %v4834_v14 = vadd.f32 %v4816_v16, %v4653_v3 }
 0xaa3   :  { %v4854_v60 = vadd.f32 %v13020_v31, %v4834_v14  ;;  %v10697_v31 = vld [vmem:[%s14361_s0 + $0x10] sm:$0xff] }
 0xaa5   :  { %v4870_v58 = vmax.f32 %v4854_v60, 0.0  ;;  %v10713_v60 = vld [vmem:[%s14361_s0 + $0xa0] sm:$0xff] }
 0xaa7   :  { %v13091_v52 = vpack.c.bf16 %v4870_v58, %v4869_v59 }
 0xaa9   :  { %4879 = vmatpush.bf16.msra.mxu0 %v13091_v52  ;;  %4944 = vmatpush.bf16.msra.mxu1 %v13091_v52 }
 0xaaa   :  { %5389 = vmatpush.bf16.msra.mxu2 %v13091_v52 }
 0xaad   :  { %4880 = vmatpush.bf16.msra.mxu0 %v13083_v17  ;;  %4945 = vmatpush.bf16.msra.mxu1 %v13083_v17 }
 0xaae   :  { %5390 = vmatpush.bf16.msra.mxu2 %v13083_v17 }
 0xab1   :  { %4881 = vmatpush.bf16.msra.mxu0 %v13072_v13  ;;  %4946 = vmatpush.bf16.msra.mxu1 %v13072_v13 }
 0xab2   :  { %5391 = vmatpush.bf16.msra.mxu2 %v13072_v13 }
 0xab5   :  { %4882 = vmatpush.bf16.msra.mxu0 %v13051_v63  ;;  %4947 = vmatpush.bf16.msra.mxu1 %v13051_v63 }
 0xab6   :  { %5392 = vmatpush.bf16.msra.mxu2 %v13051_v63 }
 0xab9   :  { %4883 = vmatpush.bf16.msra.mxu0 %v13043_v54  ;;  %4948 = vmatpush.bf16.msra.mxu1 %v13043_v54 }
 0xaba   :  { %5393 = vmatpush.bf16.msra.mxu2 %v13043_v54 }
 0xabd   :  { %4884 = vmatpush.bf16.msra.mxu0 %v13037_v37  ;;  %4949 = vmatpush.bf16.msra.mxu1 %v13037_v37 }
 0xabe   :  { %5394 = vmatpush.bf16.msra.mxu2 %v13037_v37 }
 0xac1   :  { %4885 = vmatpush.bf16.msra.mxu0 %v13031_v11  ;;  %4950 = vmatpush.bf16.msra.mxu1 %v13031_v11 }
 0xac2   :  { %5395 = vmatpush.bf16.msra.mxu2 %v13031_v11 }
 0xac5   :  { %4886 = vmatpush.bf16.msra.mxu0 %v13025_v1  ;;  %4951 = vmatpush.bf16.msra.mxu1 %v13025_v1 }
 0xac6   :  { %5396 = vmatpush.bf16.msra.mxu2 %v13025_v1 }
 0xac8   :  { %4887 = vmatmul.bf16.vlgmr.msra.gmra.mxu0 %v10693_v49  ;;  %4952 = vmatmul.bf16.vlgmr.msra.gmra.mxu1 %v10694_v62 }
 0xac9   :  { %5208 = vmatpush.bf16.msrb.mxu0 %v13091_v52 }
 0xacd   :  { %5209 = vmatpush.bf16.msrb.mxu0 %v13083_v17 }
 0xad1   :  { %5210 = vmatpush.bf16.msrb.mxu0 %v13072_v13 }
 0xad5   :  { %5211 = vmatpush.bf16.msrb.mxu0 %v13051_v63 }
 0xad8   :  { %4892 = vmatmul.bf16.gmra.mxu0 %v10695_v27  ;;  %4957 = vmatmul.bf16.gmra.mxu1 %v10696_v48 }
 0xad9   :  { %5212 = vmatpush.bf16.msrb.mxu0 %v13043_v54 }
 0xadd   :  { %5213 = vmatpush.bf16.msrb.mxu0 %v13037_v37 }
 0xae1   :  { %5214 = vmatpush.bf16.msrb.mxu0 %v13031_v11 }
 0xae5   :  { %5215 = vmatpush.bf16.msrb.mxu0 %v13025_v1 }
 0xae8   :  { %4897 = vmatmul.bf16.gmra.mxu0 %v10697_v31  ;;  %4962 = vmatmul.bf16.gmra.mxu1 %v10698_v45  ;;  %v10714_v31 = vld [vmem:[%s14361_s0 + $0xa8] sm:$0xff] }
 0xae9   :  { %5570 = vmatpush.bf16.msra.mxu0 %v13091_v52 }
 0xaed   :  { %5571 = vmatpush.bf16.msra.mxu0 %v13083_v17 }
 0xaf1   :  { %5572 = vmatpush.bf16.msra.mxu0 %v13072_v13 }
 0xaf5   :  { %5573 = vmatpush.bf16.msra.mxu0 %v13051_v63 }
 0xaf8   :  { %4902 = vmatmul.bf16.gmra.mxu0 %v10699_v25  ;;  %4967 = vmatmul.bf16.gmra.mxu1 %v10700_v61 }
 0xaf9   :  { %5574 = vmatpush.bf16.msra.mxu0 %v13043_v54 }
 0xafd   :  { %5575 = vmatpush.bf16.msra.mxu0 %v13037_v37 }
 0xb01   :  { %5576 = vmatpush.bf16.msra.mxu0 %v13031_v11 }
 0xb05   :  { %5577 = vmatpush.bf16.msra.mxu0 %v13025_v1 }
 0xb08   :  { %4907 = vmatmul.bf16.gmra.mxu0 %v10701_v40  ;;  %4972 = vmatmul.bf16.gmra.mxu1 %v10702_v23  ;;  %v9558_v23 = vld [vmem:[%s14334_s12 + $0x58] sm:$0xf] }
 0xb18   :  { %4912 = vmatmul.bf16.gmra.mxu0 %v10703_v46  ;;  %4977 = vmatmul.bf16.gmra.mxu1 %v10704_v36  ;;  %v10507_v46 = vld [vmem:[%s14334_s12 + $0x58] sm:$0x30] }
 0xb19   :  { %v9559_v36 = vor.u32 %v10507_v46, %v9558_v23  ;;  %v10726_v46 = vld [vmem:[%s14361_s0 + $0xe0] sm:$0xff] }
 0xb1b   :  { %v5322_v22 = vsel %vm3416_vm5, %v9559_v36, 0 }
 0xb1c   :  { %5328 = vmatpush.bf16.msrb.mxu1 %v5322_v22 }
 0xb20   :  { %5329 = vmatpush.bf16.msrb.mxu1 %v10506_v32 }
 0xb28   :  { %4917 = vmatmul.bf16.gmra.mxu0 %v10705_v30  ;;  %4982 = vmatmul.bf16.gmra.mxu1 %v10706_v44  ;;  %v10505_v30 = vld [vmem:[%s14334_s12 + $0x48] sm:$0xff]  ;;  %v10504_v44 = vld [vmem:[%s14334_s12 + $0x40] sm:$0xff] }
 0xb29   :  { %5330 = vmatpush.bf16.msrb.mxu1 %v10505_v30 }
 0xb2d   :  { %5331 = vmatpush.bf16.msrb.mxu1 %v10504_v44 }
 0xb38   :  { %4922 = vmatmul.bf16.gmra.mxu0 %v10707_v4  ;;  %4987 = vmatmul.bf16.gmra.mxu1 %v10708_v9 }
 0xb45   :  { %v4888_v26 = vpop.f32.mrf.mxu0  ;;  %v4953_v20 = vpop.f32.mrf.mxu1 }
 0xb48   :  { %5216 = vmatmul.bf16.vlgmr.msrb.gmra.mxu0 %v10709_v21  ;;  %v10716_v21 = vld [vmem:[%s14361_s0 + $0xb8] sm:$0xff] }
 0xb49   :  { %5932 = vmatpush.bf16.msrb.mxu0 %v13091_v52 }
 0xb4d   :  { %5933 = vmatpush.bf16.msrb.mxu0 %v13083_v17  ;;  %v4890_v42 = vpop.f32.mrf.mxu0  ;;  %v4955_v33 = vpop.f32.mrf.mxu1 }
 0xb4e   :  { %v4928_v38 = vpack.c.bf16 %v4890_v42, %v4888_v26  ;;  %v4993_v2 = vpack.c.bf16 %v4955_v33, %v4953_v20 }
 0xb50   :  { %9504 = vmatmul.msk.bf16.vlgmr.msrb.gmra.mxu2 %vm3391_vm6, %v4993_v2  ;;  %9528 = vmatmul.msk.bf16.vlgmr.msrb.gmra.mxu3 %vm3391_vm6, %v4928_v38 }
 0xb51   :  { %5751 = vmatpush.bf16.msrb.mxu2 %v13091_v52  ;;  %5934 = vmatpush.bf16.msrb.mxu0 %v13072_v13 }
 0xb55   :  { %5752 = vmatpush.bf16.msrb.mxu2 %v13083_v17  ;;  %5935 = vmatpush.bf16.msrb.mxu0 %v13051_v63  ;;  %v4893_v39 = vpop.f32.mrf.mxu0  ;;  %v4958_v19 = vpop.f32.mrf.mxu1 }
 0xb58   :  { %5221 = vmatmul.bf16.gmra.mxu0 %v10710_v10 }
 0xb59   :  { %5753 = vmatpush.bf16.msrb.mxu2 %v13072_v13  ;;  %5936 = vmatpush.bf16.msrb.mxu0 %v13043_v54 }
 0xb5d   :  { %5754 = vmatpush.bf16.msrb.mxu2 %v13051_v63  ;;  %5937 = vmatpush.bf16.msrb.mxu0 %v13037_v37  ;;  %v4895_v35 = vpop.f32.mrf.mxu0  ;;  %v4960_v43 = vpop.f32.mrf.mxu1 }
 0xb5e   :  { %v4929_v6 = vpack.c.bf16 %v4895_v35, %v4893_v39  ;;  %v4994_v0 = vpack.c.bf16 %v4960_v43, %v4958_v19  ;;  %v10717_v19 = vld [vmem:[%s14361_s0 + $0x100] sm:$0xff] }
 0xb5f   :  { %v10718_v43 = vld [vmem:[%s14361_s0 + $0xc0] sm:$0xff] }
 0xb60   :  { %9505 = vmatmul.msk.bf16.gmra.mxu2 %vm3391_vm6, %v4994_v0  ;;  %9529 = vmatmul.msk.bf16.gmra.mxu3 %vm3391_vm6, %v4929_v6 }
 0xb61   :  { %5755 = vmatpush.bf16.msrb.mxu2 %v13043_v54  ;;  %5938 = vmatpush.bf16.msrb.mxu0 %v13031_v11 }
 0xb65   :  { %5756 = vmatpush.bf16.msrb.mxu2 %v13037_v37  ;;  %5939 = vmatpush.bf16.msrb.mxu0 %v13025_v1  ;;  %v4898_v5 = vpop.f32.mrf.mxu0  ;;  %v4963_v34 = vpop.f32.mrf.mxu1 }
 0xb68   :  { %5226 = vmatmul.bf16.gmra.mxu0 %v10711_v50  ;;  %v10719_v50 = vld [vmem:[%s14361_s0 + $0x108] sm:$0xff] }
 0xb69   :  { %5757 = vmatpush.bf16.msrb.mxu2 %v13031_v11 }
 0xb6d   :  { %5758 = vmatpush.bf16.msrb.mxu2 %v13025_v1  ;;  %v4900_v53 = vpop.f32.mrf.mxu0  ;;  %v4965_v7 = vpop.f32.mrf.mxu1 }
 0xb6e   :  { %v4930_v56 = vpack.c.bf16 %v4900_v53, %v4898_v5  ;;  %v4995_v12 = vpack.c.bf16 %v4965_v7, %v4963_v34 }
 0xb70   :  { %9506 = vmatmul.msk.bf16.gmra.mxu2 %vm3391_vm6, %v4995_v12  ;;  %9530 = vmatmul.msk.bf16.gmra.mxu3 %vm3391_vm6, %v4930_v56  ;;  %v10720_v56 = vld [vmem:[%s14361_s0 + $0xc8] sm:$0xff] }
 0xb75   :  { %v4903_v28 = vpop.f32.mrf.mxu0  ;;  %v4968_v51 = vpop.f32.mrf.mxu1 }
 0xb78   :  { %5231 = vmatmul.bf16.gmra.mxu0 %v10712_v57 }
 0xb7d   :  { %v4905_v29 = vpop.f32.mrf.mxu0  ;;  %v4970_v47 = vpop.f32.mrf.mxu1 }
 0xb7e   :  { %v4931_v3 = vpack.c.bf16 %v4905_v29, %v4903_v28  ;;  %v4996_v16 = vpack.c.bf16 %v4970_v47, %v4968_v51  ;;  %v10721_v51 = vld [vmem:[%s14361_s0 + $0x110] sm:$0xff] }
 0xb80   :  { %9507 = vmatmul.msk.bf16.gmra.mxu2 %vm3391_vm6, %v4996_v16  ;;  %9531 = vmatmul.msk.bf16.gmra.mxu3 %vm3391_vm6, %v4931_v3 }
 0xb85   :  { %v4908_v41 = vpop.f32.mrf.mxu0  ;;  %v4973_v14 = vpop.f32.mrf.mxu1 }
 0xb88   :  { %5236 = vmatmul.bf16.gmra.mxu0 %v10713_v60 }
 0xb8d   :  { %v4910_v59 = vpop.f32.mrf.mxu0  ;;  %v4975_v58 = vpop.f32.mrf.mxu1 }
 0xb8e   :  { %v4932_v49 = vpack.c.bf16 %v4910_v59, %v4908_v41  ;;  %v4997_v62 = vpack.c.bf16 %v4975_v58, %v4973_v14  ;;  %v10723_v14 = vld [vmem:[%s14361_s0 + $0x118] sm:$0xff] }
 0xb90   :  { %9508 = vmatmul.msk.bf16.gmra.mxu2 %vm3391_vm6, %v4997_v62  ;;  %9532 = vmatmul.msk.bf16.gmra.mxu3 %vm3391_vm6, %v4932_v49  ;;  %v10724_v49 = vld [vmem:[%s14361_s0 + $0xd8] sm:$0xff] }
 0xb95   :  { %v4913_v27 = vpop.f32.mrf.mxu0  ;;  %v4978_v48 = vpop.f32.mrf.mxu1 }
 0xb98   :  { %5241 = vmatmul.bf16.gmra.mxu0 %v10714_v31 }
 0xb9d   :  { %v4915_v45 = vpop.f32.mrf.mxu0  ;;  %v4980_v25 = vpop.f32.mrf.mxu1 }
 0xb9e   :  { %v4933_v61 = vpack.c.bf16 %v4915_v45, %v4913_v27  ;;  %v4998_v40 = vpack.c.bf16 %v4980_v25, %v4978_v48  ;;  %v10725_v45 = vld [vmem:[%s14361_s0 + $0x120] sm:$0xff] }
 0xba0   :  { %9509 = vmatmul.msk.bf16.gmra.mxu2 %vm3391_vm6, %v4998_v40  ;;  %9533 = vmatmul.msk.bf16.gmra.mxu3 %vm3391_vm6, %v4933_v61 }
 0xba5   :  { %v4918_v8 = vpop.f32.mrf.mxu0  ;;  %v4983_v18 = vpop.f32.mrf.mxu1 }
 0xba8   :  { %5246 = vmatmul.bf16.gmra.mxu0 %v10715_v15 }
 0xbad   :  { %v4920_v24 = vpop.f32.mrf.mxu0  ;;  %v4985_v55 = vpop.f32.mrf.mxu1 }
 0xbae   :  { %v4934_v4 = vpack.c.bf16 %v4920_v24, %v4918_v8  ;;  %v4999_v9 = vpack.c.bf16 %v4985_v55, %v4983_v18  ;;  %v10727_v18 = vld [vmem:[%s14361_s0 + $0x128] sm:$0xff]  ;;  %v9590_v55 = vld [vmem:[%s14334_s12 + $0x78] sm:$0xf] }
 0xbb0   :  { %9510 = vmatmul.msk.bf16.gmra.mxu2 %vm3391_vm6, %v4999_v9  ;;  %9534 = vmatmul.msk.bf16.gmra.mxu3 %vm3391_vm6, %v4934_v4  ;;  %v10511_v4 = vld [vmem:[%s14334_s12 + $0x78] sm:$0x30] }
 0xbb1   :  { %v9591_v9 = vor.u32 %v10511_v4, %v9590_v55 }
 0xbb5   :  { %v4923_v26 = vpop.f32.mrf.mxu0  ;;  %v4988_v20 = vpop.f32.mrf.mxu1 }
 0xbb8   :  { %5251 = vmatmul.bf16.gmra.mxu0 %v10716_v21 }
 0xbbd   :  { %v4925_v42 = vpop.f32.mrf.mxu0  ;;  %v4990_v33 = vpop.f32.mrf.mxu1 }
 0xbbe   :  { %v4935_v38 = vpack.c.bf16 %v4925_v42, %v4923_v26  ;;  %v5000_v2 = vpack.c.bf16 %v4990_v33, %v4988_v20  ;;  %v10728_v26 = vld [vmem:[%s14361_s0 + $0xe8] sm:$0xff]  ;;  %v5503_v20 = vsel %vm3416_vm5, %v9591_v9, 0 }
 0xbbf   :  { %5509 = vmatpush.bf16.msra.mxu3 %v5503_v20 }
 0xbc0   :  { %9511 = vmatmul.msk.bf16.gmra.mxu2 %vm3391_vm6, %v5000_v2  ;;  %9535 = vmatmul.msk.bf16.gmra.mxu3 %vm3391_vm6, %v4935_v38  ;;  %v9622_v38 = vld [vmem:[%s14334_s12 + $0x98] sm:$0xf]  ;;  %v10515_v2 = vld [vmem:[%s14334_s12 + $0x98] sm:$0x30] }
 0xbc5   :  { %v5217_v39 = vpop.f32.mrf.mxu0 }
 0xbc8   :  { %5578 = vmatmul.bf16.vlgmr.msra.gmra.mxu0 %v10717_v19  ;;  %v9623_v19 = vor.u32 %v10515_v2, %v9622_v38 }
 0xbc9   :  { %6294 = vmatpush.bf16.msra.mxu0 %v13091_v52 }
 0xbcd   :  { %6295 = vmatpush.bf16.msra.mxu0 %v13083_v17  ;;  %v5219_v10 = vpop.f32.mrf.mxu0 }
 0xbce   :  { %v5257_v35 = vpack.c.bf16 %v5219_v10, %v5217_v39  ;;  %v5684_v10 = vsel %vm3416_vm5, %v9623_v19, 0 }
 0xbcf   :  { %5690 = vmatpush.bf16.msra.mxu1 %v5684_v10 }
 0xbd0   :  { %9560 = vmatmul.msk.bf16.vlgmr.msrb.gmra.mxu1 %vm3391_vm6, %v5257_v35  ;;  %5397 = vmatmul.bf16.vlgmr.msra.gmra.mxu2 %v10718_v43  ;;  %v10729_v35 = vld [vmem:[%s14361_s0 + $0x130] sm:$0xff] }
 0xbd1   :  { %6113 = vmatpush.bf16.msra.mxu2 %v13091_v52  ;;  %6296 = vmatpush.bf16.msra.mxu0 %v13072_v13  ;;  %v10514_v43 = vld [vmem:[%s14334_s12 + $0x90] sm:$0xff] }
 0xbd3   :  { %v5069_v6 = vpop.f32.mrf.mxu2  ;;  %v5168_v0 = vpop.f32.mrf.mxu3  ;;  %5691 = vmatpush.bf16.msra.mxu1 %v10514_v43 }
 0xbd4   :  { %v13280_v5 = vadd.f32 %v5168_v0, %v5069_v6 }
 0xbd5   :  { %6114 = vmatpush.bf16.msra.mxu2 %v13083_v17  ;;  %6297 = vmatpush.bf16.msra.mxu0 %v13051_v63  ;;  %v5222_v34 = vpop.f32.mrf.mxu0 }
 0xbd8   :  { %5583 = vmatmul.bf16.gmra.mxu0 %v10719_v50 }
 0xbd9   :  { %6115 = vmatpush.bf16.msra.mxu2 %v13072_v13  ;;  %6298 = vmatpush.bf16.msra.mxu0 %v13043_v54 }
 0xbdb   :  { %v13289_v52 = vpop.f32.mrf.mxu2  ;;  %v13291_v53 = vpop.f32.mrf.mxu3 }
 0xbdd   :  { %6116 = vmatpush.bf16.msra.mxu2 %v13051_v63  ;;  %6299 = vmatpush.bf16.msra.mxu0 %v13037_v37  ;;  %v5224_v17 = vpop.f32.mrf.mxu0 }
 0xbde   :  { %v5258_v7 = vpack.c.bf16 %v5224_v17, %v5222_v34  ;;  %v10513_v17 = vld [vmem:[%s14334_s12 + $0x88] sm:$0xff] }
 0xbdf   :  { %5692 = vmatpush.bf16.msra.mxu1 %v10513_v17 }
 0xbe0   :  { %9561 = vmatmul.msk.bf16.gmra.mxu1 %vm3391_vm6, %v5258_v7  ;;  %5402 = vmatmul.bf16.gmra.mxu2 %v10720_v56  ;;  %v10730_v7 = vld [vmem:[%s14361_s0 + $0xf0] sm:$0xff] }
 0xbe1   :  { %6117 = vmatpush.bf16.msra.mxu2 %v13043_v54  ;;  %6300 = vmatpush.bf16.msra.mxu0 %v13031_v11  ;;  %v10510_v56 = vld [vmem:[%s14334_s12 + $0x70] sm:$0xff] }
 0xbe2   :  { %5510 = vmatpush.bf16.msra.mxu3 %v10510_v56 }
 0xbe3   :  { %v5074_v13 = vpop.f32.mrf.mxu2  ;;  %v5173_v12 = vpop.f32.mrf.mxu3 }
 0xbe4   :  { %v13301_v28 = vadd.f32 %v5173_v12, %v5074_v13  ;;  %v10512_v13 = vld [vmem:[%s14334_s12 + $0x80] sm:$0xff] }
 0xbe5   :  { %6118 = vmatpush.bf16.msra.mxu2 %v13037_v37  ;;  %6301 = vmatpush.bf16.msra.mxu0 %v13025_v1  ;;  %v5227_v63 = vpop.f32.mrf.mxu0  ;;  %v10722_v37 = vld [vmem:[%s14361_s0 + $0xd0] sm:$0xff] }
 0xbe6   :  { %5693 = vmatpush.bf16.msra.mxu1 %v10512_v13 }
 0xbe8   :  { %5588 = vmatmul.bf16.gmra.mxu0 %v10721_v51 }
 0xbe9   :  { %6119 = vmatpush.bf16.msra.mxu2 %v13031_v11 }
 0xbeb   :  { %v13309_v57 = vpop.f32.mrf.mxu2  ;;  %v13311_v54 = vpop.f32.mrf.mxu3 }
 0xbec   :  { %v5176_v2 = vadd.f32 %v13311_v54, %v13309_v57  ;;  %v10738_v57 = vld [vmem:[%s14361_s0 + $0x150] sm:$0xff] }
 0xbed   :  { %6120 = vmatpush.bf16.msra.mxu2 %v13025_v1  ;;  %v5229_v29 = vpop.f32.mrf.mxu0 }
 0xbee   :  { %v5259_v47 = vpack.c.bf16 %v5229_v29, %v5227_v63 }
 0xbf0   :  { %9562 = vmatmul.msk.bf16.gmra.mxu1 %vm3391_vm6, %v5259_v47  ;;  %5407 = vmatmul.bf16.gmra.mxu2 %v10722_v37  ;;  %v10509_v47 = vld [vmem:[%s14334_s12 + $0x68] sm:$0xff]  ;;  %v10731_v37 = vld [vmem:[%s14361_s0 + $0x138] sm:$0xff] }
 0xbf1   :  { %5511 = vmatpush.bf16.msra.mxu3 %v10509_v47 }
 0xbf3   :  { %v5079_v3 = vpop.f32.mrf.mxu2  ;;  %v5178_v16 = vpop.f32.mrf.mxu3 }
 0xbf4   :  { %v13318_v41 = vadd.f32 %v5178_v16, %v5079_v3  ;;  %v10508_v3 = vld [vmem:[%s14334_s12 + $0x60] sm:$0xff] }
 0xbf5   :  { %v5232_v11 = vpop.f32.mrf.mxu0  ;;  %5512 = vmatpush.bf16.msra.mxu3 %v10508_v3 }
 0xbf8   :  { %5593 = vmatmul.bf16.gmra.mxu0 %v10723_v14 }
 0xbfb   :  { %v13323_v1 = vpop.f32.mrf.mxu2  ;;  %v13325_v60 = vpop.f32.mrf.mxu3 }
 0xbfc   :  { %v5181_v56 = vadd.f32 %v13325_v60, %v13323_v1  ;;  %v10740_v1 = vld [vmem:[%s14361_s0 + $0x158] sm:$0xff] }
 0xbfd   :  { %v5234_v59 = vpop.f32.mrf.mxu0 }
 0xbfe   :  { %v5260_v58 = vpack.c.bf16 %v5234_v59, %v5232_v11 }
 0xc00   :  { %9563 = vmatmul.msk.bf16.gmra.mxu1 %vm3391_vm6, %v5260_v58  ;;  %5412 = vmatmul.bf16.gmra.mxu2 %v10724_v49  ;;  %v10732_v58 = vld [vmem:[%s14361_s0 + $0xf8] sm:$0xff] }
 0xc03   :  { %v5084_v62 = vpop.f32.mrf.mxu2  ;;  %v5183_v27 = vpop.f32.mrf.mxu3 }
 0xc04   :  { %v13331_v48 = vadd.f32 %v5183_v27, %v5084_v62 }
 0xc05   :  { %v5237_v31 = vpop.f32.mrf.mxu0 }
 0xc08   :  { %5598 = vmatmul.bf16.gmra.mxu0 %v10725_v45  ;;  %v10733_v45 = vld [vmem:[%s14361_s0 + $0x180] sm:$0xff] }
 0xc0b   :  { %v13336_v25 = vpop.f32.mrf.mxu2  ;;  %v13338_v61 = vpop.f32.mrf.mxu3 }
 0xc0d   :  { %v5239_v40 = vpop.f32.mrf.mxu0 }
 0xc0e   :  { %v5261_v23 = vpack.c.bf16 %v5239_v40, %v5237_v31 }
 0xc10   :  { %9564 = vmatmul.msk.bf16.gmra.mxu1 %vm3391_vm6, %v5261_v23  ;;  %5417 = vmatmul.bf16.gmra.mxu2 %v10726_v46 }
 0xc13   :  { %v5089_v36 = vpop.f32.mrf.mxu2  ;;  %v5188_v22 = vpop.f32.mrf.mxu3 }
 0xc14   :  { %v13344_v32 = vadd.f32 %v5188_v22, %v5089_v36 }
 0xc15   :  { %v5242_v8 = vpop.f32.mrf.mxu0 }
 0xc18   :  { %5603 = vmatmul.bf16.gmra.mxu0 %v10727_v18 }
 0xc1b   :  { %v13349_v15 = vpop.f32.mrf.mxu2  ;;  %v13351_v30 = vpop.f32.mrf.mxu3 }
 0xc1d   :  { %v5244_v44 = vpop.f32.mrf.mxu0 }
 0xc1e   :  { %v5262_v24 = vpack.c.bf16 %v5244_v44, %v5242_v8  ;;  %v10734_v8 = vld [vmem:[%s14361_s0 + $0x140] sm:$0xff]  ;;  %v5171_v44 = vadd.f32 %v13291_v53, %v13289_v52  ;;  %v10736_v52 = vld [vmem:[%s14361_s0 + $0x148] sm:$0xff] }
 0xc20   :  { %9565 = vmatmul.msk.bf16.gmra.mxu1 %vm3391_vm6, %v5262_v24  ;;  %5422 = vmatmul.bf16.gmra.mxu2 %v10728_v26 }
 0xc23   :  { %v5094_v21 = vpop.f32.mrf.mxu2  ;;  %v5193_v42 = vpop.f32.mrf.mxu3 }
 0xc24   :  { %v13364_v33 = vadd.f32 %v5193_v42, %v5094_v21 }
 0xc25   :  { %v5247_v39 = vpop.f32.mrf.mxu0 }
 0xc28   :  { %5608 = vmatmul.bf16.gmra.mxu0 %v10729_v35 }
 0xc2b   :  { %v13379_v6 = vpop.f32.mrf.mxu2  ;;  %v13381_v0 = vpop.f32.mrf.mxu3 }
 0xc2d   :  { %v5249_v34 = vpop.f32.mrf.mxu0 }
 0xc2e   :  { %v5263_v50 = vpack.c.bf16 %v5249_v34, %v5247_v39 }
 0xc30   :  { %9566 = vmatmul.msk.bf16.gmra.mxu1 %vm3391_vm6, %v5263_v50  ;;  %5427 = vmatmul.bf16.gmra.mxu2 %v10730_v7 }
 0xc33   :  { %v5099_v12 = vpop.f32.mrf.mxu2  ;;  %v5198_v63 = vpop.f32.mrf.mxu3 }
 0xc34   :  { %v13396_v51 = vadd.f32 %v5198_v63, %v5099_v12 }
 0xc35   :  { %v5252_v29 = vpop.f32.mrf.mxu0 }
 0xc38   :  { %5613 = vmatmul.bf16.gmra.mxu0 %v10731_v37 }
 0xc3b   :  { %v13407_v16 = vpop.f32.mrf.mxu2  ;;  %v13409_v11 = vpop.f32.mrf.mxu3 }
 0xc3d   :  { %v5254_v14 = vpop.f32.mrf.mxu0 }
 0xc3e   :  { %v5264_v59 = vpack.c.bf16 %v5254_v14, %v5252_v29 }
 0xc40   :  { %9567 = vmatmul.msk.bf16.gmra.mxu1 %vm3391_vm6, %v5264_v59  ;;  %5432 = vmatmul.bf16.gmra.mxu2 %v10732_v58  ;;  %v5186_v58 = vadd.f32 %v13338_v61, %v13336_v25  ;;  %v10742_v25 = vld [vmem:[%s14361_s0 + $0x160] sm:$0xff] }
 0xc43   :  { %v5104_v49 = vpop.f32.mrf.mxu2  ;;  %v5203_v62 = vpop.f32.mrf.mxu3 }
 0xc44   :  { %v13415_v27 = vadd.f32 %v5203_v62, %v5104_v49 }
 0xc45   :  { %v5579_v31 = vpop.f32.mrf.mxu0 }
 0xc48   :  { %5940 = vmatmul.bf16.vlgmr.msrb.gmra.mxu0 %v10733_v45 }
 0xc4b   :  { %v13420_v40 = vpop.f32.mrf.mxu2 }
 0xc4d   :  { %v5333_v23 = vpop.f32.mrf.mxu1  ;;  %v5581_v46 = vpop.f32.mrf.mxu0 }
 0xc4e   :  { %v13423_v36 = vadd.f32 %v5333_v23, %v13280_v5  ;;  %v5619_v22 = vpack.c.bf16 %v5581_v46, %v5579_v31  ;;  %v10735_v5 = vld [vmem:[%s14361_s0 + $0x188] sm:$0xff] }
 0xc50   :  { %5759 = vmatmul.bf16.vlgmr.msrb.gmra.mxu2 %v10734_v8  ;;  %9624 = vmatmul.msk.bf16.vlgmr.msra.gmra.mxu1 %vm3391_vm6, %v5619_v22 }
 0xc53   :  { %v5398_v18 = vpop.f32.mrf.mxu2 }
 0xc55   :  { %v5335_v24 = vpop.f32.mrf.mxu1  ;;  %v5584_v55 = vpop.f32.mrf.mxu0 }
 0xc56   :  { %v13431_v4 = vadd.f32 %v5335_v24, %v5171_v44  ;;  %v5191_v44 = vadd.f32 %v13351_v30, %v13349_v15  ;;  %v9654_v15 = vld [vmem:[%s14334_s12 + $0xb8] sm:$0xf]  ;;  %v10519_v30 = vld [vmem:[%s14334_s12 + $0xb8] sm:$0x30] }
 0xc58   :  { %5945 = vmatmul.bf16.gmra.mxu0 %v10735_v5 }
 0xc5b   :  { %v5400_v9 = vpop.f32.mrf.mxu2 }
 0xc5c   :  { %v5438_v26 = vpack.c.bf16 %v5400_v9, %v5398_v18 }
 0xc5d   :  { %v5338_v20 = vpop.f32.mrf.mxu1  ;;  %v5586_v21 = vpop.f32.mrf.mxu0 }
 0xc5e   :  { %v13437_v42 = vadd.f32 %v5338_v20, %v13301_v28  ;;  %9592 = vmatmul.msk.bf16.vlgmr.msra.gmra.mxu3 %vm3391_vm6, %v5438_v26  ;;  %v5620_v38 = vpack.c.bf16 %v5586_v21, %v5584_v55  ;;  %v10737_v28 = vld [vmem:[%s14361_s0 + $0x190] sm:$0xff] }
 0xc60   :  { %5764 = vmatmul.bf16.gmra.mxu2 %v10736_v52  ;;  %9625 = vmatmul.msk.bf16.gmra.mxu1 %vm3391_vm6, %v5620_v38 }
 0xc63   :  { %v5403_v53 = vpop.f32.mrf.mxu2 }
 0xc65   :  { %v5340_v39 = vpop.f32.mrf.mxu1  ;;  %v5589_v19 = vpop.f32.mrf.mxu0 }
 0xc66   :  { %v13446_v10 = vadd.f32 %v5340_v39, %v5176_v2  ;;  %v10744_v2 = vld [vmem:[%s14361_s0 + $0x168] sm:$0xff] }
 0xc68   :  { %5950 = vmatmul.bf16.gmra.mxu0 %v10737_v28  ;;  %v9686_v28 = vld [vmem:[%s14334_s12 + $0xd8] sm:$0xf] }
 0xc6b   :  { %v5405_v35 = vpop.f32.mrf.mxu2 }
 0xc6c   :  { %v5439_v43 = vpack.c.bf16 %v5405_v35, %v5403_v53  ;;  %v9655_v53 = vor.u32 %v10519_v30, %v9654_v15  ;;  %v10523_v35 = vld [vmem:[%s14334_s12 + $0xd8] sm:$0x30] }
 0xc6d   :  { %v5343_v34 = vpop.f32.mrf.mxu1  ;;  %v5591_v50 = vpop.f32.mrf.mxu0 }
 0xc6e   :  { %v13452_v17 = vadd.f32 %v5343_v34, %v13318_v41  ;;  %9593 = vmatmul.msk.bf16.gmra.mxu3 %vm3391_vm6, %v5439_v43  ;;  %v5621_v7 = vpack.c.bf16 %v5591_v50, %v5589_v19  ;;  %v10739_v41 = vld [vmem:[%s14361_s0 + $0x198] sm:$0xff]  ;;  %v5196_v19 = vadd.f32 %v13381_v0, %v13379_v6  ;;  %v9687_v50 = vor.u32 %v10523_v35, %v9686_v28  ;;  %v10522_v6 = vld [vmem:[%s14334_s12 + $0xd0] sm:$0xff] }
 0xc70   :  { %5769 = vmatmul.bf16.gmra.mxu2 %v10738_v57  ;;  %9626 = vmatmul.msk.bf16.gmra.mxu1 %vm3391_vm6, %v5621_v7  ;;  %v6046_v57 = vsel %vm3416_vm5, %v9687_v50, 0 }
 0xc71   :  { %6052 = vmatpush.bf16.msrb.mxu1 %v6046_v57 }
 0xc73   :  { %v5408_v54 = vpop.f32.mrf.mxu2 }
 0xc75   :  { %v5345_v13 = vpop.f32.mrf.mxu1  ;;  %v5594_v12 = vpop.f32.mrf.mxu0  ;;  %6053 = vmatpush.bf16.msrb.mxu1 %v10522_v6 }
 0xc76   :  { %v13461_v63 = vadd.f32 %v5345_v13, %v5181_v56 }
 0xc78   :  { %5955 = vmatmul.bf16.gmra.mxu0 %v10739_v41 }
 0xc7b   :  { %v5410_v29 = vpop.f32.mrf.mxu2 }
 0xc7c   :  { %v5440_v47 = vpack.c.bf16 %v5410_v29, %v5408_v54  ;;  %v10745_v54 = vld [vmem:[%s14361_s0 + $0x1b0] sm:$0xff] }
 0xc7d   :  { %v5348_v37 = vpop.f32.mrf.mxu1  ;;  %v5596_v3 = vpop.f32.mrf.mxu0 }
 0xc7e   :  { %v13467_v14 = vadd.f32 %v5348_v37, %v13331_v48  ;;  %9594 = vmatmul.msk.bf16.gmra.mxu3 %vm3391_vm6, %v5440_v47  ;;  %v5622_v59 = vpack.c.bf16 %v5596_v3, %v5594_v12  ;;  %v10741_v48 = vld [vmem:[%s14361_s0 + $0x1a0] sm:$0xff]  ;;  %v10521_v47 = vld [vmem:[%s14334_s12 + $0xc8] sm:$0xff]  ;;  %v10746_v37 = vld [vmem:[%s14361_s0 + $0x170] sm:$0xff] }
 0xc7f   :  { %6054 = vmatpush.bf16.msrb.mxu1 %v10521_v47  ;;  %v10520_v3 = vld [vmem:[%s14334_s12 + $0xc0] sm:$0xff] }
 0xc80   :  { %5774 = vmatmul.bf16.gmra.mxu2 %v10740_v1  ;;  %9627 = vmatmul.msk.bf16.gmra.mxu1 %vm3391_vm6, %v5622_v59  ;;  %v5201_v1 = vadd.f32 %v13409_v11, %v13407_v16  ;;  %v10516_v16 = vld [vmem:[%s14334_s12 + $0xa0] sm:$0xff] }
 0xc83   :  { %v5413_v60 = vpop.f32.mrf.mxu2  ;;  %6055 = vmatpush.bf16.msrb.mxu1 %v10520_v3 }
 0xc85   :  { %v5350_v49 = vpop.f32.mrf.mxu1  ;;  %v5599_v62 = vpop.f32.mrf.mxu0 }
 0xc86   :  { %v13476_v31 = vadd.f32 %v5350_v49, %v5186_v58 }
 0xc88   :  { %5960 = vmatmul.bf16.gmra.mxu0 %v10741_v48  ;;  %v10747_v48 = vld [vmem:[%s14361_s0 + $0x1b8] sm:$0xff] }
 0xc8b   :  { %v5415_v45 = vpop.f32.mrf.mxu2 }
 0xc8c   :  { %v5441_v23 = vpack.c.bf16 %v5415_v45, %v5413_v60  ;;  %v10517_v60 = vld [vmem:[%s14334_s12 + $0xa8] sm:$0xff] }
 0xc8d   :  { %v5353_v46 = vpop.f32.mrf.mxu1  ;;  %v5601_v22 = vpop.f32.mrf.mxu0 }
 0xc8e   :  { %v13482_v8 = vadd.f32 %v5353_v46, %v13344_v32  ;;  %9595 = vmatmul.msk.bf16.gmra.mxu3 %vm3391_vm6, %v5441_v23  ;;  %v5623_v18 = vpack.c.bf16 %v5601_v22, %v5599_v62  ;;  %v10743_v32 = vld [vmem:[%s14361_s0 + $0x1a8] sm:$0xff] }
 0xc90   :  { %5779 = vmatmul.bf16.gmra.mxu2 %v10742_v25  ;;  %9628 = vmatmul.msk.bf16.gmra.mxu1 %vm3391_vm6, %v5623_v18  ;;  %v10748_v25 = vld [vmem:[%s14361_s0 + $0x178] sm:$0xff] }
 0xc93   :  { %v5418_v61 = vpop.f32.mrf.mxu2 }
 0xc95   :  { %v5355_v24 = vpop.f32.mrf.mxu1  ;;  %v5604_v55 = vpop.f32.mrf.mxu0 }
 0xc96   :  { %v13491_v5 = vadd.f32 %v5355_v24, %v5191_v44 }
 0xc98   :  { %5965 = vmatmul.bf16.gmra.mxu0 %v10743_v32 }
 0xc9b   :  { %v5420_v9 = vpop.f32.mrf.mxu2 }
 0xc9c   :  { %v5442_v26 = vpack.c.bf16 %v5420_v9, %v5418_v61  ;;  %v5205_v61 = vpop.f32.mrf.mxu3 }
 0xc9d   :  { %v5358_v20 = vpop.f32.mrf.mxu1  ;;  %v5606_v21 = vpop.f32.mrf.mxu0  ;;  %v5206_v24 = vadd.f32 %v5205_v61, %v13420_v40  ;;  %v10750_v40 = vld [vmem:[%s14361_s0 + $0x1c0] sm:$0xff] }
 0xc9e   :  { %v13497_v38 = vadd.f32 %v5358_v20, %v13364_v33  ;;  %9596 = vmatmul.msk.bf16.gmra.mxu3 %vm3391_vm6, %v5442_v26  ;;  %v5624_v52 = vpack.c.bf16 %v5606_v21, %v5604_v55  ;;  %v5865_v33 = vsel %vm3416_vm5, %v9655_v53, 0 }
 0xc9f   :  { %5871 = vmatpush.bf16.msrb.mxu3 %v5865_v33  ;;  %v10751_v33 = vld [vmem:[%s14361_s0 + $0x208] sm:$0xff] }
 0xca0   :  { %5784 = vmatmul.bf16.gmra.mxu2 %v10744_v2  ;;  %9629 = vmatmul.msk.bf16.gmra.mxu1 %vm3391_vm6, %v5624_v52 }
 0xca3   :  { %v5423_v39 = vpop.f32.mrf.mxu2 }
 0xca5   :  { %v5360_v43 = vpop.f32.mrf.mxu1  ;;  %v5609_v34 = vpop.f32.mrf.mxu0 }
 0xca6   :  { %v13519_v7 = vadd.f32 %v5360_v43, %v5196_v19 }
 0xca8   :  { %5970 = vmatmul.bf16.gmra.mxu0 %v10745_v54 }
 0xcab   :  { %v5425_v0 = vpop.f32.mrf.mxu2 }
 0xcac   :  { %v5443_v56 = vpack.c.bf16 %v5425_v0, %v5423_v39 }
 0xcad   :  { %v5363_v13 = vpop.f32.mrf.mxu1  ;;  %v5611_v12 = vpop.f32.mrf.mxu0 }
 0xcae   :  { %v13529_v41 = vadd.f32 %v5363_v13, %v13396_v51  ;;  %9597 = vmatmul.msk.bf16.gmra.mxu3 %vm3391_vm6, %v5443_v56  ;;  %v5625_v29 = vpack.c.bf16 %v5611_v12, %v5609_v34  ;;  %v10518_v51 = vld [vmem:[%s14334_s12 + $0xb0] sm:$0xff]  ;;  %v10752_v34 = vld [vmem:[%s14361_s0 + $0x1c8] sm:$0xff] }
 0xcaf   :  { %5872 = vmatpush.bf16.msrb.mxu3 %v10518_v51  ;;  %v10753_v13 = vld [vmem:[%s14361_s0 + $0x210] sm:$0xff] }
 0xcb0   :  { %5789 = vmatmul.bf16.gmra.mxu2 %v10746_v37  ;;  %9630 = vmatmul.msk.bf16.gmra.mxu1 %vm3391_vm6, %v5625_v29 }
 0xcb3   :  { %v5428_v59 = vpop.f32.mrf.mxu2  ;;  %5873 = vmatpush.bf16.msrb.mxu3 %v10517_v60 }
 0xcb5   :  { %v5365_v58 = vpop.f32.mrf.mxu1  ;;  %v5614_v49 = vpop.f32.mrf.mxu0 }
 0xcb6   :  { %v13550_v62 = vadd.f32 %v5365_v58, %v5201_v1  ;;  %v10754_v1 = vld [vmem:[%s14361_s0 + $0x1d0] sm:$0xff] }
 0xcb7   :  { %5874 = vmatpush.bf16.msrb.mxu3 %v10516_v16 }
 0xcb8   :  { %5975 = vmatmul.bf16.gmra.mxu0 %v10747_v48 }
 0xcbb   :  { %v5430_v11 = vpop.f32.mrf.mxu2 }
 0xcbc   :  { %v5444_v45 = vpack.c.bf16 %v5430_v11, %v5428_v59  ;;  %v10755_v11 = vld [vmem:[%s14361_s0 + $0x218] sm:$0xff] }
 0xcbd   :  { %v5368_v23 = vpop.f32.mrf.mxu1  ;;  %v5616_v46 = vpop.f32.mrf.mxu0 }
 0xcbe   :  { %v13559_v22 = vadd.f32 %v5368_v23, %v13415_v27  ;;  %9598 = vmatmul.msk.bf16.gmra.mxu3 %vm3391_vm6, %v5444_v45  ;;  %v5626_v18 = vpack.c.bf16 %v5616_v46, %v5614_v49  ;;  %v10749_v27 = vld [vmem:[%s14361_s0 + $0x200] sm:$0xff] }
 0xcc0   :  { %5794 = vmatmul.bf16.gmra.mxu2 %v10748_v25  ;;  %9631 = vmatmul.msk.bf16.gmra.mxu1 %vm3391_vm6, %v5626_v18 }
 0xcc3   :  { %v5433_v44 = vpop.f32.mrf.mxu2 }
 0xcc5   :  { %v5370_v55 = vpop.f32.mrf.mxu1  ;;  %v5941_v32 = vpop.f32.mrf.mxu0 }
 0xcc6   :  { %v13567_v9 = vadd.f32 %v5370_v55, %v5206_v24  ;;  %v10756_v24 = vld [vmem:[%s14361_s0 + $0x1d8] sm:$0xff] }
 0xcc8   :  { %6302 = vmatmul.bf16.vlgmr.msra.gmra.mxu0 %v10749_v27 }
 0xccb   :  { %v5435_v26 = vpop.f32.mrf.mxu2 }
 0xccc   :  { %v5445_v20 = vpack.c.bf16 %v5435_v26, %v5433_v44 }
 0xccd   :  { %v5695_v21 = vpop.f32.mrf.mxu1  ;;  %v5943_v52 = vpop.f32.mrf.mxu0 }
 0xcce   :  { %9599 = vmatmul.msk.bf16.gmra.mxu3 %vm3391_vm6, %v5445_v20  ;;  %v5981_v15 = vpack.c.bf16 %v5943_v52, %v5941_v32 }
 0xcd0   :  { %6121 = vmatmul.bf16.vlgmr.msra.gmra.mxu2 %v10750_v40  ;;  %9688 = vmatmul.msk.bf16.vlgmr.msrb.gmra.mxu1 %vm3391_vm6, %v5981_v15 }
 0xcd3   :  { %v5760_v30 = vpop.f32.mrf.mxu2 }
 0xcd5   :  { %v5697_v53 = vpop.f32.mrf.mxu1  ;;  %v5946_v2 = vpop.f32.mrf.mxu0 }
 0xcd8   :  { %6307 = vmatmul.bf16.gmra.mxu0 %v10751_v33 }
 0xcdb   :  { %v5762_v39 = vpop.f32.mrf.mxu2 }
 0xcdc   :  { %v5800_v19 = vpack.c.bf16 %v5762_v39, %v5760_v30  ;;  %v10758_v39 = vld [vmem:[%s14361_s0 + $0x1e0] sm:$0xff] }
 0xcdd   :  { %v5700_v28 = vpop.f32.mrf.mxu1  ;;  %v5948_v35 = vpop.f32.mrf.mxu0 }
 0xcde   :  { %9656 = vmatmul.msk.bf16.vlgmr.msrb.gmra.mxu3 %vm3391_vm6, %v5800_v19  ;;  %v5982_v43 = vpack.c.bf16 %v5948_v35, %v5946_v2 }
 0xce0   :  { %6126 = vmatmul.bf16.gmra.mxu2 %v10752_v34  ;;  %9689 = vmatmul.msk.bf16.gmra.mxu1 %vm3391_vm6, %v5982_v43 }
 0xce1   :  { %v5514_v50 = vpop.f32.mrf.mxu3 }
 0xce2   :  { %v5554_v57 = vadd.f32 %v5514_v50, %v13423_v36  ;;  %v10759_v50 = vld [vmem:[%s14361_s0 + $0x228] sm:$0xff] }
 0xce3   :  { %v5765_v54 = vpop.f32.mrf.mxu2 }
 0xce4   :  { %v13586_v6 = vadd.f32 %v5695_v21, %v5554_v57  ;;  %v10757_v21 = vld [vmem:[%s14361_s0 + $0x220] sm:$0xff] }
 0xce5   :  { %v5702_v0 = vpop.f32.mrf.mxu1  ;;  %v5951_v56 = vpop.f32.mrf.mxu0 }
 0xce8   :  { %6312 = vmatmul.bf16.gmra.mxu0 %v10753_v13 }
 0xce9   :  { %v5516_v12 = vpop.f32.mrf.mxu3 }
 0xcea   :  { %v5555_v29 = vadd.f32 %v5516_v12, %v13431_v4 }
 0xceb   :  { %v5767_v47 = vpop.f32.mrf.mxu2 }
 0xcec   :  { %v5801_v37 = vpack.c.bf16 %v5767_v47, %v5765_v54  ;;  %v13592_v51 = vadd.f32 %v5697_v53, %v5555_v29  ;;  %v9718_v47 = vld [vmem:[%s14334_s12 + $0xf8] sm:$0xf] }
 0xced   :  { %v5705_v3 = vpop.f32.mrf.mxu1  ;;  %v5953_v59 = vpop.f32.mrf.mxu0 }
 0xcee   :  { %9657 = vmatmul.msk.bf16.gmra.mxu3 %vm3391_vm6, %v5801_v37  ;;  %v5983_v36 = vpack.c.bf16 %v5953_v59, %v5951_v56  ;;  %v10527_v37 = vld [vmem:[%s14334_s12 + $0xf8] sm:$0x30] }
 0xcf0   :  { %6131 = vmatmul.bf16.gmra.mxu2 %v10754_v1  ;;  %9690 = vmatmul.msk.bf16.gmra.mxu1 %vm3391_vm6, %v5983_v36 }
 0xcf1   :  { %v5519_v60 = vpop.f32.mrf.mxu3 }
 0xcf2   :  { %v5556_v58 = vadd.f32 %v5519_v60, %v13437_v42 }
 0xcf3   :  { %v5770_v4 = vpop.f32.mrf.mxu2 }
 0xcf4   :  { %v13600_v49 = vadd.f32 %v5700_v28, %v5556_v58  ;;  %v9750_v58 = vld [vmem:[%s14334_s12 + $0x118] sm:$0xf] }
 0xcf5   :  { %v5707_v48 = vpop.f32.mrf.mxu1  ;;  %v5956_v16 = vpop.f32.mrf.mxu0 }
 0xcf8   :  { %6317 = vmatmul.bf16.gmra.mxu0 %v10755_v11 }
 0xcf9   :  { %v5521_v45 = vpop.f32.mrf.mxu3 }
 0xcfa   :  { %v5557_v23 = vadd.f32 %v5521_v45, %v13446_v10 }
 0xcfb   :  { %v5772_v46 = vpop.f32.mrf.mxu2 }
 0xcfc   :  { %v5802_v18 = vpack.c.bf16 %v5772_v46, %v5770_v4  ;;  %v13606_v25 = vadd.f32 %v5702_v0, %v5557_v23  ;;  %v10531_v4 = vld [vmem:[%s14334_s12 + $0x118] sm:$0x30] }
 0xcfd   :  { %v5710_v61 = vpop.f32.mrf.mxu1  ;;  %v5958_v44 = vpop.f32.mrf.mxu0 }
 0xcfe   :  { %9658 = vmatmul.msk.bf16.gmra.mxu3 %vm3391_vm6, %v5802_v18  ;;  %v5984_v42 = vpack.c.bf16 %v5958_v44, %v5956_v16 }
 0xd00   :  { %6136 = vmatmul.bf16.gmra.mxu2 %v10756_v24  ;;  %9691 = vmatmul.msk.bf16.gmra.mxu1 %vm3391_vm6, %v5984_v42 }
 0xd01   :  { %v5524_v55 = vpop.f32.mrf.mxu3 }
 0xd02   :  { %v5558_v32 = vadd.f32 %v5524_v55, %v13452_v17 }
 0xd03   :  { %v5775_v10 = vpop.f32.mrf.mxu2 }
 0xd04   :  { %v13614_v27 = vadd.f32 %v5705_v3, %v5558_v32  ;;  %v9719_v3 = vor.u32 %v10527_v37, %v9718_v47 }
 0xd05   :  { %v5712_v26 = vpop.f32.mrf.mxu1  ;;  %v5961_v20 = vpop.f32.mrf.mxu0 }
 0xd06   :  { %v6227_v36 = vsel %vm3416_vm5, %v9719_v3, 0 }
 0xd07   :  { %6233 = vmatpush.bf16.msra.mxu3 %v6227_v36 }
 0xd08   :  { %6322 = vmatmul.bf16.gmra.mxu0 %v10757_v21 }
 0xd09   :  { %v5526_v52 = vpop.f32.mrf.mxu3 }
 0xd0a   :  { %v5559_v15 = vadd.f32 %v5526_v52, %v13461_v63  ;;  %v10526_v52 = vld [vmem:[%s14334_s12 + $0xf0] sm:$0xff] }
 0xd0b   :  { %v5777_v40 = vpop.f32.mrf.mxu2  ;;  %6234 = vmatpush.bf16.msra.mxu3 %v10526_v52 }
 0xd0c   :  { %v5803_v30 = vpack.c.bf16 %v5777_v40, %v5775_v10  ;;  %v13620_v53 = vadd.f32 %v5707_v48, %v5559_v15  ;;  %v9751_v48 = vor.u32 %v10531_v4, %v9750_v58  ;;  %v10528_v15 = vld [vmem:[%s14334_s12 + $0x100] sm:$0xff] }
 0xd0d   :  { %v5715_v2 = vpop.f32.mrf.mxu1  ;;  %v5963_v33 = vpop.f32.mrf.mxu0 }
 0xd0e   :  { %9659 = vmatmul.msk.bf16.gmra.mxu3 %vm3391_vm6, %v5803_v30  ;;  %v5985_v17 = vpack.c.bf16 %v5963_v33, %v5961_v20  ;;  %v6408_v23 = vsel %vm3416_vm5, %v9751_v48, 0  ;;  %v10525_v30 = vld [vmem:[%s14334_s12 + $0xe8] sm:$0xff] }
 0xd0f   :  { %6414 = vmatpush.bf16.msra.mxu1 %v6408_v23  ;;  %6235 = vmatpush.bf16.msra.mxu3 %v10525_v30 }
 0xd10   :  { %6141 = vmatmul.bf16.gmra.mxu2 %v10758_v39  ;;  %9692 = vmatmul.msk.bf16.gmra.mxu1 %vm3391_vm6, %v5985_v17 }
 0xd11   :  { %v5529_v19 = vpop.f32.mrf.mxu3 }
 0xd12   :  { %v5560_v28 = vadd.f32 %v5529_v19, %v13467_v14 }
 0xd13   :  { %v5780_v63 = vpop.f32.mrf.mxu2 }
 0xd14   :  { %v13628_v35 = vadd.f32 %v5710_v61, %v5560_v28  ;;  %v10530_v61 = vld [vmem:[%s14334_s12 + $0x110] sm:$0xff]  ;;  %v10524_v28 = vld [vmem:[%s14334_s12 + $0xe0] sm:$0xff] }
 0xd15   :  { %v5717_v43 = vpop.f32.mrf.mxu1  ;;  %v5966_v34 = vpop.f32.mrf.mxu0  ;;  %6415 = vmatpush.bf16.msra.mxu1 %v10530_v61  ;;  %6236 = vmatpush.bf16.msra.mxu3 %v10524_v28 }
 0xd18   :  { %6327 = vmatmul.bf16.gmra.mxu0 %v10759_v50 }
 0xd19   :  { %v5531_v57 = vpop.f32.mrf.mxu3 }
 0xd1a   :  { %v5561_v54 = vadd.f32 %v5531_v57, %v13476_v31  ;;  %v10760_v31 = vld [vmem:[%s14361_s0 + $0x1e8] sm:$0xff] }
 0xd1b   :  { %v5782_v0 = vpop.f32.mrf.mxu2 }
 0xd1c   :  { %v5804_v56 = vpack.c.bf16 %v5782_v0, %v5780_v63  ;;  %v13634_v13 = vadd.f32 %v5712_v26, %v5561_v54  ;;  %v10529_v26 = vld [vmem:[%s14334_s12 + $0x108] sm:$0xff]  ;;  %v10764_v0 = vld [vmem:[%s14361_s0 + $0x1f8] sm:$0xff] }
 0xd1d   :  { %v5720_v12 = vpop.f32.mrf.mxu1  ;;  %v5968_v29 = vpop.f32.mrf.mxu0  ;;  %6416 = vmatpush.bf16.msra.mxu1 %v10529_v26 }
 0xd1e   :  { %9660 = vmatmul.msk.bf16.gmra.mxu3 %vm3391_vm6, %v5804_v56  ;;  %v5986_v14 = vpack.c.bf16 %v5968_v29, %v5966_v34 }
 0xd20   :  { %6146 = vmatmul.bf16.gmra.mxu2 %v10760_v31  ;;  %9693 = vmatmul.msk.bf16.gmra.mxu1 %vm3391_vm6, %v5986_v14 }
 0xd21   :  { %v5534_v59 = vpop.f32.mrf.mxu3  ;;  %6417 = vmatpush.bf16.msra.mxu1 %v10528_v15 }
 0xd22   :  { %v5562_v1 = vadd.f32 %v5534_v59, %v13482_v8  ;;  %v10761_v8 = vld [vmem:[%s14361_s0 + $0x230] sm:$0xff] }
 0xd23   :  { %v5785_v60 = vpop.f32.mrf.mxu2 }
 0xd24   :  { %v13655_v16 = vadd.f32 %v5715_v2, %v5562_v1 }
 0xd25   :  { %v5722_v11 = vpop.f32.mrf.mxu1  ;;  %v5971_v45 = vpop.f32.mrf.mxu0 }
 0xd28   :  { %6332 = vmatmul.bf16.gmra.mxu0 %v10761_v8 }
 0xd29   :  { %v5536_v46 = vpop.f32.mrf.mxu3 }
 0xd2a   :  { %v5563_v18 = vadd.f32 %v5536_v46, %v13491_v5  ;;  %v10762_v5 = vld [vmem:[%s14361_s0 + $0x1f0] sm:$0xff] }
 0xd2b   :  { %v5787_v44 = vpop.f32.mrf.mxu2 }
 0xd2c   :  { %v5805_v42 = vpack.c.bf16 %v5787_v44, %v5785_v60  ;;  %v13665_v24 = vadd.f32 %v5717_v43, %v5563_v18 }
 0xd2d   :  { %v5725_v55 = vpop.f32.mrf.mxu1  ;;  %v5973_v32 = vpop.f32.mrf.mxu0 }
 0xd2e   :  { %9661 = vmatmul.msk.bf16.gmra.mxu3 %vm3391_vm6, %v5805_v42  ;;  %v5987_v10 = vpack.c.bf16 %v5973_v32, %v5971_v45 }
 0xd30   :  { %6151 = vmatmul.bf16.gmra.mxu2 %v10762_v5  ;;  %9694 = vmatmul.msk.bf16.gmra.mxu1 %vm3391_vm6, %v5987_v10 }
 0xd31   :  { %v5539_v20 = vpop.f32.mrf.mxu3 }
 0xd32   :  { %v5564_v21 = vadd.f32 %v5539_v20, %v13497_v38  ;;  %v10763_v38 = vld [vmem:[%s14361_s0 + $0x238] sm:$0xff] }
 0xd33   :  { %v5790_v40 = vpop.f32.mrf.mxu2 }
 0xd34   :  { %v13685_v2 = vadd.f32 %v5720_v12, %v5564_v21 }
 0xd35   :  { %v5727_v33 = vpop.f32.mrf.mxu1  ;;  %v5976_v17 = vpop.f32.mrf.mxu0 }
 0xd38   :  { %6337 = vmatmul.bf16.gmra.mxu0 %v10763_v38 }
 0xd39   :  { %v5541_v39 = vpop.f32.mrf.mxu3 }
 0xd3a   :  { %v5565_v19 = vadd.f32 %v5541_v39, %v13519_v7 }
 0xd3b   :  { %v5792_v63 = vpop.f32.mrf.mxu2 }
 0xd3c   :  { %v5806_v43 = vpack.c.bf16 %v5792_v63, %v5790_v40  ;;  %v13694_v34 = vadd.f32 %v5722_v11, %v5565_v19 }
 0xd3d   :  { %v5730_v50 = vpop.f32.mrf.mxu1  ;;  %v5978_v57 = vpop.f32.mrf.mxu0 }
 0xd3e   :  { %9662 = vmatmul.msk.bf16.gmra.mxu3 %vm3391_vm6, %v5806_v43  ;;  %v5988_v54 = vpack.c.bf16 %v5978_v57, %v5976_v17 }
 0xd40   :  { %6156 = vmatmul.bf16.gmra.mxu2 %v10764_v0  ;;  %9695 = vmatmul.msk.bf16.gmra.mxu1 %vm3391_vm6, %v5988_v54 }
 0xd41   :  { %v5544_v7 = vpop.f32.mrf.mxu3 }
 0xd42   :  { %v5566_v56 = vadd.f32 %v5544_v7, %v13529_v41 }
 0xd43   :  { %v5795_v12 = vpop.f32.mrf.mxu2 }
 0xd44   :  { %v13702_v29 = vadd.f32 %v5725_v55, %v5566_v56 }
 0xd45   :  { %v5732_v14 = vpop.f32.mrf.mxu1  ;;  %v6303_v47 = vpop.f32.mrf.mxu0 }
 0xd49   :  { %v5546_v37 = vpop.f32.mrf.mxu3 }
 0xd4a   :  { %v5567_v3 = vadd.f32 %v5546_v37, %v13550_v62 }
 0xd4b   :  { %v5797_v31 = vpop.f32.mrf.mxu2 }
 0xd4c   :  { %v5807_v59 = vpack.c.bf16 %v5797_v31, %v5795_v12  ;;  %v13705_v36 = vadd.f32 %v5727_v33, %v5567_v3 }
 0xd4d   :  { %v6057_v1 = vpop.f32.mrf.mxu1  ;;  %v6305_v60 = vpop.f32.mrf.mxu0 }
 0xd4e   :  { %9663 = vmatmul.msk.bf16.gmra.mxu3 %vm3391_vm6, %v5807_v59  ;;  %v6343_v58 = vpack.c.bf16 %v6305_v60, %v6303_v47 }
 0xd50   :  { %9752 = vmatmul.msk.bf16.vlgmr.msra.gmra.mxu1 %vm3391_vm6, %v6343_v58 }
 0xd51   :  { %v5549_v41 = vpop.f32.mrf.mxu3 }
 0xd52   :  { %v5568_v4 = vadd.f32 %v5549_v41, %v13559_v22 }
 0xd53   :  { %v6122_v48 = vpop.f32.mrf.mxu2 }
 0xd54   :  { %v13710_v11 = vadd.f32 %v5730_v50, %v5568_v4 }
 0xd55   :  { %v6059_v45 = vpop.f32.mrf.mxu1  ;;  %v6308_v23 = vpop.f32.mrf.mxu0 }
 0xd59   :  { %v5551_v62 = vpop.f32.mrf.mxu3 }
 0xd5a   :  { %v5569_v8 = vadd.f32 %v5551_v62, %v13567_v9 }
 0xd5b   :  { %v6124_v46 = vpop.f32.mrf.mxu2 }
 0xd5c   :  { %v6162_v18 = vpack.c.bf16 %v6124_v46, %v6122_v48  ;;  %v13713_v61 = vadd.f32 %v5732_v14, %v5569_v8 }
 0xd5d   :  { %v6062_v44 = vpop.f32.mrf.mxu1  ;;  %v6310_v42 = vpop.f32.mrf.mxu0 }
 0xd5e   :  { %9720 = vmatmul.msk.bf16.vlgmr.msra.gmra.mxu3 %vm3391_vm6, %v6162_v18  ;;  %v6344_v55 = vpack.c.bf16 %v6310_v42, %v6308_v23 }
 0xd60   :  { %9753 = vmatmul.msk.bf16.gmra.mxu1 %vm3391_vm6, %v6344_v55 }
 0xd61   :  { %v5876_v22 = vpop.f32.mrf.mxu3 }
 0xd62   :  { %v5916_v32 = vadd.f32 %v5876_v22, %v13586_v6 }
 0xd63   :  { %v6127_v10 = vpop.f32.mrf.mxu2 }
 0xd64   :  { %v13718_v26 = vadd.f32 %v6057_v1, %v5916_v32 }
 0xd65   :  { %v6064_v5 = vpop.f32.mrf.mxu1  ;;  %v6313_v20 = vpop.f32.mrf.mxu0 }
 0xd69   :  { %v5878_v9 = vpop.f32.mrf.mxu3 }
 0xd6a   :  { %v5917_v21 = vadd.f32 %v5878_v9, %v13592_v51 }
 0xd6b   :  { %v6129_v52 = vpop.f32.mrf.mxu2 }
 0xd6c   :  { %v6163_v15 = vpack.c.bf16 %v6129_v52, %v6127_v10  ;;  %v13721_v40 = vadd.f32 %v6059_v45, %v5917_v21 }
 0xd6d   :  { %v6067_v30 = vpop.f32.mrf.mxu1  ;;  %v6315_v33 = vpop.f32.mrf.mxu0 }
 0xd6e   :  { %9721 = vmatmul.msk.bf16.gmra.mxu3 %vm3391_vm6, %v6163_v15  ;;  %v6345_v17 = vpack.c.bf16 %v6315_v33, %v6313_v20 }
 0xd70   :  { %9754 = vmatmul.msk.bf16.gmra.mxu1 %vm3391_vm6, %v6345_v17 }
 0xd71   :  { %v5881_v6 = vpop.f32.mrf.mxu3 }
 0xd72   :  { %v5918_v38 = vadd.f32 %v5881_v6, %v13600_v49 }
 0xd73   :  { %v6132_v39 = vpop.f32.mrf.mxu2 }
 0xd74   :  { %v13726_v19 = vadd.f32 %v6062_v44, %v5918_v38 }
 0xd75   :  { %v6069_v28 = vpop.f32.mrf.mxu1  ;;  %v6318_v63 = vpop.f32.mrf.mxu0 }
 0xd79   :  { %v5883_v51 = vpop.f32.mrf.mxu3 }
 0xd7a   :  { %v5919_v43 = vadd.f32 %v5883_v51, %v13606_v25 }
 0xd7b   :  { %v6134_v50 = vpop.f32.mrf.mxu2 }
 0xd7c   :  { %v6164_v57 = vpack.c.bf16 %v6134_v50, %v6132_v39  ;;  %v13729_v54 = vadd.f32 %v6064_v5, %v5919_v43 }
 0xd7d   :  { %v6072_v0 = vpop.f32.mrf.mxu1  ;;  %v6320_v7 = vpop.f32.mrf.mxu0 }
 0xd7e   :  { %9722 = vmatmul.msk.bf16.gmra.mxu3 %vm3391_vm6, %v6164_v57  ;;  %v6346_v56 = vpack.c.bf16 %v6320_v7, %v6318_v63 }
 0xd80   :  { %9755 = vmatmul.msk.bf16.gmra.mxu1 %vm3391_vm6, %v6346_v56 }
 0xd81   :  { %v5886_v49 = vpop.f32.mrf.mxu3 }
 0xd82   :  { %v5920_v12 = vadd.f32 %v5886_v49, %v13614_v27 }
 0xd83   :  { %v6137_v14 = vpop.f32.mrf.mxu2 }
 0xd84   :  { %v13734_v47 = vadd.f32 %v6067_v30, %v5920_v12 }
 0xd85   :  { %v6074_v37 = vpop.f32.mrf.mxu1  ;;  %v6323_v3 = vpop.f32.mrf.mxu0 }
 0xd89   :  { %v5888_v25 = vpop.f32.mrf.mxu3 }
 0xd8a   :  { %v5921_v31 = vadd.f32 %v5888_v25, %v13620_v53 }
 0xd8b   :  { %v6139_v59 = vpop.f32.mrf.mxu2 }
 0xd8c   :  { %v6165_v1 = vpack.c.bf16 %v6139_v59, %v6137_v14  ;;  %v13737_v60 = vadd.f32 %v6069_v28, %v5921_v31 }
 0xd8d   :  { %v6077_v58 = vpop.f32.mrf.mxu1  ;;  %v6325_v41 = vpop.f32.mrf.mxu0 }
 0xd8e   :  { %9723 = vmatmul.msk.bf16.gmra.mxu3 %vm3391_vm6, %v6165_v1  ;;  %v6347_v4 = vpack.c.bf16 %v6325_v41, %v6323_v3 }
 0xd90   :  { %9756 = vmatmul.msk.bf16.gmra.mxu1 %vm3391_vm6, %v6347_v4 }
 0xd91   :  { %v5891_v27 = vpop.f32.mrf.mxu3 }
 0xd92   :  { %v5922_v48 = vadd.f32 %v5891_v27, %v13628_v35 }
 0xd93   :  { %v6142_v45 = vpop.f32.mrf.mxu2 }
 0xd94   :  { %v13742_v23 = vadd.f32 %v6072_v0, %v5922_v48 }
 0xd95   :  { %v13744_v62 = vpop.f32.mrf.mxu1  ;;  %v6328_v53 = vpop.f32.mrf.mxu0 }
 0xd99   :  { %v5893_v8 = vpop.f32.mrf.mxu3 }
 0xd9a   :  { %v5923_v46 = vadd.f32 %v5893_v8, %v13634_v13  ;;  %v13786_v8 = vld [vmem:[%s14335_s13] ss:$0 sm:$0xff] }
 0xd9b   :  { %v6144_v18 = vpop.f32.mrf.mxu2 }
 0xd9c   :  { %v6166_v44 = vpack.c.bf16 %v6144_v18, %v6142_v45  ;;  %v13747_v42 = vadd.f32 %v6074_v37, %v5923_v46 }
 0xd9d   :  { %v6082_v55 = vpop.f32.mrf.mxu1  ;;  %v6330_v22 = vpop.f32.mrf.mxu0 }
 0xd9e   :  { %9724 = vmatmul.msk.bf16.gmra.mxu3 %vm3391_vm6, %v6166_v44  ;;  %v6348_v32 = vpack.c.bf16 %v6330_v22, %v6328_v53 }
 0xda0   :  { %9757 = vmatmul.msk.bf16.gmra.mxu1 %vm3391_vm6, %v6348_v32 }
 0xda1   :  { %v5896_v35 = vpop.f32.mrf.mxu3 }
 0xda2   :  { %v5924_v10 = vadd.f32 %v5896_v35, %v13655_v16 }
 0xda3   :  { %v6147_v5 = vpop.f32.mrf.mxu2 }
 0xda4   :  { %v13752_v20 = vadd.f32 %v6077_v58, %v5924_v10 }
 0xda5   :  { %v13754_v9 = vpop.f32.mrf.mxu1  ;;  %v6333_v13 = vpop.f32.mrf.mxu0 }
 0xda9   :  { %v13756_v21 = vpop.f32.mrf.mxu3 }
 0xdab   :  { %v6149_v52 = vpop.f32.mrf.mxu2 }
 0xdac   :  { %v6167_v15 = vpack.c.bf16 %v6149_v52, %v6147_v5 }
 0xdad   :  { %v6087_v30 = vpop.f32.mrf.mxu1  ;;  %v6335_v33 = vpop.f32.mrf.mxu0 }
 0xdae   :  { %9725 = vmatmul.msk.bf16.gmra.mxu3 %vm3391_vm6, %v6167_v15  ;;  %v6349_v17 = vpack.c.bf16 %v6335_v33, %v6333_v13 }
 0xdb0   :  { %9758 = vmatmul.msk.bf16.gmra.mxu1 %vm3391_vm6, %v6349_v17 }
 0xdb1   :  { %v5901_v6 = vpop.f32.mrf.mxu3 }
 0xdb2   :  { %v5926_v16 = vadd.f32 %v5901_v6, %v13685_v2 }
 0xdb3   :  { %v6152_v38 = vpop.f32.mrf.mxu2 }
 0xdb4   :  { %v13761_v39 = vadd.f32 %v6082_v55, %v5926_v16 }
 0xdb5   :  { %v13763_v28 = vpop.f32.mrf.mxu1  ;;  %v6338_v63 = vpop.f32.mrf.mxu0 }
 0xdb9   :  { %v13765_v51 = vpop.f32.mrf.mxu3 }
 0xdbb   :  { %v6154_v43 = vpop.f32.mrf.mxu2 }
 0xdbc   :  { %v6168_v50 = vpack.c.bf16 %v6154_v43, %v6152_v38 }
 0xdbd   :  { %v6092_v57 = vpop.f32.mrf.mxu1  ;;  %v6340_v0 = vpop.f32.mrf.mxu0 }
 0xdbe   :  { %9726 = vmatmul.msk.bf16.gmra.mxu3 %vm3391_vm6, %v6168_v50  ;;  %v6350_v7 = vpack.c.bf16 %v6340_v0, %v6338_v63 }
 0xdc0   :  { %9759 = vmatmul.msk.bf16.gmra.mxu1 %vm3391_vm6, %v6350_v7 }
 0xdc1   :  { %v5906_v56 = vpop.f32.mrf.mxu3 }
 0xdc2   :  { %v5928_v2 = vadd.f32 %v5906_v56, %v13702_v29 }
 0xdc3   :  { %v6157_v49 = vpop.f32.mrf.mxu2 }
 0xdc4   :  { %v13770_v12 = vadd.f32 %v6087_v30, %v5928_v2 }
 0xdc5   :  { %v13772_v14 = vpop.f32.mrf.mxu1 }
 0xdc9   :  { %v13774_v37 = vpop.f32.mrf.mxu3 }
 0xdcb   :  { %v6159_v3 = vpop.f32.mrf.mxu2 }
 0xdcc   :  { %v6169_v25 = vpack.c.bf16 %v6159_v3, %v6157_v49 }
 0xdcd   :  { %v6419_v31 = vpop.f32.mrf.mxu1 }
 0xdce   :  { %9727 = vmatmul.msk.bf16.gmra.mxu3 %vm3391_vm6, %v6169_v25 }
 0xdd1   :  { %v5911_v59 = vpop.f32.mrf.mxu3 }
 0xdd2   :  { %v5930_v1 = vadd.f32 %v5911_v59, %v13710_v11 }
 0xdd4   :  { %v13778_v58 = vadd.f32 %v6092_v57, %v5930_v1 }
 0xdd5   :  { %v6421_v41 = vpop.f32.mrf.mxu1 }
 0xdd9   :  { %v13780_v4 = vpop.f32.mrf.mxu3 }
 0xddd   :  { %v6424_v29 = vpop.f32.mrf.mxu1 }
 0xde1   :  { %v6238_v27 = vpop.f32.mrf.mxu3 }
 0xde2   :  { %v6278_v48 = vadd.f32 %v6238_v27, %v13718_v26 }
 0xde4   :  { %v6459_v45 = vadd.f32 %v6419_v31, %v6278_v48 }
 0xde5   :  { %v6426_v53 = vpop.f32.mrf.mxu1 }
 0xde6   :  { %v6479_v11 = vadd.f32 %v13786_v8, %v6459_v45 }
 0xde8   :  { %v6495_v32 = vmax.f32 %v6479_v11, 0.0 }
 0xde9   :  { %v6240_v46 = vpop.f32.mrf.mxu3 }
 0xdea   :  { %v6279_v18 = vadd.f32 %v6240_v46, %v13721_v40 }
 0xdec   :  { %v6460_v44 = vadd.f32 %v6421_v41, %v6279_v18 }
 0xded   :  { %v6429_v55 = vpop.f32.mrf.mxu1 }
 0xdee   :  { %v6480_v22 = vadd.f32 %v13786_v8, %v6460_v44 }
 0xdf0   :  { %v6496_v35 = vmax.f32 %v6480_v22, 0.0 }
 0xdf1   :  { %v6243_v10 = vpop.f32.mrf.mxu3 }
 0xdf2   :  { %v6280_v26 = vadd.f32 %v6243_v10, %v13726_v19  ;;  %v13792_v5 = vpack.c.bf16 %v6496_v35, %v6495_v32 }
 0xdf4   :  { %v6461_v13 = vadd.f32 %v6424_v29, %v6280_v26 }
 0xdf5   :  { %v6431_v52 = vpop.f32.mrf.mxu1 }
 0xdf6   :  { %v6481_v40 = vadd.f32 %v13786_v8, %v6461_v13 }
 0xdf8   :  { %v6497_v6 = vmax.f32 %v6481_v40, 0.0 }
 0xdf9   :  { %v6245_v15 = vpop.f32.mrf.mxu3 }
 0xdfa   :  { %v6281_v30 = vadd.f32 %v6245_v15, %v13729_v54 }
 0xdfc   :  { %v6462_v33 = vadd.f32 %v6426_v53, %v6281_v30 }
 0xdfd   :  { %v6434_v63 = vpop.f32.mrf.mxu1 }
 0xdfe   :  { %v6482_v17 = vadd.f32 %v13786_v8, %v6462_v33 }
 0xe00   :  { %v6498_v16 = vmax.f32 %v6482_v17, 0.0 }
 0xe01   :  { %v6248_v38 = vpop.f32.mrf.mxu3 }
 0xe02   :  { %v6282_v43 = vadd.f32 %v6248_v38, %v13734_v47  ;;  %v13798_v50 = vpack.c.bf16 %v6498_v16, %v6497_v6 }
 0xe04   :  { %v6463_v19 = vadd.f32 %v6429_v55, %v6282_v43 }
 0xe05   :  { %v6436_v7 = vpop.f32.mrf.mxu1 }
 0xe06   :  { %v6483_v54 = vadd.f32 %v13786_v8, %v6463_v19 }
 0xe08   :  { %v6499_v49 = vmax.f32 %v6483_v54, 0.0 }
 0xe09   :  { %v6250_v57 = vpop.f32.mrf.mxu3 }
 0xe0a   :  { %v6283_v0 = vadd.f32 %v6250_v57, %v13737_v60 }
 0xe0c   :  { %v6464_v56 = vadd.f32 %v6431_v52, %v6283_v0 }
 0xe0d   :  { %v6439_v1 = vpop.f32.mrf.mxu1 }
 0xe0e   :  { %v6484_v2 = vadd.f32 %v13786_v8, %v6464_v56 }
 0xe10   :  { %v6500_v3 = vmax.f32 %v6484_v2, 0.0 }
 0xe11   :  { %v6253_v25 = vpop.f32.mrf.mxu3 }
 0xe12   :  { %v6284_v31 = vadd.f32 %v6253_v25, %v13742_v23  ;;  %v13804_v59 = vpack.c.bf16 %v6500_v3, %v6499_v49  ;;  %v5925_v23 = vadd.f32 %v13756_v21, %v13665_v24  ;;  %v5927_v24 = vadd.f32 %v13765_v51, %v13694_v34 }
 0xe13   :  { %v5929_v34 = vadd.f32 %v13774_v37, %v13705_v36  ;;  %v5931_v36 = vadd.f32 %v13780_v4, %v13713_v61  ;;  %v10532_v61 = vld [vmem:[%s14336_s6] sm:$0xff]  ;;  %v10535_v4 = vld [vmem:[%s14336_s6 + $0x18] sm:$0xff] }
 0xe14   :  { %v6465_v47 = vadd.f32 %v6434_v63, %v6284_v31  ;;  %v6106_v22 = vadd.f32 %v13744_v62, %v5925_v23  ;;  %v6108_v33 = vadd.f32 %v13754_v9, %v5927_v24 }
 0xe15   :  { %v6441_v45 = vpop.f32.mrf.mxu1  ;;  %v6110_v9 = vadd.f32 %v13763_v28, %v5929_v34  ;;  %v6112_v28 = vadd.f32 %v13772_v14, %v5931_v36  ;;  %v10534_v14 = vld [vmem:[%s14336_s6 + $0x10] sm:$0xff]  ;;  %v10564_v36 = vld [vmem:[%s14338_s4 + $0x40] sm:$0xff] }
 0xe16   :  { %v6485_v60 = vadd.f32 %v13786_v8, %v6465_v47 }
 0xe18   :  { %v6501_v53 = vmax.f32 %v6485_v60, 0.0 }
 0xe19   :  { %v6255_v41 = vpop.f32.mrf.mxu3 }
 0xe1a   :  { %v6285_v29 = vadd.f32 %v6255_v41, %v13747_v42 }
 0xe1c   :  { %v6466_v27 = vadd.f32 %v6436_v7, %v6285_v29 }
 0xe1d   :  { %v6444_v42 = vpop.f32.mrf.mxu1 }
 0xe1e   :  { %v6486_v48 = vadd.f32 %v13786_v8, %v6466_v27 }
 0xe20   :  { %v6502_v46 = vmax.f32 %v6486_v48, 0.0 }
 0xe21   :  { %v6258_v18 = vpop.f32.mrf.mxu3 }
 0xe22   :  { %v6286_v11 = vadd.f32 %v6258_v18, %v13752_v20  ;;  %v13810_v44 = vpack.c.bf16 %v6502_v46, %v6501_v53 }
 0xe24   :  { %v6467_v55 = vadd.f32 %v6439_v1, %v6286_v11 }
 0xe25   :  { %v6446_v40 = vpop.f32.mrf.mxu1 }
 0xe26   :  { %v6487_v10 = vadd.f32 %v13786_v8, %v6467_v55 }
 0xe28   :  { %v6503_v52 = vmax.f32 %v6487_v10, 0.0 }
 0xe29   :  { %v6260_v32 = vpop.f32.mrf.mxu3 }
 0xe2a   :  { %v6287_v35 = vadd.f32 %v6260_v32, %v6106_v22 }
 0xe2c   :  { %v6468_v26 = vadd.f32 %v6441_v45, %v6287_v35 }
 0xe2d   :  { %v6449_v63 = vpop.f32.mrf.mxu1 }
 0xe2e   :  { %v6488_v13 = vadd.f32 %v13786_v8, %v6468_v26 }
 0xe30   :  { %v6504_v15 = vmax.f32 %v6488_v13, 0.0 }
 0xe31   :  { %v6263_v30 = vpop.f32.mrf.mxu3 }
 0xe32   :  { %v13817_v20 = vpack.c.bf16 %v6504_v15, %v6503_v52  ;;  %v6288_v21 = vadd.f32 %v6263_v30, %v13761_v39 }
 0xe34   :  { %v6469_v62 = vadd.f32 %v6444_v42, %v6288_v21 }
 0xe35   :  { %v6451_v51 = vpop.f32.mrf.mxu1 }
 0xe36   :  { %v6489_v16 = vadd.f32 %v13786_v8, %v6469_v62 }
 0xe38   :  { %v6505_v19 = vmax.f32 %v6489_v16, 0.0 }
 0xe39   :  { %v6265_v17 = vpop.f32.mrf.mxu3 }
 0xe3a   :  { %v6289_v6 = vadd.f32 %v6265_v17, %v6108_v33 }
 0xe3c   :  { %v6470_v38 = vadd.f32 %v6446_v40, %v6289_v6 }
 0xe3d   :  { %v6454_v1 = vpop.f32.mrf.mxu1 }
 0xe3e   :  { %v6490_v43 = vadd.f32 %v13786_v8, %v6470_v38  ;;  %v9850_v38 = vld [vmem:[%s14337_s14 + $0x38] sm:$0xf] }
 0xe40   :  { %v6506_v57 = vmax.f32 %v6490_v43, 0.0 }
 0xe41   :  { %v6268_v0 = vpop.f32.mrf.mxu3 }
 0xe42   :  { %v6516_v7 = vpack.c.bf16 %v6506_v57, %v6505_v19  ;;  %v6290_v39 = vadd.f32 %v6268_v0, %v13770_v12 }
 0xe44   :  { %v6471_v54 = vadd.f32 %v6449_v63, %v6290_v39  ;;  %v10551_v63 = vld [vmem:[%s14337_s14 + $0x38] sm:$0x30] }
 0xe45   :  { %v6456_v48 = vpop.f32.mrf.mxu1 }
 0xe46   :  { %v6491_v49 = vadd.f32 %v13786_v8, %v6471_v54 }
 0xe48   :  { %v6507_v31 = vmax.f32 %v6491_v49, 0.0  ;;  %v10540_v49 = vld [vmem:[%s14338_s4] sm:$0xff] }
 0xe49   :  { %v6270_v56 = vpop.f32.mrf.mxu3 }
 0xe4a   :  { %v6291_v2 = vadd.f32 %v6270_v56, %v6110_v9 }
 0xe4c   :  { %v6472_v3 = vadd.f32 %v6451_v51, %v6291_v2  ;;  %v9851_v51 = vor.u32 %v10551_v63, %v9850_v38  ;;  %v10546_v2 = vld [vmem:[%s14338_s4 + $0x10] sm:$0xff]  ;;  %v10583_v63 = vld [vmem:[%s14338_s4 + $0x78] sm:$0xff] }
 0xe4d   :  { %v10582_v38 = vld [vmem:[%s14338_s4 + $0x70] sm:$0xff] }
 0xe4e   :  { %v6492_v25 = vadd.f32 %v13786_v8, %v6472_v3  ;;  %v6807_v56 = vsel %vm3416_vm5, %v9851_v51, 0  ;;  %v10552_v3 = vld [vmem:[%s14338_s4 + $0x20] sm:$0xff] }
 0xe50   :  { %v6508_v47 = vmax.f32 %v6492_v25, 0.0  ;;  %v10550_v25 = vld [vmem:[%s14337_s14 + $0x30] sm:$0xff] }
 0xe51   :  { %v6273_v41 = vpop.f32.mrf.mxu3 }
 0xe52   :  { %v6517_v29 = vpack.c.bf16 %v6508_v47, %v6507_v31  ;;  %v6292_v12 = vadd.f32 %v6273_v41, %v13778_v58  ;;  %v10533_v58 = vld [vmem:[%s14336_s6 + $0x8] sm:$0xff]  ;;  %v10548_v47 = vld [vmem:[%s14337_s14 + $0x20] sm:$0xff] }
 0xe53   :  { %v10549_v31 = vld [vmem:[%s14337_s14 + $0x28] sm:$0xff] }
 0xe54   :  { %v6473_v37 = vadd.f32 %v6454_v1, %v6292_v12  ;;  %v10547_v1 = vld [vmem:[%s14338_s4 + $0x18] sm:$0xff]  ;;  %v10541_v41 = vld [vmem:[%s14338_s4 + $0x8] sm:$0xff] }
 0xe55   :  { %v9868_v12 = vld [vmem:[%s14337_s14 + $0x18] sm:$0xf] }
 0xe56   :  { %v6493_v45 = vadd.f32 %v13786_v8, %v6473_v37  ;;  %v10545_v37 = vld [vmem:[%s14337_s14 + $0x18] sm:$0x30] }
 0xe58   :  { %v6509_v18 = vmax.f32 %v6493_v45, 0.0  ;;  %v10557_v45 = vld [vmem:[%s14337_s14 + $0x58] sm:$0x30] }
 0xe59   :  { %v6275_v60 = vpop.f32.mrf.mxu3 }
 0xe5a   :  { %v6293_v27 = vadd.f32 %v6275_v60, %v6112_v28  ;;  %v9869_v28 = vor.u32 %v10545_v37, %v9868_v12 }
 0xe5c   :  { %v6474_v53 = vadd.f32 %v6456_v48, %v6293_v27  ;;  %v6858_v60 = vsel %vm3416_vm5, %v9869_v28, 0  ;;  %v10544_v27 = vld [vmem:[%s14337_s14 + $0x10] sm:$0xff]  ;;  %v9908_v48 = vld [vmem:[%s14337_s14 + $0x58] sm:$0xf]  ;;  %v10560_v28 = vld [vmem:[%s14337_s14 + $0x60] sm:$0xff] }
 0xe5e   :  { %v6494_v46 = vadd.f32 %v13786_v8, %v6474_v53  ;;  %v10536_v8 = vld [vmem:[%s14336_s6 + $0x20] sm:$0xff]  ;;  %v9909_v53 = vor.u32 %v10557_v45, %v9908_v48 }
 0xe60   :  { %v6510_v11 = vmax.f32 %v6494_v46, 0.0  ;;  %v10543_v46 = vld [vmem:[%s14337_s14 + $0x8] sm:$0xff] }
 0xe62   :  { %v6518_v23 = vpack.c.bf16 %v6510_v11, %v6509_v18  ;;  %v6960_v18 = vsel %vm3416_vm5, %v9909_v53, 0  ;;  %v10542_v11 = vld [vmem:[%s14337_s14] sm:$0xff] }
 0xe63   :  { %6966 = vmatpush.bf16.msrb.mxu1 %v6960_v18 }
 0xe64   :  { %6535 = vmatpush.bf16.msrb.mxu2 %v6518_v23  ;;  %6571 = vmatpush.bf16.msrb.mxu3 %v6518_v23 }
 0xe68   :  { %6536 = vmatpush.bf16.msrb.mxu2 %v6517_v29  ;;  %6572 = vmatpush.bf16.msrb.mxu3 %v6517_v29 }
 0xe6c   :  { %6537 = vmatpush.bf16.msrb.mxu2 %v6516_v7  ;;  %6573 = vmatpush.bf16.msrb.mxu3 %v6516_v7 }
 0xe70   :  { %6538 = vmatpush.bf16.msrb.mxu2 %v13817_v20  ;;  %6574 = vmatpush.bf16.msrb.mxu3 %v13817_v20 }
 0xe74   :  { %6539 = vmatpush.bf16.msrb.mxu2 %v13810_v44  ;;  %6575 = vmatpush.bf16.msrb.mxu3 %v13810_v44 }
 0xe78   :  { %6540 = vmatpush.bf16.msrb.mxu2 %v13804_v59  ;;  %6576 = vmatpush.bf16.msrb.mxu3 %v13804_v59 }
 0xe7c   :  { %6541 = vmatpush.bf16.msrb.mxu2 %v13798_v50  ;;  %6577 = vmatpush.bf16.msrb.mxu3 %v13798_v50 }
 0xe80   :  { %6542 = vmatpush.bf16.msrb.mxu2 %v13792_v5  ;;  %6578 = vmatpush.bf16.msrb.mxu3 %v13792_v5 }
 0xe83   :  { %6543 = vmatmul.bf16.vlgmr.msrb.gmra.mxu2 %v10532_v61  ;;  %6579 = vmatmul.bf16.vlgmr.msrb.gmra.mxu3 %v10534_v14  ;;  %v10555_v61 = vld [vmem:[%s14337_s14 + $0x48] sm:$0xff]  ;;  %v10554_v14 = vld [vmem:[%s14337_s14 + $0x40] sm:$0xff] }
 0xe84   :  { %6607 = vmatpush.bf16.msra.mxu2 %v6518_v23  ;;  %6643 = vmatpush.bf16.msra.mxu3 %v6518_v23  ;;  %v10556_v23 = vld [vmem:[%s14337_s14 + $0x50] sm:$0xff] }
 0xe85   :  { %6967 = vmatpush.bf16.msrb.mxu1 %v10556_v23  ;;  %v10581_v23 = vld [vmem:[%s14337_s14 + $0xd8] sm:$0x30] }
 0xe88   :  { %6608 = vmatpush.bf16.msra.mxu2 %v6517_v29  ;;  %6644 = vmatpush.bf16.msra.mxu3 %v6517_v29  ;;  %v10553_v29 = vld [vmem:[%s14338_s4 + $0x28] sm:$0xff] }
 0xe89   :  { %6968 = vmatpush.bf16.msrb.mxu1 %v10555_v61 }
 0xe8c   :  { %6609 = vmatpush.bf16.msra.mxu2 %v6516_v7  ;;  %6645 = vmatpush.bf16.msra.mxu3 %v6516_v7 }
 0xe8d   :  { %6969 = vmatpush.bf16.msrb.mxu1 %v10554_v14 }
 0xe90   :  { %6610 = vmatpush.bf16.msra.mxu2 %v13817_v20  ;;  %6646 = vmatpush.bf16.msra.mxu3 %v13817_v20 }
 0xe93   :  { %6548 = vmatmul.bf16.gmra.mxu2 %v10533_v58  ;;  %6584 = vmatmul.bf16.gmra.mxu3 %v10535_v4 }
 0xe94   :  { %6611 = vmatpush.bf16.msra.mxu2 %v13810_v44  ;;  %6647 = vmatpush.bf16.msra.mxu3 %v13810_v44  ;;  %v10538_v44 = vld [vmem:[%s14336_s6 + $0x30] sm:$0xff] }
 0xe98   :  { %6612 = vmatpush.bf16.msra.mxu2 %v13804_v59  ;;  %6648 = vmatpush.bf16.msra.mxu3 %v13804_v59  ;;  %v10537_v59 = vld [vmem:[%s14336_s6 + $0x28] sm:$0xff] }
 0xe9c   :  { %6613 = vmatpush.bf16.msra.mxu2 %v13798_v50  ;;  %6649 = vmatpush.bf16.msra.mxu3 %v13798_v50  ;;  %v10539_v50 = vld [vmem:[%s14336_s6 + $0x38] sm:$0xff] }
 0xea0   :  { %6614 = vmatpush.bf16.msra.mxu2 %v13792_v5  ;;  %6650 = vmatpush.bf16.msra.mxu3 %v13792_v5 }
 0xea3   :  { %6615 = vmatmul.bf16.vlgmr.msra.gmra.mxu2 %v10536_v8  ;;  %6651 = vmatmul.bf16.vlgmr.msra.gmra.mxu3 %v10538_v44 }
 0xeb3   :  { %6620 = vmatmul.bf16.gmra.mxu2 %v10537_v59  ;;  %6656 = vmatmul.bf16.gmra.mxu3 %v10539_v50 }
 0xf06   :  { %v6544_v5 = vpop.f32.mrf.mxu2  ;;  %v6580_v55 = vpop.f32.mrf.mxu3 }
 0xf07   :  { %v6662_v7 = vmax.f32 %v6544_v5, %v6580_v55 }
 0xf0e   :  { %v6546_v22 = vpop.f32.mrf.mxu2  ;;  %v6582_v42 = vpop.f32.mrf.mxu3 }
 0xf0f   :  { %v6663_v43 = vmax.f32 %v6546_v22, %v6582_v42 }
 0xf16   :  { %v6549_v32 = vpop.f32.mrf.mxu2  ;;  %v6585_v35 = vpop.f32.mrf.mxu3 }
 0xf17   :  { %v6664_v33 = vmax.f32 %v6549_v32, %v6585_v35 }
 0xf1e   :  { %v6551_v10 = vpop.f32.mrf.mxu2  ;;  %v6587_v26 = vpop.f32.mrf.mxu3 }
 0xf1f   :  { %v6665_v17 = vmax.f32 %v6551_v10, %v6587_v26 }
 0xf26   :  { %v6616_v13 = vpop.f32.mrf.mxu2  ;;  %v6652_v52 = vpop.f32.mrf.mxu3 }
 0xf27   :  { %v6666_v19 = vmax.f32 %v6616_v13, %v6652_v52 }
 0xf29   :  { %v6670_v54 = vmax.f32 %v6662_v7, %v6666_v19  ;;  %v10569_v19 = vld [vmem:[%s14337_s14 + $0x98] sm:$0x30]  ;;  %v9948_v7 = vld [vmem:[%s14337_s14 + $0x78] sm:$0xf] }
 0xf2e   :  { %v6618_v15 = vpop.f32.mrf.mxu2  ;;  %v6654_v30 = vpop.f32.mrf.mxu3 }
 0xf2f   :  { %v6667_v6 = vmax.f32 %v6618_v15, %v6654_v30  ;;  %v10565_v30 = vld [vmem:[%s14338_s4 + $0x48] sm:$0xff] }
 0xf31   :  { %v6671_v34 = vmax.f32 %v6663_v43, %v6667_v6  ;;  %v10571_v6 = vld [vmem:[%s14338_s4 + $0x58] sm:$0xff] }
 0xf32   :  { %v9988_v43 = vld [vmem:[%s14337_s14 + $0x98] sm:$0xf] }
 0xf33   :  { %v13892_v9 = vpack.c.bf16 %v6671_v34, %v6670_v54  ;;  %v10563_v34 = vld [vmem:[%s14337_s14 + $0x78] sm:$0x30] }
 0xf34   :  { %v9949_v51 = vor.u32 %v10563_v34, %v9948_v7  ;;  %v10591_v34 = vld [vmem:[%s14337_s14 + $0x108] sm:$0xff] }
 0xf36   :  { %v6621_v20 = vpop.f32.mrf.mxu2  ;;  %v6657_v40 = vpop.f32.mrf.mxu3 }
 0xf37   :  { %v6668_v24 = vmax.f32 %v6621_v20, %v6657_v40  ;;  %v10558_v40 = vld [vmem:[%s14338_s4 + $0x30] sm:$0xff] }
 0xf39   :  { %v6672_v57 = vmax.f32 %v6664_v33, %v6668_v24  ;;  %v10576_v24 = vld [vmem:[%s14338_s4 + $0x60] sm:$0xff]  ;;  %v10570_v33 = vld [vmem:[%s14338_s4 + $0x50] sm:$0xff] }
 0xf3e   :  { %v6623_v21 = vpop.f32.mrf.mxu2  ;;  %v6659_v62 = vpop.f32.mrf.mxu3 }
 0xf3f   :  { %v6669_v16 = vmax.f32 %v6623_v21, %v6659_v62  ;;  %v10559_v21 = vld [vmem:[%s14338_s4 + $0x38] sm:$0xff]  ;;  %v10577_v62 = vld [vmem:[%s14338_s4 + $0x68] sm:$0xff] }
 0xf41   :  { %v6673_v0 = vmax.f32 %v6665_v17, %v6669_v16  ;;  %v10588_v17 = vld [vmem:[%s14338_s4 + $0x80] sm:$0xff]  ;;  %v10589_v16 = vld [vmem:[%s14338_s4 + $0x88] sm:$0xff] }
 0xf43   :  { %v13887_v39 = vpack.c.bf16 %v6673_v0, %v6672_v57  ;;  %v9989_v57 = vor.u32 %v10569_v19, %v9988_v43  ;;  %v10108_v19 = vld [vmem:[%s14337_s14 + $0xf8] sm:$0xf] }
 0xf45   :  { %6703 = vmatpush.bf16.msrb.mxu2 %v13887_v39  ;;  %6753 = vmatpush.bf16.msrb.mxu3 %v13887_v39  ;;  %v7172_v0 = vsel %vm3416_vm5, %v9989_v57, 0  ;;  %v10587_v57 = vld [vmem:[%s14337_s14 + $0xf8] sm:$0x30] }
 0xf46   :  { %6906 = vmatpush.bf16.msrb.mxu0 %v13887_v39  ;;  %7178 = vmatpush.bf16.msra.mxu1 %v7172_v0  ;;  %v10109_v7 = vor.u32 %v10587_v57, %v10108_v19  ;;  %v10617_v19 = vld [vmem:[%s14339_s15] ss:$0 sm:$0xff] }
 0xf49   :  { %6704 = vmatpush.bf16.msrb.mxu2 %v13892_v9  ;;  %6754 = vmatpush.bf16.msrb.mxu3 %v13892_v9 }
 0xf4a   :  { %6907 = vmatpush.bf16.msrb.mxu0 %v13892_v9 }
 0xf4c   :  { %9826 = vmatmul.msk.bf16.vlgmr.msrb.gmra.mxu3 %vm6690_vm7, %v10546_v2  ;;  %9812 = vmatmul.msk.bf16.vlgmr.msrb.gmra.mxu2 %vm6690_vm7, %v10540_v49 }
 0xf4d   :  { %6813 = vmatpush.bf16.msra.mxu2 %v6807_v56  ;;  %9884 = vmatmul.msk.bf16.vlgmr.msrb.gmra.mxu0 %vm6690_vm7, %v10552_v3  ;;  %v10567_v56 = vld [vmem:[%s14337_s14 + $0x88] sm:$0xff]  ;;  %v10562_v3 = vld [vmem:[%s14337_s14 + $0x70] sm:$0xff] }
 0xf4e   :  { %7118 = vmatpush.bf16.msra.mxu0 %v13887_v39  ;;  %6864 = vmatpush.bf16.msra.mxu3 %v6858_v60 }
 0xf51   :  { %6814 = vmatpush.bf16.msra.mxu2 %v10550_v25  ;;  %v10566_v25 = vld [vmem:[%s14337_s14 + $0x80] sm:$0xff] }
 0xf52   :  { %7119 = vmatpush.bf16.msra.mxu0 %v13892_v9  ;;  %6865 = vmatpush.bf16.msra.mxu3 %v10544_v27 }
 0xf55   :  { %6815 = vmatpush.bf16.msra.mxu2 %v10549_v31 }
 0xf56   :  { %7330 = vmatpush.bf16.msrb.mxu0 %v13887_v39  ;;  %6866 = vmatpush.bf16.msra.mxu3 %v10543_v46 }
 0xf59   :  { %6816 = vmatpush.bf16.msra.mxu2 %v10548_v47 }
 0xf5a   :  { %7331 = vmatpush.bf16.msrb.mxu0 %v13892_v9  ;;  %6867 = vmatpush.bf16.msra.mxu3 %v10542_v11  ;;  %v10068_v11 = vld [vmem:[%s14337_s14 + $0xd8] sm:$0xf] }
 0xf5b   :  { %v10069_v14 = vor.u32 %v10581_v23, %v10068_v11 }
 0xf5c   :  { %9827 = vmatmul.msk.bf16.gmra.mxu3 %vm6690_vm7, %v10547_v1  ;;  %9813 = vmatmul.msk.bf16.gmra.mxu2 %vm6690_vm7, %v10541_v41  ;;  %v10561_v1 = vld [vmem:[%s14337_s14 + $0x68] sm:$0xff] }
 0xf5d   :  { %7012 = vmatpush.bf16.msrb.mxu2 %v13887_v39  ;;  %9885 = vmatmul.msk.bf16.gmra.mxu0 %vm6690_vm7, %v10553_v29 }
 0xf61   :  { %7013 = vmatpush.bf16.msrb.mxu2 %v13892_v9 }
 0xf6d   :  { %9964 = vmatmul.msk.bf16.vlgmr.msra.gmra.mxu0 %vm6690_vm7, %v10564_v36 }
 0xf6e   :  { %7542 = vmatpush.bf16.msra.mxu0 %v13887_v39 }
 0xf72   :  { %7543 = vmatpush.bf16.msra.mxu0 %v13892_v9 }
 0xf7d   :  { %9965 = vmatmul.msk.bf16.gmra.mxu0 %vm6690_vm7, %v10565_v30  ;;  %v10572_v30 = vld [vmem:[%s14337_s14 + $0xa0] sm:$0xff] }
 0xf8d   :  { %10044 = vmatmul.msk.bf16.vlgmr.msrb.gmra.mxu0 %vm6690_vm7, %v10576_v24 }
 0xf9d   :  { %10045 = vmatmul.msk.bf16.gmra.mxu0 %vm6690_vm7, %v10577_v62  ;;  %v10148_v62 = vld [vmem:[%s14337_s14 + $0x118] sm:$0xf] }
 0xfad   :  { %10124 = vmatmul.msk.bf16.vlgmr.msra.gmra.mxu0 %vm6690_vm7, %v10588_v17 }
 0xfbd   :  { %10125 = vmatmul.msk.bf16.gmra.mxu0 %vm6690_vm7, %v10589_v16 }
 0xfca   :  { %v6909_v58 = vpop.f32.mrf.mxu0 }
 0xfcf   :  { %v6756_v4 = vpop.f32.mrf.mxu3  ;;  %v6706_v8 = vpop.f32.mrf.mxu2 }
 0xfd2   :  { %v6911_v44 = vpop.f32.mrf.mxu0 }
 0xfd3   :  { %v6919_v59 = vpack.c.bf16 %v6911_v44, %v6909_v58  ;;  %v10580_v44 = vld [vmem:[%s14337_s14 + $0xd0] sm:$0xff] }
 0xfd5   :  { %9910 = vmatmul.msk.bf16.vlgmr.msrb.gmra.mxu1 %vm3391_vm6, %v6919_v59  ;;  %v10028_v59 = vld [vmem:[%s14337_s14 + $0xb8] sm:$0xf] }
 0xfd7   :  { %v6758_v50 = vpop.f32.mrf.mxu3  ;;  %v6708_v5 = vpop.f32.mrf.mxu2 }
 0xfd8   :  { %v6766_v55 = vpack.c.bf16 %v6758_v50, %v6756_v4  ;;  %v6716_v22 = vpack.c.bf16 %v6708_v5, %v6706_v8  ;;  %v7384_v4 = vsel %vm3416_vm5, %v10069_v14, 0  ;;  %v10575_v50 = vld [vmem:[%s14337_s14 + $0xb8] sm:$0x30] }
 0xfda   :  { %9852 = vmatmul.msk.bf16.vlgmr.msra.gmra.mxu2 %vm3391_vm6, %v6766_v55  ;;  %9870 = vmatmul.msk.bf16.vlgmr.msra.gmra.mxu3 %vm3391_vm6, %v6716_v22  ;;  %v6914_v42 = vpop.f32.mrf.mxu0  ;;  %v10029_v55 = vor.u32 %v10575_v50, %v10028_v59  ;;  %v10579_v22 = vld [vmem:[%s14337_s14 + $0xc8] sm:$0xff] }
 0xfdb   :  { %7224 = vmatpush.bf16.msra.mxu2 %v13887_v39 }
 0xfdf   :  { %7225 = vmatpush.bf16.msra.mxu2 %v13892_v9  ;;  %v6761_v32 = vpop.f32.mrf.mxu3  ;;  %v6711_v35 = vpop.f32.mrf.mxu2 }
 0xfe2   :  { %v6916_v10 = vpop.f32.mrf.mxu0 }
 0xfe3   :  { %v6920_v26 = vpack.c.bf16 %v6916_v10, %v6914_v42  ;;  %v7278_v42 = vsel %vm3416_vm5, %v10029_v55, 0  ;;  %v10578_v10 = vld [vmem:[%s14337_s14 + $0xc0] sm:$0xff] }
 0xfe5   :  { %9911 = vmatmul.msk.bf16.gmra.mxu1 %vm3391_vm6, %v6920_v26  ;;  %v10573_v26 = vld [vmem:[%s14337_s14 + $0xa8] sm:$0xff] }
 0xfe7   :  { %v6763_v13 = vpop.f32.mrf.mxu3  ;;  %v6713_v52 = vpop.f32.mrf.mxu2 }
 0xfe8   :  { %v6767_v15 = vpack.c.bf16 %v6763_v13, %v6761_v32  ;;  %v6717_v20 = vpack.c.bf16 %v6713_v52, %v6711_v35  ;;  %v10574_v35 = vld [vmem:[%s14337_s14 + $0xb0] sm:$0xff] }
 0xfea   :  { %9853 = vmatmul.msk.bf16.gmra.mxu2 %vm3391_vm6, %v6767_v15  ;;  %9871 = vmatmul.msk.bf16.gmra.mxu3 %vm3391_vm6, %v6717_v20  ;;  %v7121_v54 = vpop.f32.mrf.mxu0 }
 0xff2   :  { %v7123_v41 = vpop.f32.mrf.mxu0 }
 0xff3   :  { %v7131_v29 = vpack.c.bf16 %v7123_v41, %v7121_v54  ;;  %v10586_v54 = vld [vmem:[%s14337_s14 + $0xf0] sm:$0xff] }
 0xffa   :  { %9924 = vmatmul.msk.bf16.vlgmr.msrb.gmra.mxu2 %vm6690_vm7, %v10558_v40  ;;  %v7126_v27 = vpop.f32.mrf.mxu0 }
 0xffb   :  { %7436 = vmatpush.bf16.msrb.mxu2 %v13887_v39  ;;  %v10568_v39 = vld [vmem:[%s14337_s14 + $0x90] sm:$0xff] }
 0xffc   :  { %7179 = vmatpush.bf16.msra.mxu1 %v10568_v39  ;;  %v7490_v39 = vsel %vm3416_vm5, %v10109_v7, 0 }
 0xfff   :  { %7437 = vmatpush.bf16.msrb.mxu2 %v13892_v9  ;;  %v7066_v9 = vsel %vm3416_vm5, %v9949_v51, 0 }
0x1000   :  { %7072 = vmatpush.bf16.msrb.mxu3 %v7066_v9  ;;  %7180 = vmatpush.bf16.msra.mxu1 %v10567_v56  ;;  %v10590_v9 = vld [vmem:[%s14337_s14 + $0x100] sm:$0xff]  ;;  %v10585_v56 = vld [vmem:[%s14337_s14 + $0xe8] sm:$0xff] }
0x1002   :  { %v7128_v46 = vpop.f32.mrf.mxu0 }
0x1003   :  { %v7132_v61 = vpack.c.bf16 %v7128_v46, %v7126_v27 }
0x1004   :  { %7073 = vmatpush.bf16.msrb.mxu3 %v10562_v3  ;;  %7181 = vmatpush.bf16.msra.mxu1 %v10566_v25  ;;  %v10584_v25 = vld [vmem:[%s14337_s14 + $0xe0] sm:$0xff] }
0x1007   :  { %9990 = vmatmul.msk.bf16.vlgmr.msra.gmra.mxu1 %vm3391_vm6, %v7131_v29 }
0x1008   :  { %7074 = vmatpush.bf16.msrb.mxu3 %v10561_v1  ;;  %7390 = vmatpush.bf16.msrb.mxu1 %v7384_v4 }
0x100a   :  { %9925 = vmatmul.msk.bf16.gmra.mxu2 %vm6690_vm7, %v10559_v21  ;;  %v7333_v5 = vpop.f32.mrf.mxu0 }
0x100c   :  { %7075 = vmatpush.bf16.msrb.mxu3 %v10560_v28  ;;  %7391 = vmatpush.bf16.msrb.mxu1 %v10580_v44 }
0x1010   :  { %7284 = vmatpush.bf16.msra.mxu3 %v7278_v42  ;;  %7392 = vmatpush.bf16.msrb.mxu1 %v10579_v22 }
0x1012   :  { %v7335_v13 = vpop.f32.mrf.mxu0 }
0x1013   :  { %v7343_v52 = vpack.c.bf16 %v7335_v13, %v7333_v5 }
0x1014   :  { %7285 = vmatpush.bf16.msra.mxu3 %v10574_v35  ;;  %7393 = vmatpush.bf16.msrb.mxu1 %v10578_v10 }
0x1017   :  { %9991 = vmatmul.msk.bf16.gmra.mxu1 %vm3391_vm6, %v7132_v61 }
0x1018   :  { %7286 = vmatpush.bf16.msra.mxu3 %v10573_v26 }
0x101a   :  { %10004 = vmatmul.msk.bf16.vlgmr.msra.gmra.mxu2 %vm6690_vm7, %v10570_v33  ;;  %v7338_v40 = vpop.f32.mrf.mxu0  ;;  %v10593_v33 = vld [vmem:[%s14337_s14 + $0x118] sm:$0x30] }
0x101c   :  { %7287 = vmatpush.bf16.msra.mxu3 %v10572_v30 }
0x1022   :  { %v7340_v21 = vpop.f32.mrf.mxu0 }
0x1023   :  { %v7344_v17 = vpack.c.bf16 %v7340_v21, %v7338_v40 }
0x1027   :  { %10070 = vmatmul.msk.bf16.vlgmr.msrb.gmra.mxu1 %vm3391_vm6, %v7343_v52 }
0x102a   :  { %10005 = vmatmul.msk.bf16.gmra.mxu2 %vm6690_vm7, %v10571_v6  ;;  %v10149_v6 = vor.u32 %v10593_v33, %v10148_v62  ;;  %v7545_v0 = vpop.f32.mrf.mxu0 }
0x102c   :  { %v7596_v16 = vsel %vm3416_vm5, %v10149_v6, 0 }
0x102d   :  { %7602 = vmatpush.bf16.msra.mxu1 %v7596_v16 }
0x1037   :  { %10071 = vmatmul.msk.bf16.gmra.mxu1 %vm3391_vm6, %v7344_v17 }
0x103a   :  { %10084 = vmatmul.msk.bf16.vlgmr.msrb.gmra.mxu2 %vm6690_vm7, %v10582_v38 }
0x104a   :  { %10085 = vmatmul.msk.bf16.gmra.mxu2 %vm6690_vm7, %v10583_v63  ;;  %v10592_v63 = vld [vmem:[%s14337_s14 + $0x110] sm:$0xff] }
0x104b   :  { %7603 = vmatpush.bf16.msra.mxu1 %v10592_v63 }
0x104f   :  { %7604 = vmatpush.bf16.msra.mxu1 %v10591_v34 }
0x1052   :  { %v6971_v2 = vpop.f32.mrf.mxu1 }
0x1053   :  { %7605 = vmatpush.bf16.msra.mxu1 %v10590_v9 }
0x105a   :  { %v14061_v12 = vpop.f32.mrf.mxu1 }
0x105d   :  { %v6818_v49 = vpop.f32.mrf.mxu2  ;;  %v6869_v31 = vpop.f32.mrf.mxu3 }
0x105e   :  { %v6870_v47 = vadd.f32 %v6869_v31, %v6818_v49 }
0x1060   :  { %v14058_v36 = vadd.f32 %v6971_v2, %v6870_v47  ;;  %v7547_v2 = vpop.f32.mrf.mxu0 }
0x1061   :  { %v7555_v49 = vpack.c.bf16 %v7547_v2, %v7545_v0 }
0x1062   :  { %v6976_v53 = vpop.f32.mrf.mxu1 }
0x1063   :  { %10150 = vmatmul.msk.bf16.vlgmr.msra.gmra.mxu1 %vm3391_vm6, %v7555_v49 }
0x1065   :  { %v14063_v37 = vpop.f32.mrf.mxu2  ;;  %v14068_v60 = vpop.f32.mrf.mxu3 }
0x1066   :  { %v6872_v5 = vadd.f32 %v14068_v60, %v14063_v37 }
0x1068   :  { %v7550_v47 = vpop.f32.mrf.mxu0  ;;  %v6982_v22 = vadd.f32 %v14061_v12, %v6872_v5 }
0x106a   :  { %v6978_v23 = vpop.f32.mrf.mxu1 }
0x106d   :  { %v6823_v48 = vpop.f32.mrf.mxu2  ;;  %v6874_v45 = vpop.f32.mrf.mxu3 }
0x106e   :  { %v6875_v18 = vadd.f32 %v6874_v45, %v6823_v48 }
0x1070   :  { %v14076_v58 = vadd.f32 %v6976_v53, %v6875_v18  ;;  %v7552_v41 = vpop.f32.mrf.mxu0 }
0x1071   :  { %v7556_v29 = vpack.c.bf16 %v7552_v41, %v7550_v47 }
0x1073   :  { %10151 = vmatmul.msk.bf16.gmra.mxu1 %vm3391_vm6, %v7556_v29 }
0x1075   :  { %v14080_v8 = vpop.f32.mrf.mxu2  ;;  %v6876_v4 = vpop.f32.mrf.mxu3 }
0x1076   :  { %v6877_v63 = vadd.f32 %v6876_v4, %v14080_v8  ;;  %v10155_v4 = vld [vmem:[%s14340_s7 + $0x8] sm:$0xf] }
0x1078   :  { %v6984_v7 = vadd.f32 %v6978_v23, %v6877_v63  ;;  %v10599_v63 = vld [vmem:[%s14341_s16 + $0x28] sm:$0x70] }
0x107d   :  { %v7015_v32 = vpop.f32.mrf.mxu2 }
0x1084   :  { %v7183_v61 = vpop.f32.mrf.mxu1 }
0x1085   :  { %v7017_v15 = vpop.f32.mrf.mxu2 }
0x1086   :  { %v7025_v20 = vpack.c.bf16 %v7017_v15, %v7015_v32 }
0x1088   :  { %9950 = vmatmul.msk.bf16.vlgmr.msrb.gmra.mxu3 %vm3391_vm6, %v7025_v20 }
0x1089   :  { %7496 = vmatpush.bf16.msrb.mxu3 %v7490_v39 }
0x108c   :  { %v7185_v14 = vpop.f32.mrf.mxu1 }
0x108d   :  { %v7020_v24 = vpop.f32.mrf.mxu2  ;;  %7497 = vmatpush.bf16.msrb.mxu3 %v10586_v54 }
0x1091   :  { %7498 = vmatpush.bf16.msrb.mxu3 %v10585_v56 }
0x1094   :  { %v7188_v59 = vpop.f32.mrf.mxu1 }
0x1095   :  { %v7022_v38 = vpop.f32.mrf.mxu2  ;;  %7499 = vmatpush.bf16.msrb.mxu3 %v10584_v25 }
0x1096   :  { %v7026_v43 = vpack.c.bf16 %v7022_v38, %v7020_v24 }
0x1098   :  { %9951 = vmatmul.msk.bf16.gmra.mxu3 %vm3391_vm6, %v7026_v43 }
0x109c   :  { %v7190_v35 = vpop.f32.mrf.mxu1 }
0x109d   :  { %v7227_v51 = vpop.f32.mrf.mxu2 }
0x10a4   :  { %v7395_v15 = vpop.f32.mrf.mxu1 }
0x10a5   :  { %v7229_v3 = vpop.f32.mrf.mxu2 }
0x10a6   :  { %v7237_v31 = vpack.c.bf16 %v7229_v3, %v7227_v51 }
0x10a8   :  { %10030 = vmatmul.msk.bf16.vlgmr.msra.gmra.mxu3 %vm3391_vm6, %v7237_v31 }
0x10ac   :  { %v7397_v20 = vpop.f32.mrf.mxu1 }
0x10ad   :  { %v7232_v1 = vpop.f32.mrf.mxu2 }
0x10b5   :  { %v7234_v28 = vpop.f32.mrf.mxu2 }
0x10b6   :  { %v7238_v27 = vpack.c.bf16 %v7234_v28, %v7232_v1 }
0x10b8   :  { %10031 = vmatmul.msk.bf16.gmra.mxu3 %vm3391_vm6, %v7238_v27 }
0x10bd   :  { %v7439_v48 = vpop.f32.mrf.mxu2 }
0x10c5   :  { %v7441_v45 = vpop.f32.mrf.mxu2 }
0x10c6   :  { %v7449_v53 = vpack.c.bf16 %v7441_v45, %v7439_v48 }
0x10c8   :  { %10110 = vmatmul.msk.bf16.vlgmr.msrb.gmra.mxu3 %vm3391_vm6, %v7449_v53 }
0x10cd   :  { %v7444_v46 = vpop.f32.mrf.mxu2 }
0x10d5   :  { %v7446_v18 = vpop.f32.mrf.mxu2 }
0x10d6   :  { %v7450_v11 = vpack.c.bf16 %v7446_v18, %v7444_v46 }
0x10d8   :  { %10111 = vmatmul.msk.bf16.gmra.mxu3 %vm3391_vm6, %v7450_v11 }
0x110b   :  { %v7077_v44 = vpop.f32.mrf.mxu3 }
0x110c   :  { %v7087_v50 = vadd.f32 %v7077_v44, %v14058_v36  ;;  %v7400_v36 = vpop.f32.mrf.mxu1  ;;  %v10157_v44 = vld [vmem:[%s14340_s7 + $0xc] sm:$0xf] }
0x110e   :  { %v7193_v55 = vadd.f32 %v7183_v61, %v7087_v50  ;;  %v7635_v61 = vld [vmem:[%s14340_s7] sm:$0xf]  ;;  %v10597_v50 = vld [vmem:[%s14341_s16 + $0x18] sm:$0x70] }
0x1113   :  { %v7079_v42 = vpop.f32.mrf.mxu3 }
0x1114   :  { %v7088_v32 = vadd.f32 %v7079_v42, %v6982_v22  ;;  %v7402_v62 = vpop.f32.mrf.mxu1  ;;  %v10596_v22 = vld [vmem:[%s14341_s16 + $0x10] sm:$0xff] }
0x1116   :  { %v7194_v10 = vadd.f32 %v7185_v14, %v7088_v32  ;;  %v10153_v14 = vld [vmem:[%s14340_s7 + $0x4] sm:$0xf] }
0x111b   :  { %v7082_v26 = vpop.f32.mrf.mxu3 }
0x111c   :  { %v7089_v13 = vadd.f32 %v7082_v26, %v14076_v58  ;;  %v7607_v60 = vpop.f32.mrf.mxu1 }
0x111e   :  { %v7195_v52 = vadd.f32 %v7188_v59, %v7089_v13  ;;  %v10172_v59 = vld [vmem:[%s14341_s16 + $0x18] sm:$0xf] }
0x111f   :  { %v10173_v5 = vor.u32 %v10597_v50, %v10172_v59 }
0x1123   :  { %v7084_v30 = vpop.f32.mrf.mxu3 }
0x1124   :  { %v7609_v38 = vpop.f32.mrf.mxu1  ;;  %v7090_v51 = vadd.f32 %v7084_v30, %v6984_v7 }
0x1126   :  { %v7196_v25 = vadd.f32 %v7190_v35, %v7090_v51 }
0x112b   :  { %v7289_v40 = vpop.f32.mrf.mxu3 }
0x112c   :  { %v7299_v33 = vadd.f32 %v7289_v40, %v7193_v55  ;;  %v7612_v3 = vpop.f32.mrf.mxu1  ;;  %v7777_v55 = vsel %vm7775_vm8, %v10173_v5, 0 }
0x112e   :  { %v7405_v17 = vadd.f32 %v7395_v15, %v7299_v33  ;;  %v10181_v33 = vld [vmem:[%s14341_s16 + $0x8] sm:$0xf] }
0x1133   :  { %v7291_v24 = vpop.f32.mrf.mxu3 }
0x1134   :  { %v7300_v6 = vadd.f32 %v7291_v24, %v7194_v10  ;;  %v7614_v48 = vpop.f32.mrf.mxu1  ;;  %v10160_v24 = vld [vmem:[%s14342_s5 + $0x4] sm:$0xf] }
0x1136   :  { %v7406_v58 = vadd.f32 %v7397_v20, %v7300_v6 }
0x113b   :  { %v7294_v21 = vpop.f32.mrf.mxu3 }
0x113c   :  { %v7301_v54 = vadd.f32 %v7294_v21, %v7195_v52 }
0x113e   :  { %v7407_v8 = vadd.f32 %v7400_v36, %v7301_v54  ;;  %v7710_v36 = vld [vmem:[%s14342_s5] sm:$0xf] }
0x1143   :  { %v7296_v37 = vpop.f32.mrf.mxu3 }
0x1144   :  { %v7302_v47 = vadd.f32 %v7296_v37, %v7196_v25  ;;  %v10184_v37 = vld [vmem:[%s14342_s5 + $0x8] sm:$0xf]  ;;  %v10229_v25 = vld [vmem:[%s14342_s5 + $0x14] sm:$0xf] }
0x1146   :  { %v7408_v41 = vadd.f32 %v7402_v62, %v7302_v47  ;;  %v10601_v47 = vld [vmem:[%s14341_s16 + $0x38] sm:$0x70] }
0x114b   :  { %v7501_v12 = vpop.f32.mrf.mxu3 }
0x114c   :  { %v7511_v16 = vadd.f32 %v7501_v12, %v7405_v17  ;;  %v10595_v12 = vld [vmem:[%s14341_s16 + $0x8] sm:$0x70] }
0x114d   :  { %v10182_v17 = vor.u32 %v10595_v12, %v10181_v33  ;;  %v10610_v12 = vld [vmem:[%s14341_s16 + $0x80] sm:$0xff] }
0x114e   :  { %v7617_v43 = vadd.f32 %v7607_v60, %v7511_v16  ;;  %v10214_v60 = vld [vmem:[%s14342_s5 + $0x10] sm:$0xf]  ;;  %v10594_v16 = vld [vmem:[%s14341_s16] sm:$0xff] }
0x114f   :  { %v7807_v6 = vsel %vm7775_vm8, %v10182_v17, 0 }
0x1150   :  { %v7625_v34 = vadd.f32 %v10617_v19, %v7617_v43 }
0x1152   :  { %v7629_v56 = vmax.f32 %v7625_v34, 0.0 }
0x1153   :  { %v7503_v57 = vpop.f32.mrf.mxu3 }
0x1154   :  { %v7512_v0 = vadd.f32 %v7503_v57, %v7406_v58 }
0x1156   :  { %v7618_v39 = vadd.f32 %v7609_v38, %v7512_v0  ;;  %v10196_v38 = vld [vmem:[%s14341_s16 + $0x28] sm:$0xf] }
0x1157   :  { %v10197_v58 = vor.u32 %v10599_v63, %v10196_v38 }
0x1158   :  { %v7626_v9 = vadd.f32 %v10617_v19, %v7618_v39  ;;  %v10244_v39 = vld [vmem:[%s14342_s5 + $0x18] sm:$0xf] }
0x1159   :  { %v7861_v43 = vsel %vm7775_vm8, %v10197_v58, 0  ;;  %v10608_v58 = vld [vmem:[%s14341_s16 + $0x70] sm:$0xff] }
0x115a   :  { %v7630_v2 = vmax.f32 %v7626_v9, 0.0  ;;  %v10199_v9 = vld [vmem:[%s14342_s5 + $0xc] sm:$0xf] }
0x115b   :  { %v7506_v49 = vpop.f32.mrf.mxu3 }
0x115c   :  { %v7633_v31 = vpack.c.bf16 %v7630_v2, %v7629_v56  ;;  %v7513_v1 = vadd.f32 %v7506_v49, %v7407_v8  ;;  %v10274_v49 = vld [vmem:[%s14342_s5 + $0x20] sm:$0xf]  ;;  %v10259_v8 = vld [vmem:[%s14342_s5 + $0x1c] sm:$0xf] }
0x115e   :  { %v7619_v29 = vadd.f32 %v7612_v3, %v7513_v1 }
0x1160   :  { %v7627_v45 = vadd.f32 %v10617_v19, %v7619_v29  ;;  %v10603_v29 = vld [vmem:[%s14341_s16 + $0x48] sm:$0x70] }
0x1162   :  { %v7631_v18 = vmax.f32 %v7627_v45, 0.0  ;;  %v10600_v45 = vld [vmem:[%s14341_s16 + $0x30] sm:$0xff] }
0x1163   :  { %v7508_v28 = vpop.f32.mrf.mxu3 }
0x1164   :  { %v7514_v27 = vadd.f32 %v7508_v28, %v7408_v41  ;;  %v10226_v41 = vld [vmem:[%s14341_s16 + $0x48] sm:$0xf] }
0x1166   :  { %v7620_v53 = vadd.f32 %v7614_v48, %v7514_v27  ;;  %v10227_v27 = vor.u32 %v10603_v29, %v10226_v41 }
0x1168   :  { %v7628_v46 = vadd.f32 %v10617_v19, %v7620_v53  ;;  %v10598_v19 = vld [vmem:[%s14341_s16 + $0x20] sm:$0xff]  ;;  %v7971_v48 = vsel %vm7775_vm8, %v10227_v27, 0 }
0x1169   :  { %v10602_v53 = vld [vmem:[%s14341_s16 + $0x40] sm:$0xff] }
0x116a   :  { %v7632_v11 = vmax.f32 %v7628_v46, 0.0 }
0x116c   :  { %v7634_v23 = vpack.c.bf16 %v7632_v11, %v7631_v18  ;;  %v10241_v11 = vld [vmem:[%s14341_s16 + $0x58] sm:$0xf] }
0x116e   :  { %7645 = vmatpush.bf16.msra.mxu2 %v7634_v23  ;;  %7663 = vmatpush.bf16.msra.mxu3 %v7634_v23 }
0x1172   :  { %7646 = vmatpush.bf16.msra.mxu2 %v7633_v31  ;;  %7664 = vmatpush.bf16.msra.mxu3 %v7633_v31 }
0x1175   :  { %10152 = vmatmul.msk.bf16.vlgmr.msra.gmra.mxu2 %vm6690_vm7, %v7635_v61  ;;  %10154 = vmatmul.msk.bf16.vlgmr.msra.gmra.mxu3 %vm6690_vm7, %v10153_v14 }
0x1176   :  { %7681 = vmatpush.bf16.msrb.mxu2 %v7634_v23  ;;  %7699 = vmatpush.bf16.msrb.mxu3 %v7634_v23  ;;  %v10605_v23 = vld [vmem:[%s14341_s16 + $0x58] sm:$0x70] }
0x1177   :  { %v10242_v61 = vor.u32 %v10605_v23, %v10241_v11 }
0x1179   :  { %v8026_v59 = vsel %vm7775_vm8, %v10242_v61, 0 }
0x117a   :  { %7682 = vmatpush.bf16.msrb.mxu2 %v7633_v31  ;;  %7700 = vmatpush.bf16.msrb.mxu3 %v7633_v31  ;;  %v10211_v31 = vld [vmem:[%s14341_s16 + $0x38] sm:$0xf] }
0x117b   :  { %v10212_v1 = vor.u32 %v10601_v47, %v10211_v31  ;;  %v8213_v31 = vld [vmem:[%s14344_s18] sm:$0xff] }
0x117d   :  { %v7916_v28 = vsel %vm7775_vm8, %v10212_v1, 0  ;;  %v25_v1 = vstv %s14345_s19 }
0x117e   :  { %7785 = vmatpush.bf16.msra.mxu2 %v7777_v55  ;;  %7815 = vmatpush.bf16.msra.mxu3 %v7807_v6  ;;  %26 = vst [vmem:[#allocation2] sm:$0x1] %v25_v1 }
0x1182   :  { %7786 = vmatpush.bf16.msra.mxu2 %v10596_v22  ;;  %7816 = vmatpush.bf16.msra.mxu3 %v10594_v16  ;;  %v10604_v22 = vld [vmem:[%s14341_s16 + $0x50] sm:$0xff] }
0x1185   :  { %10156 = vmatmul.msk.bf16.vlgmr.msrb.gmra.mxu2 %vm6690_vm7, %v10155_v4  ;;  %10158 = vmatmul.msk.bf16.vlgmr.msrb.gmra.mxu3 %vm6690_vm7, %v10157_v44  ;;  %v10256_v4 = vld [vmem:[%s14341_s16 + $0x68] sm:$0xf]  ;;  %v10607_v44 = vld [vmem:[%s14341_s16 + $0x68] sm:$0x70] }
0x1186   :  { %7924 = vmatpush.bf16.msrb.mxu3 %v7916_v28  ;;  %v10257_v50 = vor.u32 %v10607_v44, %v10256_v4  ;;  %v10619_v4 = vld [vmem:[#allocation2] ss:$0 sm:$0xff] }
0x1188   :  { %v8081_v5 = vsel %vm7775_vm8, %v10257_v50, 0 }
0x118a   :  { %7925 = vmatpush.bf16.msrb.mxu3 %v10600_v45 }
0x11f8   :  { %v7648_v42 = vpop.f32.mrf.mxu2  ;;  %v7666_v32 = vpop.f32.mrf.mxu3 }
0x11f9   :  { %v7706_v52 = vmax.f32 %v7648_v42, %v7666_v32  ;;  %v10606_v42 = vld [vmem:[%s14341_s16 + $0x60] sm:$0xff] }
0x1200   :  { %v7650_v35 = vpop.f32.mrf.mxu2  ;;  %v7668_v10 = vpop.f32.mrf.mxu3 }
0x1208   :  { %v7684_v26 = vpop.f32.mrf.mxu2  ;;  %v7702_v13 = vpop.f32.mrf.mxu3 }
0x1209   :  { %v7707_v15 = vmax.f32 %v7684_v26, %v7702_v13 }
0x120b   :  { %v7708_v30 = vmax.f32 %v7706_v52, %v7707_v15  ;;  %v10271_v15 = vld [vmem:[%s14341_s16 + $0x78] sm:$0xf] }
0x120d   :  { %v7709_v20 = vpack.c.bf16 %v7708_v30, %v7708_v30  ;;  %v10609_v30 = vld [vmem:[%s14341_s16 + $0x78] sm:$0x70] }
0x120f   :  { %v7716_v40 = vsel %vm1404_vm3, %v7709_v20, 0 }
0x1210   :  { %7748 = vmatpush.bf16.msrb.mxu1 %v7716_v40  ;;  %7725 = vmatpush.bf16.msrb.mxu0 %v7716_v40  ;;  %v7686_v21 = vpop.f32.mrf.mxu2  ;;  %v7704_v62 = vpop.f32.mrf.mxu3 }
0x1211   :  { %7889 = vmatpush.bf16.msrb.mxu2 %v7716_v40 }
0x1213   :  { %10161 = vmatmul.msk.bf16.vlgmr.msrb.gmra.mxu1 %vm7711_vm9, %v10160_v24  ;;  %10159 = vmatmul.msk.bf16.vlgmr.msrb.gmra.mxu0 %vm7711_vm9, %v7710_v36  ;;  %v10611_v24 = vld [vmem:[%s14341_s16 + $0x88] sm:$0x70] }
0x1214   :  { %7834 = vmatpush.bf16.msra.mxu0 %v7716_v40  ;;  %7869 = vmatpush.bf16.msra.mxu1 %v7861_v43 }
0x1218   :  { %7944 = vmatpush.bf16.msrb.mxu0 %v7716_v40  ;;  %7870 = vmatpush.bf16.msra.mxu1 %v10598_v19 }
0x121c   :  { %7979 = vmatpush.bf16.msrb.mxu1 %v7971_v48 }
0x1220   :  { %7980 = vmatpush.bf16.msrb.mxu1 %v10602_v53 }
0x1223   :  { %10185 = vmatmul.msk.bf16.vlgmr.msra.gmra.mxu0 %vm7711_vm9, %v10184_v37  ;;  %v10272_v37 = vor.u32 %v10609_v30, %v10271_v15 }
0x1224   :  { %8054 = vmatpush.bf16.msra.mxu0 %v7716_v40 }
0x1225   :  { %v8136_v6 = vsel %vm7775_vm8, %v10272_v37, 0 }
0x1233   :  { %10215 = vmatmul.msk.bf16.vlgmr.msrb.gmra.mxu0 %vm7711_vm9, %v10214_v60 }
0x1234   :  { %8164 = vmatpush.bf16.msrb.mxu0 %v7716_v40 }
0x1243   :  { %10245 = vmatmul.msk.bf16.vlgmr.msra.gmra.mxu0 %vm7711_vm9, %v10244_v39 }
0x1253   :  { %10275 = vmatmul.msk.bf16.vlgmr.msrb.gmra.mxu0 %vm7711_vm9, %v10274_v49 }
0x1290   :  { %v7750_v57 = vpop.f32.mrf.mxu1  ;;  %v7727_v0 = vpop.f32.mrf.mxu0 }
0x1291   :  { %v7754_v7 = vpack.c.bf16 %v7750_v57, %v7750_v57  ;;  %v7731_v34 = vpack.c.bf16 %v7727_v0, %v7727_v0 }
0x1293   :  { %10174 = vmatmul.msk.bf16.vlgmr.msra.gmra.mxu2 %vm7771_vm10, %v7754_v7  ;;  %10183 = vmatmul.msk.bf16.vlgmr.msra.gmra.mxu3 %vm7771_vm10, %v7731_v34 }
0x1294   :  { %7999 = vmatpush.bf16.msra.mxu2 %v7716_v40  ;;  %8034 = vmatpush.bf16.msra.mxu3 %v8026_v59 }
0x1298   :  { %v7729_v51 = vpop.f32.mrf.mxu0  ;;  %v7752_v54 = vpop.f32.mrf.mxu1  ;;  %8035 = vmatpush.bf16.msra.mxu3 %v10604_v22 }
0x12a0   :  { %v7836_v56 = vpop.f32.mrf.mxu0 }
0x12a1   :  { %v7840_v2 = vpack.c.bf16 %v7836_v56, %v7836_v56 }
0x12a3   :  { %10200 = vmatmul.msk.bf16.vlgmr.msrb.gmra.mxu2 %vm7711_vm9, %v10199_v9  ;;  %10198 = vmatmul.msk.bf16.vlgmr.msra.gmra.mxu1 %vm7771_vm10, %v7840_v2 }
0x12a4   :  { %8109 = vmatpush.bf16.msrb.mxu2 %v7716_v40  ;;  %8089 = vmatpush.bf16.msra.mxu1 %v8081_v5  ;;  %v10286_v40 = vld [vmem:[%s14341_s16 + $0x88] sm:$0xf] }
0x12a5   :  { %v10287_v21 = vor.u32 %v10611_v24, %v10286_v40 }
0x12a7   :  { %v8191_v60 = vsel %vm7775_vm8, %v10287_v21, 0 }
0x12a8   :  { %v7838_v3 = vpop.f32.mrf.mxu0  ;;  %8090 = vmatpush.bf16.msra.mxu1 %v10606_v42 }
0x12b0   :  { %v7946_v46 = vpop.f32.mrf.mxu0 }
0x12b1   :  { %v7950_v18 = vpack.c.bf16 %v7946_v46, %v7946_v46 }
0x12b3   :  { %10230 = vmatmul.msk.bf16.vlgmr.msra.gmra.mxu2 %vm7711_vm9, %v10229_v25  ;;  %10228 = vmatmul.msk.bf16.vlgmr.msrb.gmra.mxu1 %vm7771_vm10, %v7950_v18  ;;  %v10618_v18 = vld [vmem:[%s14343_s17] ss:$0 sm:$0xff] }
0x12b4   :  { %8199 = vmatpush.bf16.msrb.mxu1 %v8191_v60 }
0x12b8   :  { %v7948_v14 = vpop.f32.mrf.mxu0  ;;  %8200 = vmatpush.bf16.msrb.mxu1 %v10610_v12 }
0x12c0   :  { %v8056_v10 = vpop.f32.mrf.mxu0 }
0x12c1   :  { %v8060_v26 = vpack.c.bf16 %v8056_v10, %v8056_v10 }
0x12c3   :  { %10260 = vmatmul.msk.bf16.vlgmr.msrb.gmra.mxu2 %vm7711_vm9, %v10259_v8  ;;  %10258 = vmatmul.msk.bf16.vlgmr.msra.gmra.mxu1 %vm7771_vm10, %v8060_v26  ;;  %v8214_v8 = vld [vmem:[%s14344_s18 + $0x8] sm:$0x3] }
0x12c4   :  { %10289 = vmatpush.msk.msra.mxu2 %vm646_vm1, %v8214_v8 }
0x12c6   :  { %8241 = vmatpush.msra.mxu2 %v8213_v31 }
0x12c8   :  { %v8058_v20 = vpop.f32.mrf.mxu0 }
0x12d0   :  { %v8166_v16 = vpop.f32.mrf.mxu0 }
0x12d1   :  { %v8170_v63 = vpack.c.bf16 %v8166_v16, %v8166_v16 }
0x12d3   :  { %10288 = vmatmul.msk.bf16.vlgmr.msrb.gmra.mxu1 %vm7771_vm10, %v8170_v63 }
0x12d8   :  { %v8168_v19 = vpop.f32.mrf.mxu0 }
0x1316   :  { %v7788_v55 = vpop.f32.mrf.mxu2  ;;  %v7818_v32 = vpop.f32.mrf.mxu3 }
0x1317   :  { %v7819_v35 = vadd.f32 %v7818_v32, %v7788_v55 }
0x131e   :  { %v7790_v13 = vpop.f32.mrf.mxu2  ;;  %v7820_v52 = vpop.f32.mrf.mxu3 }
0x1320   :  { %v7872_v36 = vpop.f32.mrf.mxu1 }
0x1321   :  { %v7876_v62 = vadd.f32 %v7872_v36, %v7819_v35 }
0x1326   :  { %v7891_v33 = vpop.f32.mrf.mxu2 }
0x1327   :  { %v7895_v17 = vpack.c.bf16 %v7891_v33, %v7891_v33 }
0x1328   :  { %v7874_v38 = vpop.f32.mrf.mxu1 }
0x1329   :  { %10213 = vmatmul.msk.bf16.vlgmr.msrb.gmra.mxu3 %vm7771_vm10, %v7895_v17 }
0x132a   :  { %8144 = vmatpush.bf16.msrb.mxu3 %v8136_v6 }
0x132e   :  { %v7893_v43 = vpop.f32.mrf.mxu2  ;;  %8145 = vmatpush.bf16.msrb.mxu3 %v10608_v58 }
0x1330   :  { %v7982_v54 = vpop.f32.mrf.mxu1 }
0x1336   :  { %v8001_v57 = vpop.f32.mrf.mxu2 }
0x1337   :  { %v8005_v0 = vpack.c.bf16 %v8001_v57, %v8001_v57 }
0x1338   :  { %v7984_v9 = vpop.f32.mrf.mxu1 }
0x1339   :  { %10243 = vmatmul.msk.bf16.vlgmr.msra.gmra.mxu3 %vm7771_vm10, %v8005_v0 }
0x133e   :  { %v8003_v7 = vpop.f32.mrf.mxu2 }
0x1340   :  { %v8092_v56 = vpop.f32.mrf.mxu1 }
0x1346   :  { %v8111_v34 = vpop.f32.mrf.mxu2 }
0x1347   :  { %v8115_v39 = vpack.c.bf16 %v8111_v34, %v8111_v34 }
0x1348   :  { %v8094_v2 = vpop.f32.mrf.mxu1 }
0x1349   :  { %10273 = vmatmul.msk.bf16.vlgmr.msrb.gmra.mxu3 %vm7771_vm10, %v8115_v39 }
0x134e   :  { %v8113_v51 = vpop.f32.mrf.mxu2 }
0x1350   :  { %v8202_v49 = vpop.f32.mrf.mxu1 }
0x1358   :  { %v8204_v25 = vpop.f32.mrf.mxu1 }
0x13ac   :  { %v7927_v3 = vpop.f32.mrf.mxu3 }
0x13ad   :  { %v7931_v29 = vadd.f32 %v7927_v3, %v7876_v62 }
0x13af   :  { %v7986_v27 = vadd.f32 %v7982_v54, %v7931_v29 }
0x13b4   :  { %v7929_v47 = vpop.f32.mrf.mxu3 }
0x13bc   :  { %v8037_v41 = vpop.f32.mrf.mxu3 }
0x13bd   :  { %v8041_v48 = vadd.f32 %v8037_v41, %v7986_v27 }
0x13bf   :  { %v8096_v45 = vadd.f32 %v8092_v56, %v8041_v48 }
0x13c4   :  { %v8039_v28 = vpop.f32.mrf.mxu3 }
0x13cc   :  { %v8147_v53 = vpop.f32.mrf.mxu3 }
0x13cd   :  { %v8151_v46 = vadd.f32 %v8147_v53, %v8096_v45 }
0x13cf   :  { %v8206_v11 = vadd.f32 %v8202_v49, %v8151_v46 }
0x13d1   :  { %v8211_v23 = vadd.f32 %v10618_v18, %v8206_v11 }
0x13d3   :  { %v8212_v61 = vmax.f32 %v8211_v23, 0.0 }
0x13d4   :  { %v8149_v14 = vpop.f32.mrf.mxu3 }
0x13d5   :  { %10290 = vmatmul.msk.f32.vlgmr.msra.gmra.mxu2 %vm8219_vm11, %v8212_v61 }
0x1458   :  { %v8243_v44 = vpop.f32.mrf.mxu2 }
0x1459   :  { %v8244_v59 = vadd.f32 %v10619_v4, %v8243_v44 }
0x145b   :  { %8247 = vst.msk [vmem:[%s14346_s20] sm:$0xff] %vm8246_vm12, %v8244_v59 }

</bundles_post_ra>
